<compile_context>
chip_gen: v6e
topology: v6e:2x2x1
jax: 0.10.0
libtpu: 0.0.40
codegen_flags: <defaults>
</compile_context>

<pallas_src>
import functools
import math

import numpy as np
import jax
import jax.numpy as jnp
from jax.experimental import pallas as pl
from jax.experimental.pallas import tpu as pltpu

# ----------------------------- configuration --------------------------------
NS = 8                 # ns
NV = 4                 # nv
NUM_CONV_LAYERS = 2    # < 3  -> node_embedding_dim == ns
SH_LMAX = 2
EDGE_SIZE = 8
MAX_EDGE_LENGTH = 20.0

N_NODES = 16
N_EDGES = 32

_LANE = 128
_DP = 128              # padded node-state width (>= widest irreps width = 72)
_D_SH = (SH_LMAX + 1) ** 2


def _ru(x, m=_LANE):
    return ((x + m - 1) // m) * m


# ---------------------- real spherical harmonics (lmax=2) -------------------
# Component normalization: ||Y_l(u)||^2 = 2l+1 for unit u.  The Wigner-3j table
# below is computed in this same basis, so everything stays self-consistent.
def _np_sh(l, v):
    x, y, z = v[:, 0], v[:, 1], v[:, 2]
    if l == 0:
        return np.ones((v.shape[0], 1))
    if l == 1:
        return math.sqrt(3.0) * np.stack([x, y, z], axis=-1)
    return np.stack(
        [
            math.sqrt(15.0) * x * y,
            math.sqrt(15.0) * y * z,
            (math.sqrt(5.0) / 2.0) * (3.0 * z * z - 1.0),
            math.sqrt(15.0) * x * z,
            (math.sqrt(15.0) / 2.0) * (x * x - y * y),
        ],
        axis=-1,
    )


# ---------------------- Wigner-3j (real basis) table -------------------------
def _rot_irrep(l, R, V):
    """Fit D_l(R) such that Y_l(R v) = D_l(R) Y_l(v)."""
    if l == 0:
        return np.ones((1, 1))
    A = _np_sh(l, V)
    B = _np_sh(l, V @ R.T)
    Dt, *_ = np.linalg.lstsq(A, B, rcond=None)
    return Dt.T


def _build_w3j_table(lmax=2, n_rot=4, seed=0):
    rng = np.random.default_rng(seed)
    V = rng.normal(size=(32, 3))
    V /= np.linalg.norm(V, axis=1, keepdims=True)
    Rs = []
    for _ in range(n_rot):
        Q, _ = np.linalg.qr(rng.normal(size=(3, 3)))
        if np.linalg.det(Q) < 0:
            Q[:, 0] = -Q[:, 0]
        Rs.append(Q)
    table = {}
    for l1 in range(lmax + 1):
        for l2 in range(lmax + 1):
            for l3 in range(lmax + 1):
                if not (abs(l1 - l2) <= l3 <= l1 + l2):
                    continue
                d1, d2, d3 = 2 * l1 + 1, 2 * l2 + 1, 2 * l3 + 1
                rows = []
                for R in Rs:
                    K = np.kron(
                        np.kron(_rot_irrep(l1, R, V), _rot_irrep(l2, R, V)),
                        _rot_irrep(l3, R, V),
                    )
                    rows.append(K - np.eye(d1 * d2 * d3))
                A = np.concatenate(rows, axis=0)
                _, _, vh = np.linalg.svd(A)
                c = vh[-1]
                i = int(np.argmax(np.abs(c)))
                if c[i] < 0:
                    c = -c
                c = c / np.linalg.norm(c)
                table[(l1, l2, l3)] = c.reshape(d1, d2, d3)
    return table


# ---------------------- irreps & tensor-product structure --------------------
def _irrep_seq(ns, nv):
    return [
        [(ns, 0, 1)],
        [(ns, 0, 1), (nv, 1, -1), (nv, 2, 1)],
        [(ns, 0, 1), (nv, 1, -1), (nv, 2, 1), (nv, 1, 1), (nv, 2, -1)],
        [(ns, 0, 1), (nv, 1, -1), (nv, 2, 1), (nv, 1, 1), (nv, 2, -1), (ns, 0, -1)],
    ]


def _dims(irreps):
    return sum(m * (2 * l + 1) for m, l, _ in irreps)


def _offsets(irreps):
    offs, o = [], 0
    for m, l, _ in irreps:
        offs.append(o)
        o += m * (2 * l + 1)
    return offs


def _vec_ranges(out_irreps):
    """Static (start, end, mul) column ranges of each l>0 irrep block."""
    ranges, off = [], 0
    for (mul, l, _) in out_irreps:
        width = mul * (2 * l + 1)
        if l > 0:
            ranges.append((off, off + width, mul))
        off += width
    return tuple(ranges)


def build_tp_struct(irreps_in, irreps_sh, irreps_out, w3j, dp=_DP):
    """Dense-matrix encoding of FullyConnectedTensorProduct(in, sh, out) with
    per-edge ('uvw') weights.  M1 is stored per SH component (lane-padded),
    Sw/St are row-stacked into one buffer, rows/cols are padded so every
    in-kernel slice is aligned and the node-state width is a constant dp."""
    D_in, D_sh, D_out = _dims(irreps_in), _dims(irreps_sh), _dims(irreps_out)
    in_off, sh_off, out_off = _offsets(irreps_in), _offsets(irreps_sh), _offsets(irreps_out)

    paths = []
    for io, (mulo, lo, po) in enumerate(irreps_out):
        for i1, (mul1, l1, p1) in enumerate(irreps_in):
            for i2, (_, l2, p2) in enumerate(irreps_sh):
                if p1 * p2 == po and abs(l1 - l2) <= lo <= l1 + l2:
                    paths.append((i1, i2, io))

    fan_in = {}
    for (i1, _, io) in paths:
        fan_in[io] = fan_in.get(io, 0) + irreps_in[i1][0]

    w_off, t_off, q_off = [], [], []
    wN = tN = qN = 0
    for (i1, _, io) in paths:
        mul1 = irreps_in[i1][0]
        mulo, lo, _ = irreps_out[io]
        w_off.append(wN); wN += mul1 * mulo
        t_off.append(tN); tN += mul1 * (2 * lo + 1)
        q_off.append(qN); qN += mul1 * mulo * (2 * lo + 1)

    wNp, tNp, qNp = _ru(wN), _ru(tN), _ru(qN)

    M1_3d = np.zeros((D_in, D_sh, tN), np.float32)
    Sw = np.zeros((wNp, qNp), np.float32)
    St = np.zeros((tNp, qNp), np.float32)
    So = np.zeros((qNp, dp), np.float32)

    for p, (i1, i2, io) in enumerate(paths):
        mul1, l1, _ = irreps_in[i1]
        _, l2, _ = irreps_sh[i2]
        mulo, lo, _ = irreps_out[io]
        C = w3j[(l1, l2, lo)]
        alpha = 1.0 / math.sqrt(fan_in[io])          # path fan-in normalization
        for k1 in range(mul1):
            for m1 in range(2 * l1 + 1):
                i_idx = in_off[i1] + k1 * (2 * l1 + 1) + m1
                for m2 in range(2 * l2 + 1):
                    s_idx = sh_off[i2] + m2
                    for mo in range(2 * lo + 1):
                        M1_3d[i_idx, s_idx, t_off[p] + k1 * (2 * lo + 1) + mo] += (
                            alpha * C[m1, m2, mo])
            for ko in range(mulo):
                for mo in range(2 * lo + 1):
                    qi = q_off[p] + (k1 * mulo + ko) * (2 * lo + 1) + mo
                    Sw[w_off[p] + k1 * mulo + ko, qi] = 1.0
                    St[t_off[p] + k1 * (2 * lo + 1) + mo, qi] = 1.0
                    So[qi, out_off[io] + ko * (2 * lo + 1) + mo] = 1.0

    # per-SH-component stacked M1 with D_in rows zero-padded to dp (node width)
    M1s = np.zeros((dp, D_sh * tNp), np.float32)
    for s in range(D_sh):
        M1s[:D_in, s * tNp:s * tNp + tN] = M1_3d[:, s, :]
    SwSt = np.concatenate([Sw, St], axis=0)          # [wNp + tNp, qNp]

    bf = lambda a: jnp.asarray(a, jnp.bfloat16)      # 0/1 + CG coeffs -> bf16 MXU operands
    return dict(M1s=bf(M1s), SwSt=bf(SwSt), So=bf(So),
                weight_numel=wN, wNp=wNp, tNp=tNp, qNp=qNp, D_out=D_out,
                vec_ranges=_vec_ranges(irreps_out))


# ------------------------------ fused Pallas kernel ---------------------------
_VMEM = pltpu.MemorySpace.VMEM


def _fused_interaction_kernel(node0_ref, edge_static_ref, gsc_ref, misc_ref, *rest,
                              num_layers, ns, edge_size, max_edge_length,
                              n_nodes, n_edges, dp, d_sh, layer_meta):
    """Whole InteractionModule forward in one kernel.
       rest = [per layer: fc1_pack, fc2_pack, M1s, SwSt, So] + [out_ref]."""
    f32, bf16 = jnp.float32, jnp.bfloat16
    out_ref = rest[-1]
    lrefs = rest[:-1]

    node_state = node0_ref[...]                                   # [N, dp]   f32
    es = edge_static_ref[...]                                     # [E, 16]   f32
    gsc = gsc_ref[...]                                            # [2E+N, max(N,E)] bf16
    misc = misc_ref[...]                                          # [64, 8]   f32

    oh_sd = gsc[0:2 * n_edges, 0:n_nodes]                         # [2E, N] src|dst one-hots
    scat = gsc[2 * n_edges:2 * n_edges + n_nodes, 0:n_edges]      # [N, E]  src scatter
    counts = jnp.maximum(jnp.sum(scat.astype(f32), axis=1, keepdims=True), 1.0)
    inv_counts = 1.0 / counts                                     # scatter(reduce='mean')

    etype = es[:, 0:edge_size]                                    # [E, G]
    ex = es[:, edge_size:edge_size + 1]
    ey = es[:, edge_size + 1:edge_size + 2]
    ez = es[:, edge_size + 2:edge_size + 3]

    # ---- edge geometry: length + real spherical harmonics (component norm)
    d2 = ex * ex + ey * ey + ez * ez
    d = jnp.sqrt(d2)                                              # [E, 1]
    inv_len = jax.lax.rsqrt(jnp.maximum(d2, 1e-24))
    ux, uy, uz = ex * inv_len, ey * inv_len, ez * inv_len
    s3, s15 = math.sqrt(3.0), math.sqrt(15.0)
    s5h = math.sqrt(5.0) / 2.0
    sh_cols = (None,
               s3 * ux, s3 * uy, s3 * uz,
               s15 * ux * uy, s15 * uy * uz, s5h * (3.0 * uz * uz - 1.0),
               s15 * ux * uz, (s15 / 2.0) * (ux * ux - uy * uy))

    # ---- gaussian edge-length embedding + edge embedder MLP (EUP exp, MXU)
    step = max_edge_length / (edge_size - 1)
    coeff = -0.5 / (step * step)
    goff = jax.lax.broadcasted_iota(jnp.int32, (n_edges, edge_size), 1).astype(f32) * step
    g = jnp.exp(coeff * (d - goff) ** 2)                          # [E, G]
    gw1 = misc[0:8, 0:edge_size].astype(bf16);  gb1 = misc[8:9, 0:edge_size]
    gw2 = misc[16:24, 0:edge_size].astype(bf16); gb2 = misc[24:25, 0:edge_size]
    he = jnp.maximum(jnp.dot(g.astype(bf16), gw1, preferred_element_type=f32) + gb1, 0.0)
    elen = jnp.dot(he.astype(bf16), gw2, preferred_element_type=f32) + gb2

    ee = jnp.concatenate([elen, etype], axis=1)                   # layer-invariant edge feats

    col = jax.lax.broadcasted_iota(jnp.int32, (n_nodes, dp), 1)
    scalar_mask = col < ns
    nef = 2 * ns + 2 * edge_size                                  # fc hidden width

    for li in range(num_layers):
        fc1p = lrefs[5 * li + 0][...]
        fc2p = lrefs[5 * li + 1][...]
        m1s = lrefs[5 * li + 2][...]
        swst = lrefs[5 * li + 3][...]
        so_m = lrefs[5 * li + 4][...]
        w_np, t_np, vec_ranges = layer_meta[li]

        # merged src/dst gather (single one-hot MXU push)
        xg = jnp.dot(oh_sd, node_state.astype(bf16), preferred_element_type=f32)  # [2E, dp]
        x_src_s = xg[0:n_edges, 0:ns]
        x_dst = xg[n_edges:2 * n_edges, :]

        # fused edge MLP: concat == [elen | etype | x_src_s | x_dst_s] @ fc1
        edge_in = jnp.concatenate([ee, x_src_s, x_dst[:, 0:ns]], axis=1).astype(bf16)
        fc1w = fc1p[0:nef].astype(bf16); fc1b = fc1p[nef:nef + 1]
        hmid = jnp.maximum(jnp.dot(edge_in, fc1w, preferred_element_type=f32) + fc1b, 0.0)
        fc2w = fc2p[0:nef].astype(bf16); fc2b = fc2p[nef:nef + 1]
        w_tp = jnp.dot(hmid.astype(bf16), fc2w, preferred_element_type=f32) + fc2b   # [E, wNp]

        # CG contraction per SH component: t = sum_s sh_s * (x_dst @ M1_s)
        t_all = jnp.dot(x_dst.astype(bf16), m1s, preferred_element_type=f32)         # [E, 9*tNp]
        t = t_all[:, 0:t_np]
        for s in range(1, d_sh):
            t = t + sh_cols[s] * t_all[:, s * t_np:(s + 1) * t_np]

        # couple per-edge weights with CG features, sum into output irreps
        sw_m = swst[0:w_np]
        st_m = swst[w_np:w_np + t_np]
        w_q = jnp.dot(w_tp.astype(bf16), sw_m, preferred_element_type=f32)           # [E, qNp]
        t_q = jnp.dot(t.astype(bf16), st_m, preferred_element_type=f32)              # [E, qNp]
        msg = jnp.dot((w_q * t_q).astype(bf16), so_m, preferred_element_type=f32)    # [E, dp]

        # scatter(reduce='mean') onto edge-source nodes
        upd = jnp.dot(scat, msg.astype(bf16), preferred_element_type=f32) * inv_counts

        # ---- equivariant layer norm on VPU/XLU only (no MXU dots)
        # TODO(synk): exact ATOMICA 'layer' norm is not in the reference snippet;
        #             placeholder: LayerNorm on the scalar irrep, per-irrep RMS on l>0.
        ssum = jnp.sum(jnp.where(scalar_mask, upd, 0.0), axis=1, keepdims=True)
        mu = ssum / ns
        diff = upd - mu
        vsum = jnp.sum(jnp.where(scalar_mask, diff * diff, 0.0), axis=1, keepdims=True)
        inv_std = jax.lax.rsqrt(vsum / ns + 1e-5)
        upd2 = upd * upd
        vec_scale = jnp.zeros((n_nodes, dp), f32)
        for (a, b, mul) in vec_ranges:
            m = jnp.logical_and(col >= a, col < b)
            ms = jnp.sum(jnp.where(m, upd2, 0.0), axis=1, keepdims=True) / mul
            vec_scale = vec_scale + jnp.where(m, jax.lax.rsqrt(ms + 1e-5), 0.0)
        upd = jnp.where(scalar_mask, diff * inv_std, upd * vec_scale)

        # residual:  F.pad(node_attr, ...) + update  (node_state already dp-wide)
        node_state = node_state + upd

    # num_conv_layers < 3  ->  node_embeddings = node_attr[:, :ns]
    # TODO(synk): num_conv_layers >= 3 would also need the trailing ns scalars.
    node_emb = node_state[:, 0:ns].astype(bf16)
    fw1 = misc[32:40, 0:ns].astype(bf16); fb1 = misc[40:41, 0:ns]
    fw2 = misc[48:56, 0:ns].astype(bf16); fb2 = misc[56:57, 0:ns]
    h = jnp.maximum(jnp.dot(node_emb, fw1, preferred_element_type=f32) + fb1, 0.0)
    out_ref[...] = jnp.dot(h.astype(bf16), fw2, preferred_element_type=f32) + fb2


# ------------------------------ parameters -----------------------------------
def _linear_init(key, fan_in, fan_out):
    kw, kb = jax.random.split(key)
    w = jax.random.normal(kw, (fan_in, fan_out), jnp.float32) / math.sqrt(fan_in)
    b = 0.01 * jax.random.normal(kb, (1, fan_out), jnp.float32)
    return w, b


def init_interaction_module(key):
    seq = _irrep_seq(NS, NV)
    sh_irreps = [(1, l, (-1) ** l) for l in range(SH_LMAX + 1)]
    w3j = _build_w3j_table(SH_LMAX)

    keys = jax.random.split(key, 8 + 2 * NUM_CONV_LAYERS)
    gw1, gb1 = _linear_init(keys[0], EDGE_SIZE, EDGE_SIZE)
    gw2, gb2 = _linear_init(keys[1], EDGE_SIZE, EDGE_SIZE)
    ned = NS if NUM_CONV_LAYERS < 3 else 2 * NS
    fw1, fb1 = _linear_init(keys[-2], ned, ned)
    fw2, fb2 = _linear_init(keys[-1], ned, NS)

    # misc pack: gaussian-MLP + out_ffn weights in one [64, 8] f32 buffer
    mw = max(EDGE_SIZE, ned, NS)
    misc = jnp.zeros((64, mw), jnp.float32)
    misc = misc.at[0:EDGE_SIZE, 0:EDGE_SIZE].set(gw1)
    misc = misc.at[8:9, 0:EDGE_SIZE].set(gb1)
    misc = misc.at[16:16 + EDGE_SIZE, 0:EDGE_SIZE].set(gw2)
    misc = misc.at[24:25, 0:EDGE_SIZE].set(gb2)
    misc = misc.at[32:32 + ned, 0:ned].set(fw1)
    misc = misc.at[40:41, 0:ned].set(fb1)
    misc = misc.at[48:48 + ned, 0:NS].set(fw2)
    misc = misc.at[56:57, 0:NS].set(fb2)

    structs, layers = [], []
    n_edge_features = 2 * NS + 2 * EDGE_SIZE
    hidden = n_edge_features
    for i in range(NUM_CONV_LAYERS):
        in_irreps = seq[min(i, len(seq) - 1)]
        out_irreps = seq[min(i + 1, len(seq) - 1)]
        st = build_tp_struct(in_irreps, sh_irreps, out_irreps, w3j)
        structs.append(st)
        w1, b1 = _linear_init(keys[2 + 2 * i], n_edge_features, hidden)
        fc1_pack = jnp.concatenate([w1, b1], axis=0)                   # [hidden+1, hidden]
        w2, b2 = _linear_init(keys[3 + 2 * i], hidden, st["weight_numel"])
        padc = st["wNp"] - st["weight_numel"]                          # lane-pad fc2 (zero cols)
        w2 = jnp.pad(w2, ((0, 0), (0, padc)))
        b2 = jnp.pad(b2, ((0, 0), (0, padc)))
        fc2_pack = jnp.concatenate([w2, b2], axis=0)                   # [hidden+1, wNp]
        layers.append(dict(fc1_pack=fc1_pack, fc2_pack=fc2_pack))

    params = dict(misc_pack=misc, layers=layers)
    return params, structs


# ------------------------------- forward -------------------------------------
def interaction_forward(params, structs, node_attr, coords, batch_id, perturb_mask,
                        edges, edge_type_attr):
    # batch_id / perturb_mask are only consumed by the (disabled) noise heads.
    del batch_id, perturb_mask
    n, feat = node_attr.shape
    e = edges.shape[1]
    src = edges[0].astype(jnp.int32)
    dst = edges[1].astype(jnp.int32)
    node_ids = jnp.arange(n, dtype=jnp.int32)

    # edge-static gather / scatter one-hots (0/1 -> bf16-exact), packed once
    oh_src = (src[:, None] == node_ids[None, :]).astype(jnp.bfloat16)      # [E, N]
    oh_dst = (dst[:, None] == node_ids[None, :]).astype(jnp.bfloat16)      # [E, N]
    scat = (node_ids[:, None] == src[None, :]).astype(jnp.bfloat16)        # [N, E]
    gw = max(n, e)
    gsc = jnp.zeros((2 * e + n, gw), jnp.bfloat16)
    gsc = gsc.at[0:e, 0:n].set(oh_src)
    gsc = gsc.at[e:2 * e, 0:n].set(oh_dst)
    gsc = gsc.at[2 * e:2 * e + n, 0:e].set(scat)

    # edge-static payload: [edge_type | edge_vec | 0-pad]
    ev = (coords[dst] - coords[src]).astype(jnp.float32)                   # [E, 3]
    pad = 16 - (EDGE_SIZE + 3)
    edge_static = jnp.concatenate(
        [edge_type_attr.astype(jnp.float32), ev, jnp.zeros((e, pad), jnp.float32)], axis=1)

    # node state zero-padded to a fixed lane-dense width
    node0p = jnp.pad(node_attr.astype(jnp.float32), ((0, 0), (0, _DP - feat)))

    args = [node0p, edge_static, gsc, params["misc_pack"]]
    for lp, st in zip(params["layers"], structs):
        args += [lp["fc1_pack"], lp["fc2_pack"], st["M1s"], st["SwSt"], st["So"]]

    layer_meta = tuple((st["wNp"], st["tNp"], st["vec_ranges"]) for st in structs)
    kern = functools.partial(
        _fused_interaction_kernel,
        num_layers=NUM_CONV_LAYERS, ns=NS, edge_size=EDGE_SIZE,
        max_edge_length=MAX_EDGE_LENGTH, n_nodes=n, n_edges=e,
        dp=_DP, d_sh=_D_SH, layer_meta=layer_meta)

    return pl.pallas_call(
        kern,
        out_shape=jax.ShapeDtypeStruct((n, NS), jnp.float32),
        in_specs=[pl.BlockSpec(memory_space=_VMEM) for _ in args],
        out_specs=pl.BlockSpec(memory_space=_VMEM),
    )(*args)


# --------------------------------- main ---------------------------------------
if __name__ == "__main__":
    key = jax.random.PRNGKey(0)
    kp, kn, kc, ke, kt = jax.random.split(key, 5)

    params, structs = init_interaction_module(kp)

    node_attr = jax.random.normal(kn, (N_NODES, NS), jnp.float32)
    coords = 3.0 * jax.random.normal(kc, (N_NODES, 3), jnp.float32)
    edges = jax.random.randint(ke, (2, N_EDGES), 0, N_NODES, dtype=jnp.int32)
    edge_type_attr = jax.random.normal(kt, (N_EDGES, EDGE_SIZE), jnp.float32)
    batch_id = jnp.zeros((N_NODES,), jnp.int32)
    perturb_mask = jnp.ones((N_NODES,), bool)

    fwd = jax.jit(functools.partial(interaction_forward, params, structs))
    out = jax.block_until_ready(
        fwd(node_attr, coords, batch_id, perturb_mask, edges, edge_type_attr))

    assert out.shape == (N_NODES, NS), out.shape
    assert bool(jnp.all(jnp.isfinite(out)))
    print("KERNEL_OK")
</pallas_src>

<mosaic_0001>
module attributes {stable_mosaic.version = 11 : i64} {
  func.func @_fused_interaction_kernel(%arg0: memref<16x128xf32, #tpu.memory_space<vmem>>, %arg1: memref<32x16xf32, #tpu.memory_space<vmem>>, %arg2: memref<80x32xbf16, #tpu.memory_space<vmem>>, %arg3: memref<64x8xf32, #tpu.memory_space<vmem>>, %arg4: memref<33x32xf32, #tpu.memory_space<vmem>>, %arg5: memref<33x128xf32, #tpu.memory_space<vmem>>, %arg6: memref<128x1152xbf16, #tpu.memory_space<vmem>>, %arg7: memref<256x384xbf16, #tpu.memory_space<vmem>>, %arg8: memref<384x128xbf16, #tpu.memory_space<vmem>>, %arg9: memref<33x32xf32, #tpu.memory_space<vmem>>, %arg10: memref<33x384xf32, #tpu.memory_space<vmem>>, %arg11: memref<128x2304xbf16, #tpu.memory_space<vmem>>, %arg12: memref<640x1024xbf16, #tpu.memory_space<vmem>>, %arg13: memref<1024x128xbf16, #tpu.memory_space<vmem>>, %arg14: memref<16x8xf32, #tpu.memory_space<vmem>>) attributes {dimension_semantics = [], scalar_prefetch = 0 : i64, scratch_operands = 0 : i64, tpu.core_type = #tpu.core_type<tc>} {
    %c0 = arith.constant 0 : index
    %c0_0 = arith.constant 0 : index
    %0 = vector.load %arg0[%c0, %c0_0] : memref<16x128xf32, #tpu.memory_space<vmem>>, vector<16x128xf32>
    %c0_1 = arith.constant 0 : index
    %c0_2 = arith.constant 0 : index
    %1 = vector.load %arg1[%c0_1, %c0_2] : memref<32x16xf32, #tpu.memory_space<vmem>>, vector<32x16xf32>
    %c0_3 = arith.constant 0 : index
    %c0_4 = arith.constant 0 : index
    %2 = vector.load %arg2[%c0_3, %c0_4] : memref<80x32xbf16, #tpu.memory_space<vmem>>, vector<80x32xbf16>
    %c0_5 = arith.constant 0 : index
    %c0_6 = arith.constant 0 : index
    %3 = vector.load %arg3[%c0_5, %c0_6] : memref<64x8xf32, #tpu.memory_space<vmem>>, vector<64x8xf32>
    %4 = vector.extract_strided_slice %2 {offsets = [0, 0], sizes = [64, 16], strides = [1, 1]} : vector<80x32xbf16> to vector<64x16xbf16>
    %5 = vector.extract_strided_slice %2 {offsets = [64, 0], sizes = [16, 32], strides = [1, 1]} : vector<80x32xbf16> to vector<16x32xbf16>
    %6 = arith.extf %5 : vector<16x32xbf16> to vector<16x32xf32>
    %cst = arith.constant dense<0.000000e+00> : vector<16xf32>
    %7 = vector.multi_reduction <add>, %6, %cst [1] : vector<16x32xf32> to vector<16xf32>
    %8 = vector.shape_cast %7 : vector<16xf32> to vector<16x1xf32>
    %cst_7 = arith.constant 1.000000e+00 : f32
    %9 = vector.broadcast %cst_7 : f32 to vector<16x1xf32>
    %10 = arith.maximumf %8, %9 : vector<16x1xf32>
    %cst_8 = arith.constant 1.000000e+00 : f32
    %11 = vector.broadcast %cst_8 : f32 to vector<16x1xf32>
    %12 = arith.divf %11, %10 : vector<16x1xf32>
    %13 = vector.extract_strided_slice %1 {offsets = [0, 0], sizes = [32, 8], strides = [1, 1]} : vector<32x16xf32> to vector<32x8xf32>
    %14 = vector.extract_strided_slice %1 {offsets = [0, 8], sizes = [32, 1], strides = [1, 1]} : vector<32x16xf32> to vector<32x1xf32>
    %15 = vector.extract_strided_slice %1 {offsets = [0, 9], sizes = [32, 1], strides = [1, 1]} : vector<32x16xf32> to vector<32x1xf32>
    %16 = vector.extract_strided_slice %1 {offsets = [0, 10], sizes = [32, 1], strides = [1, 1]} : vector<32x16xf32> to vector<32x1xf32>
    %17 = arith.mulf %14, %14 : vector<32x1xf32>
    %18 = arith.mulf %15, %15 : vector<32x1xf32>
    %19 = arith.addf %17, %18 : vector<32x1xf32>
    %20 = arith.mulf %16, %16 : vector<32x1xf32>
    %21 = arith.addf %19, %20 : vector<32x1xf32>
    %22 = math.sqrt %21 : vector<32x1xf32>
    %cst_9 = arith.constant 1.000000e-24 : f32
    %23 = vector.broadcast %cst_9 : f32 to vector<32x1xf32>
    %24 = arith.maximumf %21, %23 : vector<32x1xf32>
    %25 = math.rsqrt %24 : vector<32x1xf32>
    %26 = arith.mulf %14, %25 : vector<32x1xf32>
    %27 = arith.mulf %15, %25 : vector<32x1xf32>
    %28 = arith.mulf %16, %25 : vector<32x1xf32>
    %cst_10 = arith.constant 1.73205078 : f32
    %29 = vector.broadcast %cst_10 : f32 to vector<32x1xf32>
    %30 = arith.mulf %29, %26 : vector<32x1xf32>
    %cst_11 = arith.constant 1.73205078 : f32
    %31 = vector.broadcast %cst_11 : f32 to vector<32x1xf32>
    %32 = arith.mulf %31, %27 : vector<32x1xf32>
    %cst_12 = arith.constant 1.73205078 : f32
    %33 = vector.broadcast %cst_12 : f32 to vector<32x1xf32>
    %34 = arith.mulf %33, %28 : vector<32x1xf32>
    %cst_13 = arith.constant 3.87298346 : f32
    %35 = vector.broadcast %cst_13 : f32 to vector<32x1xf32>
    %36 = arith.mulf %35, %26 : vector<32x1xf32>
    %37 = arith.mulf %36, %27 : vector<32x1xf32>
    %cst_14 = arith.constant 3.87298346 : f32
    %38 = vector.broadcast %cst_14 : f32 to vector<32x1xf32>
    %39 = arith.mulf %38, %27 : vector<32x1xf32>
    %40 = arith.mulf %39, %28 : vector<32x1xf32>
    %cst_15 = arith.constant 3.000000e+00 : f32
    %41 = vector.broadcast %cst_15 : f32 to vector<32x1xf32>
    %42 = arith.mulf %41, %28 : vector<32x1xf32>
    %43 = arith.mulf %42, %28 : vector<32x1xf32>
    %cst_16 = arith.constant 1.000000e+00 : f32
    %44 = vector.broadcast %cst_16 : f32 to vector<32x1xf32>
    %45 = arith.subf %43, %44 : vector<32x1xf32>
    %cst_17 = arith.constant 1.11803401 : f32
    %46 = vector.broadcast %cst_17 : f32 to vector<32x1xf32>
    %47 = arith.mulf %46, %45 : vector<32x1xf32>
    %cst_18 = arith.constant 3.87298346 : f32
    %48 = vector.broadcast %cst_18 : f32 to vector<32x1xf32>
    %49 = arith.mulf %48, %26 : vector<32x1xf32>
    %50 = arith.mulf %49, %28 : vector<32x1xf32>
    %51 = arith.mulf %26, %26 : vector<32x1xf32>
    %52 = arith.mulf %27, %27 : vector<32x1xf32>
    %53 = arith.subf %51, %52 : vector<32x1xf32>
    %cst_19 = arith.constant 1.93649173 : f32
    %54 = vector.broadcast %cst_19 : f32 to vector<32x1xf32>
    %55 = arith.mulf %54, %53 : vector<32x1xf32>
    %56 = tpu.iota {dimensions = array<i32: 1>} : vector<32x8xi32>
    %57 = arith.sitofp %56 : vector<32x8xi32> to vector<32x8xf32>
    %cst_20 = arith.constant 2.85714293 : f32
    %58 = vector.broadcast %cst_20 : f32 to vector<32x8xf32>
    %59 = arith.mulf %57, %58 : vector<32x8xf32>
    %60 = vector.broadcast %22 : vector<32x1xf32> to vector<32x8xf32>
    %61 = arith.subf %60, %59 : vector<32x8xf32>
    %62 = arith.mulf %61, %61 : vector<32x8xf32>
    %cst_21 = arith.constant -6.125000e-02 : f32
    %63 = vector.broadcast %cst_21 : f32 to vector<32x8xf32>
    %64 = arith.mulf %63, %62 : vector<32x8xf32>
    %65 = math.exp %64 : vector<32x8xf32>
    %66 = vector.extract_strided_slice %3 {offsets = [0, 0], sizes = [8, 8], strides = [1, 1]} : vector<64x8xf32> to vector<8x8xf32>
    %67 = arith.truncf %66 : vector<8x8xf32> to vector<8x8xbf16>
    %68 = vector.extract_strided_slice %3 {offsets = [8, 0], sizes = [1, 8], strides = [1, 1]} : vector<64x8xf32> to vector<1x8xf32>
    %69 = vector.extract_strided_slice %3 {offsets = [16, 0], sizes = [8, 8], strides = [1, 1]} : vector<64x8xf32> to vector<8x8xf32>
    %70 = arith.truncf %69 : vector<8x8xf32> to vector<8x8xbf16>
    %71 = vector.extract_strided_slice %3 {offsets = [24, 0], sizes = [1, 8], strides = [1, 1]} : vector<64x8xf32> to vector<1x8xf32>
    %72 = arith.truncf %65 : vector<32x8xf32> to vector<32x8xbf16>
    %cst_22 = arith.constant dense<0.000000e+00> : vector<32x8xf32>
    %73 = tpu.matmul %72, %67, %cst_22 {dimension_numbers = #tpu.dot_dimension_numbers<[1], [0], [0], [1], [0, 0, 1, 1], [], []>} : vector<32x8xbf16>, vector<8x8xbf16>, vector<32x8xf32> -> vector<32x8xf32>
    %74 = vector.broadcast %68 : vector<1x8xf32> to vector<32x8xf32>
    %75 = arith.addf %73, %74 : vector<32x8xf32>
    %cst_23 = arith.constant 0.000000e+00 : f32
    %76 = vector.broadcast %cst_23 : f32 to vector<32x8xf32>
    %77 = arith.maximumf %75, %76 : vector<32x8xf32>
    %78 = arith.truncf %77 : vector<32x8xf32> to vector<32x8xbf16>
    %cst_24 = arith.constant dense<0.000000e+00> : vector<32x8xf32>
    %79 = tpu.matmul %78, %70, %cst_24 {dimension_numbers = #tpu.dot_dimension_numbers<[1], [0], [0], [1], [0, 0, 1, 1], [], []>} : vector<32x8xbf16>, vector<8x8xbf16>, vector<32x8xf32> -> vector<32x8xf32>
    %80 = vector.broadcast %71 : vector<1x8xf32> to vector<32x8xf32>
    %81 = arith.addf %79, %80 : vector<32x8xf32>
    %82 = tpu.concatenate %81, %13 in 1 : vector<32x8xf32>, vector<32x8xf32> -> vector<32x16xf32>
    %83 = tpu.iota {dimensions = array<i32: 1>} : vector<16x128xi32>
    %c8_i32 = arith.constant 8 : i32
    %84 = vector.broadcast %c8_i32 : i32 to vector<16x128xi32>
    %85 = arith.cmpi slt, %83, %84 : vector<16x128xi32>
    %c0_25 = arith.constant 0 : index
    %c0_26 = arith.constant 0 : index
    %86 = vector.load %arg4[%c0_25, %c0_26] : memref<33x32xf32, #tpu.memory_space<vmem>>, vector<33x32xf32>
    %c0_27 = arith.constant 0 : index
    %c0_28 = arith.constant 0 : index
    %87 = vector.load %arg5[%c0_27, %c0_28] : memref<33x128xf32, #tpu.memory_space<vmem>>, vector<33x128xf32>
    %c0_29 = arith.constant 0 : index
    %c0_30 = arith.constant 0 : index
    %88 = vector.load %arg6[%c0_29, %c0_30] : memref<128x1152xbf16, #tpu.memory_space<vmem>>, vector<128x1152xbf16>
    %c0_31 = arith.constant 0 : index
    %c0_32 = arith.constant 0 : index
    %89 = vector.load %arg7[%c0_31, %c0_32] : memref<256x384xbf16, #tpu.memory_space<vmem>>, vector<256x384xbf16>
    %c0_33 = arith.constant 0 : index
    %c0_34 = arith.constant 0 : index
    %90 = vector.load %arg8[%c0_33, %c0_34] : memref<384x128xbf16, #tpu.memory_space<vmem>>, vector<384x128xbf16>
    %91 = arith.truncf %0 : vector<16x128xf32> to vector<16x128xbf16>
    %cst_35 = arith.constant dense<0.000000e+00> : vector<64x128xf32>
    %92 = tpu.matmul %4, %91, %cst_35 {dimension_numbers = #tpu.dot_dimension_numbers<[1], [0], [0], [1], [0, 0, 1, 1], [], []>} : vector<64x16xbf16>, vector<16x128xbf16>, vector<64x128xf32> -> vector<64x128xf32>
    %93 = vector.extract_strided_slice %92 {offsets = [0, 0], sizes = [32, 8], strides = [1, 1]} : vector<64x128xf32> to vector<32x8xf32>
    %94 = vector.extract_strided_slice %92 {offsets = [32, 0], sizes = [32, 128], strides = [1, 1]} : vector<64x128xf32> to vector<32x128xf32>
    %95 = vector.extract_strided_slice %94 {offsets = [0, 0], sizes = [32, 8], strides = [1, 1]} : vector<32x128xf32> to vector<32x8xf32>
    %96 = tpu.concatenate %82, %93, %95 in 1 : vector<32x16xf32>, vector<32x8xf32>, vector<32x8xf32> -> vector<32x32xf32>
    %97 = arith.truncf %96 : vector<32x32xf32> to vector<32x32xbf16>
    %98 = vector.extract_strided_slice %86 {offsets = [0, 0], sizes = [32, 32], strides = [1, 1]} : vector<33x32xf32> to vector<32x32xf32>
    %99 = arith.truncf %98 : vector<32x32xf32> to vector<32x32xbf16>
    %100 = vector.extract_strided_slice %86 {offsets = [32, 0], sizes = [1, 32], strides = [1, 1]} : vector<33x32xf32> to vector<1x32xf32>
    %cst_36 = arith.constant dense<0.000000e+00> : vector<32x32xf32>
    %101 = tpu.matmul %97, %99, %cst_36 {dimension_numbers = #tpu.dot_dimension_numbers<[1], [0], [0], [1], [0, 0, 1, 1], [], []>} : vector<32x32xbf16>, vector<32x32xbf16>, vector<32x32xf32> -> vector<32x32xf32>
    %102 = vector.broadcast %100 : vector<1x32xf32> to vector<32x32xf32>
    %103 = arith.addf %101, %102 : vector<32x32xf32>
    %cst_37 = arith.constant 0.000000e+00 : f32
    %104 = vector.broadcast %cst_37 : f32 to vector<32x32xf32>
    %105 = arith.maximumf %103, %104 : vector<32x32xf32>
    %106 = vector.extract_strided_slice %87 {offsets = [0, 0], sizes = [32, 128], strides = [1, 1]} : vector<33x128xf32> to vector<32x128xf32>
    %107 = arith.truncf %106 : vector<32x128xf32> to vector<32x128xbf16>
    %108 = vector.extract_strided_slice %87 {offsets = [32, 0], sizes = [1, 128], strides = [1, 1]} : vector<33x128xf32> to vector<1x128xf32>
    %109 = arith.truncf %105 : vector<32x32xf32> to vector<32x32xbf16>
    %cst_38 = arith.constant dense<0.000000e+00> : vector<32x128xf32>
    %110 = tpu.matmul %109, %107, %cst_38 {dimension_numbers = #tpu.dot_dimension_numbers<[1], [0], [0], [1], [0, 0, 1, 1], [], []>} : vector<32x32xbf16>, vector<32x128xbf16>, vector<32x128xf32> -> vector<32x128xf32>
    %111 = vector.broadcast %108 : vector<1x128xf32> to vector<32x128xf32>
    %112 = arith.addf %110, %111 : vector<32x128xf32>
    %113 = arith.truncf %94 : vector<32x128xf32> to vector<32x128xbf16>
    %cst_39 = arith.constant dense<0.000000e+00> : vector<32x1152xf32>
    %114 = tpu.matmul %113, %88, %cst_39 {dimension_numbers = #tpu.dot_dimension_numbers<[1], [0], [0], [1], [0, 0, 1, 1], [], []>} : vector<32x128xbf16>, vector<128x1152xbf16>, vector<32x1152xf32> -> vector<32x1152xf32>
    %115 = vector.extract_strided_slice %114 {offsets = [0, 0], sizes = [32, 128], strides = [1, 1]} : vector<32x1152xf32> to vector<32x128xf32>
    %116 = vector.extract_strided_slice %114 {offsets = [0, 128], sizes = [32, 128], strides = [1, 1]} : vector<32x1152xf32> to vector<32x128xf32>
    %117 = vector.broadcast %30 : vector<32x1xf32> to vector<32x128xf32>
    %118 = arith.mulf %117, %116 : vector<32x128xf32>
    %119 = arith.addf %115, %118 : vector<32x128xf32>
    %120 = vector.extract_strided_slice %114 {offsets = [0, 256], sizes = [32, 128], strides = [1, 1]} : vector<32x1152xf32> to vector<32x128xf32>
    %121 = vector.broadcast %32 : vector<32x1xf32> to vector<32x128xf32>
    %122 = arith.mulf %121, %120 : vector<32x128xf32>
    %123 = arith.addf %119, %122 : vector<32x128xf32>
    %124 = vector.extract_strided_slice %114 {offsets = [0, 384], sizes = [32, 128], strides = [1, 1]} : vector<32x1152xf32> to vector<32x128xf32>
    %125 = vector.broadcast %34 : vector<32x1xf32> to vector<32x128xf32>
    %126 = arith.mulf %125, %124 : vector<32x128xf32>
    %127 = arith.addf %123, %126 : vector<32x128xf32>
    %128 = vector.extract_strided_slice %114 {offsets = [0, 512], sizes = [32, 128], strides = [1, 1]} : vector<32x1152xf32> to vector<32x128xf32>
    %129 = vector.broadcast %37 : vector<32x1xf32> to vector<32x128xf32>
    %130 = arith.mulf %129, %128 : vector<32x128xf32>
    %131 = arith.addf %127, %130 : vector<32x128xf32>
    %132 = vector.extract_strided_slice %114 {offsets = [0, 640], sizes = [32, 128], strides = [1, 1]} : vector<32x1152xf32> to vector<32x128xf32>
    %133 = vector.broadcast %40 : vector<32x1xf32> to vector<32x128xf32>
    %134 = arith.mulf %133, %132 : vector<32x128xf32>
    %135 = arith.addf %131, %134 : vector<32x128xf32>
    %136 = vector.extract_strided_slice %114 {offsets = [0, 768], sizes = [32, 128], strides = [1, 1]} : vector<32x1152xf32> to vector<32x128xf32>
    %137 = vector.broadcast %47 : vector<32x1xf32> to vector<32x128xf32>
    %138 = arith.mulf %137, %136 : vector<32x128xf32>
    %139 = arith.addf %135, %138 : vector<32x128xf32>
    %140 = vector.extract_strided_slice %114 {offsets = [0, 896], sizes = [32, 128], strides = [1, 1]} : vector<32x1152xf32> to vector<32x128xf32>
    %141 = vector.broadcast %50 : vector<32x1xf32> to vector<32x128xf32>
    %142 = arith.mulf %141, %140 : vector<32x128xf32>
    %143 = arith.addf %139, %142 : vector<32x128xf32>
    %144 = vector.extract_strided_slice %114 {offsets = [0, 1024], sizes = [32, 128], strides = [1, 1]} : vector<32x1152xf32> to vector<32x128xf32>
    %145 = vector.broadcast %55 : vector<32x1xf32> to vector<32x128xf32>
    %146 = arith.mulf %145, %144 : vector<32x128xf32>
    %147 = arith.addf %143, %146 : vector<32x128xf32>
    %148 = vector.extract_strided_slice %89 {offsets = [0, 0], sizes = [128, 384], strides = [1, 1]} : vector<256x384xbf16> to vector<128x384xbf16>
    %149 = vector.extract_strided_slice %89 {offsets = [128, 0], sizes = [128, 384], strides = [1, 1]} : vector<256x384xbf16> to vector<128x384xbf16>
    %150 = arith.truncf %112 : vector<32x128xf32> to vector<32x128xbf16>
    %cst_40 = arith.constant dense<0.000000e+00> : vector<32x384xf32>
    %151 = tpu.matmul %150, %148, %cst_40 {dimension_numbers = #tpu.dot_dimension_numbers<[1], [0], [0], [1], [0, 0, 1, 1], [], []>} : vector<32x128xbf16>, vector<128x384xbf16>, vector<32x384xf32> -> vector<32x384xf32>
    %152 = arith.truncf %147 : vector<32x128xf32> to vector<32x128xbf16>
    %cst_41 = arith.constant dense<0.000000e+00> : vector<32x384xf32>
    %153 = tpu.matmul %152, %149, %cst_41 {dimension_numbers = #tpu.dot_dimension_numbers<[1], [0], [0], [1], [0, 0, 1, 1], [], []>} : vector<32x128xbf16>, vector<128x384xbf16>, vector<32x384xf32> -> vector<32x384xf32>
    %154 = arith.mulf %151, %153 : vector<32x384xf32>
    %155 = arith.truncf %154 : vector<32x384xf32> to vector<32x384xbf16>
    %cst_42 = arith.constant dense<0.000000e+00> : vector<32x128xf32>
    %156 = tpu.matmul %155, %90, %cst_42 {dimension_numbers = #tpu.dot_dimension_numbers<[1], [0], [0], [1], [0, 0, 1, 1], [], []>} : vector<32x384xbf16>, vector<384x128xbf16>, vector<32x128xf32> -> vector<32x128xf32>
    %157 = arith.truncf %156 : vector<32x128xf32> to vector<32x128xbf16>
    %cst_43 = arith.constant dense<0.000000e+00> : vector<16x128xf32>
    %158 = tpu.matmul %5, %157, %cst_43 {dimension_numbers = #tpu.dot_dimension_numbers<[1], [0], [0], [1], [0, 0, 1, 1], [], []>} : vector<16x32xbf16>, vector<32x128xbf16>, vector<16x128xf32> -> vector<16x128xf32>
    %159 = vector.broadcast %12 : vector<16x1xf32> to vector<16x128xf32>
    %160 = arith.mulf %158, %159 : vector<16x128xf32>
    %cst_44 = arith.constant 0.000000e+00 : f32
    %161 = vector.broadcast %cst_44 : f32 to vector<16x128xf32>
    %162 = arith.select %85, %160, %161 : vector<16x128xi1>, vector<16x128xf32>
    %cst_45 = arith.constant dense<0.000000e+00> : vector<16xf32>
    %163 = vector.multi_reduction <add>, %162, %cst_45 [1] : vector<16x128xf32> to vector<16xf32>
    %164 = vector.shape_cast %163 : vector<16xf32> to vector<16x1xf32>
    %cst_46 = arith.constant 8.000000e+00 : f32
    %165 = vector.broadcast %cst_46 : f32 to vector<16x1xf32>
    %166 = arith.divf %164, %165 : vector<16x1xf32>
    %167 = vector.broadcast %166 : vector<16x1xf32> to vector<16x128xf32>
    %168 = arith.subf %160, %167 : vector<16x128xf32>
    %169 = arith.mulf %168, %168 : vector<16x128xf32>
    %cst_47 = arith.constant 0.000000e+00 : f32
    %170 = vector.broadcast %cst_47 : f32 to vector<16x128xf32>
    %171 = arith.select %85, %169, %170 : vector<16x128xi1>, vector<16x128xf32>
    %cst_48 = arith.constant dense<0.000000e+00> : vector<16xf32>
    %172 = vector.multi_reduction <add>, %171, %cst_48 [1] : vector<16x128xf32> to vector<16xf32>
    %173 = vector.shape_cast %172 : vector<16xf32> to vector<16x1xf32>
    %cst_49 = arith.constant 8.000000e+00 : f32
    %174 = vector.broadcast %cst_49 : f32 to vector<16x1xf32>
    %175 = arith.divf %173, %174 : vector<16x1xf32>
    %cst_50 = arith.constant 9.99999974E-6 : f32
    %176 = vector.broadcast %cst_50 : f32 to vector<16x1xf32>
    %177 = arith.addf %175, %176 : vector<16x1xf32>
    %178 = math.rsqrt %177 : vector<16x1xf32>
    %179 = arith.mulf %160, %160 : vector<16x128xf32>
    %cst_51 = arith.constant 0.000000e+00 : f32
    %180 = vector.broadcast %cst_51 : f32 to vector<16x128xf32>
    %c8_i32_52 = arith.constant 8 : i32
    %181 = vector.broadcast %c8_i32_52 : i32 to vector<16x128xi32>
    %182 = arith.cmpi sge, %83, %181 : vector<16x128xi32>
    %c20_i32 = arith.constant 20 : i32
    %183 = vector.broadcast %c20_i32 : i32 to vector<16x128xi32>
    %184 = arith.cmpi slt, %83, %183 : vector<16x128xi32>
    %185 = arith.andi %182, %184 : vector<16x128xi1>
    %cst_53 = arith.constant 0.000000e+00 : f32
    %186 = vector.broadcast %cst_53 : f32 to vector<16x128xf32>
    %187 = arith.select %185, %179, %186 : vector<16x128xi1>, vector<16x128xf32>
    %cst_54 = arith.constant dense<0.000000e+00> : vector<16xf32>
    %188 = vector.multi_reduction <add>, %187, %cst_54 [1] : vector<16x128xf32> to vector<16xf32>
    %189 = vector.shape_cast %188 : vector<16xf32> to vector<16x1xf32>
    %cst_55 = arith.constant 4.000000e+00 : f32
    %190 = vector.broadcast %cst_55 : f32 to vector<16x1xf32>
    %191 = arith.divf %189, %190 : vector<16x1xf32>
    %cst_56 = arith.constant 9.99999974E-6 : f32
    %192 = vector.broadcast %cst_56 : f32 to vector<16x1xf32>
    %193 = arith.addf %191, %192 : vector<16x1xf32>
    %194 = math.rsqrt %193 : vector<16x1xf32>
    %cst_57 = arith.constant 0.000000e+00 : f32
    %195 = vector.shape_cast %194 : vector<16x1xf32> to vector<16x1xf32>
    %196 = vector.broadcast %195 : vector<16x1xf32> to vector<16x128xf32>
    %197 = vector.broadcast %cst_57 : f32 to vector<16x128xf32>
    %198 = arith.select %185, %196, %197 : vector<16x128xi1>, vector<16x128xf32>
    %199 = arith.addf %180, %198 : vector<16x128xf32>
    %c20_i32_58 = arith.constant 20 : i32
    %200 = vector.broadcast %c20_i32_58 : i32 to vector<16x128xi32>
    %201 = arith.cmpi sge, %83, %200 : vector<16x128xi32>
    %c40_i32 = arith.constant 40 : i32
    %202 = vector.broadcast %c40_i32 : i32 to vector<16x128xi32>
    %203 = arith.cmpi slt, %83, %202 : vector<16x128xi32>
    %204 = arith.andi %201, %203 : vector<16x128xi1>
    %cst_59 = arith.constant 0.000000e+00 : f32
    %205 = vector.broadcast %cst_59 : f32 to vector<16x128xf32>
    %206 = arith.select %204, %179, %205 : vector<16x128xi1>, vector<16x128xf32>
    %cst_60 = arith.constant dense<0.000000e+00> : vector<16xf32>
    %207 = vector.multi_reduction <add>, %206, %cst_60 [1] : vector<16x128xf32> to vector<16xf32>
    %208 = vector.shape_cast %207 : vector<16xf32> to vector<16x1xf32>
    %cst_61 = arith.constant 4.000000e+00 : f32
    %209 = vector.broadcast %cst_61 : f32 to vector<16x1xf32>
    %210 = arith.divf %208, %209 : vector<16x1xf32>
    %cst_62 = arith.constant 9.99999974E-6 : f32
    %211 = vector.broadcast %cst_62 : f32 to vector<16x1xf32>
    %212 = arith.addf %210, %211 : vector<16x1xf32>
    %213 = math.rsqrt %212 : vector<16x1xf32>
    %cst_63 = arith.constant 0.000000e+00 : f32
    %214 = vector.shape_cast %213 : vector<16x1xf32> to vector<16x1xf32>
    %215 = vector.broadcast %214 : vector<16x1xf32> to vector<16x128xf32>
    %216 = vector.broadcast %cst_63 : f32 to vector<16x128xf32>
    %217 = arith.select %204, %215, %216 : vector<16x128xi1>, vector<16x128xf32>
    %218 = arith.addf %199, %217 : vector<16x128xf32>
    %219 = vector.broadcast %178 : vector<16x1xf32> to vector<16x128xf32>
    %220 = arith.mulf %168, %219 : vector<16x128xf32>
    %221 = arith.mulf %160, %218 : vector<16x128xf32>
    %222 = arith.select %85, %220, %221 : vector<16x128xi1>, vector<16x128xf32>
    %223 = arith.addf %0, %222 : vector<16x128xf32>
    %c0_64 = arith.constant 0 : index
    %c0_65 = arith.constant 0 : index
    %224 = vector.load %arg9[%c0_64, %c0_65] : memref<33x32xf32, #tpu.memory_space<vmem>>, vector<33x32xf32>
    %c0_66 = arith.constant 0 : index
    %c0_67 = arith.constant 0 : index
    %225 = vector.load %arg10[%c0_66, %c0_67] : memref<33x384xf32, #tpu.memory_space<vmem>>, vector<33x384xf32>
    %c0_68 = arith.constant 0 : index
    %c0_69 = arith.constant 0 : index
    %226 = vector.load %arg11[%c0_68, %c0_69] : memref<128x2304xbf16, #tpu.memory_space<vmem>>, vector<128x2304xbf16>
    %c0_70 = arith.constant 0 : index
    %c0_71 = arith.constant 0 : index
    %227 = vector.load %arg12[%c0_70, %c0_71] : memref<640x1024xbf16, #tpu.memory_space<vmem>>, vector<640x1024xbf16>
    %c0_72 = arith.constant 0 : index
    %c0_73 = arith.constant 0 : index
    %228 = vector.load %arg13[%c0_72, %c0_73] : memref<1024x128xbf16, #tpu.memory_space<vmem>>, vector<1024x128xbf16>
    %229 = arith.truncf %223 : vector<16x128xf32> to vector<16x128xbf16>
    %cst_74 = arith.constant dense<0.000000e+00> : vector<64x128xf32>
    %230 = tpu.matmul %4, %229, %cst_74 {dimension_numbers = #tpu.dot_dimension_numbers<[1], [0], [0], [1], [0, 0, 1, 1], [], []>} : vector<64x16xbf16>, vector<16x128xbf16>, vector<64x128xf32> -> vector<64x128xf32>
    %231 = vector.extract_strided_slice %230 {offsets = [0, 0], sizes = [32, 8], strides = [1, 1]} : vector<64x128xf32> to vector<32x8xf32>
    %232 = vector.extract_strided_slice %230 {offsets = [32, 0], sizes = [32, 128], strides = [1, 1]} : vector<64x128xf32> to vector<32x128xf32>
    %233 = vector.extract_strided_slice %232 {offsets = [0, 0], sizes = [32, 8], strides = [1, 1]} : vector<32x128xf32> to vector<32x8xf32>
    %234 = tpu.concatenate %82, %231, %233 in 1 : vector<32x16xf32>, vector<32x8xf32>, vector<32x8xf32> -> vector<32x32xf32>
    %235 = arith.truncf %234 : vector<32x32xf32> to vector<32x32xbf16>
    %236 = vector.extract_strided_slice %224 {offsets = [0, 0], sizes = [32, 32], strides = [1, 1]} : vector<33x32xf32> to vector<32x32xf32>
    %237 = arith.truncf %236 : vector<32x32xf32> to vector<32x32xbf16>
    %238 = vector.extract_strided_slice %224 {offsets = [32, 0], sizes = [1, 32], strides = [1, 1]} : vector<33x32xf32> to vector<1x32xf32>
    %cst_75 = arith.constant dense<0.000000e+00> : vector<32x32xf32>
    %239 = tpu.matmul %235, %237, %cst_75 {dimension_numbers = #tpu.dot_dimension_numbers<[1], [0], [0], [1], [0, 0, 1, 1], [], []>} : vector<32x32xbf16>, vector<32x32xbf16>, vector<32x32xf32> -> vector<32x32xf32>
    %240 = vector.broadcast %238 : vector<1x32xf32> to vector<32x32xf32>
    %241 = arith.addf %239, %240 : vector<32x32xf32>
    %cst_76 = arith.constant 0.000000e+00 : f32
    %242 = vector.broadcast %cst_76 : f32 to vector<32x32xf32>
    %243 = arith.maximumf %241, %242 : vector<32x32xf32>
    %244 = vector.extract_strided_slice %225 {offsets = [0, 0], sizes = [32, 384], strides = [1, 1]} : vector<33x384xf32> to vector<32x384xf32>
    %245 = arith.truncf %244 : vector<32x384xf32> to vector<32x384xbf16>
    %246 = vector.extract_strided_slice %225 {offsets = [32, 0], sizes = [1, 384], strides = [1, 1]} : vector<33x384xf32> to vector<1x384xf32>
    %247 = arith.truncf %243 : vector<32x32xf32> to vector<32x32xbf16>
    %cst_77 = arith.constant dense<0.000000e+00> : vector<32x384xf32>
    %248 = tpu.matmul %247, %245, %cst_77 {dimension_numbers = #tpu.dot_dimension_numbers<[1], [0], [0], [1], [0, 0, 1, 1], [], []>} : vector<32x32xbf16>, vector<32x384xbf16>, vector<32x384xf32> -> vector<32x384xf32>
    %249 = vector.broadcast %246 : vector<1x384xf32> to vector<32x384xf32>
    %250 = arith.addf %248, %249 : vector<32x384xf32>
    %251 = arith.truncf %232 : vector<32x128xf32> to vector<32x128xbf16>
    %cst_78 = arith.constant dense<0.000000e+00> : vector<32x2304xf32>
    %252 = tpu.matmul %251, %226, %cst_78 {dimension_numbers = #tpu.dot_dimension_numbers<[1], [0], [0], [1], [0, 0, 1, 1], [], []>} : vector<32x128xbf16>, vector<128x2304xbf16>, vector<32x2304xf32> -> vector<32x2304xf32>
    %253 = vector.extract_strided_slice %252 {offsets = [0, 0], sizes = [32, 256], strides = [1, 1]} : vector<32x2304xf32> to vector<32x256xf32>
    %254 = vector.extract_strided_slice %252 {offsets = [0, 256], sizes = [32, 256], strides = [1, 1]} : vector<32x2304xf32> to vector<32x256xf32>
    %255 = vector.broadcast %30 : vector<32x1xf32> to vector<32x256xf32>
    %256 = arith.mulf %255, %254 : vector<32x256xf32>
    %257 = arith.addf %253, %256 : vector<32x256xf32>
    %258 = vector.extract_strided_slice %252 {offsets = [0, 512], sizes = [32, 256], strides = [1, 1]} : vector<32x2304xf32> to vector<32x256xf32>
    %259 = vector.broadcast %32 : vector<32x1xf32> to vector<32x256xf32>
    %260 = arith.mulf %259, %258 : vector<32x256xf32>
    %261 = arith.addf %257, %260 : vector<32x256xf32>
    %262 = vector.extract_strided_slice %252 {offsets = [0, 768], sizes = [32, 256], strides = [1, 1]} : vector<32x2304xf32> to vector<32x256xf32>
    %263 = vector.broadcast %34 : vector<32x1xf32> to vector<32x256xf32>
    %264 = arith.mulf %263, %262 : vector<32x256xf32>
    %265 = arith.addf %261, %264 : vector<32x256xf32>
    %266 = vector.extract_strided_slice %252 {offsets = [0, 1024], sizes = [32, 256], strides = [1, 1]} : vector<32x2304xf32> to vector<32x256xf32>
    %267 = vector.broadcast %37 : vector<32x1xf32> to vector<32x256xf32>
    %268 = arith.mulf %267, %266 : vector<32x256xf32>
    %269 = arith.addf %265, %268 : vector<32x256xf32>
    %270 = vector.extract_strided_slice %252 {offsets = [0, 1280], sizes = [32, 256], strides = [1, 1]} : vector<32x2304xf32> to vector<32x256xf32>
    %271 = vector.broadcast %40 : vector<32x1xf32> to vector<32x256xf32>
    %272 = arith.mulf %271, %270 : vector<32x256xf32>
    %273 = arith.addf %269, %272 : vector<32x256xf32>
    %274 = vector.extract_strided_slice %252 {offsets = [0, 1536], sizes = [32, 256], strides = [1, 1]} : vector<32x2304xf32> to vector<32x256xf32>
    %275 = vector.broadcast %47 : vector<32x1xf32> to vector<32x256xf32>
    %276 = arith.mulf %275, %274 : vector<32x256xf32>
    %277 = arith.addf %273, %276 : vector<32x256xf32>
    %278 = vector.extract_strided_slice %252 {offsets = [0, 1792], sizes = [32, 256], strides = [1, 1]} : vector<32x2304xf32> to vector<32x256xf32>
    %279 = vector.broadcast %50 : vector<32x1xf32> to vector<32x256xf32>
    %280 = arith.mulf %279, %278 : vector<32x256xf32>
    %281 = arith.addf %277, %280 : vector<32x256xf32>
    %282 = vector.extract_strided_slice %252 {offsets = [0, 2048], sizes = [32, 256], strides = [1, 1]} : vector<32x2304xf32> to vector<32x256xf32>
    %283 = vector.broadcast %55 : vector<32x1xf32> to vector<32x256xf32>
    %284 = arith.mulf %283, %282 : vector<32x256xf32>
    %285 = arith.addf %281, %284 : vector<32x256xf32>
    %286 = vector.extract_strided_slice %227 {offsets = [0, 0], sizes = [384, 1024], strides = [1, 1]} : vector<640x1024xbf16> to vector<384x1024xbf16>
    %287 = vector.extract_strided_slice %227 {offsets = [384, 0], sizes = [256, 1024], strides = [1, 1]} : vector<640x1024xbf16> to vector<256x1024xbf16>
    %288 = arith.truncf %250 : vector<32x384xf32> to vector<32x384xbf16>
    %cst_79 = arith.constant dense<0.000000e+00> : vector<32x1024xf32>
    %289 = tpu.matmul %288, %286, %cst_79 {dimension_numbers = #tpu.dot_dimension_numbers<[1], [0], [0], [1], [0, 0, 1, 1], [], []>} : vector<32x384xbf16>, vector<384x1024xbf16>, vector<32x1024xf32> -> vector<32x1024xf32>
    %290 = arith.truncf %285 : vector<32x256xf32> to vector<32x256xbf16>
    %cst_80 = arith.constant dense<0.000000e+00> : vector<32x1024xf32>
    %291 = tpu.matmul %290, %287, %cst_80 {dimension_numbers = #tpu.dot_dimension_numbers<[1], [0], [0], [1], [0, 0, 1, 1], [], []>} : vector<32x256xbf16>, vector<256x1024xbf16>, vector<32x1024xf32> -> vector<32x1024xf32>
    %292 = arith.mulf %289, %291 : vector<32x1024xf32>
    %293 = arith.truncf %292 : vector<32x1024xf32> to vector<32x1024xbf16>
    %cst_81 = arith.constant dense<0.000000e+00> : vector<32x128xf32>
    %294 = tpu.matmul %293, %228, %cst_81 {dimension_numbers = #tpu.dot_dimension_numbers<[1], [0], [0], [1], [0, 0, 1, 1], [], []>} : vector<32x1024xbf16>, vector<1024x128xbf16>, vector<32x128xf32> -> vector<32x128xf32>
    %295 = arith.truncf %294 : vector<32x128xf32> to vector<32x128xbf16>
    %cst_82 = arith.constant dense<0.000000e+00> : vector<16x128xf32>
    %296 = tpu.matmul %5, %295, %cst_82 {dimension_numbers = #tpu.dot_dimension_numbers<[1], [0], [0], [1], [0, 0, 1, 1], [], []>} : vector<16x32xbf16>, vector<32x128xbf16>, vector<16x128xf32> -> vector<16x128xf32>
    %297 = vector.broadcast %12 : vector<16x1xf32> to vector<16x128xf32>
    %298 = arith.mulf %296, %297 : vector<16x128xf32>
    %cst_83 = arith.constant 0.000000e+00 : f32
    %299 = vector.broadcast %cst_83 : f32 to vector<16x128xf32>
    %300 = arith.select %85, %298, %299 : vector<16x128xi1>, vector<16x128xf32>
    %cst_84 = arith.constant dense<0.000000e+00> : vector<16xf32>
    %301 = vector.multi_reduction <add>, %300, %cst_84 [1] : vector<16x128xf32> to vector<16xf32>
    %302 = vector.shape_cast %301 : vector<16xf32> to vector<16x1xf32>
    %cst_85 = arith.constant 8.000000e+00 : f32
    %303 = vector.broadcast %cst_85 : f32 to vector<16x1xf32>
    %304 = arith.divf %302, %303 : vector<16x1xf32>
    %305 = vector.broadcast %304 : vector<16x1xf32> to vector<16x128xf32>
    %306 = arith.subf %298, %305 : vector<16x128xf32>
    %307 = arith.mulf %306, %306 : vector<16x128xf32>
    %cst_86 = arith.constant 0.000000e+00 : f32
    %308 = vector.broadcast %cst_86 : f32 to vector<16x128xf32>
    %309 = arith.select %85, %307, %308 : vector<16x128xi1>, vector<16x128xf32>
    %cst_87 = arith.constant dense<0.000000e+00> : vector<16xf32>
    %310 = vector.multi_reduction <add>, %309, %cst_87 [1] : vector<16x128xf32> to vector<16xf32>
    %311 = vector.shape_cast %310 : vector<16xf32> to vector<16x1xf32>
    %cst_88 = arith.constant 8.000000e+00 : f32
    %312 = vector.broadcast %cst_88 : f32 to vector<16x1xf32>
    %313 = arith.divf %311, %312 : vector<16x1xf32>
    %cst_89 = arith.constant 9.99999974E-6 : f32
    %314 = vector.broadcast %cst_89 : f32 to vector<16x1xf32>
    %315 = arith.addf %313, %314 : vector<16x1xf32>
    %316 = math.rsqrt %315 : vector<16x1xf32>
    %317 = arith.mulf %298, %298 : vector<16x128xf32>
    %cst_90 = arith.constant 0.000000e+00 : f32
    %318 = vector.broadcast %cst_90 : f32 to vector<16x128xf32>
    %c8_i32_91 = arith.constant 8 : i32
    %319 = vector.broadcast %c8_i32_91 : i32 to vector<16x128xi32>
    %320 = arith.cmpi sge, %83, %319 : vector<16x128xi32>
    %c20_i32_92 = arith.constant 20 : i32
    %321 = vector.broadcast %c20_i32_92 : i32 to vector<16x128xi32>
    %322 = arith.cmpi slt, %83, %321 : vector<16x128xi32>
    %323 = arith.andi %320, %322 : vector<16x128xi1>
    %cst_93 = arith.constant 0.000000e+00 : f32
    %324 = vector.broadcast %cst_93 : f32 to vector<16x128xf32>
    %325 = arith.select %323, %317, %324 : vector<16x128xi1>, vector<16x128xf32>
    %cst_94 = arith.constant dense<0.000000e+00> : vector<16xf32>
    %326 = vector.multi_reduction <add>, %325, %cst_94 [1] : vector<16x128xf32> to vector<16xf32>
    %327 = vector.shape_cast %326 : vector<16xf32> to vector<16x1xf32>
    %cst_95 = arith.constant 4.000000e+00 : f32
    %328 = vector.broadcast %cst_95 : f32 to vector<16x1xf32>
    %329 = arith.divf %327, %328 : vector<16x1xf32>
    %cst_96 = arith.constant 9.99999974E-6 : f32
    %330 = vector.broadcast %cst_96 : f32 to vector<16x1xf32>
    %331 = arith.addf %329, %330 : vector<16x1xf32>
    %332 = math.rsqrt %331 : vector<16x1xf32>
    %cst_97 = arith.constant 0.000000e+00 : f32
    %333 = vector.shape_cast %332 : vector<16x1xf32> to vector<16x1xf32>
    %334 = vector.broadcast %333 : vector<16x1xf32> to vector<16x128xf32>
    %335 = vector.broadcast %cst_97 : f32 to vector<16x128xf32>
    %336 = arith.select %323, %334, %335 : vector<16x128xi1>, vector<16x128xf32>
    %337 = arith.addf %318, %336 : vector<16x128xf32>
    %c20_i32_98 = arith.constant 20 : i32
    %338 = vector.broadcast %c20_i32_98 : i32 to vector<16x128xi32>
    %339 = arith.cmpi sge, %83, %338 : vector<16x128xi32>
    %c40_i32_99 = arith.constant 40 : i32
    %340 = vector.broadcast %c40_i32_99 : i32 to vector<16x128xi32>
    %341 = arith.cmpi slt, %83, %340 : vector<16x128xi32>
    %342 = arith.andi %339, %341 : vector<16x128xi1>
    %cst_100 = arith.constant 0.000000e+00 : f32
    %343 = vector.broadcast %cst_100 : f32 to vector<16x128xf32>
    %344 = arith.select %342, %317, %343 : vector<16x128xi1>, vector<16x128xf32>
    %cst_101 = arith.constant dense<0.000000e+00> : vector<16xf32>
    %345 = vector.multi_reduction <add>, %344, %cst_101 [1] : vector<16x128xf32> to vector<16xf32>
    %346 = vector.shape_cast %345 : vector<16xf32> to vector<16x1xf32>
    %cst_102 = arith.constant 4.000000e+00 : f32
    %347 = vector.broadcast %cst_102 : f32 to vector<16x1xf32>
    %348 = arith.divf %346, %347 : vector<16x1xf32>
    %cst_103 = arith.constant 9.99999974E-6 : f32
    %349 = vector.broadcast %cst_103 : f32 to vector<16x1xf32>
    %350 = arith.addf %348, %349 : vector<16x1xf32>
    %351 = math.rsqrt %350 : vector<16x1xf32>
    %cst_104 = arith.constant 0.000000e+00 : f32
    %352 = vector.shape_cast %351 : vector<16x1xf32> to vector<16x1xf32>
    %353 = vector.broadcast %352 : vector<16x1xf32> to vector<16x128xf32>
    %354 = vector.broadcast %cst_104 : f32 to vector<16x128xf32>
    %355 = arith.select %342, %353, %354 : vector<16x128xi1>, vector<16x128xf32>
    %356 = arith.addf %337, %355 : vector<16x128xf32>
    %c40_i32_105 = arith.constant 40 : i32
    %357 = vector.broadcast %c40_i32_105 : i32 to vector<16x128xi32>
    %358 = arith.cmpi sge, %83, %357 : vector<16x128xi32>
    %c52_i32 = arith.constant 52 : i32
    %359 = vector.broadcast %c52_i32 : i32 to vector<16x128xi32>
    %360 = arith.cmpi slt, %83, %359 : vector<16x128xi32>
    %361 = arith.andi %358, %360 : vector<16x128xi1>
    %cst_106 = arith.constant 0.000000e+00 : f32
    %362 = vector.broadcast %cst_106 : f32 to vector<16x128xf32>
    %363 = arith.select %361, %317, %362 : vector<16x128xi1>, vector<16x128xf32>
    %cst_107 = arith.constant dense<0.000000e+00> : vector<16xf32>
    %364 = vector.multi_reduction <add>, %363, %cst_107 [1] : vector<16x128xf32> to vector<16xf32>
    %365 = vector.shape_cast %364 : vector<16xf32> to vector<16x1xf32>
    %cst_108 = arith.constant 4.000000e+00 : f32
    %366 = vector.broadcast %cst_108 : f32 to vector<16x1xf32>
    %367 = arith.divf %365, %366 : vector<16x1xf32>
    %cst_109 = arith.constant 9.99999974E-6 : f32
    %368 = vector.broadcast %cst_109 : f32 to vector<16x1xf32>
    %369 = arith.addf %367, %368 : vector<16x1xf32>
    %370 = math.rsqrt %369 : vector<16x1xf32>
    %cst_110 = arith.constant 0.000000e+00 : f32
    %371 = vector.shape_cast %370 : vector<16x1xf32> to vector<16x1xf32>
    %372 = vector.broadcast %371 : vector<16x1xf32> to vector<16x128xf32>
    %373 = vector.broadcast %cst_110 : f32 to vector<16x128xf32>
    %374 = arith.select %361, %372, %373 : vector<16x128xi1>, vector<16x128xf32>
    %375 = arith.addf %356, %374 : vector<16x128xf32>
    %c52_i32_111 = arith.constant 52 : i32
    %376 = vector.broadcast %c52_i32_111 : i32 to vector<16x128xi32>
    %377 = arith.cmpi sge, %83, %376 : vector<16x128xi32>
    %c72_i32 = arith.constant 72 : i32
    %378 = vector.broadcast %c72_i32 : i32 to vector<16x128xi32>
    %379 = arith.cmpi slt, %83, %378 : vector<16x128xi32>
    %380 = arith.andi %377, %379 : vector<16x128xi1>
    %cst_112 = arith.constant 0.000000e+00 : f32
    %381 = vector.broadcast %cst_112 : f32 to vector<16x128xf32>
    %382 = arith.select %380, %317, %381 : vector<16x128xi1>, vector<16x128xf32>
    %cst_113 = arith.constant dense<0.000000e+00> : vector<16xf32>
    %383 = vector.multi_reduction <add>, %382, %cst_113 [1] : vector<16x128xf32> to vector<16xf32>
    %384 = vector.shape_cast %383 : vector<16xf32> to vector<16x1xf32>
    %cst_114 = arith.constant 4.000000e+00 : f32
    %385 = vector.broadcast %cst_114 : f32 to vector<16x1xf32>
    %386 = arith.divf %384, %385 : vector<16x1xf32>
    %cst_115 = arith.constant 9.99999974E-6 : f32
    %387 = vector.broadcast %cst_115 : f32 to vector<16x1xf32>
    %388 = arith.addf %386, %387 : vector<16x1xf32>
    %389 = math.rsqrt %388 : vector<16x1xf32>
    %cst_116 = arith.constant 0.000000e+00 : f32
    %390 = vector.shape_cast %389 : vector<16x1xf32> to vector<16x1xf32>
    %391 = vector.broadcast %390 : vector<16x1xf32> to vector<16x128xf32>
    %392 = vector.broadcast %cst_116 : f32 to vector<16x128xf32>
    %393 = arith.select %380, %391, %392 : vector<16x128xi1>, vector<16x128xf32>
    %394 = arith.addf %375, %393 : vector<16x128xf32>
    %395 = vector.broadcast %316 : vector<16x1xf32> to vector<16x128xf32>
    %396 = arith.mulf %306, %395 : vector<16x128xf32>
    %397 = arith.mulf %298, %394 : vector<16x128xf32>
    %398 = arith.select %85, %396, %397 : vector<16x128xi1>, vector<16x128xf32>
    %399 = arith.addf %223, %398 : vector<16x128xf32>
    %400 = vector.extract_strided_slice %399 {offsets = [0, 0], sizes = [16, 8], strides = [1, 1]} : vector<16x128xf32> to vector<16x8xf32>
    %401 = arith.truncf %400 : vector<16x8xf32> to vector<16x8xbf16>
    %402 = vector.extract_strided_slice %3 {offsets = [32, 0], sizes = [8, 8], strides = [1, 1]} : vector<64x8xf32> to vector<8x8xf32>
    %403 = arith.truncf %402 : vector<8x8xf32> to vector<8x8xbf16>
    %404 = vector.extract_strided_slice %3 {offsets = [40, 0], sizes = [1, 8], strides = [1, 1]} : vector<64x8xf32> to vector<1x8xf32>
    %405 = vector.extract_strided_slice %3 {offsets = [48, 0], sizes = [8, 8], strides = [1, 1]} : vector<64x8xf32> to vector<8x8xf32>
    %406 = arith.truncf %405 : vector<8x8xf32> to vector<8x8xbf16>
    %407 = vector.extract_strided_slice %3 {offsets = [56, 0], sizes = [1, 8], strides = [1, 1]} : vector<64x8xf32> to vector<1x8xf32>
    %cst_117 = arith.constant dense<0.000000e+00> : vector<16x8xf32>
    %408 = tpu.matmul %401, %403, %cst_117 {dimension_numbers = #tpu.dot_dimension_numbers<[1], [0], [0], [1], [0, 0, 1, 1], [], []>} : vector<16x8xbf16>, vector<8x8xbf16>, vector<16x8xf32> -> vector<16x8xf32>
    %409 = vector.broadcast %404 : vector<1x8xf32> to vector<16x8xf32>
    %410 = arith.addf %408, %409 : vector<16x8xf32>
    %cst_118 = arith.constant 0.000000e+00 : f32
    %411 = vector.broadcast %cst_118 : f32 to vector<16x8xf32>
    %412 = arith.maximumf %410, %411 : vector<16x8xf32>
    %413 = arith.truncf %412 : vector<16x8xf32> to vector<16x8xbf16>
    %cst_119 = arith.constant dense<0.000000e+00> : vector<16x8xf32>
    %414 = tpu.matmul %413, %406, %cst_119 {dimension_numbers = #tpu.dot_dimension_numbers<[1], [0], [0], [1], [0, 0, 1, 1], [], []>} : vector<16x8xbf16>, vector<8x8xbf16>, vector<16x8xf32> -> vector<16x8xf32>
    %415 = vector.broadcast %407 : vector<1x8xf32> to vector<16x8xf32>
    %416 = arith.addf %414, %415 : vector<16x8xf32>
    %c0_120 = arith.constant 0 : index
    %c0_121 = arith.constant 0 : index
    %417 = vector.load %arg14[%c0_120, %c0_121] : memref<16x8xf32, #tpu.memory_space<vmem>>, vector<16x8xf32>
    tpu.vector_store %arg14[%c0_120, %c0_121], %416 {strides = array<i32>} : memref<16x8xf32, #tpu.memory_space<vmem>>, vector<16x8xf32>,
    return
  }
}

</mosaic_0001>

<bundles_post_ra>
// kernel: sub.1
= control target key start
LH: loop header
LB: loop body
LE: loop exit
PB: predicated region body
PF: predicated region fallthrough
CT: control target
= control target key end

     0   :  { %s100_s0 = inlined_call_operand.vmem [shape: f32[32,3], index: 0, kind: input, shape index: {}]   ;;  %s101_s1 = inlined_call_operand.vmem [shape: f32[32,3], index: 1, kind: input, shape index: {}]   ;;  %s102_s2 = inlined_call_operand.vmem [shape: f32[32,3], index: 2, kind: output, shape index: {}]  }
   0x1   :  { %v3_v0 = vld [vmem:[%s100_s0] sm:$0xff]  ;;  %v40_v2 = vld [vmem:[%s100_s0 + $0x8] sm:$0xff]  ;;  %v43_v5 = vld [vmem:[%s100_s0 + $0x10] sm:$0xff] }
   0x2   :  { %v4_v1 = vld [vmem:[%s101_s1] sm:$0xff]  ;;  %v41_v4 = vld [vmem:[%s101_s1 + $0x8] sm:$0xff]  ;;  %v44_v6 = vld [vmem:[%s101_s1 + $0x10] sm:$0xff] }
   0x3   :  { %v7_v3 = vsub.f32 %v3_v0, %v4_v1  ;;  %v16_v7 = vsub.f32 %v40_v2, %v41_v4  ;;  %v26_v8 = vsub.f32 %v43_v5, %v44_v6  ;;  %v46_v9 = vld [vmem:[%s100_s0 + $0x18] sm:$0xff] }
   0x4   :  { %v47_v10 = vld [vmem:[%s101_s1 + $0x18] sm:$0xff] }
   0x5   :  { %9 = vst [vmem:[%s102_s2] sm:$0xff] %v7_v3  ;;  %v36_v11 = vsub.f32 %v46_v9, %v47_v10  ;;  %42 = vst [vmem:[%s102_s2 + $0x8] sm:$0xff] %v16_v7 }
   0x6   :  { %45 = vst [vmem:[%s102_s2 + $0x10] sm:$0xff] %v26_v8 }
   0x7   :  { %48 = vst [vmem:[%s102_s2 + $0x18] sm:$0xff] %v36_v11 }

// kernel: interaction_forward.1
= control target key start
LH: loop header
LB: loop body
LE: loop exit
PB: predicated region body
PF: predicated region fallthrough
CT: control target
= control target key end

     0   :  { %19 = vsyncpa [#allocation3], 0  ;;  %s11829_s0 = inlined_call_operand.vmem [shape: f32[16,128], index: 0, kind: input, shape index: {}]   ;;  %s11830_s1 = inlined_call_operand.vmem [shape: f32[32,16], index: 1, kind: input, shape index: {}]   ;;  %s11831_s2 = inlined_call_operand.vmem [shape: bf16[80,32], index: 2, kind: input, shape index: {}]   ;;  %s11832_s3 = inlined_call_operand.hbm [shape: f32[64,8], index: 3, kind: input, shape index: {}]   ;;  %s11833_s4 = inlined_call_operand.hbm [shape: f32[33,32], index: 4, kind: input, shape index: {}]   ;;  %s11834_s5 = inlined_call_operand.hbm [shape: f32[33,128], index: 5, kind: input, shape index: {}]   ;;  %s11835_s6 = inlined_call_operand.hbm [shape: bf16[128,1152], index: 6, kind: input, shape index: {}]   ;;  %s11836_s7 = inlined_call_operand.hbm [shape: bf16[256,384], index: 7, kind: input, shape index: {}]   ;;  %s11837_s8 = inlined_call_operand.hbm [shape: bf16[384,128], index: 8, kind: input, shape index: {}]   ;;  %s11838_s9 = inlined_call_operand.hbm [shape: f32[33,32], index: 9, kind: input, shape index: {}]   ;;  %s11839_s10 = inlined_call_operand.hbm [shape: f32[33,384], index: 10, kind: input, shape index: {}]   ;;  %s11840_s11 = inlined_call_operand.hbm [shape: bf16[128,2304], index: 11, kind: input, shape index: {}]   ;;  %s11841_s12 = inlined_call_operand.hbm [shape: bf16[640,1024], index: 12, kind: input, shape index: {}]   ;;  %s11842_s13 = inlined_call_operand.hbm [shape: bf16[1024,128], index: 13, kind: input, shape index: {}]   ;;  %s11843_s14 = inlined_call_operand.vmem [shape: f32[16,8], index: 14, kind: output, shape index: {}]  }
   0x1   :  { %20 = vsyncpa [#allocation5], 0 }
   0x2   :  { %21 = vsyncpa [#allocation8], 0 }
   0x3   :  { %22 = vsyncpa [#allocation11], 0 }
   0x4   :  { %23 = vsyncpa [#allocation14], 0 }
   0x5   :  { %24 = vsyncpa [#allocation17], 0  ;;  %s10227_s29 = smov [#allocation4]   ;;  %s10228_s15 = smov [#allocation7]  }
   0x6   :  { %s48_s30 = sshll.u32 %s10227_s29, 4  ;;  %s72_s16 = sshll.u32 %s10228_s15, 4  ;;  %s49_s30 = int_to_ptr.vmem [resolvable:$true] %s48_s30  ;;  %s73_s16 = int_to_ptr.vmem [resolvable:$true] %s72_s16 }
   0x7   :  { %s10003_s17 = scalar_lea.vmem %s49_s30, 640  ;;  %p10008_p1 = scmp.lt.s32.totalorder %s49_s30, %s49_s30 }
   0x8   :  { %p10004_p0 = scmp.ne.s32.totalorder %s49_s30, %s10003_s17  ;;  %p10009_p2 = scmp.lt.s32.totalorder %s10003_s17, %s10003_s17 }
   0xa   :  { %p10010_p3 = por %p10009_p2, %p10008_p1 }
   0xc   :  { %p10011_p4 = pnand %p10010_p3, %p10004_p0 }
   0xe   :  { %10014 = shalt.err (!%p10011_p4)
}
   0xf   :  { %s10229_s18 = smov 128   ;;  %s10230_s19 = smov 8  }
  0x10   :  { %54 = dma.hbm_to_vmem [thread:$0]  %s11833_s4, 640, %s49_s30, [#allocation5], %s10229_s18, %s10229_s18, %s10230_s19  }
  0x11   :  { %s10023_s22 = scalar_lea.vmem %s73_s16, 9216  ;;  %p10028_p6 = scmp.lt.s32.totalorder %s73_s16, %s73_s16 }
  0x12   :  { %p10024_p5 = scmp.ne.s32.totalorder %s73_s16, %s10023_s22  ;;  %p10029_p7 = scmp.lt.s32.totalorder %s10023_s22, %s10023_s22 }
  0x14   :  { %p10030_p8 = por %p10029_p7, %p10028_p6 }
  0x16   :  { %p10031_p9 = pnand %p10030_p8, %p10024_p5 }
  0x18   :  { %10034 = shalt.err (!%p10031_p9)
}
  0x19   :  { %s10231_s23 = smov 576   ;;  %s10232_s24 = smov 36  }
  0x1a   :  { %78 = dma.hbm_to_vmem [thread:$0]  %s11835_s6, 9216, %s73_s16, [#allocation8], %s10231_s23, %s10231_s23, %s10232_s24  }
  0x1b   :  { %s10233_s27 = smov [#allocation10]  }
  0x1c   :  { %s96_s28 = sshll.u32 %s10233_s27, 4  ;;  %s97_s28 = int_to_ptr.vmem [resolvable:$true] %s96_s28 }
  0x1d   :  { %s10043_s29 = scalar_lea.vmem %s97_s28, 3072  ;;  %p10048_p11 = scmp.lt.s32.totalorder %s97_s28, %s97_s28 }
  0x1e   :  { %p10044_p10 = scmp.ne.s32.totalorder %s97_s28, %s10043_s29  ;;  %p10049_p12 = scmp.lt.s32.totalorder %s10043_s29, %s10043_s29 }
  0x20   :  { %p10050_p13 = por %p10049_p12, %p10048_p11 }
  0x22   :  { %p10051_p0 = pnand %p10050_p13, %p10044_p10 }
  0x24   :  { %10054 = shalt.err (!%p10051_p0)
}
  0x25   :  { %s10234_s4 = smov 64   ;;  %s10235_s30 = smov 4  }
  0x26   :  { %102 = dma.hbm_to_vmem [thread:$0]  %s11837_s8, 3072, %s97_s28, [#allocation11], %s10234_s4, %s10234_s4, %s10235_s30  }
  0x27   :  { %s10236_s6 = smov [#allocation13]  }
  0x28   :  { %s120_s16 = sshll.u32 %s10236_s6, 4  ;;  %s121_s16 = int_to_ptr.vmem [resolvable:$true] %s120_s16 }
  0x29   :  { %s10063_s20 = scalar_lea.vmem %s121_s16, 1920  ;;  %p10068_p2 = scmp.lt.s32.totalorder %s121_s16, %s121_s16 }
  0x2a   :  { %p10064_p1 = scmp.ne.s32.totalorder %s121_s16, %s10063_s20  ;;  %p10069_p3 = scmp.lt.s32.totalorder %s10063_s20, %s10063_s20 }
  0x2c   :  { %p10070_p4 = por %p10069_p3, %p10068_p2 }
  0x2e   :  { %p10071_p5 = pnand %p10070_p4, %p10064_p1 }
  0x30   :  { %10074 = shalt.err (!%p10071_p5)
}
  0x31   :  { %s10237_s21 = smov 384   ;;  %s10238_s22 = smov 24  }
  0x32   :  { %126 = dma.hbm_to_vmem [thread:$0]  %s11839_s10, 1920, %s121_s16, [#allocation14], %s10237_s21, %s10237_s21, %s10238_s22  }
  0x33   :  { %s10239_s25 = smov [#allocation16]  }
  0x34   :  { %s144_s26 = sshll.u32 %s10239_s25, 4  ;;  %s145_s26 = int_to_ptr.vmem [resolvable:$true] %s144_s26 }
  0x35   :  { %s10083_s8 = scalar_lea.vmem %s145_s26, 40960  ;;  %p10088_p7 = scmp.lt.s32.totalorder %s145_s26, %s145_s26 }
  0x36   :  { %p10084_p6 = scmp.ne.s32.totalorder %s145_s26, %s10083_s8  ;;  %p10089_p8 = scmp.lt.s32.totalorder %s10083_s8, %s10083_s8 }
  0x38   :  { %p10090_p9 = por %p10089_p8, %p10088_p7 }
  0x3a   :  { %p10091_p10 = pnand %p10090_p9, %p10084_p6 }
  0x3c   :  { %10094 = shalt.err (!%p10091_p10)
}
  0x3d   :  { %s10240_s27 = smov 512   ;;  %s10241_s28 = smov 32  }
  0x3e   :  { %150 = dma.hbm_to_vmem [thread:$0]  %s11841_s12, 40960, %s145_s26, [#allocation17], %s10240_s27, %s10240_s27, %s10241_s28  }
  0x3f   :  { %s10242_s17 = smov [#allocation2]   ;;  %s10243_s10 = smov [#allocation6]  }
  0x40   :  { %s36_s6 = sshll.u32 %s10242_s17, 4  ;;  %s60_s16 = sshll.u32 %s10243_s10, 4  ;;  %s37_s6 = int_to_ptr.vmem [resolvable:$true] %s36_s6  ;;  %s61_s16 = int_to_ptr.vmem [resolvable:$true] %s60_s16 }
  0x41   :  { %s10103_s20 = scalar_lea.vmem %s37_s6, 1024  ;;  %p10108_p12 = scmp.lt.s32.totalorder %s37_s6, %s37_s6 }
  0x42   :  { %p10104_p11 = scmp.ne.s32.totalorder %s37_s6, %s10103_s20  ;;  %p10109_p13 = scmp.lt.s32.totalorder %s10103_s20, %s10103_s20 }
  0x44   :  { %p10110_p0 = por %p10109_p13, %p10108_p12 }
  0x46   :  { %p10111_p1 = pnand %p10110_p0, %p10104_p11 }
  0x48   :  { %10114 = shalt.err (!%p10111_p1)
}
  0x49   :  { %42 = dma.hbm_to_vmem [thread:$0]  %s11832_s3, 1024, %s37_s6, [#allocation3], %s10229_s18, %s10229_s18, %s10230_s19  }
  0x4a   :  { %s10123_s12 = scalar_lea.vmem %s61_s16, 640  ;;  %p10128_p3 = scmp.lt.s32.totalorder %s61_s16, %s61_s16 }
  0x4b   :  { %p10124_p2 = scmp.ne.s32.totalorder %s61_s16, %s10123_s12  ;;  %p10129_p4 = scmp.lt.s32.totalorder %s10123_s12, %s10123_s12 }
  0x4d   :  { %p10130_p5 = por %p10129_p4, %p10128_p3 }
  0x4f   :  { %p10131_p6 = pnand %p10130_p5, %p10124_p2 }
  0x51   :  { %10134 = shalt.err (!%p10131_p6)
}
  0x52   :  { %66 = dma.hbm_to_vmem [thread:$0]  %s11834_s5, 640, %s61_s16, [#allocation5], %s10229_s18, %s10229_s18, %s10230_s19  }
  0x53   :  { %s10244_s26 = smov [#allocation9]  }
  0x54   :  { %s84_s8 = sshll.u32 %s10244_s26, 4  ;;  %s85_s8 = int_to_ptr.vmem [resolvable:$true] %s84_s8 }
  0x55   :  { %s10143_s27 = scalar_lea.vmem %s85_s8, 6144  ;;  %p10148_p8 = scmp.lt.s32.totalorder %s85_s8, %s85_s8 }
  0x56   :  { %p10144_p7 = scmp.ne.s32.totalorder %s85_s8, %s10143_s27  ;;  %p10149_p9 = scmp.lt.s32.totalorder %s10143_s27, %s10143_s27 }
  0x58   :  { %p10150_p10 = por %p10149_p9, %p10148_p8 }
  0x5a   :  { %p10151_p11 = pnand %p10150_p10, %p10144_p7 }
  0x5c   :  { %10154 = shalt.err (!%p10151_p11)
}
  0x5d   :  { %s10245_s3 = smov 192   ;;  %s10246_s28 = smov 12  }
  0x5e   :  { %90 = dma.hbm_to_vmem [thread:$0]  %s11836_s7, 6144, %s85_s8, [#allocation8], %s10245_s3, %s10245_s3, %s10246_s28  }
  0x5f   :  { %s10247_s17 = smov [#allocation12]   ;;  %s10248_s10 = smov [#allocation15]  }
  0x60   :  { %s108_s6 = sshll.u32 %s10247_s17, 4  ;;  %s132_s5 = sshll.u32 %s10248_s10, 4  ;;  %s109_s6 = int_to_ptr.vmem [resolvable:$true] %s108_s6  ;;  %s133_s5 = int_to_ptr.vmem [resolvable:$true] %s132_s5 }
  0x61   :  { %s10163_s16 = scalar_lea.vmem %s109_s6, 640  ;;  %p10168_p13 = scmp.lt.s32.totalorder %s109_s6, %s109_s6 }
  0x62   :  { %p10164_p12 = scmp.ne.s32.totalorder %s109_s6, %s10163_s16  ;;  %p10169_p0 = scmp.lt.s32.totalorder %s10163_s16, %s10163_s16 }
  0x64   :  { %p10170_p1 = por %p10169_p0, %p10168_p13 }
  0x66   :  { %p10171_p2 = pnand %p10170_p1, %p10164_p12 }
  0x68   :  { %10174 = shalt.err (!%p10171_p2)
}
  0x69   :  { %114 = dma.hbm_to_vmem [thread:$0]  %s11838_s9, 640, %s109_s6, [#allocation11], %s10229_s18, %s10229_s18, %s10230_s19  }
  0x6a   :  { %s10183_s7 = scalar_lea.vmem %s133_s5, 18432  ;;  %p10188_p4 = scmp.lt.s32.totalorder %s133_s5, %s133_s5 }
  0x6b   :  { %p10184_p3 = scmp.ne.s32.totalorder %s133_s5, %s10183_s7  ;;  %p10189_p5 = scmp.lt.s32.totalorder %s10183_s7, %s10183_s7 }
  0x6d   :  { %p10190_p6 = por %p10189_p5, %p10188_p4 }
  0x6f   :  { %p10191_p7 = pnand %p10190_p6, %p10184_p3 }
  0x71   :  { %10194 = shalt.err (!%p10191_p7)
}
  0x72   :  { %s10249_s23 = smov 1152   ;;  %s10250_s12 = smov 72  }
  0x73   :  { %138 = dma.hbm_to_vmem [thread:$0]  %s11840_s11, 18432, %s133_s5, [#allocation14], %s10249_s23, %s10249_s23, %s10250_s12  }
  0x74   :  { %s10251_s26 = smov [#allocation18]  }
  0x75   :  { %s156_s8 = sshll.u32 %s10251_s26, 4  ;;  %s157_s8 = int_to_ptr.vmem [resolvable:$true] %s156_s8 }
  0x76   :  { %s10203_s27 = scalar_lea.vmem %s157_s8, 8192  ;;  %p10208_p9 = scmp.lt.s32.totalorder %s157_s8, %s157_s8 }
  0x77   :  { %p10204_p8 = scmp.ne.s32.totalorder %s157_s8, %s10203_s27  ;;  %p10209_p10 = scmp.lt.s32.totalorder %s10203_s27, %s10203_s27 }
  0x79   :  { %p10210_p11 = por %p10209_p10, %p10208_p9 }
  0x7b   :  { %p10211_p12 = pnand %p10210_p11, %p10204_p8 }
  0x7d   :  { %10214 = shalt.err (!%p10211_p12)
}
  0x7e   :  { %162 = dma.hbm_to_vmem [thread:$0]  %s11842_s13, 8192, %s157_s8, [#allocation17], %s10234_s4, %s10234_s4, %s10235_s30  }
  0x7f   :  { %10215 = dma.done.wait [#allocation3], 1024  }
  0x80   :  { %10216 = vsyncadd [#allocation3], 4294966272 }
  0x81   :  { %10217 = dma.done.wait [#allocation5], 1280  }
  0x82   :  { %10218 = vsyncadd [#allocation5], 4294966016 }
  0x83   :  { %10219 = dma.done.wait [#allocation8], 15360  }
  0x84   :  { %10220 = vsyncadd [#allocation8], 4294951936 }
  0x85   :  { %10221 = dma.done.wait [#allocation11], 3712  }
  0x86   :  { %10222 = vsyncadd [#allocation11], 4294963584 }
  0x87   :  { %10223 = dma.done.wait [#allocation14], 20352  }
  0x88   :  { %10224 = vsyncadd [#allocation14], 4294946944 }
  0x89   :  { %10225 = dma.done.wait [#allocation17], 49152  }
  0x8a   :  { %10226 = vsyncadd [#allocation17], 4294918144  ;;  %v201_v0 = vld [vmem:[%s11830_s1 + $0x10] sm:$0xff]  ;;  %v199_v1 = vld [vmem:[%s11830_s1] sm:$0xff]  ;;  %s10252_s17 = smov 127   ;;  %v10253_v8 = vmov 8   ;;  %v476_v51 = vlaneseq }
  0x8b   :  { %v202_v2 = vld [vmem:[%s11830_s1 + $0x18] sm:$0xff]  ;;  %v238_v3 = vmul.f32 %v201_v0, %v201_v0  ;;  %v236_v4 = vmul.f32 %v199_v1, %v199_v1  ;;  %v200_v5 = vld [vmem:[%s11830_s1 + $0x8] sm:$0xff]  ;;  %9384 = vset.pattern.permute.xlu1 %v10253_v8  ;;  %9383 = vset.pattern.permute.xlu0 %v10253_v8  ;;  %s10254_s6 = smov 126   ;;  %v213_v45 = vld [vmem:[#allocation2] sm:$0xff]  ;;  %vm535_vm8 = vcmask 1043456   ;;  %vm528_vm9 = vcmask 64512  }
  0x8c   :  { %v239_v6 = vmul.f32 %v202_v2, %v202_v2  ;;  %v237_v7 = vmul.f32 %v200_v5, %v200_v5  ;;  %v520_v46 = vpack.c.bf16 %v213_v45, %v213_v45  ;;  %v197_v48 = vld [vmem:[%s11829_s0] sm:$0xff]  ;;  %v198_v49 = vld [vmem:[%s11829_s0 + $0x8] sm:$0xff]  ;;  %v10455_v52 = vand.u32 127, %v476_v51  ;;  %v9469_v45 = vld [vmem:[#allocation7 + $0x48] ss:$36 sps:$4 sm:$0xff]   ;;  %s10258_s4 = smov 2  }
  0x8d   :  { %248 = vrot.lane.b32.xlu1 %v238_v3, %s10252_s17  ;;  %244 = vrot.lane.b32.xlu0 %v236_v4, %s10252_s17  ;;  %v879_v50 = vpack.c.bf16 %v198_v49, %v197_v48  ;;  %vm900_vm10 = vcmask 130048   ;;  %v9474_v49 = vld [vmem:[#allocation7 + $0x4] ss:$36 sps:$4 sm:$0xff]   ;;  %vm1014_vm11 = vcmask 195584   ;;  %vm223_vm12 = vcmask 261120  }
  0x8e   :  { %9345 = vmatprep.subr.msk.bf16.mxu0 %vm535_vm8, %v520_v46  ;;  %v537_v47 = vsel %vm535_vm8, %v520_v46, 0  ;;  %11908 = vst [vmem:[#allocation25_spill] sm:$0xff] %v10455_v52  ;;  %v478_v53 = vcvt.s32.f32 %v10455_v52  ;;  %v10494_v46 = vld [vmem:[%s11830_s1] sm:$0xff]  ;;  %vm10262_vm13 = vmmov 0   ;;  %vm676_vm14 = vcmp.lt.s32.totalorder %v10455_v52, 8 }
  0x8f   :  { %9174 = vmatpush3.bf16.msra.mxu0 %v537_v47  ;;  %v10499_v47 = vld [vmem:[%s11830_s1 + $0x8] sm:$0xff]  ;;  %vm2808_vm15 = vcmp.ge.s32.totalorder %v10455_v52, 8 }
  0x90   :  { %9185 = vmatprep.subr.bf16.mxu0 %v879_v50  ;;  %v479_v54 = vmul.f32 2.857143, %v478_v53  ;;  %v9385_v48 = vpack.i.bf16 %v10499_v47, %v10494_v46  ;;  %v9477_v53 = vld [vmem:[#allocation7 + $0x20c] ss:$36 sps:$4 sm:$0xff]  }
  0x91   :  { %250 = vrot.lane.b32.xlu1 %v239_v6, %s10252_s17  ;;  %246 = vrot.lane.b32.xlu0 %v237_v7, %s10252_s17 }
  0x95   :  { %262 = vrot.lane.b32.xlu1 %v237_v7, %s10254_s6  ;;  %260 = vrot.lane.b32.xlu0 %v236_v4, %s10254_s6 }
  0x99   :  { %266 = vrot.lane.b32.xlu1 %v239_v6, %s10254_s6  ;;  %264 = vrot.lane.b32.xlu0 %v238_v3, %s10254_s6 }
  0xff   :  { %v249_v9 = vpop.permute.xlu1 %248  ;;  %v245_v10 = vpop.permute.xlu0 %244 }
 0x100   :  { %v256_v13 = vadd.f32 %v245_v10, %v236_v4  ;;  %v258_v19 = vadd.f32 %v249_v9, %v238_v3 }
 0x103   :  { %v251_v11 = vpop.permute.xlu1 %250  ;;  %v247_v12 = vpop.permute.xlu0 %246 }
 0x104   :  { %v257_v14 = vadd.f32 %v247_v12, %v237_v7  ;;  %v259_v20 = vadd.f32 %v251_v11, %v239_v6 }
 0x107   :  { %v263_v15 = vpop.permute.xlu1 %262  ;;  %v261_v16 = vpop.permute.xlu0 %260 }
 0x108   :  { %v10412_v17 = vadd.f32 %v263_v15, %v257_v14  ;;  %v10414_v18 = vadd.f32 %v261_v16, %v256_v13 }
 0x10a   :  { %9925 = vrsqrt.f32 %v10412_v17  ;;  %v288_v25 = vand.u32 2147483648, %v10412_v17  ;;  %v281_v26 = vand.u32 2147483648, %v10414_v18  ;;  %vm285_vm0 = vcmp.eq.f32.partialorder %v10412_v17, inf }
 0x10b   :  { %v267_v21 = vpop.permute.xlu1 %266  ;;  %v265_v22 = vpop.permute.xlu0 %264  ;;  %9927 = vrsqrt.f32 %v10414_v18  ;;  %vm287_vm1 = vcmp.eq.f32.partialorder %v10412_v17, 0.0  ;;  %vm278_vm2 = vcmp.eq.f32.partialorder %v10414_v18, inf  ;;  %vm280_vm3 = vcmp.eq.f32.partialorder %v10414_v18, 0.0 }
 0x10c   :  { %v10418_v23 = vadd.f32 %v267_v21, %v259_v20  ;;  %v10420_v24 = vadd.f32 %v265_v22, %v258_v19  ;;  %v9447_v19 = vld [vmem:[%s11831_s2] sm:$0xff]   ;;  %v9453_v21 = vld [vmem:[#allocation7 + $0x1fc] ss:$36 sps:$4 sm:$0xff]  }
 0x10d   :  { %v9448_v22 = vld [vmem:[%s11831_s2 + $0x8] sm:$0xff]  }
 0x10e   :  { %9929 = vrsqrt.f32 %v10418_v23  ;;  %vm299_vm4 = vcmp.eq.f32.partialorder %v10418_v23, inf  ;;  %vm301_vm5 = vcmp.eq.f32.partialorder %v10418_v23, 0.0  ;;  %v302_v38 = vand.u32 2147483648, %v10418_v23 }
 0x10f   :  { %9931 = vrsqrt.f32 %v10420_v24  ;;  %vm292_vm6 = vcmp.eq.f32.partialorder %v10420_v24, inf  ;;  %vm294_vm7 = vcmp.eq.f32.partialorder %v10420_v24, 0.0  ;;  %v295_v40 = vand.u32 2147483648, %v10420_v24 }
 0x117   :  { %v9926_v27 = vpop.eup %9925 }
 0x118   :  { %v9928_v28 = vpop.eup %9927  ;;  %v284_v29 = vmul.f32 %v9926_v27, %v10412_v17  ;;  %v9456_v27 = vld [vmem:[#allocation7 + $0x1b4] ss:$36 sps:$4 sm:$0xff]  }
 0x119   :  { %v277_v30 = vmul.f32 %v9928_v28, %v10414_v18  ;;  %v9454_v28 = vld [vmem:[#allocation7 + $0x1b0] ss:$36 sps:$4 sm:$0xff]  }
 0x11a   :  { %v286_v31 = vsel %vm285_vm0, %v10412_v17, %v284_v29  ;;  %v9450_v29 = vld [vmem:[%s11831_s2 + $0x18] sm:$0xff]   ;;  %vm2809_vm0 = vcmp.lt.s32.totalorder %v10455_v52, 20 }
 0x11b   :  { %v9930_v32 = vpop.eup %9929  ;;  %v289_v33 = vsel %vm287_vm1, %v288_v25, %v286_v31  ;;  %v279_v34 = vsel %vm278_vm2, %v10414_v18, %v277_v30  ;;  %v9449_v25 = vld [vmem:[%s11831_s2 + $0x10] sm:$0xff]   ;;  %v9459_v30 = vld [vmem:[#allocation7 + $0x16c] ss:$36 sps:$4 sm:$0xff]   ;;  %vm10894_vm1 = vmand %vm2808_vm15, %vm2809_vm0  ;;  %vm2828_vm2 = vcmp.ge.s32.totalorder %v10455_v52, 20 }
 0x11c   :  { %v9932_v35 = vpop.eup %9931  ;;  %487 = vperm.xlu1 %9384, %v289_v33   ;;  %v282_v36 = vsel %vm280_vm3, %v281_v26, %v279_v34  ;;  %v298_v37 = vmul.f32 %v9930_v32, %v10418_v23  ;;  %v9451_v26 = vld [vmem:[#allocation7 + $0x1f8] ss:$36 sps:$4 sm:$0xff]   ;;  %v9457_v31 = vld [vmem:[#allocation7 + $0x168] ss:$36 sps:$4 sm:$0xff]   ;;  %v9460_v33 = vld [vmem:[#allocation7 + $0x120] ss:$36 sps:$4 sm:$0xff]  }
 0x11d   :  { %482 = vperm.xlu0 %9383, %v282_v36   ;;  %v291_v39 = vmul.f32 %v9932_v35, %v10420_v24  ;;  %v9462_v32 = vld [vmem:[#allocation7 + $0x124] ss:$36 sps:$4 sm:$0xff]   ;;  %v9465_v34 = vld [vmem:[#allocation7 + $0xdc] ss:$36 sps:$4 sm:$0xff]   ;;  %vm2829_vm3 = vcmp.lt.s32.totalorder %v10455_v52, 40 }
 0x11e   :  { %v300_v41 = vsel %vm299_vm4, %v10418_v23, %v298_v37  ;;  %v9463_v35 = vld [vmem:[#allocation7 + $0xd8] ss:$36 sps:$4 sm:$0xff]   ;;  %v215_v36 = vld [vmem:[#allocation2 + $0x10] sm:$0xff]  ;;  %vm10910_vm4 = vmand %vm2828_vm2, %vm2829_vm3 }
 0x11f   :  { %v303_v42 = vsel %vm301_vm5, %v302_v38, %v300_v41  ;;  %v293_v43 = vsel %vm292_vm6, %v10420_v24, %v291_v39  ;;  %v521_v37 = vpack.c.bf16 %v215_v36, %v215_v36  ;;  %v9468_v39 = vld [vmem:[#allocation7 + $0x94] ss:$36 sps:$4 sm:$0xff]   ;;  %v10481_v41 = vld [vmem:[%s11830_s1 + $0x10] sm:$0xff] }
 0x120   :  { %v296_v44 = vsel %vm294_vm7, %v295_v40, %v293_v43  ;;  %v9466_v40 = vld [vmem:[#allocation7 + $0x90] ss:$36 sps:$4 sm:$0xff]  }
 0x121   :  { %497 = vperm.xlu0 %9383, %v303_v42   ;;  %492 = vperm.xlu1 %9384, %v296_v44   ;;  %v605_v38 = vsel %vm535_vm8, %v521_v37, 0  ;;  %v10486_v42 = vld [vmem:[%s11830_s1 + $0x18] sm:$0xff]  ;;  %s10256_s1 = smov 16   ;;  %v9484_v36 = vld [vmem:[#allocation7 + $0x130] ss:$36 sps:$4 sm:$0xff]  }
 0x122   :  { %9346 = vmatprep.subr.msk.bf16.mxu1 %vm535_vm8, %v521_v37  ;;  %v9390_v43 = vpack.i.bf16 %v10486_v42, %v10481_v41  ;;  %v9471_v44 = vld [vmem:[#allocation7 + $0x4c] ss:$36 sps:$4 sm:$0xff]  }
 0x123   :  { %9180 = vmatpush3.bf16.msra.mxu1 %v605_v38  ;;  %v9489_v37 = vld [vmem:[#allocation7 + $0xec] ss:$36 sps:$4 sm:$0xff]  }
 0x125   :  { %9391 = vrot.lane.b32.xlu0 %v9390_v43, %s10230_s19  ;;  %9386 = vrot.lane.b32.xlu1 %v9385_v48, %s10230_s19  ;;  %s10257_s19 = smov 1   ;;  %v9490_v43 = vld [vmem:[#allocation7 + $0xa0] ss:$36 sps:$4 sm:$0xff]   ;;  %v9498_v48 = vld [vmem:[#allocation7 + $0x14] ss:$36 sps:$4 sm:$0xff]  }
 0x197   :  { %v488_v55 = vpop.permute.xlu1 %487 }
 0x198   :  { %v501_v56 = vsub.f32 %v488_v55, %v479_v54  ;;  %v483_v57 = vpop.permute.xlu0 %482  ;;  %v525_v55 = vshrl.u32 %v476_v51, 7 }
 0x199   :  { %v500_v58 = vsub.f32 %v483_v57, %v479_v54  ;;  %v214_v57 = vld [vmem:[#allocation2 + $0x8] sm:$0xff] }
 0x19a   :  { %v505_v59 = vmul.f32 %v501_v56, %v501_v56  ;;  %v10506_v56 = vsub.s32 0, %v525_v55  ;;  %v9501_v55 = vld [vmem:[#allocation7 + $0x188] ss:$36 sps:$4 sm:$0xff]  }
 0x19b   :  { %v504_v60 = vmul.f32 %v500_v58, %v500_v58 }
 0x19c   :  { %v509_v61 = vmul.f32 -0.06125, %v505_v59  ;;  %v493_v62 = vpop.permute.xlu1 %492  ;;  %v498_v63 = vpop.permute.xlu0 %497  ;;  %11909 = vst [vmem:[#allocation26_spill] sm:$0xff] %v10506_v56  ;;  %v527_v59 = vrot.slane %v214_v57, %v10506_v56  ;;  %v9502_v57 = vld [vmem:[#allocation7 + $0x140] ss:$36 sps:$4 sm:$0xff]  }
 0x19d   :  { %v508_v0 = vmul.f32 -0.06125, %v504_v60  ;;  %v502_v1 = vsub.f32 %v493_v62, %v479_v54  ;;  %v503_v2 = vsub.f32 %v498_v63, %v479_v54  ;;  %v11844_v54 = vmov 0  }
 0x19e   :  { %v514_v3 = vmul.f32 1.442695, %v509_v61 }
 0x19f   :  { %v512_v4 = vmul.f32 1.442695, %v508_v0  ;;  %v506_v5 = vmul.f32 %v502_v1, %v502_v1  ;;  %v507_v6 = vmul.f32 %v503_v2, %v503_v2 }
 0x1a0   :  { %9933 = vpow2.f32 %v514_v3 }
 0x1a1   :  { %9935 = vpow2.f32 %v512_v4  ;;  %v510_v7 = vmul.f32 -0.06125, %v506_v5  ;;  %v511_v9 = vmul.f32 -0.06125, %v507_v6  ;;  %v305_v5 = vmax.f32 %v10412_v17, 1e-24 }
 0x1a3   :  { %v516_v10 = vmul.f32 1.442695, %v510_v7  ;;  %v518_v11 = vmul.f32 1.442695, %v511_v9 }
 0x1a5   :  { %9937 = vpow2.f32 %v516_v10  ;;  %v304_v10 = vmax.f32 %v10414_v18, 1e-24 }
 0x1a6   :  { %9939 = vpow2.f32 %v518_v11 }
 0x1a7   :  { %9941 = vrsqrt.f32 %v305_v5  ;;  %v10550_v5 = vpop.permute.xlu1 %9386 }
 0x1a8   :  { %9943 = vrsqrt.f32 %v304_v10 }
 0x1ad   :  { %v9934_v12 = vpop.eup %9933 }
 0x1ae   :  { %v9936_v13 = vpop.eup %9935 }
 0x1af   :  { %v522_v14 = vpack.c.bf16 %v9934_v12, %v9936_v13 }
 0x1b1   :  { %9175 = vmatprep.mubr.msk.bf16.mxu0 %vm528_vm9, %v522_v14 }
 0x1b2   :  { %v9938_v15 = vpop.eup %9937 }
 0x1b3   :  { %v9940_v16 = vpop.eup %9939 }
 0x1b4   :  { %v523_v20 = vpack.c.bf16 %v9940_v16, %v9938_v15 }
 0x1b6   :  { %9176 = vmatmul.mubr.msk.bf16.vlgmr.msra.gmra.mxu0 %vm528_vm9, %v523_v20  ;;  %v306_v20 = vmax.f32 %v10420_v24, 1e-24  ;;  %v9478_v24 = vld [vmem:[#allocation7 + $0x1c0] ss:$36 sps:$4 sm:$0xff]  }
 0x1b7   :  { %9186 = vmatpush3.bf16.msra.mxu0 %v879_v50  ;;  %9187 = vmatprep.mubr.msk.bf16.mxu0 %vm900_vm10, %v9447_v19  ;;  %v9472_v50 = vld [vmem:[#allocation7] ss:$36 sps:$4 sm:$0xff]   ;;  %v307_v19 = vmax.f32 %v10418_v23, 1e-24  ;;  %v10522_v23 = vpop.eup %9941 }
 0x1b8   :  { %1519 = vmatprep.subr.bf16.mxu0 %v9453_v21 }
 0x1b9   :  { %9945 = vrsqrt.f32 %v307_v19 }
 0x1ba   :  { %9947 = vrsqrt.f32 %v306_v20 }
 0x1be   :  { %9188 = vmatmul.mubr.msk.bf16.vlgmr.msra.gmra.mxu0 %vm900_vm10, %v9448_v22 }
 0x1bf   :  { %9191 = vmatprep.mubr.msk.bf16.mxu0 %vm900_vm10, %v9449_v25  ;;  %1520 = vmatpush1.bf16.msra.mxu0 %v9451_v26  ;;  %v9475_v26 = vld [vmem:[#allocation7 + $0x208] ss:$36 sps:$4 sm:$0xff]  }
 0x1c0   :  { %1521 = vmatprep.subr.bf16.mxu0 %v9456_v27 }
 0x1c3   :  { %1522 = vmatpush1.bf16.msra.mxu0 %v9454_v28 }
 0x1c4   :  { %1523 = vmatprep.subr.bf16.mxu0 %v9459_v30  ;;  %v9483_v30 = vld [vmem:[#allocation7 + $0x17c] ss:$36 sps:$4 sm:$0xff]  }
 0x1c6   :  { %9192 = vmatmul.mubr.msk.bf16.gmra.mxu0 %vm900_vm10, %v9450_v29  ;;  %v9480_v29 = vld [vmem:[#allocation7 + $0x1c4] ss:$36 sps:$4 sm:$0xff]  }
 0x1c7   :  { %1524 = vmatpush1.bf16.msra.mxu0 %v9457_v31  ;;  %1551 = vmatprep.mubr.bf16.mxu0 %v11844_v54  ;;  %v10526_v31 = vpop.eup %9943 }
 0x1c8   :  { %1525 = vmatprep.subr.bf16.mxu0 %v9462_v32 }
 0x1cb   :  { %1526 = vmatpush1.bf16.msra.mxu0 %v9460_v33  ;;  %v9481_v33 = vld [vmem:[#allocation7 + $0x178] ss:$36 sps:$4 sm:$0xff]  }
 0x1cc   :  { %1527 = vmatprep.subr.bf16.mxu0 %v9465_v34  ;;  %v9486_v34 = vld [vmem:[#allocation7 + $0x134] ss:$36 sps:$4 sm:$0xff]  }
 0x1cf   :  { %1528 = vmatpush1.bf16.msra.mxu0 %v9463_v35  ;;  %v10534_v35 = vpop.eup %9945 }
 0x1d0   :  { %1529 = vmatprep.subr.bf16.mxu0 %v9468_v39  ;;  %v10538_v38 = vpop.eup %9947  ;;  %v9487_v39 = vld [vmem:[#allocation7 + $0xe8] ss:$36 sps:$4 sm:$0xff]  }
 0x1d3   :  { %1530 = vmatpush1.bf16.msra.mxu0 %v9466_v40  ;;  %v9492_v40 = vld [vmem:[#allocation7 + $0xa4] ss:$36 sps:$4 sm:$0xff]  }
 0x1d4   :  { %1531 = vmatprep.subr.bf16.mxu0 %v9471_v44  ;;  %v9495_v44 = vld [vmem:[#allocation7 + $0x5c] ss:$36 sps:$4 sm:$0xff]  }
 0x1d7   :  { %1532 = vmatpush1.bf16.msra.mxu0 %v9469_v45  ;;  %v9493_v45 = vld [vmem:[#allocation7 + $0x58] ss:$36 sps:$4 sm:$0xff]  }
 0x1d8   :  { %1533 = vmatprep.subr.bf16.mxu0 %v9474_v49  ;;  %v9496_v49 = vld [vmem:[#allocation7 + $0x10] ss:$36 sps:$4 sm:$0xff]  }
 0x1db   :  { %1534 = vmatpush1.bf16.msra.mxu0 %v9472_v50  ;;  %v9499_v50 = vld [vmem:[#allocation7 + $0x218] ss:$36 sps:$4 sm:$0xff]  }
 0x1dc   :  { %1625 = vmatprep.subr.bf16.mxu0 %v9477_v53  ;;  %v9500_v53 = vld [vmem:[#allocation7 + $0x1d0] ss:$36 sps:$4 sm:$0xff]  }
 0x276   :  { %v9177_v58 = vpop.f32.mrf.mxu0 }
 0x277   :  { %v582_v0 = vadd.f32 %v9177_v58, %v527_v59  ;;  %v9503_v58 = vld [vmem:[#allocation7 + $0xf8] ss:$36 sps:$4 sm:$0xff]  }
 0x278   :  { %v573_v60 = vpop.f32.mrf.mxu0 }
 0x279   :  { %v574_v62 = vadd.f32 %v573_v60, %v527_v59  ;;  %v590_v51 = vmax.f32 %v582_v0, 0.0  ;;  %v9505_v60 = vld [vmem:[#allocation7 + $0x68] ss:$36 sps:$4 sm:$0xff]  }
 0x27a   :  { %v9178_v61 = vpop.f32.mrf.mxu0 }
 0x27b   :  { %v585_v63 = vadd.f32 %v9178_v61, %v527_v59  ;;  %v588_v6 = vmax.f32 %v574_v62, 0.0  ;;  %v9506_v61 = vld [vmem:[#allocation7 + $0x20] ss:$36 sps:$4 sm:$0xff]  }
 0x27c   :  { %v576_v1 = vpop.f32.mrf.mxu0  ;;  %v679_v62 = vld [vmem:[#allocation4 + $0x10] sm:$0xff] }
 0x27d   :  { %v577_v2 = vadd.f32 %v576_v1, %v527_v59  ;;  %v591_v3 = vmax.f32 %v585_v63, 0.0  ;;  %v9504_v59 = vld [vmem:[#allocation7 + $0xb0] ss:$36 sps:$4 sm:$0xff]   ;;  %v680_v63 = vld [vmem:[#allocation4 + $0x18] sm:$0xff] }
 0x27e   :  { %v9189_v4 = vpop.f32.mrf.mxu0  ;;  %v1022_v0 = vpack.c.bf16 %v680_v63, %v679_v62  ;;  %v677_v1 = vld [vmem:[#allocation4] sm:$0xff] }
 0x27f   :  { %v589_v7 = vmax.f32 %v577_v2, 0.0  ;;  %v593_v12 = vpack.c.bf16 %v591_v3, %v590_v51  ;;  %v678_v2 = vld [vmem:[#allocation4 + $0x8] sm:$0xff] }
 0x280   :  { %v947_v9 = vpop.f32.mrf.mxu0  ;;  %9195 = vmatprep.subr.bf16.mxu1 %v1022_v0  ;;  %v1021_v3 = vpack.c.bf16 %v678_v2, %v677_v1 }
 0x281   :  { %v592_v11 = vpack.c.bf16 %v589_v7, %v588_v6 }
 0x282   :  { %v9190_v13 = vpop.f32.mrf.mxu0 }
 0x283   :  { %v9395_v14 = vpack.i.bf16 %v9190_v13, %v9189_v4  ;;  %9181 = vmatprep.mubr.msk.bf16.mxu1 %vm528_vm9, %v592_v11  ;;  %v10548_v4 = vpop.permute.xlu0 %9391 }
 0x284   :  { %9182 = vmatmul.mubr.msk.bf16.vlgmr.msra.gmra.mxu1 %vm528_vm9, %v593_v12  ;;  %v950_v15 = vpop.f32.mrf.mxu0 }
 0x285   :  { %v9400_v16 = vpack.i.bf16 %v950_v15, %v947_v9  ;;  %9396 = vrot.lane.b32.xlu0 %v9395_v14, %s10256_s1  ;;  %9196 = vmatpush3.bf16.msra.mxu1 %v1022_v0 }
 0x286   :  { %v9193_v17 = vpop.f32.mrf.mxu0  ;;  %9197 = vmatprep.subr.bf16.mxu1 %v1021_v3 }
 0x287   :  { %9401 = vrot.lane.b32.xlu1 %v9400_v16, %s10256_s1 }
 0x288   :  { %v963_v18 = vpop.f32.mrf.mxu0 }
 0x289   :  { %9198 = vmatpush3.bf16.msra.mxu1 %v1021_v3 }
 0x28a   :  { %v9194_v21 = vpop.f32.mrf.mxu0 }
 0x28b   :  { %v9410_v22 = vpack.i.bf16 %v9194_v21, %v9193_v17  ;;  %v10528_v32 = vpack.c.bf16 %v9194_v21, %v9193_v17 }
 0x28c   :  { %v966_v25 = vpop.f32.mrf.mxu0 }
 0x28d   :  { %v10517_v27 = vpack.c.bf16 %v966_v25, %v963_v18  ;;  %9411 = vrot.lane.b32.xlu0 %v9410_v22, %s10238_s22  ;;  %v9405_v28 = vpack.i.bf16 %v966_v25, %v963_v18 }
 0x28f   :  { %9406 = vrot.lane.b32.xlu1 %v9405_v28, %s10238_s22  ;;  %1552 = vmatmul.mubr.bf16.vlgmr.msra.gmra.mxu0 %v10517_v27 }
 0x290   :  { %1626 = vmatpush1.bf16.msra.mxu0 %v9475_v26  ;;  %1561 = vmatprep.mubr.bf16.mxu0 %v11844_v54 }
 0x291   :  { %322 = vrot.lane.b32.xlu0 %v10522_v23, %s10257_s19  ;;  %1627 = vmatprep.subr.bf16.mxu0 %v9480_v29 }
 0x293   :  { %320 = vrot.lane.b32.xlu1 %v10526_v31, %s10257_s19 }
 0x294   :  { %1628 = vmatpush1.bf16.msra.mxu0 %v9478_v24 }
 0x295   :  { %338 = vrot.lane.b32.xlu0 %v10522_v23, %s10258_s4  ;;  %1629 = vmatprep.subr.bf16.mxu0 %v9483_v30 }
 0x297   :  { %336 = vrot.lane.b32.xlu1 %v10526_v31, %s10258_s4  ;;  %1562 = vmatmul.mubr.bf16.gmra.mxu0 %v10528_v32 }
 0x298   :  { %1630 = vmatpush1.bf16.msra.mxu0 %v9481_v33  ;;  %1657 = vmatprep.mubr.bf16.mxu0 %v11844_v54  ;;  %v10618_v33 = vmul.f32 %v10499_v47, %v10522_v23  ;;  %v10259_v23 = vmov 9  }
 0x299   :  { %326 = vrot.lane.b32.xlu0 %v10534_v35, %s10257_s19  ;;  %1631 = vmatprep.subr.bf16.mxu0 %v9486_v34 }
 0x29b   :  { %324 = vrot.lane.b32.xlu1 %v10538_v38, %s10257_s19 }
 0x29c   :  { %1632 = vmatpush1.bf16.msra.mxu0 %v9484_v36  ;;  %v10625_v36 = vmul.f32 %v10494_v46, %v10526_v31  ;;  %v216_v31 = vld [vmem:[#allocation2 + $0x18] sm:$0xff] }
 0x29d   :  { %342 = vrot.lane.b32.xlu0 %v10534_v35, %s10258_s4  ;;  %1633 = vmatprep.subr.bf16.mxu0 %v9489_v37  ;;  %v353_v37 = vmul.f32 1.7320508, %v10618_v33 }
 0x29f   :  { %340 = vrot.lane.b32.xlu1 %v10538_v38, %s10258_s4 }
 0x2a0   :  { %1634 = vmatpush1.bf16.msra.mxu0 %v9487_v39  ;;  %v352_v39 = vmul.f32 1.7320508, %v10625_v36 }
 0x2a1   :  { %1635 = vmatprep.subr.bf16.mxu0 %v9492_v40 }
 0x2a4   :  { %1636 = vmatpush1.bf16.msra.mxu0 %v9490_v43  ;;  %v10260_v43 = vmov 10  }
 0x2a5   :  { %1637 = vmatprep.subr.bf16.mxu0 %v9495_v44  ;;  %v597_v44 = vrot.slane %v216_v31, %v10506_v56 }
 0x2a8   :  { %1638 = vmatpush1.bf16.msra.mxu0 %v9493_v45  ;;  %v9393_v45 = vunpack.i.l.bf16 %v10548_v4 }
 0x2a9   :  { %1639 = vmatprep.subr.bf16.mxu0 %v9498_v48 }
 0x2ac   :  { %1640 = vmatpush1.bf16.msra.mxu0 %v9496_v49 }
 0x2ad   :  { %9211 = vmatprep.subr.bf16.mxu0 %v9499_v50 }
 0x2af   :  { %1658 = vmatmul.mubr.bf16.vlgmr.msra.gmra.mxu0 %v10517_v27 }
 0x2b0   :  { %9212 = vmatpush3.bf16.msra.mxu0 %v9499_v50  ;;  %1667 = vmatprep.mubr.bf16.mxu0 %v11844_v54 }
 0x2b1   :  { %9213 = vmatprep.subr.bf16.mxu0 %v9500_v53 }
 0x2b4   :  { %9214 = vmatpush3.bf16.msra.mxu0 %v9500_v53 }
 0x2b5   :  { %9215 = vmatprep.subr.bf16.mxu0 %v9501_v55 }
 0x2b7   :  { %1668 = vmatmul.mubr.bf16.gmra.mxu0 %v10528_v32 }
 0x2b8   :  { %9216 = vmatpush3.bf16.msra.mxu0 %v9501_v55  ;;  %9227 = vmatprep.mubr.bf16.mxu0 %v10517_v27 }
 0x2b9   :  { %9217 = vmatprep.subr.bf16.mxu0 %v9502_v57 }
 0x2bc   :  { %9218 = vmatpush3.bf16.msra.mxu0 %v9502_v57  ;;  %v9388_v57 = vunpack.i.l.bf16 %v10550_v5 }
 0x2bd   :  { %9219 = vmatprep.subr.bf16.mxu0 %v9503_v58 }
 0x2c0   :  { %9220 = vmatpush3.bf16.msra.mxu0 %v9503_v58 }
 0x2c1   :  { %9221 = vmatprep.subr.bf16.mxu0 %v9504_v59 }
 0x2c4   :  { %9222 = vmatpush3.bf16.msra.mxu0 %v9504_v59 }
 0x2c5   :  { %9223 = vmatprep.subr.bf16.mxu0 %v9505_v60 }
 0x2c8   :  { %9224 = vmatpush3.bf16.msra.mxu0 %v9505_v60  ;;  %v9394_v60 = vunpack.i.h.bf16 %v10548_v4 }
 0x2c9   :  { %9225 = vmatprep.subr.bf16.mxu0 %v9506_v61 }
 0x2cc   :  { %9226 = vmatpush3.bf16.msra.mxu0 %v9506_v61 }
 0x2cf   :  { %9228 = vmatmul.mubr.bf16.vlgmr.msra.gmra.mxu0 %v10528_v32 }
 0x2f7   :  { %v10552_v6 = vpop.permute.xlu0 %9396 }
 0x2f8   :  { %v9398_v53 = vunpack.i.l.bf16 %v10552_v6 }
 0x2f9   :  { %v10554_v7 = vpop.permute.xlu1 %9401 }
 0x2fa   :  { %v9403_v61 = vunpack.i.l.bf16 %v10554_v7 }
 0x2ff   :  { %v10556_v51 = vpop.permute.xlu0 %9411 }
 0x300   :  { %v9413_v49 = vunpack.i.l.bf16 %v10556_v51 }
 0x301   :  { %v10558_v9 = vpop.permute.xlu1 %9406 }
 0x302   :  { %v9408_v0 = vunpack.i.l.bf16 %v10558_v9 }
 0x303   :  { %v323_v10 = vpop.permute.xlu0 %322 }
 0x304   :  { %v10561_v11 = vmul.f32 %v10499_v47, %v323_v10  ;;  %v9389_v10 = vunpack.i.h.bf16 %v10550_v5  ;;  %v9409_v5 = vunpack.i.h.bf16 %v10558_v9 }
 0x305   :  { %v321_v12 = vpop.permute.xlu1 %320 }
 0x306   :  { %v10564_v13 = vmul.f32 %v10494_v46, %v321_v12  ;;  %374 = vrot.lane.b32.xlu0 %v10561_v11, %s10252_s17  ;;  %v449_v18 = vmul.f32 %v10561_v11, %v10561_v11  ;;  %v9399_v12 = vunpack.i.h.bf16 %v10552_v6 }
 0x307   :  { %v339_v14 = vpop.permute.xlu0 %338 }
 0x308   :  { %v10569_v15 = vmul.f32 %v10499_v47, %v339_v14  ;;  %372 = vrot.lane.b32.xlu1 %v10564_v13, %s10252_s17  ;;  %v448_v21 = vmul.f32 %v10564_v13, %v10564_v13  ;;  %v356_v47 = vmul.f32 1.7320508, %v10564_v13 }
 0x309   :  { %v337_v16 = vpop.permute.xlu1 %336 }
 0x30a   :  { %v10574_v17 = vmul.f32 %v10494_v46, %v337_v16  ;;  %398 = vrot.lane.b32.xlu0 %v10569_v15, %s10252_s17  ;;  %v361_v46 = vmul.f32 1.7320508, %v10569_v15  ;;  %v9414_v16 = vunpack.i.h.bf16 %v10556_v51 }
 0x30b   :  { %v327_v19 = vpop.permute.xlu0 %326 }
 0x30c   :  { %396 = vrot.lane.b32.xlu1 %v10574_v17, %s10252_s17  ;;  %v10590_v22 = vmul.f32 %v10486_v42, %v327_v19  ;;  %v360_v40 = vmul.f32 1.7320508, %v10574_v17 }
 0x30d   :  { %v325_v20 = vpop.permute.xlu1 %324 }
 0x30e   :  { %430 = vrot.lane.b32.xlu0 %v10569_v15, %s10254_s6  ;;  %v10594_v26 = vmul.f32 %v10481_v41, %v325_v20  ;;  %v451_v30 = vmul.f32 %v10590_v22, %v10590_v22 }
 0x30f   :  { %v343_v25 = vpop.permute.xlu0 %342 }
 0x310   :  { %428 = vrot.lane.b32.xlu1 %v10574_v17, %s10254_s6  ;;  %v10599_v29 = vmul.f32 %v10486_v42, %v343_v25  ;;  %v450_v34 = vmul.f32 %v10594_v26, %v10594_v26 }
 0x311   :  { %v341_v28 = vpop.permute.xlu1 %340 }
 0x312   :  { %458 = vrot.lane.b32.xlu0 %v449_v18, %s10252_s17  ;;  %v10604_v24 = vmul.f32 %v10481_v41, %v341_v28 }
 0x314   :  { %456 = vrot.lane.b32.xlu1 %v448_v21, %s10252_s17  ;;  %v9404_v21 = vunpack.i.h.bf16 %v10554_v7  ;;  %v365_v7 = vmul.f32 3.8729835, %v10618_v33 }
 0x316   :  { %378 = vrot.lane.b32.xlu0 %v10590_v22, %s10252_s17 }
 0x318   :  { %376 = vrot.lane.b32.xlu1 %v10594_v26, %s10252_s17 }
 0x31a   :  { %402 = vrot.lane.b32.xlu0 %v10599_v29, %s10252_s17 }
 0x31c   :  { %400 = vrot.lane.b32.xlu1 %v10604_v24, %s10252_s17 }
 0x31e   :  { %434 = vrot.lane.b32.xlu0 %v10599_v29, %s10254_s6 }
 0x320   :  { %432 = vrot.lane.b32.xlu1 %v10604_v24, %s10254_s6 }
 0x322   :  { %462 = vrot.lane.b32.xlu0 %v451_v30, %s10252_s17 }
 0x324   :  { %460 = vrot.lane.b32.xlu1 %v450_v34, %s10252_s17 }
 0x326   :  { %1787 = vperm.xlu0 %9383, %v353_v37  }
 0x328   :  { %1782 = vperm.xlu1 %9384, %v352_v39  }
 0x32c   :  { %9415 = vset.pattern.permute.xlu1 %v10259_v23 }
 0x32d   :  { %1810 = vperm.xlu1 %9415, %v356_v47   ;;  %v364_v47 = vmul.f32 3.8729835, %v10625_v36 }
 0x331   :  { %9416 = vset.pattern.permute.xlu1 %v10260_v43 }
 0x332   :  { %1838 = vperm.xlu1 %9416, %v360_v40   ;;  %v10679_v40 = vmul.f32 %v10481_v41, %v10538_v38 }
 0x336   :  { %1843 = vperm.xlu1 %9416, %v361_v46  }
 0x33a   :  { %9417 = vset.pattern.permute.xlu1 %v10253_v8 }
 0x344   :  { %v9183_v48 = vpop.f32.mrf.mxu1 }
 0x345   :  { %v650_v50 = vadd.f32 %v9183_v48, %v597_v44  ;;  %v354_v48 = vmul.f32 1.7320508, %v10679_v40 }
 0x346   :  { %v641_v55 = vpop.f32.mrf.mxu1 }
 0x347   :  { %v10642_v58 = vsel %vm528_vm9, %v650_v50, %v9393_v45  ;;  %v642_v59 = vadd.f32 %v641_v55, %v597_v44 }
 0x348   :  { %v1012_v62 = vsel %vm900_vm10, %v10642_v58, %v9398_v53  ;;  %v9184_v63 = vpop.f32.mrf.mxu1  ;;  %v388_v53 = vmul.f32 3.8729835, %v10564_v13 }
 0x349   :  { %v1017_v1 = vsel %vm1014_vm11, %v1012_v62, %v9413_v49  ;;  %v10651_v2 = vsel %vm528_vm9, %v642_v59, %v9388_v57  ;;  %v653_v3 = vadd.f32 %v9184_v63, %v597_v44  ;;  %v359_v63 = vmul.f32 1.7320508, %v10590_v22 }
 0x34a   :  { %v1010_v4 = vsel %vm900_vm10, %v10651_v2, %v9403_v61  ;;  %v644_v14 = vpop.f32.mrf.mxu1 }
 0x34b   :  { %v10659_v19 = vsel %vm528_vm9, %v653_v3, %v9394_v60  ;;  %v645_v18 = vadd.f32 %v644_v14, %v597_v44  ;;  %v1015_v20 = vsel %vm1014_vm11, %v1010_v4, %v9408_v0  ;;  %v10683_v44 = vmul.f32 %v10486_v42, %v10534_v35 }
 0x34c   :  { %v1013_v25 = vsel %vm900_vm10, %v10659_v19, %v9399_v12  ;;  %v413_v42 = vmul.f32 3.0, %v10569_v15  ;;  %v444_v35 = vmul.f32 %v10625_v36, %v10625_v36  ;;  %v358_v60 = vmul.f32 1.7320508, %v10594_v26 }
 0x34d   :  { %v1018_v6 = vsel %vm1014_vm11, %v1013_v25, %v9414_v16  ;;  %v10668_v28 = vsel %vm528_vm9, %v645_v18, %v9389_v10  ;;  %v355_v50 = vmul.f32 1.7320508, %v10683_v44  ;;  %v357_v3 = vmul.f32 1.7320508, %v10561_v11  ;;  %v685_v25 = vld [vmem:[#allocation6 + $0x18] sm:$0xff] }
 0x34e   :  { %v1020_v30 = vpack.c.bf16 %v1018_v6, %v1017_v1  ;;  %v1011_v51 = vsel %vm900_vm10, %v10668_v28, %v9404_v21  ;;  %v417_v13 = vmul.f32 %v413_v42, %v10569_v15  ;;  %v412_v36 = vmul.f32 3.0, %v10574_v17  ;;  %v684_v21 = vld [vmem:[#allocation6 + $0x10] sm:$0xff] }
 0x34f   :  { %v1016_v34 = vsel %vm1014_vm11, %v1011_v51, %v9409_v5  ;;  %v389_v12 = vmul.f32 3.8729835, %v10561_v11  ;;  %v362_v14 = vmul.f32 1.7320508, %v10604_v24  ;;  %v390_v18 = vmul.f32 3.8729835, %v10594_v26 }
 0x350   :  { %v1019_v37 = vpack.c.bf16 %v1016_v34, %v1015_v20  ;;  %v8239_v0 = vadd.f32 -1.0, %v417_v13  ;;  %v416_v16 = vmul.f32 %v412_v36, %v10574_v17  ;;  %v415_v11 = vmul.f32 3.0, %v10599_v29  ;;  %v682_v17 = vld [vmem:[#allocation6] sm:$0xff]  ;;  %v683_v26 = vld [vmem:[#allocation6 + $0x8] sm:$0xff] }
 0x351   :  { %v366_v34 = vmul.f32 3.8729835, %v10679_v40  ;;  %v9562_v36 = vld [vmem:[#allocation9 + $0x98] ss:$12 sps:$4 sm:$0xff]  }
 0x352   :  { %9199 = vmatprep.mubr.msk.bf16.mxu1 %vm223_vm12, %v1019_v37  ;;  %v425_v10 = vmul.f32 1.118034, %v8239_v0  ;;  %v8238_v6 = vadd.f32 -1.0, %v416_v16 }
 0x353   :  { %9200 = vmatmul.mubr.msk.bf16.vlgmr.msra.gmra.mxu1 %vm223_vm12, %v1020_v30  ;;  %v1087_v30 = vpack.c.bf16 %v685_v25, %v684_v21 }
 0x355   :  { %9203 = vmatprep.subr.bf16.mxu1 %v1087_v30 }
 0x356   :  { %9204 = vmatpush3.bf16.msra.mxu1 %v1087_v30 }
 0x378   :  { %v375_v9 = vpop.permute.xlu0 %374 }
 0x379   :  { %v385_v39 = vmul.f32 %v375_v9, %v365_v7  ;;  %v419_v9 = vmul.f32 %v415_v11, %v10599_v29 }
 0x37a   :  { %v373_v46 = vpop.permute.xlu1 %372 }
 0x37b   :  { %v384_v31 = vmul.f32 %v373_v46, %v364_v47  ;;  %1871 = vperm.xlu1 %9417, %v385_v39   ;;  %v1086_v39 = vpack.c.bf16 %v683_v26, %v682_v17  ;;  %v9512_v26 = vld [vmem:[#allocation7 + $0x1bc] ss:$36 sps:$4 sm:$0xff]  }
 0x37c   :  { %v399_v45 = vpop.permute.xlu0 %398 }
 0x37d   :  { %1866 = vperm.xlu0 %9383, %v384_v31   ;;  %v409_v15 = vmul.f32 %v399_v45, %v389_v12  ;;  %9205 = vmatprep.subr.bf16.mxu1 %v1086_v39  ;;  %v367_v45 = vmul.f32 3.8729835, %v10683_v44  ;;  %v9570_v12 = vld [vmem:[#allocation9 + $0x68] ss:$12 sps:$4 sm:$0xff]  }
 0x37e   :  { %v397_v49 = vpop.permute.xlu1 %396  ;;  %9206 = vmatpush3.bf16.msra.mxu1 %v1086_v39  ;;  %v9518_v39 = vld [vmem:[#allocation7 + $0x12c] ss:$36 sps:$4 sm:$0xff]  }
 0x37f   :  { %1792 = vperm.xlu1 %9417, %v354_v48   ;;  %v408_v41 = vmul.f32 %v397_v49, %v388_v53  ;;  %v363_v48 = vmul.f32 1.7320508, %v10599_v29  ;;  %v8241_v49 = vadd.f32 -1.0, %v419_v9  ;;  %v9513_v9 = vld [vmem:[#allocation7 + $0x170] ss:$36 sps:$4 sm:$0xff]  }
 0x380   :  { %v431_v55 = vpop.permute.xlu0 %430 }
 0x381   :  { %1797 = vperm.xlu0 %9383, %v355_v50   ;;  %v441_v57 = vmul.f32 %v431_v55, %v365_v7  ;;  %v424_v7 = vmul.f32 1.118034, %v8238_v6  ;;  %v9509_v50 = vld [vmem:[#allocation7 + $0x204] ss:$36 sps:$4 sm:$0xff]  }
 0x382   :  { %v429_v38 = vpop.permute.xlu1 %428  ;;  %1572 = vmatprep.subr.bf16.mxu1 %v9509_v50  ;;  %v9525_v50 = vld [vmem:[#allocation7 + $0x50] ss:$36 sps:$4 sm:$0xff]  }
 0x383   :  { %9418 = vset.pattern.permute.xlu1 %v10259_v23  ;;  %v440_v51 = vmul.f32 %v429_v38, %v364_v47  ;;  %v445_v47 = vmul.f32 %v10618_v33, %v10618_v33  ;;  %v446_v38 = vmul.f32 %v10679_v40, %v10679_v40  ;;  %v427_v33 = vmul.f32 1.118034, %v8241_v49  ;;  %v9527_v49 = vld [vmem:[#allocation7 + $0x54] ss:$36 sps:$4 sm:$0xff]  }
 0x384   :  { %1894 = vperm.xlu1 %9418, %v408_v41   ;;  %v459_v5 = vpop.permute.xlu0 %458 }
 0x385   :  { %1955 = vperm.xlu0 %9383, %v441_v57   ;;  %v469_v53 = vsub.f32 %v445_v47, %v459_v5  ;;  %v414_v57 = vmul.f32 3.0, %v10604_v24  ;;  %v9519_v47 = vld [vmem:[#allocation7 + $0xe0] ss:$36 sps:$4 sm:$0xff]  }
 0x386   :  { %v457_v59 = vpop.permute.xlu1 %456 }
 0x387   :  { %v468_v61 = vsub.f32 %v444_v35, %v457_v59  ;;  %v473_v42 = vmul.f32 1.9364917, %v469_v53  ;;  %v418_v29 = vmul.f32 %v414_v57, %v10604_v24  ;;  %v9530_v53 = vld [vmem:[#allocation7 + $0xc] ss:$36 sps:$4 sm:$0xff]  }
 0x388   :  { %1820 = vperm.xlu1 %9418, %v358_v60   ;;  %v379_v31 = vpop.permute.xlu0 %378  ;;  %v391_v60 = vmul.f32 3.8729835, %v10590_v22  ;;  %v447_v22 = vmul.f32 %v10683_v44, %v10683_v44  ;;  %v9536_v57 = vld [vmem:[#allocation7 + $0x1cc] ss:$36 sps:$4 sm:$0xff]  }
 0x389   :  { %v472_v62 = vmul.f32 1.9364917, %v468_v61  ;;  %v387_v55 = vmul.f32 %v379_v31, %v367_v45  ;;  %v8240_v40 = vadd.f32 -1.0, %v418_v29  ;;  %v9521_v31 = vld [vmem:[#allocation7 + $0xe4] ss:$36 sps:$4 sm:$0xff]  }
 0x38a   :  { %v377_v1 = vpop.permute.xlu1 %376  ;;  %v9540_v29 = vld [vmem:[#allocation7 + $0x138] ss:$36 sps:$4 sm:$0xff]  }
 0x38b   :  { %1978 = vperm.xlu0 %9383, %v472_v62   ;;  %v386_v46 = vmul.f32 %v377_v1, %v366_v34 }
 0x38c   :  { %1825 = vperm.xlu1 %9418, %v359_v63   ;;  %v403_v59 = vpop.permute.xlu0 %402  ;;  %v426_v63 = vmul.f32 1.118034, %v8240_v40  ;;  %v9546_v40 = vld [vmem:[#allocation7 + $0xa8] ss:$36 sps:$4 sm:$0xff]  }
 0x38d   :  { %v411_v13 = vmul.f32 %v403_v59, %v391_v60  ;;  %v9542_v59 = vld [vmem:[#allocation7 + $0x13c] ss:$36 sps:$4 sm:$0xff]   ;;  %v9545_v60 = vld [vmem:[#allocation7 + $0xf4] ss:$36 sps:$4 sm:$0xff]  }
 0x38e   :  { %v401_v4 = vpop.permute.xlu1 %400 }
 0x38f   :  { %9421 = vset.pattern.permute.xlu0 %v10259_v23  ;;  %v410_v20 = vmul.f32 %v401_v4, %v390_v18  ;;  %v8254_v4 = vld [vmem:[#allocation4 + $0x20] ss:$0 sm:$0xff] }
 0x390   :  { %9419 = vset.pattern.permute.xlu1 %v10260_v43  ;;  %1815 = vperm.xlu0 %9421, %v357_v3   ;;  %v435_v62 = vpop.permute.xlu0 %434 }
 0x391   :  { %1927 = vperm.xlu1 %9419, %v425_v10   ;;  %v443_v24 = vmul.f32 %v435_v62, %v367_v45  ;;  %v9558_v10 = vld [vmem:[#allocation9 + $0xb0] ss:$12 sps:$4 sm:$0xff]   ;;  %v9551_v62 = vld [vmem:[#allocation7 + $0x64] ss:$36 sps:$4 sm:$0xff]  }
 0x392   :  { %v433_v37 = vpop.permute.xlu1 %432  ;;  %9231 = vmatprep.subr.bf16.mxu0 %v9558_v10  ;;  %v9524_v45 = vld [vmem:[#allocation7 + $0x9c] ss:$36 sps:$4 sm:$0xff]  }
 0x393   :  { %v442_v0 = vmul.f32 %v433_v37, %v366_v34  ;;  %9232 = vmatpush3.bf16.msra.mxu0 %v9558_v10  ;;  %v9507_v34 = vld [vmem:[#allocation7 + $0x200] ss:$36 sps:$4 sm:$0xff]   ;;  %v9510_v37 = vld [vmem:[#allocation7 + $0x1b8] ss:$36 sps:$4 sm:$0xff]  }
 0x394   :  { %1899 = vperm.xlu0 %9421, %v409_v15   ;;  %v463_v1 = vpop.permute.xlu0 %462  ;;  %9233 = vmatprep.subr.bf16.mxu0 %v9562_v36  ;;  %v9559_v10 = vld [vmem:[#allocation9 + $0x90] ss:$12 sps:$4 sm:$0xff]  }
 0x395   :  { %1848 = vperm.xlu1 %9419, %v362_v14   ;;  %v471_v3 = vsub.f32 %v447_v22, %v463_v1  ;;  %v9552_v1 = vld [vmem:[#allocation7 + $0x18] ss:$36 sps:$4 sm:$0xff]  }
 0x396   :  { %v461_v41 = vpop.permute.xlu1 %460  ;;  %v9557_v22 = vld [vmem:[#allocation9 + $0xac] ss:$12 sps:$4 sm:$0xff]  }
 0x397   :  { %v470_v35 = vsub.f32 %v446_v38, %v461_v41  ;;  %9234 = vmatpush3.bf16.msra.mxu0 %v9562_v36  ;;  %v9533_v41 = vld [vmem:[#allocation7 + $0x214] ss:$36 sps:$4 sm:$0xff]   ;;  %v9565_v36 = vld [vmem:[#allocation9 + $0x7c] ss:$12 sps:$4 sm:$0xff]  }
 0x398   :  { %1904 = vperm.xlu0 %9421, %v410_v20   ;;  %v9531_v38 = vld [vmem:[#allocation7 + $0x210] ss:$36 sps:$4 sm:$0xff]  }
 0x399   :  { %9420 = vset.pattern.permute.xlu1 %v10253_v8  ;;  %v474_v61 = vmul.f32 1.9364917, %v470_v35  ;;  %v9537_v35 = vld [vmem:[#allocation7 + $0x180] ss:$36 sps:$4 sm:$0xff]  }
 0x39a   :  { %1950 = vperm.xlu1 %9420, %v440_v51  }
 0x39c   :  { %9422 = vset.pattern.permute.xlu0 %v10260_v43 }
 0x39d   :  { %1922 = vperm.xlu0 %9422, %v424_v7   ;;  %v9515_v7 = vld [vmem:[#allocation7 + $0x174] ss:$36 sps:$4 sm:$0xff]  }
 0x39e   :  { %1876 = vperm.xlu1 %9420, %v386_v46   ;;  %v9516_v46 = vld [vmem:[#allocation7 + $0x128] ss:$36 sps:$4 sm:$0xff]  }
 0x3a1   :  { %1853 = vperm.xlu0 %9422, %v363_v48   ;;  %v9522_v48 = vld [vmem:[#allocation7 + $0x98] ss:$36 sps:$4 sm:$0xff]  }
 0x3a2   :  { %1881 = vperm.xlu1 %9420, %v387_v55   ;;  %v9528_v55 = vld [vmem:[#allocation7 + $0x8] ss:$36 sps:$4 sm:$0xff]  }
 0x3a5   :  { %1937 = vperm.xlu0 %9422, %v427_v33   ;;  %v9534_v33 = vld [vmem:[#allocation7 + $0x1c8] ss:$36 sps:$4 sm:$0xff]  }
 0x3a6   :  { %1983 = vperm.xlu1 %9420, %v473_v42   ;;  %v9539_v42 = vld [vmem:[#allocation7 + $0x184] ss:$36 sps:$4 sm:$0xff]  }
 0x3a9   :  { %9426 = vset.pattern.permute.xlu0 %v10253_v8 }
 0x3aa   :  { %9423 = vset.pattern.permute.xlu1 %v10259_v23  ;;  %1988 = vperm.xlu0 %9426, %v474_v61   ;;  %v475_v23 = vmul.f32 1.9364917, %v471_v3  ;;  %v9543_v61 = vld [vmem:[#allocation7 + $0xf0] ss:$36 sps:$4 sm:$0xff]  }
 0x3ab   :  { %1909 = vperm.xlu1 %9423, %v411_v13   ;;  %v9548_v13 = vld [vmem:[#allocation7 + $0xac] ss:$36 sps:$4 sm:$0xff]   ;;  %v9561_v3 = vld [vmem:[#allocation9 + $0x94] ss:$12 sps:$4 sm:$0xff]  }
 0x3af   :  { %9424 = vset.pattern.permute.xlu1 %v10260_v43  ;;  %v9566_v43 = vld [vmem:[#allocation9 + $0x80] ss:$12 sps:$4 sm:$0xff]  }
 0x3b0   :  { %1932 = vperm.xlu1 %9424, %v426_v63   ;;  %9235 = vmatprep.subr.bf16.mxu0 %v9566_v43  ;;  %v9549_v63 = vld [vmem:[#allocation7 + $0x60] ss:$36 sps:$4 sm:$0xff]  }
 0x3b1   :  { %9236 = vmatpush3.bf16.msra.mxu0 %v9566_v43  ;;  %v9582_v43 = vld [vmem:[#allocation9 + $0x20] ss:$12 sps:$4 sm:$0xff]  }
 0x3b2   :  { %9237 = vmatprep.subr.bf16.mxu0 %v9570_v12 }
 0x3b4   :  { %9425 = vset.pattern.permute.xlu1 %v10253_v8  ;;  %v9574_v8 = vld [vmem:[#allocation9 + $0x50] ss:$12 sps:$4 sm:$0xff]  }
 0x3b5   :  { %1960 = vperm.xlu1 %9425, %v442_v0   ;;  %9238 = vmatpush3.bf16.msra.mxu0 %v9570_v12  ;;  %v9554_v0 = vld [vmem:[#allocation7 + $0x1c] ss:$36 sps:$4 sm:$0xff]   ;;  %v9563_v12 = vld [vmem:[#allocation9 + $0x78] ss:$12 sps:$4 sm:$0xff]  }
 0x3b6   :  { %9239 = vmatprep.subr.bf16.mxu0 %v9574_v8 }
 0x3b9   :  { %1965 = vperm.xlu1 %9425, %v443_v24   ;;  %9240 = vmatpush3.bf16.msra.mxu0 %v9574_v8  ;;  %v9555_v24 = vld [vmem:[#allocation9 + $0xa8] ss:$12 sps:$4 sm:$0xff]   ;;  %v9569_v8 = vld [vmem:[#allocation9 + $0x64] ss:$12 sps:$4 sm:$0xff]  }
 0x3bd   :  { %1993 = vperm.xlu1 %9425, %v475_v23   ;;  %v9578_v23 = vld [vmem:[#allocation9 + $0x38] ss:$12 sps:$4 sm:$0xff]  }
 0x3be   :  { %9241 = vmatprep.subr.bf16.mxu0 %v9578_v23 }
 0x3bf   :  { %9242 = vmatpush3.bf16.msra.mxu0 %v9578_v23  ;;  %v9597_v23 = vld [vmem:[#allocation9 + $0x120] ss:$12 sps:$4 sm:$0xff]  }
 0x3c0   :  { %9243 = vmatprep.subr.bf16.mxu0 %v9582_v43 }
 0x3c3   :  { %9244 = vmatpush3.bf16.msra.mxu0 %v9582_v43 }
 0x413   :  { %v9201_v44 = vpop.f32.mrf.mxu1 }
 0x414   :  { %v1076_v20 = vadd.f32 %v9201_v44, %v8254_v4  ;;  %v9586_v44 = vld [vmem:[#allocation9 + $0x8] ss:$12 sps:$4 sm:$0xff]  }
 0x415   :  { %v1067_v15 = vpop.f32.mrf.mxu1  ;;  %9245 = vmatprep.subr.bf16.mxu0 %v9586_v44 }
 0x416   :  { %v1068_v16 = vadd.f32 %v8254_v4, %v1067_v15  ;;  %v1084_v30 = vmax.f32 %v1076_v20, 0.0  ;;  %v9573_v15 = vld [vmem:[#allocation9 + $0x4c] ss:$12 sps:$4 sm:$0xff]   ;;  %9246 = vmatpush3.bf16.msra.mxu0 %v9586_v44  ;;  %v9601_v44 = vld [vmem:[#allocation9 + $0x108] ss:$12 sps:$4 sm:$0xff]  }
 0x417   :  { %v9202_v14 = vpop.f32.mrf.mxu1  ;;  %v9579_v20 = vld [vmem:[#allocation9 + $0x18] ss:$12 sps:$4 sm:$0xff]  }
 0x418   :  { %v1079_v18 = vadd.f32 %v9202_v14, %v8254_v4  ;;  %v1082_v6 = vmax.f32 %v1068_v16, 0.0  ;;  %v9577_v14 = vld [vmem:[#allocation9 + $0x34] ss:$12 sps:$4 sm:$0xff]   ;;  %v9575_v16 = vld [vmem:[#allocation9 + $0x30] ss:$12 sps:$4 sm:$0xff]  }
 0x419   :  { %v1070_v21 = vpop.f32.mrf.mxu1 }
 0x41a   :  { %v1071_v25 = vadd.f32 %v8254_v4, %v1070_v21  ;;  %v1085_v5 = vmax.f32 %v1079_v18, 0.0  ;;  %v9571_v4 = vld [vmem:[#allocation9 + $0x48] ss:$12 sps:$4 sm:$0xff]   ;;  %v9583_v21 = vld [vmem:[#allocation9] ss:$12 sps:$4 sm:$0xff]  }
 0x41b   :  { %v9581_v18 = vld [vmem:[#allocation9 + $0x1c] ss:$12 sps:$4 sm:$0xff]  }
 0x41c   :  { %v1083_v11 = vmax.f32 %v1071_v25, 0.0  ;;  %v1089_v17 = vpack.c.bf16 %v1085_v5, %v1084_v30  ;;  %v9589_v25 = vld [vmem:[#allocation9 + $0x16c] ss:$12 sps:$4 sm:$0xff]   ;;  %v9596_v5 = vld [vmem:[#allocation9 + $0x170] ss:$12 sps:$4 sm:$0xff]  }
 0x41d   :  { %9251 = vmatprep.subr.bf16.mxu0 %v9596_v5 }
 0x41e   :  { %v1088_v51 = vpack.c.bf16 %v1083_v11, %v1082_v6  ;;  %v10734_v6 = vpop.permute.xlu1 %1782 }
 0x420   :  { %9207 = vmatprep.mubr.msk.bf16.mxu1 %vm223_vm12, %v1088_v51 }
 0x421   :  { %9208 = vmatmul.mubr.msk.bf16.vlgmr.msra.gmra.mxu1 %vm223_vm12, %v1089_v17 }
 0x422   :  { %1573 = vmatpush1.bf16.msra.mxu1 %v9507_v34  ;;  %1604 = vmatprep.mubr.bf16.mxu1 %v11844_v54  ;;  %v10736_v11 = vpop.permute.xlu1 %1810 }
 0x423   :  { %1574 = vmatprep.subr.bf16.mxu1 %v9512_v26  ;;  %v10746_v26 = vpop.f32.mrf.mxu0 }
 0x426   :  { %1575 = vmatpush1.bf16.msra.mxu1 %v9510_v37  ;;  %v10738_v30 = vpop.permute.xlu1 %1838  ;;  %v10748_v37 = vpop.f32.mrf.mxu0 }
 0x427   :  { %1576 = vmatprep.subr.bf16.mxu1 %v9515_v7 }
 0x42a   :  { %1577 = vmatpush1.bf16.msra.mxu1 %v9513_v9  ;;  %v10740_v51 = vpop.permute.xlu1 %1843 }
 0x42b   :  { %1578 = vmatprep.subr.bf16.mxu1 %v9518_v39 }
 0x42e   :  { %1579 = vmatpush1.bf16.msra.mxu1 %v9516_v46  ;;  %v10742_v34 = vpop.permute.xlu1 %1871  ;;  %v10752_v46 = vpop.f32.mrf.mxu0 }
 0x42f   :  { %1580 = vmatprep.subr.bf16.mxu1 %v9521_v31 }
 0x432   :  { %1581 = vmatpush1.bf16.msra.mxu1 %v9519_v47  ;;  %v10744_v17 = vpop.permute.xlu1 %1792  ;;  %v8257_v47 = vld [vmem:[#allocation6 + $0x20] ss:$0 sm:$0xff] }
 0x433   :  { %1582 = vmatprep.subr.bf16.mxu1 %v9524_v45 }
 0x436   :  { %1583 = vmatpush1.bf16.msra.mxu1 %v9522_v48  ;;  %v10750_v7 = vpop.permute.xlu1 %1894 }
 0x437   :  { %1584 = vmatprep.subr.bf16.mxu1 %v9527_v49  ;;  %11910 = vst [vmem:[#allocation27_spill] sm:$0xff] %v10750_v7 }
 0x43a   :  { %1585 = vmatpush1.bf16.msra.mxu1 %v9525_v50  ;;  %v10754_v45 = vpop.permute.xlu1 %1820  ;;  %v10756_v50 = vpop.f32.mrf.mxu0 }
 0x43b   :  { %1586 = vmatprep.subr.bf16.mxu1 %v9530_v53 }
 0x43e   :  { %1587 = vmatpush1.bf16.msra.mxu1 %v9528_v55 }
 0x43f   :  { %1678 = vmatprep.subr.bf16.mxu1 %v9533_v41 }
 0x441   :  { %1605 = vmatmul.mubr.bf16.vlgmr.msra.gmra.mxu1 %v10517_v27 }
 0x442   :  { %1679 = vmatpush1.bf16.msra.mxu1 %v9531_v38  ;;  %1614 = vmatprep.mubr.bf16.mxu1 %v11844_v54 }
 0x443   :  { %1680 = vmatprep.subr.bf16.mxu1 %v9536_v57  ;;  %v9587_v57 = vld [vmem:[#allocation9 + $0x168] ss:$12 sps:$4 sm:$0xff]  }
 0x446   :  { %1681 = vmatpush1.bf16.msra.mxu1 %v9534_v33 }
 0x447   :  { %1682 = vmatprep.subr.bf16.mxu1 %v9539_v42  ;;  %v9592_v42 = vld [vmem:[#allocation9 + $0x154] ss:$12 sps:$4 sm:$0xff]  }
 0x449   :  { %1615 = vmatmul.mubr.bf16.gmra.mxu1 %v10528_v32 }
 0x44a   :  { %1683 = vmatpush1.bf16.msra.mxu1 %v9537_v35  ;;  %1710 = vmatprep.mubr.bf16.mxu1 %v11844_v54  ;;  %v9600_v35 = vld [vmem:[#allocation9 + $0x158] ss:$12 sps:$4 sm:$0xff]  }
 0x44b   :  { %1684 = vmatprep.subr.bf16.mxu1 %v9542_v59  ;;  %v10758_v59 = vpop.f32.mrf.mxu0 }
 0x44e   :  { %1685 = vmatpush1.bf16.msra.mxu1 %v9540_v29  ;;  %v10760_v29 = vpop.permute.xlu1 %1825 }
 0x44f   :  { %1686 = vmatprep.subr.bf16.mxu1 %v9545_v60  ;;  %11911 = vst [vmem:[#allocation28_spill] sm:$0xff] %v10760_v29  ;;  %v9590_v60 = vld [vmem:[#allocation9 + $0x150] ss:$12 sps:$4 sm:$0xff]  }
 0x452   :  { %1687 = vmatpush1.bf16.msra.mxu1 %v9543_v61  ;;  %v10763_v61 = vpop.permute.xlu0 %1787 }
 0x453   :  { %1688 = vmatprep.subr.bf16.mxu1 %v9548_v13  ;;  %v9595_v13 = vld [vmem:[#allocation9 + $0x13c] ss:$12 sps:$4 sm:$0xff]  }
 0x456   :  { %1689 = vmatpush1.bf16.msra.mxu1 %v9546_v40  ;;  %v9604_v40 = vld [vmem:[#allocation9 + $0x140] ss:$12 sps:$4 sm:$0xff]  }
 0x457   :  { %1690 = vmatprep.subr.bf16.mxu1 %v9551_v62  ;;  %v10765_v62 = vpop.f32.mrf.mxu0 }
 0x45a   :  { %1691 = vmatpush1.bf16.msra.mxu1 %v9549_v63  ;;  %v9593_v63 = vld [vmem:[#allocation9 + $0x138] ss:$12 sps:$4 sm:$0xff]  }
 0x45b   :  { %1692 = vmatprep.subr.bf16.mxu1 %v9554_v0  ;;  %v10767_v0 = vpop.permute.xlu0 %1866 }
 0x45e   :  { %1693 = vmatpush1.bf16.msra.mxu1 %v9552_v1  ;;  %v10769_v1 = vpop.permute.xlu1 %1927 }
 0x45f   :  { %2134 = vmatprep.subr.bf16.mxu1 %v9557_v22  ;;  %11912 = vst [vmem:[#allocation29_spill] sm:$0xff] %v10769_v1  ;;  %v9599_v22 = vld [vmem:[#allocation9 + $0x124] ss:$12 sps:$4 sm:$0xff]  }
 0x461   :  { %1711 = vmatmul.mubr.bf16.vlgmr.msra.gmra.mxu1 %v10517_v27  ;;  %v9567_v27 = vld [vmem:[#allocation9 + $0x60] ss:$12 sps:$4 sm:$0xff]  }
 0x462   :  { %1720 = vmatprep.mubr.bf16.mxu1 %v11844_v54  ;;  %2135 = vmatpush1.bf16.msra.mxu1 %v9555_v24  ;;  %v9608_v24 = vld [vmem:[#allocation9 + $0x128] ss:$12 sps:$4 sm:$0xff]  }
 0x463   :  { %2136 = vmatprep.subr.bf16.mxu1 %v9561_v3  ;;  %v10771_v3 = vpop.f32.mrf.mxu0 }
 0x465   :  { %v10774_v43 = vpop.f32.mrf.mxu0 }
 0x466   :  { %2137 = vmatpush1.bf16.msra.mxu1 %v9559_v10  ;;  %v9603_v10 = vld [vmem:[#allocation9 + $0x10c] ss:$12 sps:$4 sm:$0xff]  }
 0x467   :  { %2138 = vmatprep.subr.bf16.mxu1 %v9565_v36  ;;  %v9612_v36 = vld [vmem:[#allocation9 + $0x110] ss:$12 sps:$4 sm:$0xff]  }
 0x469   :  { %1721 = vmatmul.mubr.bf16.gmra.mxu1 %v10528_v32  ;;  %v9585_v32 = vld [vmem:[#allocation9 + $0x4] ss:$12 sps:$4 sm:$0xff]  }
 0x46a   :  { %2139 = vmatpush1.bf16.msra.mxu1 %v9563_v12  ;;  %2166 = vmatprep.mubr.bf16.mxu1 %v11844_v54  ;;  %v10776_v12 = vpop.permute.xlu0 %1797 }
 0x46b   :  { %2140 = vmatprep.subr.bf16.mxu1 %v9569_v8  ;;  %v10778_v8 = vpop.permute.xlu1 %1848 }
 0x46e   :  { %2141 = vmatpush1.bf16.msra.mxu1 %v9567_v27  ;;  %v9607_v27 = vld [vmem:[#allocation9 + $0xf4] ss:$12 sps:$4 sm:$0xff]  }
 0x46f   :  { %2142 = vmatprep.subr.bf16.mxu1 %v9573_v15  ;;  %v9616_v15 = vld [vmem:[#allocation9 + $0xf8] ss:$12 sps:$4 sm:$0xff]  }
 0x472   :  { %2143 = vmatpush1.bf16.msra.mxu1 %v9571_v4  ;;  %v1659_v4 = vpop.f32.mrf.mxu0 }
 0x473   :  { %2144 = vmatprep.subr.bf16.mxu1 %v9577_v14  ;;  %v9605_v14 = vld [vmem:[#allocation9 + $0xf0] ss:$12 sps:$4 sm:$0xff]  }
 0x476   :  { %2145 = vmatpush1.bf16.msra.mxu1 %v9575_v16  ;;  %v10780_v16 = vpop.permute.xlu0 %1955 }
 0x477   :  { %2146 = vmatprep.subr.bf16.mxu1 %v9581_v18  ;;  %11913 = vst [vmem:[#allocation30_spill] sm:$0xff] %v10780_v16  ;;  %v10782_v18 = vpop.permute.xlu1 %1950 }
 0x478   :  { %11914 = vst [vmem:[#allocation31_spill] sm:$0xff] %v10782_v18 }
 0x47a   :  { %2147 = vmatpush1.bf16.msra.mxu1 %v9579_v20  ;;  %v9611_v20 = vld [vmem:[#allocation9 + $0xdc] ss:$12 sps:$4 sm:$0xff]  }
 0x47b   :  { %2148 = vmatprep.subr.bf16.mxu1 %v9585_v32  ;;  %v9617_v32 = vld [vmem:[#allocation9 + $0xe0] ss:$12 sps:$4 sm:$0xff]  }
 0x47e   :  { %2149 = vmatpush1.bf16.msra.mxu1 %v9583_v21  ;;  %v1661_v21 = vpop.f32.mrf.mxu0 }
 0x47f   :  { %2366 = vmatprep.subr.bf16.mxu1 %v9589_v25  ;;  %v9609_v25 = vld [vmem:[#allocation9 + $0xd8] ss:$12 sps:$4 sm:$0xff]  }
 0x4e1   :  { %v9209_v9 = vpop.f32.mrf.mxu1 }
 0x4e2   :  { %v1143_v41 = vadd.f32 %v9209_v9, %v8257_v47 }
 0x4e3   :  { %v1134_v39 = vpop.f32.mrf.mxu1 }
 0x4e4   :  { %v1135_v53 = vadd.f32 %v8257_v47, %v1134_v39  ;;  %v9615_v39 = vld [vmem:[#allocation9 + $0xc4] ss:$12 sps:$4 sm:$0xff]  }
 0x4e5   :  { %v9210_v31 = vpop.f32.mrf.mxu1 }
 0x4e6   :  { %v1146_v48 = vadd.f32 %v9210_v31, %v8257_v47  ;;  %v9618_v31 = vld [vmem:[#allocation9 + $0xc8] ss:$12 sps:$4 sm:$0xff]  }
 0x4e7   :  { %v1137_v49 = vpop.f32.mrf.mxu1 }
 0x4e8   :  { %v1138_v55 = vadd.f32 %v8257_v47, %v1137_v49  ;;  %v2005_v33 = vpack.c.bf16 %v1146_v48, %v1143_v41  ;;  %v1663_v47 = vpop.f32.mrf.mxu0  ;;  %v10786_v48 = vpop.permute.xlu1 %1876  ;;  %v9613_v49 = vld [vmem:[#allocation9 + $0xc0] ss:$12 sps:$4 sm:$0xff]  }
 0x4e9   :  { %11916 = vst [vmem:[#allocation33_spill] sm:$0xff] %v10786_v48 }
 0x4ea   :  { %v2004_v38 = vpack.c.bf16 %v1138_v55, %v1135_v53  ;;  %v1665_v55 = vpop.f32.mrf.mxu0 }
 0x4ec   :  { %2167 = vmatmul.mubr.bf16.vlgmr.msra.gmra.mxu1 %v2004_v38  ;;  %9247 = vmatprep.mubr.bf16.mxu0 %v2004_v38  ;;  %v10790_v38 = vpop.permute.xlu1 %1881 }
 0x4ed   :  { %9248 = vmatmul.mubr.bf16.vlgmr.msra.gmra.mxu0 %v2005_v33  ;;  %2176 = vmatprep.mubr.bf16.mxu1 %v11844_v54  ;;  %11917 = vst [vmem:[#allocation34_spill] sm:$0xff] %v10790_v38 }
 0x4ee   :  { %2367 = vmatpush1.bf16.msra.mxu1 %v9587_v57  ;;  %9252 = vmatpush3.bf16.msra.mxu0 %v9596_v5  ;;  %v10784_v5 = vpop.permute.xlu0 %1978 }
 0x4ef   :  { %2368 = vmatprep.subr.bf16.mxu1 %v9592_v42  ;;  %9253 = vmatprep.subr.bf16.mxu0 %v9600_v35  ;;  %11915 = vst [vmem:[#allocation32_spill] sm:$0xff] %v10784_v5  ;;  %v1800_v42 = vmul.f32 %v10734_v6, %v10748_v37 }
 0x4f2   :  { %2369 = vmatpush1.bf16.msra.mxu1 %v9590_v60  ;;  %9254 = vmatpush3.bf16.msra.mxu0 %v9600_v35  ;;  %v10788_v41 = vpop.permute.xlu0 %1815 }
 0x4f3   :  { %2370 = vmatprep.subr.bf16.mxu1 %v9595_v13  ;;  %9255 = vmatprep.subr.bf16.mxu0 %v9604_v40 }
 0x4f4   :  { %2177 = vmatmul.mubr.bf16.gmra.mxu1 %v2005_v33  ;;  %v1669_v33 = vpop.f32.mrf.mxu0 }
 0x4f5   :  { %2398 = vmatprep.mubr.bf16.mxu1 %v11844_v54 }
 0x4f6   :  { %2371 = vmatpush1.bf16.msra.mxu1 %v9593_v63  ;;  %9256 = vmatpush3.bf16.msra.mxu0 %v9604_v40  ;;  %v10794_v35 = vpop.permute.xlu0 %1899  ;;  %v1671_v13 = vpop.f32.mrf.mxu0 }
 0x4f7   :  { %2372 = vmatprep.subr.bf16.mxu1 %v9599_v22  ;;  %9257 = vmatprep.subr.bf16.mxu0 %v9608_v24  ;;  %11918 = vst [vmem:[#allocation35_spill] sm:$0xff] %v10794_v35  ;;  %v10796_v40 = vpop.permute.xlu1 %1983  ;;  %v1801_v22 = vmul.f32 %v10763_v61, %v10756_v50  ;;  %v1802_v50 = vmul.f32 %v10744_v17, %v10765_v62 }
 0x4f8   :  { %11919 = vst [vmem:[#allocation36_spill] sm:$0xff] %v10796_v40 }
 0x4fa   :  { %2373 = vmatpush1.bf16.msra.mxu1 %v9597_v23  ;;  %9258 = vmatpush3.bf16.msra.mxu0 %v9608_v24  ;;  %v1804_v24 = vadd.f32 %v1800_v42, %v10746_v26  ;;  %v1806_v42 = vadd.f32 %v1802_v50, %v10758_v59 }
 0x4fb   :  { %2374 = vmatprep.subr.bf16.mxu1 %v9603_v10  ;;  %9259 = vmatprep.subr.bf16.mxu0 %v9612_v36  ;;  %v1673_v10 = vpop.f32.mrf.mxu0 }
 0x4fe   :  { %2375 = vmatpush1.bf16.msra.mxu1 %v9601_v44  ;;  %9260 = vmatpush3.bf16.msra.mxu0 %v9612_v36  ;;  %v10802_v36 = vpop.permute.xlu0 %1904 }
 0x4ff   :  { %2376 = vmatprep.subr.bf16.mxu1 %v9607_v27  ;;  %9261 = vmatprep.subr.bf16.mxu0 %v9616_v15  ;;  %11920 = vst [vmem:[#allocation37_spill] sm:$0xff] %v10802_v36 }
 0x501   :  { %v1606_v9 = vpop.f32.mrf.mxu1 }
 0x502   :  { %2377 = vmatpush1.bf16.msra.mxu1 %v9605_v14  ;;  %9262 = vmatpush3.bf16.msra.mxu0 %v9616_v15  ;;  %v1828_v63 = vmul.f32 %v10736_v11, %v1606_v9  ;;  %v10806_v15 = vpop.permute.xlu1 %1909  ;;  %v1805_v14 = vadd.f32 %v1801_v22, %v10752_v46  ;;  %v1803_v46 = vmul.f32 %v10776_v12, %v10774_v43 }
 0x503   :  { %2378 = vmatprep.subr.bf16.mxu1 %v9611_v20  ;;  %9263 = vmatprep.subr.bf16.mxu0 %v9617_v32  ;;  %v1608_v53 = vpop.f32.mrf.mxu1  ;;  %11921 = vst [vmem:[#allocation38_spill] sm:$0xff] %v10806_v15 }
 0x504   :  { %v1832_v44 = vadd.f32 %v1828_v63, %v1804_v24  ;;  %v1856_v37 = vmul.f32 %v10738_v30, %v1608_v53 }
 0x505   :  { %v1610_v57 = vpop.f32.mrf.mxu1 }
 0x506   :  { %2379 = vmatpush1.bf16.msra.mxu1 %v9609_v25  ;;  %9264 = vmatpush3.bf16.msra.mxu0 %v9617_v32  ;;  %v1829_v27 = vmul.f32 %v10788_v41, %v1610_v57  ;;  %v1675_v32 = vpop.f32.mrf.mxu0  ;;  %v1860_v25 = vadd.f32 %v1856_v37, %v1832_v44  ;;  %v10821_v63 = vpop.permute.xlu1 %1932  ;;  %v1912_v44 = vmul.f32 %v10750_v7, %v1661_v21  ;;  %v11211_v7 = vld [vmem:[#allocation16 + $0x318] sm:$0xff] }
 0x507   :  { %2380 = vmatprep.subr.bf16.mxu1 %v9615_v39  ;;  %9265 = vmatprep.subr.bf16.mxu0 %v9618_v31  ;;  %v1612_v60 = vpop.f32.mrf.mxu1  ;;  %11923 = vst [vmem:[#allocation40_spill] sm:$0xff] %v10821_v63  ;;  %v1913_v21 = vmul.f32 %v10794_v35, %v1665_v55 }
 0x508   :  { %v1833_v26 = vadd.f32 %v1829_v27, %v1805_v14  ;;  %v1857_v9 = vmul.f32 %v10740_v51, %v1612_v60  ;;  %v10816_v57 = vpop.f32.mrf.mxu0  ;;  %v1807_v14 = vadd.f32 %v1803_v46, %v10771_v3 }
 0x509   :  { %v1616_v23 = vpop.f32.mrf.mxu1 }
 0x50a   :  { %2381 = vmatpush1.bf16.msra.mxu1 %v9613_v49  ;;  %9266 = vmatpush3.bf16.msra.mxu0 %v9618_v31  ;;  %v1830_v39 = vmul.f32 %v10754_v45, %v1616_v23  ;;  %v1884_v31 = vmul.f32 %v10767_v0, %v1659_v4  ;;  %v10814_v49 = vpop.permute.xlu0 %1922  ;;  %v1861_v22 = vadd.f32 %v1857_v9, %v1833_v26  ;;  %v1765_v27 = vpop.f32.mrf.mxu0 }
 0x50b   :  { %v1618_v20 = vpop.f32.mrf.mxu1  ;;  %11922 = vst [vmem:[#allocation39_spill] sm:$0xff] %v10814_v49  ;;  %v1885_v4 = vmul.f32 %v10742_v34, %v1663_v47 }
 0x50c   :  { %v1888_v62 = vadd.f32 %v1884_v31, %v1860_v25  ;;  %v1834_v24 = vadd.f32 %v1830_v39, %v1806_v42  ;;  %v1858_v60 = vmul.f32 %v10778_v8, %v1618_v20  ;;  %v10832_v39 = vpop.permute.xlu1 %1960  ;;  %v9230_v31 = vpop.f32.mrf.mxu0 }
 0x50d   :  { %v1620_v53 = vpop.f32.mrf.mxu1  ;;  %v1889_v59 = vadd.f32 %v1885_v4, %v1861_v22  ;;  %11925 = vst [vmem:[#allocation42_spill] sm:$0xff] %v10832_v39 }
 0x50e   :  { %v1831_v23 = vmul.f32 %v10760_v29, %v1620_v53  ;;  %v10828_v43 = vpop.permute.xlu0 %1853  ;;  %v1916_v54 = vadd.f32 %v1912_v44, %v1888_v62  ;;  %v1862_v25 = vadd.f32 %v1858_v60, %v1834_v24  ;;  %v1886_v53 = vmul.f32 %v10786_v48, %v1669_v33  ;;  %v1768_v44 = vpop.f32.mrf.mxu0 }
 0x50f   :  { %v1622_v37 = vpop.f32.mrf.mxu1  ;;  %11924 = vst [vmem:[#allocation41_spill] sm:$0xff] %v10828_v43  ;;  %v1917_v24 = vadd.f32 %v1913_v21, %v1889_v59  ;;  %v1996_v33 = vmul.f32 %v10784_v5, %v1765_v27  ;;  %v3065_v5 = vld [vmem:[#allocation16 + $0x170] sm:$0xff] }
 0x510   :  { %v1835_v26 = vadd.f32 %v1831_v23, %v1807_v14  ;;  %v1859_v9 = vmul.f32 %v10828_v43, %v1622_v37  ;;  %v1890_v22 = vadd.f32 %v1886_v53, %v1862_v25  ;;  %v1914_v23 = vmul.f32 %v10802_v36, %v1671_v13  ;;  %v11253_v43 = vld [vmem:[#allocation16 + $0x2b8] sm:$0xff] }
 0x511   :  { %v1887_v37 = vmul.f32 %v10790_v38, %v1673_v10  ;;  %v1997_v25 = vmul.f32 %v10796_v40, %v1768_v44  ;;  %v1915_v10 = vmul.f32 %v10806_v15, %v1675_v32  ;;  %v3161_v15 = vld [vmem:[#allocation16 + $0x470] sm:$0xff]  ;;  %11970 = vst [vmem:[#allocation82_spill] sm:$0xff] %v11253_v43 }
 0x512   :  { %v1863_v62 = vadd.f32 %v1859_v9, %v1835_v26  ;;  %v10840_v14 = vpop.permute.xlu0 %1937  ;;  %v10845_v26 = vpop.permute.xlu1 %1965  ;;  %v1918_v13 = vadd.f32 %v1914_v23, %v1890_v22 }
 0x513   :  { %11926 = vst [vmem:[#allocation43_spill] sm:$0xff] %v10840_v14  ;;  %11927 = vst [vmem:[#allocation44_spill] sm:$0xff] %v10845_v26 }
 0x514   :  { %v1891_v9 = vadd.f32 %v1887_v37, %v1863_v62 }
 0x516   :  { %v10850_v27 = vpop.permute.xlu0 %1988  ;;  %v10853_v62 = vpop.permute.xlu1 %1993 }
 0x517   :  { %11928 = vst [vmem:[#allocation45_spill] sm:$0xff] %v10850_v27  ;;  %11929 = vst [vmem:[#allocation46_spill] sm:$0xff] %v10853_v62 }
 0x521   :  { %v1712_v50 = vpop.f32.mrf.mxu1 }
 0x522   :  { %v1940_v20 = vmul.f32 %v10814_v49, %v1712_v50  ;;  %v3082_v49 = vld [vmem:[#allocation16 + $0x1f8] sm:$0xff] }
 0x523   :  { %v1714_v47 = vpop.f32.mrf.mxu1 }
 0x524   :  { %v1944_v3 = vadd.f32 %v1940_v20, %v1916_v54  ;;  %v1968_v46 = vmul.f32 %v10782_v18, %v1714_v47  ;;  %v3201_v18 = vld [vmem:[#allocation16 + $0x5b0] sm:$0xff] }
 0x525   :  { %v1716_v42 = vpop.f32.mrf.mxu1 }
 0x526   :  { %v1941_v60 = vmul.f32 %v10769_v1, %v1716_v42  ;;  %v1972_v55 = vadd.f32 %v1968_v46, %v1944_v3 }
 0x527   :  { %v1718_v4 = vpop.f32.mrf.mxu1 }
 0x528   :  { %v1945_v50 = vadd.f32 %v1941_v60, %v1917_v24  ;;  %v1969_v54 = vmul.f32 %v10780_v16, %v1718_v4  ;;  %v2000_v53 = vadd.f32 %v1996_v33, %v1972_v55  ;;  %v1919_v4 = vadd.f32 %v1915_v10, %v1891_v9  ;;  %v9624_v10 = vld [vmem:[#allocation10 + $0xb8] sm:$0xff]  }
 0x529   :  { %v1722_v59 = vpop.f32.mrf.mxu1  ;;  %v11930_v55 = vmov 0   ;;  %9271 = vmatprep.subr.bf16.mxu0 %v9624_v10 }
 0x52a   :  { %v1973_v20 = vadd.f32 %v1969_v54, %v1945_v50  ;;  %v1942_v47 = vmul.f32 %v10821_v63, %v1722_v59  ;;  %v1998_v50 = vmul.f32 %v10816_v57, %v10850_v27  ;;  %v1999_v54 = vmul.f32 %v9230_v31, %v10853_v62  ;;  %v9630_v57 = vld [vmem:[#allocation10 + $0xa8] sm:$0xff]  }
 0x52b   :  { %v1724_v21 = vpop.f32.mrf.mxu1  ;;  %v9625_v31 = vld [vmem:[#allocation10 + $0x28] sm:$0xff]  }
 0x52c   :  { %v2001_v3 = vadd.f32 %v1997_v25, %v1973_v20  ;;  %v1946_v46 = vadd.f32 %v1942_v47, %v1918_v13  ;;  %v1970_v42 = vmul.f32 %v10832_v39, %v1724_v21  ;;  %v9619_v20 = vld [vmem:[#allocation10 + $0x78] sm:$0xff]   ;;  %v9621_v47 = vld [vmem:[#allocation10 + $0x70] sm:$0xff]  }
 0x52d   :  { %v1726_v24 = vpop.f32.mrf.mxu1  ;;  %v9620_v13 = vld [vmem:[#allocation10 + $0x38] sm:$0xff]   ;;  %9000 = vmatprep.subr.bf16.mxu1 %v9619_v20  ;;  %v9627_v21 = vld [vmem:[#allocation10 + $0xb0] sm:$0xff]  }
 0x52e   :  { %v2236_v60 = vpack.c.bf16 %v2001_v3, %v2000_v53  ;;  %v1943_v44 = vmul.f32 %v10840_v14, %v1726_v24  ;;  %v1974_v23 = vadd.f32 %v1970_v42, %v1946_v46  ;;  %v9622_v53 = vld [vmem:[#allocation10 + $0x30] sm:$0xff]   ;;  %v9623_v3 = vld [vmem:[#allocation10 + $0x68] sm:$0xff]   ;;  %v9626_v46 = vld [vmem:[#allocation10 + $0x60] sm:$0xff]  }
 0x52f   :  { %v1728_v22 = vpop.f32.mrf.mxu1  ;;  %v9628_v42 = vld [vmem:[#allocation10 + $0x20] sm:$0xff]   ;;  %v9629_v24 = vld [vmem:[#allocation10 + $0x58] sm:$0xff]  }
 0x530   :  { %v1947_v37 = vadd.f32 %v1943_v44, %v1919_v4  ;;  %v1971_v32 = vmul.f32 %v10845_v26, %v1728_v22  ;;  %2399 = vmatmul.mubr.bf16.vlgmr.msra.gmra.mxu1 %v2236_v60  ;;  %9267 = vmatprep.mubr.bf16.mxu0 %v2236_v60  ;;  %v2002_v25 = vadd.f32 %v1998_v50, %v1974_v23  ;;  %v9631_v60 = vld [vmem:[#allocation10 + $0x18] sm:$0xff]   ;;  %v9632_v4 = vld [vmem:[#allocation10 + $0x50] sm:$0xff]   ;;  %v9633_v44 = vld [vmem:[#allocation10 + $0xa0] sm:$0xff]  }
 0x531   :  { %2408 = vmatprep.mubr.bf16.mxu1 %v11930_v55  ;;  %9001 = vmatpush3.bf16.msra.mxu1 %v9620_v13  ;;  %v9634_v22 = vld [vmem:[#allocation10 + $0x10] sm:$0xff]   ;;  %v9635_v23 = vld [vmem:[#allocation10 + $0x48] sm:$0xff]   ;;  %v9638_v50 = vld [vmem:[#allocation10 + $0x40] sm:$0xff]  }
 0x532   :  { %v1975_v33 = vadd.f32 %v1971_v32, %v1947_v37  ;;  %9002 = vmatprep.subr.bf16.mxu1 %v9621_v47  ;;  %v9636_v37 = vld [vmem:[#allocation10 + $0x98] sm:$0xff]   ;;  %v9637_v32 = vld [vmem:[#allocation10 + $0x8] sm:$0xff]  }
 0x534   :  { %v2003_v59 = vadd.f32 %v1999_v54, %v1975_v33  ;;  %v9639_v54 = vld [vmem:[#allocation10 + $0x90] sm:$0xff]   ;;  %v9640_v33 = vld [vmem:[#allocation10] sm:$0xff]  }
 0x535   :  { %9003 = vmatpush3.bf16.msra.mxu1 %v9622_v53 }
 0x536   :  { %v2237_v9 = vpack.c.bf16 %v2003_v59, %v2002_v25  ;;  %9004 = vmatprep.subr.bf16.mxu1 %v9623_v3  ;;  %v9641_v25 = vld [vmem:[#allocation10 + $0x88] sm:$0xff]   ;;  %v9642_v59 = vld [vmem:[#allocation10 + $0x80] sm:$0xff]  }
 0x538   :  { %2409 = vmatmul.mubr.bf16.gmra.mxu1 %v2237_v9  ;;  %9268 = vmatmul.mubr.bf16.vlgmr.msra.gmra.mxu0 %v2237_v9 }
 0x539   :  { %9272 = vmatpush3.bf16.msra.mxu0 %v9624_v10  ;;  %9005 = vmatpush3.bf16.msra.mxu1 %v9625_v31 }
 0x53a   :  { %9273 = vmatprep.subr.bf16.mxu0 %v9627_v21  ;;  %9006 = vmatprep.subr.bf16.mxu1 %v9626_v46 }
 0x53d   :  { %9274 = vmatpush3.bf16.msra.mxu0 %v9627_v21  ;;  %9007 = vmatpush3.bf16.msra.mxu1 %v9628_v42 }
 0x53e   :  { %9275 = vmatprep.subr.bf16.mxu0 %v9630_v57  ;;  %9008 = vmatprep.subr.bf16.mxu1 %v9629_v24 }
 0x541   :  { %9276 = vmatpush3.bf16.msra.mxu0 %v9630_v57  ;;  %9009 = vmatpush3.bf16.msra.mxu1 %v9631_v60 }
 0x542   :  { %9010 = vmatprep.subr.bf16.mxu1 %v9632_v4  ;;  %9277 = vmatprep.subr.bf16.mxu0 %v9633_v44 }
 0x545   :  { %9011 = vmatpush3.bf16.msra.mxu1 %v9634_v22  ;;  %9278 = vmatpush3.bf16.msra.mxu0 %v9633_v44 }
 0x546   :  { %9012 = vmatprep.subr.bf16.mxu1 %v9635_v23  ;;  %9279 = vmatprep.subr.bf16.mxu0 %v9636_v37 }
 0x549   :  { %9013 = vmatpush3.bf16.msra.mxu1 %v9637_v32  ;;  %9280 = vmatpush3.bf16.msra.mxu0 %v9636_v37 }
 0x54a   :  { %9014 = vmatprep.subr.bf16.mxu1 %v9638_v50  ;;  %9281 = vmatprep.subr.bf16.mxu0 %v9639_v54 }
 0x54d   :  { %9015 = vmatpush3.bf16.msra.mxu1 %v9640_v33  ;;  %9282 = vmatpush3.bf16.msra.mxu0 %v9639_v54 }
 0x54e   :  { %9283 = vmatprep.subr.bf16.mxu0 %v9641_v25 }
 0x551   :  { %9284 = vmatpush3.bf16.msra.mxu0 %v9641_v25 }
 0x552   :  { %9285 = vmatprep.subr.bf16.mxu0 %v9642_v59 }
 0x555   :  { %9286 = vmatpush3.bf16.msra.mxu0 %v9642_v59 }
 0x5ac   :  { %v2168_v9 = vpop.f32.mrf.mxu1 }
 0x5ad   :  { %v9249_v53 = vpop.f32.mrf.mxu0 }
 0x5ae   :  { %v2170_v20 = vpop.f32.mrf.mxu1 }
 0x5af   :  { %v2221_v57 = vpop.f32.mrf.mxu0 }
 0x5b0   :  { %v2172_v13 = vpop.f32.mrf.mxu1 }
 0x5b1   :  { %v9250_v42 = vpop.f32.mrf.mxu0 }
 0x5b2   :  { %v2174_v47 = vpop.f32.mrf.mxu1 }
 0x5b3   :  { %v2224_v4 = vpop.f32.mrf.mxu0 }
 0x5b4   :  { %v2178_v10 = vpop.f32.mrf.mxu1 }
 0x5b6   :  { %v2180_v21 = vpop.f32.mrf.mxu1 }
 0x5b8   :  { %v2182_v3 = vpop.f32.mrf.mxu1 }
 0x5ba   :  { %v2184_v31 = vpop.f32.mrf.mxu1 }
 0x5f0   :  { %v2400_v46 = vpop.f32.mrf.mxu1 }
 0x5f1   :  { %v2468_v32 = vmul.f32 %v2400_v46, %v2168_v9 }
 0x5f2   :  { %v2402_v24 = vpop.f32.mrf.mxu1 }
 0x5f3   :  { %v2469_v23 = vmul.f32 %v2402_v24, %v2170_v20 }
 0x5f4   :  { %v2404_v60 = vpop.f32.mrf.mxu1 }
 0x5f5   :  { %v2471_v44 = vmul.f32 %v2404_v60, %v2172_v13 }
 0x5f6   :  { %v2406_v22 = vpop.f32.mrf.mxu1 }
 0x5f7   :  { %v2472_v37 = vmul.f32 %v2406_v22, %v2174_v47  ;;  %v2480_v25 = vpack.c.bf16 %v2471_v44, %v2468_v32 }
 0x5f8   :  { %v2410_v50 = vpop.f32.mrf.mxu1  ;;  %v9269_v54 = vpop.f32.mrf.mxu0 }
 0x5f9   :  { %v2481_v33 = vpack.c.bf16 %v2472_v37, %v2469_v23  ;;  %v2474_v47 = vmul.f32 %v2410_v50, %v2178_v10  ;;  %v2476_v9 = vmul.f32 %v9269_v54, %v9249_v53  ;;  %v11862_v23 = vmov 0.0  }
 0x5fa   :  { %v2412_v59 = vpop.f32.mrf.mxu1  ;;  %v2453_v56 = vpop.f32.mrf.mxu0  ;;  %9291 = vmatprep.subr.bf16.mxu1 %v11862_v23 }
 0x5fb   :  { %2662 = vmatprep.mubr.bf16.mxu1 %v2481_v33  ;;  %v2475_v63 = vmul.f32 %v2412_v59, %v2180_v21  ;;  %v2470_v13 = vmul.f32 %v2453_v56, %v2221_v57  ;;  %v10866_v56 = vld [vmem:[%s11831_s2 + $0x20] sm:$0xff]  }
 0x5fc   :  { %v2414_v62 = vpop.f32.mrf.mxu1  ;;  %v9270_v27 = vpop.f32.mrf.mxu0  ;;  %2663 = vmatmul.mubr.bf16.vlgmr.msra.gmra.mxu1 %v2480_v25  ;;  %11931 = vst [vmem:[#allocation47_spill] sm:$0xff] %v10866_v56 }
 0x5fd   :  { %v2477_v26 = vmul.f32 %v2414_v62, %v2182_v3  ;;  %v2479_v39 = vmul.f32 %v9270_v27, %v9250_v42 }
 0x5fe   :  { %v2416_v40 = vpop.f32.mrf.mxu1  ;;  %v2456_v14 = vpop.f32.mrf.mxu0 }
 0x5ff   :  { %v2478_v60 = vmul.f32 %v2416_v40, %v2184_v31  ;;  %v2473_v20 = vmul.f32 %v2456_v14, %v2224_v4  ;;  %v2483_v22 = vpack.c.bf16 %v2477_v26, %v2474_v47  ;;  %v2485_v44 = vpack.c.bf16 %v2479_v39, %v2476_v9  ;;  %v9989_v9 = vld [vmem:[%s11831_s2] sm:$0xff]  }
 0x600   :  { %v221_v40 = vunpack.c.l.bf16 %v10866_v56 }
 0x601   :  { %v2484_v46 = vpack.c.bf16 %v2478_v60, %v2475_v63  ;;  %v2482_v24 = vpack.c.bf16 %v2473_v20, %v2470_v13  ;;  %v222_v63 = vunpack.c.h.bf16 %v10866_v56 }
 0x602   :  { %v224_v39 = vsel %vm223_vm12, %v221_v40, 0.0 }
 0x603   :  { %2670 = vmatprep.mubr.bf16.mxu1 %v2484_v46  ;;  %9287 = vmatprep.mubr.bf16.mxu0 %v2482_v24  ;;  %v227_v14 = vsel %vm223_vm12, %v222_v63, 0.0 }
 0x604   :  { %2671 = vmatmul.mubr.bf16.gmra.mxu1 %v2483_v22  ;;  %9288 = vmatmul.mubr.bf16.vlgmr.msra.gmra.mxu0 %v2485_v44 }
 0x605   :  { %9295 = vmatprep.mubr.msk.bf16.mxu1 %vm10262_vm13, %v11862_v23  ;;  %225 = vadd.xlane.f32.xlu1 %v224_v39 }
 0x606   :  { %228 = vadd.xlane.f32.xlu0 %v227_v14 }
 0x68e   :  { %v226_v46 = vpop.xlane.xlu1 %225 }
 0x68f   :  { %v230_v24 = vmax.f32 %v226_v46, 1.0  ;;  %v229_v22 = vpop.xlane.xlu0 %228 }
 0x690   :  { %v231_v44 = vmax.f32 %v229_v22, 1.0 }
 0x691   :  { %9949 = vrcp.f32 %v230_v24 }
 0x692   :  { %9951 = vrcp.f32 %v231_v44 }
 0x69e   :  { %v10879_v40 = vpop.eup %9949 }
 0x69f   :  { %11932 = vst [vmem:[#allocation48_spill] sm:$0xff] %v10879_v40  ;;  %v10887_v14 = vpop.eup %9951 }
 0x6a0   :  { %11933 = vst [vmem:[#allocation49_spill] sm:$0xff] %v10887_v14 }
 0x6bc   :  { %v9016_v26 = vpop.f32.mrf.mxu1 }
 0x6be   :  { %v9017_v27 = vpop.f32.mrf.mxu1 }
 0x6bf   :  { %v9018_v59 = vadd.f32 %v9017_v27, %v9016_v26 }
 0x6c0   :  { %v9019_v62 = vpop.f32.mrf.mxu1 }
 0x6c2   :  { %v9020_v10 = vpop.f32.mrf.mxu1 }
 0x6c3   :  { %v9021_v54 = vadd.f32 %v9020_v10, %v9019_v62 }
 0x6c4   :  { %v9022_v21 = vpop.f32.mrf.mxu1  ;;  %v9289_v53 = vpop.f32.mrf.mxu0 }
 0x6c6   :  { %v9023_v3 = vpop.f32.mrf.mxu1  ;;  %v2713_v57 = vpop.f32.mrf.mxu0 }
 0x6c7   :  { %v9024_v4 = vadd.f32 %v9023_v3, %v9022_v21  ;;  %v2714_v20 = vadd.f32 %v9018_v59, %v2713_v57  ;;  %v11934_v21 = vmov 0 }
 0x6c8   :  { %v9025_v31 = vpop.f32.mrf.mxu1  ;;  %v9290_v42 = vpop.f32.mrf.mxu0  ;;  %v11935_v21 = vsel %vm10894_vm1, 4294967295, %v11934_v21 }
 0x6c9   :  { %v2722_v33 = vadd.f32 %v9289_v53, %v9024_v4  ;;  %11936 = vst [vmem:[#allocation50_spill] sm:$0xff] %v11935_v21  ;;  %v11937_v4 = vmov 0  ;;  %v3188_v21 = vld [vmem:[#allocation16 + $0x548] sm:$0xff] }
 0x6ca   :  { %v9026_v37 = vpop.f32.mrf.mxu1  ;;  %v2716_v50 = vpop.f32.mrf.mxu0  ;;  %v11938_v4 = vsel %vm10910_vm4, 4294967295, %v11937_v4 }
 0x6cb   :  { %v9027_v32 = vadd.f32 %v9026_v37, %v9025_v31  ;;  %v2717_v60 = vadd.f32 %v9021_v54, %v2716_v50  ;;  %11939 = vst [vmem:[#allocation51_spill] sm:$0xff] %v11938_v4  ;;  %v3064_v4 = vld [vmem:[#allocation16 + $0x168] sm:$0xff] }
 0x6cd   :  { %v2725_v25 = vadd.f32 %v9290_v42, %v9027_v32  ;;  %v2728_v47 = vpack.c.bf16 %v2717_v60, %v2714_v20 }
 0x6cf   :  { %v2729_v13 = vpack.c.bf16 %v2725_v25, %v2722_v33 }
 0x6d1   :  { %9292 = vmatpush3.bf16.msra.mxu1 %v2729_v13 }
 0x6d2   :  { %9293 = vmatprep.subr.bf16.mxu1 %v11862_v23 }
 0x6d5   :  { %9294 = vmatpush3.bf16.msra.mxu1 %v2728_v47 }
 0x6d8   :  { %9296 = vmatmul.mubr.msk.bf16.vlgmr.msra.gmra.mxu1 %vm223_vm12, %v10866_v56  ;;  %v3061_v56 = vld [vmem:[#allocation16 + $0x150] sm:$0xff] }
 0x6d9   :  { %9301 = vmatprep.mubr.msk.bf16.mxu1 %vm900_vm10, %v9989_v9 }
 0x798   :  { %v2772_v63 = vpop.f32.mrf.mxu1 }
 0x799   :  { %v10883_v39 = vmul.f32 %v10879_v40, %v2772_v63  ;;  %v3180_v40 = vld [vmem:[#allocation16 + $0x508] sm:$0xff] }
 0x79a   :  { %v9297_v26 = vpop.f32.mrf.mxu1 }
 0x79b   :  { %v2781_v27 = vsel %vm676_vm14, %v10883_v39, 0.0  ;;  %v2806_v62 = vmul.f32 %v10883_v39, %v10883_v39 }
 0x79c   :  { %2783 = vadd.xlane.f32.xlu0 %v2781_v27  ;;  %v2775_v10 = vpop.f32.mrf.mxu1 }
 0x79d   :  { %v10899_v53 = vmul.f32 %v10887_v14, %v2775_v10  ;;  %v2811_v57 = vsel %vm10894_vm1, %v2806_v62, 0.0  ;;  %v2831_v37 = vsel %vm10910_vm4, %v2806_v62, 0.0 }
 0x79e   :  { %v9298_v3 = vpop.f32.mrf.mxu1 }
 0x79f   :  { %v2782_v31 = vsel %vm676_vm14, %v10899_v53, 0.0  ;;  %v2807_v42 = vmul.f32 %v10899_v53, %v10899_v53 }
 0x7a0   :  { %2813 = vadd.xlane.f32.xlu0 %v2811_v57  ;;  %2785 = vadd.xlane.f32.xlu1 %v2782_v31 }
 0x7a1   :  { %v2812_v32 = vsel %vm10894_vm1, %v2807_v42, 0.0  ;;  %v2832_v50 = vsel %vm10910_vm4, %v2807_v42, 0.0 }
 0x7a4   :  { %2833 = vadd.xlane.f32.xlu0 %v2831_v37  ;;  %2815 = vadd.xlane.f32.xlu1 %v2812_v32 }
 0x7a8   :  { %2835 = vadd.xlane.f32.xlu1 %v2832_v50 }
 0x825   :  { %v2784_v54 = vpop.xlane.xlu0 %2783 }
 0x826   :  { %v2788_v33 = vmul.f32 0.125, %v2784_v54 }
 0x828   :  { %v2790_v25 = vsub.f32 %v10883_v39, %v2788_v33 }
 0x829   :  { %v2786_v59 = vpop.xlane.xlu1 %2785  ;;  %v2814_v24 = vpop.xlane.xlu0 %2813 }
 0x82a   :  { %v2789_v13 = vmul.f32 0.125, %v2786_v59  ;;  %v2792_v60 = vmul.f32 %v2790_v25, %v2790_v25  ;;  %v2818_v27 = vmul.f32 0.25, %v2814_v24 }
 0x82c   :  { %v2791_v20 = vsub.f32 %v10899_v53, %v2789_v13  ;;  %v2794_v47 = vsel %vm676_vm14, %v2792_v60, 0.0  ;;  %v2820_v57 = vadd.f32 1e-05, %v2818_v27 }
 0x82d   :  { %2796 = vadd.xlane.f32.xlu0 %v2794_v47  ;;  %v2816_v22 = vpop.xlane.xlu1 %2815  ;;  %v2834_v44 = vpop.xlane.xlu0 %2833 }
 0x82e   :  { %v2793_v9 = vmul.f32 %v2791_v20, %v2791_v20  ;;  %v2837_v26 = vmul.f32 0.25, %v2834_v44  ;;  %v2819_v3 = vmul.f32 0.25, %v2816_v22 }
 0x830   :  { %v2795_v46 = vsel %vm676_vm14, %v2793_v9, 0.0  ;;  %v2839_v10 = vadd.f32 1e-05, %v2837_v26  ;;  %v2821_v42 = vadd.f32 1e-05, %v2819_v3 }
 0x831   :  { %2798 = vadd.xlane.f32.xlu1 %v2795_v46  ;;  %v2836_v63 = vpop.xlane.xlu1 %2835 }
 0x832   :  { %v2838_v62 = vmul.f32 0.25, %v2836_v63  ;;  %9953 = vrsqrt.f32 %v2839_v10 }
 0x833   :  { %9955 = vrsqrt.f32 %v2820_v57 }
 0x834   :  { %v2840_v31 = vadd.f32 1e-05, %v2838_v62 }
 0x836   :  { %9957 = vrsqrt.f32 %v2840_v31 }
 0x837   :  { %9959 = vrsqrt.f32 %v2821_v42 }
 0x83f   :  { %v9954_v13 = vpop.eup %9953 }
 0x840   :  { %v9956_v60 = vpop.eup %9955  ;;  %v2843_v9 = vsel %vm10910_vm4, %v9954_v13, 0.0  ;;  %v2857_v13 = vld [vmem:[#allocation12 + $0x10] sm:$0xff] }
 0x841   :  { %v2824_v24 = vsel %vm10894_vm1, %v9956_v60, 0.0  ;;  %v2858_v60 = vld [vmem:[#allocation12 + $0x18] sm:$0xff] }
 0x842   :  { %v2845_v44 = vadd.f32 %v2843_v9, %v2824_v24  ;;  %v2855_v24 = vld [vmem:[#allocation12] sm:$0xff] }
 0x843   :  { %v9958_v47 = vpop.eup %9957 }
 0x844   :  { %v9960_v46 = vpop.eup %9959  ;;  %v2844_v22 = vsel %vm10910_vm4, %v9958_v47, 0.0  ;;  %v2849_v10 = vmul.f32 %v2845_v44, %v10883_v39  ;;  %v9991_v39 = vld [vmem:[%s11829_s0 + $0x8] sm:$0xff]  ;;  %v3576_v47 = vpack.c.bf16 %v2858_v60, %v2857_v13 }
 0x845   :  { %v2825_v26 = vsel %vm10894_vm1, %v9960_v46, 0.0 }
 0x846   :  { %v2846_v27 = vadd.f32 %v2844_v22, %v2825_v26  ;;  %9309 = vmatprep.subr.bf16.mxu0 %v3576_v47  ;;  %v2856_v22 = vld [vmem:[#allocation12 + $0x8] sm:$0xff] }
 0x847   :  { %9310 = vmatpush3.bf16.msra.mxu0 %v3576_v47 }
 0x848   :  { %v2850_v31 = vmul.f32 %v2846_v27, %v10899_v53 }
 0x8b6   :  { %v2797_v37 = vpop.xlane.xlu0 %2796 }
 0x8b7   :  { %v2800_v32 = vmul.f32 0.125, %v2797_v37 }
 0x8b9   :  { %v2802_v50 = vadd.f32 1e-05, %v2800_v32  ;;  %v9990_v32 = vld [vmem:[%s11829_s0] sm:$0xff] }
 0x8ba   :  { %v2799_v54 = vpop.xlane.xlu1 %2798 }
 0x8bb   :  { %9961 = vrsqrt.f32 %v2802_v50  ;;  %v2801_v33 = vmul.f32 0.125, %v2799_v54  ;;  %v9993_v54 = vld [vmem:[%s11831_s2 + $0x10] sm:$0xff]  }
 0x8bd   :  { %v2803_v59 = vadd.f32 1e-05, %v2801_v33  ;;  %v9994_v33 = vld [vmem:[%s11831_s2 + $0x18] sm:$0xff]  }
 0x8bf   :  { %9963 = vrsqrt.f32 %v2803_v59 }
 0x8c8   :  { %v9962_v63 = vpop.eup %9961 }
 0x8c9   :  { %v2847_v62 = vmul.f32 %v9962_v63, %v2790_v25  ;;  %v3575_v63 = vpack.c.bf16 %v2856_v22, %v2855_v24 }
 0x8cb   :  { %v2851_v42 = vsel %vm676_vm14, %v2847_v62, %v2849_v10  ;;  %9311 = vmatprep.subr.bf16.mxu0 %v3575_v63 }
 0x8cc   :  { %v9964_v3 = vpop.eup %9963  ;;  %v10943_v50 = vadd.f32 %v9990_v32, %v2851_v42  ;;  %9312 = vmatpush3.bf16.msra.mxu0 %v3575_v63 }
 0x8cd   :  { %v2848_v57 = vmul.f32 %v9964_v3, %v2791_v20  ;;  %v9992_v20 = vld [vmem:[%s11831_s2 + $0x8] sm:$0xff]  }
 0x8ce   :  { %11940 = vst [vmem:[#allocation52_spill] sm:$0xff] %v10943_v50 }
 0x8cf   :  { %v2852_v37 = vsel %vm676_vm14, %v2848_v57, %v2850_v31 }
 0x8d0   :  { %v10948_v25 = vadd.f32 %v9991_v39, %v2852_v37 }
 0x8d2   :  { %11941 = vst [vmem:[#allocation53_spill] sm:$0xff] %v10948_v25  ;;  %v3467_v53 = vpack.c.bf16 %v10948_v25, %v10943_v50 }
 0x8d4   :  { %9299 = vmatprep.subr.bf16.mxu1 %v3467_v53 }
 0x8d5   :  { %9300 = vmatpush3.bf16.msra.mxu1 %v3467_v53 }
 0x8d8   :  { %9302 = vmatmul.mubr.msk.bf16.vlgmr.msra.gmra.mxu1 %vm900_vm10, %v9992_v20 }
 0x8d9   :  { %9305 = vmatprep.mubr.msk.bf16.mxu1 %vm900_vm10, %v9993_v54 }
 0x8e0   :  { %9306 = vmatmul.mubr.msk.bf16.gmra.mxu1 %vm900_vm10, %v9994_v33 }
 0x998   :  { %v9303_v59 = vpop.f32.mrf.mxu1 }
 0x99a   :  { %v3502_v9 = vpop.f32.mrf.mxu1 }
 0x99c   :  { %v9304_v46 = vpop.f32.mrf.mxu1 }
 0x99d   :  { %v9427_v44 = vpack.i.bf16 %v9304_v46, %v9303_v59 }
 0x99e   :  { %v3505_v26 = vpop.f32.mrf.mxu1 }
 0x99f   :  { %v9432_v27 = vpack.i.bf16 %v3505_v26, %v3502_v9  ;;  %9428 = vrot.lane.b32.xlu1 %v9427_v44, %s10256_s1 }
 0x9a0   :  { %v9307_v62 = vpop.f32.mrf.mxu1 }
 0x9a1   :  { %9433 = vrot.lane.b32.xlu0 %v9432_v27, %s10256_s1 }
 0x9a2   :  { %v10966_v10 = vpop.f32.mrf.mxu1 }
 0x9a4   :  { %v9308_v3 = vpop.f32.mrf.mxu1 }
 0x9a5   :  { %v10968_v57 = vpack.c.bf16 %v9308_v3, %v9307_v62  ;;  %v9442_v31 = vpack.i.bf16 %v9308_v3, %v9307_v62 }
 0x9a6   :  { %v10970_v42 = vpop.f32.mrf.mxu1 }
 0x9a7   :  { %9443 = vrot.lane.b32.xlu0 %v9442_v31, %s10238_s22  ;;  %v9437_v37 = vpack.i.bf16 %v10970_v42, %v10966_v10 }
 0x9a9   :  { %9438 = vrot.lane.b32.xlu1 %v9437_v37, %s10238_s22 }
 0xa11   :  { %v9429_v32 = vpop.permute.xlu1 %9428 }
 0xa12   :  { %v9431_v53 = vunpack.i.h.bf16 %v9429_v32  ;;  %v9430_v20 = vunpack.i.l.bf16 %v9429_v32  ;;  %v2869_v32 = vld [vmem:[#allocation13 + $0x48] sm:$0xff] }
 0xa13   :  { %v9434_v39 = vpop.permute.xlu0 %9433 }
 0xa14   :  { %v9436_v54 = vunpack.i.h.bf16 %v9434_v39  ;;  %v9435_v33 = vunpack.i.l.bf16 %v9434_v39  ;;  %v3568_v9 = vsel %vm900_vm10, %v10659_v19, %v9431_v53  ;;  %v3567_v46 = vsel %vm900_vm10, %v10642_v58, %v9430_v20  ;;  %v2867_v58 = vld [vmem:[#allocation13 + $0x38] sm:$0xff]  ;;  %v2868_v39 = vld [vmem:[#allocation13 + $0x40] sm:$0xff] }
 0xa15   :  { %v2871_v20 = vld [vmem:[#allocation13 + $0x58] sm:$0xff] }
 0xa16   :  { %v3566_v44 = vsel %vm900_vm10, %v10668_v28, %v9436_v54  ;;  %v3565_v63 = vsel %vm900_vm10, %v10651_v2, %v9435_v33  ;;  %v2870_v28 = vld [vmem:[#allocation13 + $0x50] sm:$0xff]  ;;  %v3645_v54 = vpack.c.bf16 %v2871_v20, %v2868_v39  ;;  %v2861_v33 = vld [vmem:[#allocation13 + $0x8] sm:$0xff] }
 0xa17   :  { %v3644_v37 = vpack.c.bf16 %v2870_v28, %v2867_v58  ;;  %v2866_v2 = vld [vmem:[#allocation13 + $0x30] sm:$0xff] }
 0xa18   :  { %v3643_v53 = vpack.c.bf16 %v2869_v32, %v2866_v2  ;;  %9317 = vmatprep.subr.bf16.mxu1 %v3645_v54  ;;  %v9644_v20 = vld [vmem:[#allocation15 + $0x3f0] ss:$72 sps:$4 sm:$0xff]  }
 0xa19   :  { %v9444_v59 = vpop.permute.xlu0 %9443  ;;  %3678 = vmatprep.subr.bf16.mxu0 %v3644_v37  ;;  %9318 = vmatpush3.bf16.msra.mxu1 %v3645_v54 }
 0xa1a   :  { %v9446_v13 = vunpack.i.h.bf16 %v9444_v59  ;;  %v9445_v60 = vunpack.i.l.bf16 %v9444_v59  ;;  %v2864_v59 = vld [vmem:[#allocation13 + $0x20] sm:$0xff] }
 0xa1b   :  { %v9439_v47 = vpop.permute.xlu1 %9438 }
 0xa1c   :  { %v9441_v24 = vunpack.i.h.bf16 %v9439_v47  ;;  %v9440_v22 = vunpack.i.l.bf16 %v9439_v47  ;;  %v3572_v26 = vsel %vm1014_vm11, %v3568_v9, %v9446_v13  ;;  %v3571_v27 = vsel %vm1014_vm11, %v3567_v46, %v9445_v60  ;;  %v2860_v60 = vld [vmem:[#allocation13] sm:$0xff]  ;;  %v2863_v47 = vld [vmem:[#allocation13 + $0x18] sm:$0xff]  ;;  %v2862_v9 = vld [vmem:[#allocation13 + $0x10] sm:$0xff] }
 0xa1d   :  { %v3574_v31 = vpack.c.bf16 %v3572_v26, %v3571_v27  ;;  %v3641_v13 = vpack.c.bf16 %v2864_v59, %v2861_v33  ;;  %v3640_v46 = vpack.c.bf16 %v2863_v47, %v2860_v60  ;;  %v9647_v33 = vld [vmem:[#allocation15 + $0x3f8] ss:$72 sps:$4 sm:$0xff]   ;;  %v9652_v59 = vld [vmem:[#allocation15 + $0x364] ss:$72 sps:$4 sm:$0xff]  }
 0xa1e   :  { %v3570_v62 = vsel %vm1014_vm11, %v3566_v44, %v9441_v24  ;;  %v3569_v3 = vsel %vm1014_vm11, %v3565_v63, %v9440_v22  ;;  %v2865_v24 = vld [vmem:[#allocation13 + $0x28] sm:$0xff]  ;;  %v9649_v63 = vld [vmem:[#allocation15 + $0x3fc] ss:$72 sps:$4 sm:$0xff]   ;;  %v9650_v47 = vld [vmem:[#allocation15 + $0x360] ss:$72 sps:$4 sm:$0xff]  }
 0xa1f   :  { %v3573_v19 = vpack.c.bf16 %v3570_v62, %v3569_v3  ;;  %v3642_v22 = vpack.c.bf16 %v2865_v24, %v2862_v9  ;;  %v9646_v44 = vld [vmem:[#allocation15 + $0x3f4] ss:$72 sps:$4 sm:$0xff]   ;;  %v8410_v62 = vld [vmem:[#allocation12 + $0x20] ss:$0 sm:$0xff]  ;;  %v9653_v9 = vld [vmem:[#allocation15 + $0x368] ss:$72 sps:$4 sm:$0xff]  }
 0xa20   :  { %v9655_v60 = vld [vmem:[#allocation15 + $0x36c] ss:$72 sps:$4 sm:$0xff]   ;;  %v9661_v24 = vld [vmem:[#allocation15 + $0x2dc] ss:$72 sps:$4 sm:$0xff]  }
 0xa21   :  { %9313 = vmatprep.mubr.msk.bf16.mxu0 %vm223_vm12, %v3573_v19  ;;  %9319 = vmatprep.subr.bf16.mxu1 %v3642_v22 }
 0xa22   :  { %9314 = vmatmul.mubr.msk.bf16.vlgmr.msra.gmra.mxu0 %vm223_vm12, %v3574_v31  ;;  %9320 = vmatpush3.bf16.msra.mxu1 %v3642_v22  ;;  %v9656_v22 = vld [vmem:[#allocation15 + $0x2d0] ss:$72 sps:$4 sm:$0xff]  }
 0xa23   :  { %3698 = vmatprep.mubr.bf16.mxu0 %v11930_v55  ;;  %3679 = vmatpush1.bf16.msra.mxu0 %v3643_v53 }
 0xa24   :  { %3680 = vmatprep.subr.bf16.mxu0 %v3641_v13  ;;  %4543 = vmatprep.subr.bf16.mxu1 %v9649_v63  ;;  %v9664_v63 = vld [vmem:[#allocation15 + $0x244] ss:$72 sps:$4 sm:$0xff]  }
 0xa27   :  { %3681 = vmatpush1.bf16.msra.mxu0 %v3640_v46  ;;  %v9658_v46 = vld [vmem:[#allocation15 + $0x2d4] ss:$72 sps:$4 sm:$0xff]  }
 0xa28   :  { %4490 = vmatprep.subr.bf16.mxu0 %v9646_v44  ;;  %v9659_v44 = vld [vmem:[#allocation15 + $0x2d8] ss:$72 sps:$4 sm:$0xff]  }
 0xae2   :  { %v9315_v26 = vpop.f32.mrf.mxu0 }
 0xae3   :  { %v3630_v58 = vadd.f32 %v9315_v26, %v8410_v62  ;;  %v9667_v26 = vld [vmem:[#allocation15 + $0x24c] ss:$72 sps:$4 sm:$0xff]  }
 0xae4   :  { %v3621_v27 = vpop.f32.mrf.mxu0 }
 0xae5   :  { %v3622_v19 = vadd.f32 %v8410_v62, %v3621_v27  ;;  %v3638_v53 = vmax.f32 %v3630_v58, 0.0  ;;  %v9662_v27 = vld [vmem:[#allocation15 + $0x240] ss:$72 sps:$4 sm:$0xff]  }
 0xae6   :  { %v9316_v3 = vpop.f32.mrf.mxu0  ;;  %v9671_v58 = vld [vmem:[#allocation15 + $0x1b8] ss:$72 sps:$4 sm:$0xff]  }
 0xae7   :  { %v3633_v31 = vadd.f32 %v9316_v3, %v8410_v62  ;;  %v3636_v32 = vmax.f32 %v3622_v19, 0.0  ;;  %v9670_v3 = vld [vmem:[#allocation15 + $0x1b4] ss:$72 sps:$4 sm:$0xff]  }
 0xae8   :  { %v3624_v28 = vpop.f32.mrf.mxu0  ;;  %v9673_v19 = vld [vmem:[#allocation15 + $0x1bc] ss:$72 sps:$4 sm:$0xff]  }
 0xae9   :  { %v3625_v37 = vadd.f32 %v8410_v62, %v3624_v28  ;;  %v3639_v2 = vmax.f32 %v3633_v31, 0.0  ;;  %v9665_v62 = vld [vmem:[#allocation15 + $0x248] ss:$72 sps:$4 sm:$0xff]   ;;  %v9676_v28 = vld [vmem:[#allocation15 + $0x124] ss:$72 sps:$4 sm:$0xff]  }
 0xaea   :  { %v9668_v31 = vld [vmem:[#allocation15 + $0x1b0] ss:$72 sps:$4 sm:$0xff]  }
 0xaeb   :  { %v3637_v39 = vmax.f32 %v3625_v37, 0.0  ;;  %v3647_v13 = vpack.c.bf16 %v3639_v2, %v3638_v53  ;;  %v9679_v37 = vld [vmem:[#allocation15 + $0x12c] ss:$72 sps:$4 sm:$0xff]   ;;  %v9674_v2 = vld [vmem:[#allocation15 + $0x120] ss:$72 sps:$4 sm:$0xff]  }
 0xaec   :  { %v9685_v53 = vld [vmem:[#allocation15 + $0x9c] ss:$72 sps:$4 sm:$0xff]  }
 0xaed   :  { %v3646_v54 = vpack.c.bf16 %v3637_v39, %v3636_v32  ;;  %v9677_v32 = vld [vmem:[#allocation15 + $0x128] ss:$72 sps:$4 sm:$0xff]   ;;  %v9682_v39 = vld [vmem:[#allocation15 + $0x94] ss:$72 sps:$4 sm:$0xff]  }
 0xaef   :  { %8416 = vmatmul.mubr.msk.bf16.vlgmr.msra.gmra.mxu0 %vm223_vm12, %v3646_v54  ;;  %9321 = vmatprep.mubr.msk.bf16.mxu1 %vm223_vm12, %v3646_v54  ;;  %v9683_v54 = vld [vmem:[#allocation15 + $0x98] ss:$72 sps:$4 sm:$0xff]  }
 0xaf0   :  { %4491 = vmatpush1.bf16.msra.mxu0 %v9644_v20  ;;  %9322 = vmatmul.mubr.msk.bf16.vlgmr.msra.gmra.mxu1 %vm223_vm12, %v3647_v13  ;;  %v9680_v20 = vld [vmem:[#allocation15 + $0x90] ss:$72 sps:$4 sm:$0xff]  }
 0xaf1   :  { %4544 = vmatpush1.bf16.msra.mxu1 %v9647_v33  ;;  %4492 = vmatprep.subr.bf16.mxu0 %v9652_v59  ;;  %v9688_v33 = vld [vmem:[#allocation15 + $0x4] ss:$72 sps:$4 sm:$0xff]  }
 0xaf2   :  { %4545 = vmatprep.subr.bf16.mxu1 %v9655_v60  ;;  %3708 = vmatprep.mubr.bf16.mxu0 %v11930_v55  ;;  %v9691_v59 = vld [vmem:[#allocation15 + $0xc] ss:$72 sps:$4 sm:$0xff]   ;;  %v9689_v60 = vld [vmem:[#allocation15 + $0x8] ss:$72 sps:$4 sm:$0xff]  }
 0xaf3   :  { %4575 = vmatprep.mubr.bf16.mxu1 %v11930_v55 }
 0xaf4   :  { %4493 = vmatpush1.bf16.msra.mxu0 %v9650_v47  ;;  %v9694_v47 = vld [vmem:[#allocation15 + $0x404] ss:$72 sps:$4 sm:$0xff]  }
 0xaf5   :  { %4546 = vmatpush1.bf16.msra.mxu1 %v9653_v9  ;;  %4494 = vmatprep.subr.bf16.mxu0 %v9658_v46  ;;  %v9697_v9 = vld [vmem:[#allocation15 + $0x40c] ss:$72 sps:$4 sm:$0xff]   ;;  %v9692_v46 = vld [vmem:[#allocation15 + $0x400] ss:$72 sps:$4 sm:$0xff]  }
 0xaf6   :  { %4547 = vmatprep.subr.bf16.mxu1 %v9661_v24  ;;  %v11000_v24 = vpack.c.bf16 %v10970_v42, %v10966_v10  ;;  %v9709_v10 = vld [vmem:[#allocation15 + $0x2ec] ss:$72 sps:$4 sm:$0xff]   ;;  %v9704_v42 = vld [vmem:[#allocation15 + $0x2e0] ss:$72 sps:$4 sm:$0xff]  }
 0xaf7   :  { %8417 = vmatmul.mubr.msk.bf16.gmra.mxu0 %vm223_vm12, %v3647_v13  ;;  %v9686_v13 = vld [vmem:[#allocation15] ss:$72 sps:$4 sm:$0xff]  }
 0xaf8   :  { %4495 = vmatpush1.bf16.msra.mxu0 %v9656_v22  ;;  %4522 = vmatprep.mubr.bf16.mxu0 %v11930_v55  ;;  %v9695_v22 = vld [vmem:[#allocation15 + $0x408] ss:$72 sps:$4 sm:$0xff]  }
 0xaf9   :  { %4548 = vmatpush1.bf16.msra.mxu1 %v9659_v44  ;;  %4496 = vmatprep.subr.bf16.mxu0 %v9664_v63  ;;  %v9700_v44 = vld [vmem:[#allocation15 + $0x374] ss:$72 sps:$4 sm:$0xff]  }
 0xafa   :  { %4549 = vmatprep.subr.bf16.mxu1 %v9667_v26  ;;  %v9703_v63 = vld [vmem:[#allocation15 + $0x37c] ss:$72 sps:$4 sm:$0xff]   ;;  %v9698_v26 = vld [vmem:[#allocation15 + $0x370] ss:$72 sps:$4 sm:$0xff]  }
 0xafc   :  { %4497 = vmatpush1.bf16.msra.mxu0 %v9662_v27  ;;  %v9701_v27 = vld [vmem:[#allocation15 + $0x378] ss:$72 sps:$4 sm:$0xff]  }
 0xafd   :  { %4550 = vmatpush1.bf16.msra.mxu1 %v9665_v62  ;;  %4498 = vmatprep.subr.bf16.mxu0 %v9670_v3  ;;  %v9706_v62 = vld [vmem:[#allocation15 + $0x2e4] ss:$72 sps:$4 sm:$0xff]   ;;  %v9707_v3 = vld [vmem:[#allocation15 + $0x2e8] ss:$72 sps:$4 sm:$0xff]  }
 0xafe   :  { %4551 = vmatprep.subr.bf16.mxu1 %v9673_v19  ;;  %v9712_v19 = vld [vmem:[#allocation15 + $0x254] ss:$72 sps:$4 sm:$0xff]  }
 0xb00   :  { %4499 = vmatpush1.bf16.msra.mxu0 %v9668_v31  ;;  %v9715_v31 = vld [vmem:[#allocation15 + $0x25c] ss:$72 sps:$4 sm:$0xff]  }
 0xb01   :  { %4552 = vmatpush1.bf16.msra.mxu1 %v9671_v58  ;;  %4500 = vmatprep.subr.bf16.mxu0 %v9676_v28  ;;  %v9710_v58 = vld [vmem:[#allocation15 + $0x250] ss:$72 sps:$4 sm:$0xff]  }
 0xb02   :  { %4553 = vmatprep.subr.bf16.mxu1 %v9679_v37  ;;  %v9713_v28 = vld [vmem:[#allocation15 + $0x258] ss:$72 sps:$4 sm:$0xff]   ;;  %v9718_v37 = vld [vmem:[#allocation15 + $0x1c4] ss:$72 sps:$4 sm:$0xff]  }
 0xb04   :  { %4501 = vmatpush1.bf16.msra.mxu0 %v9674_v2  ;;  %v9721_v2 = vld [vmem:[#allocation15 + $0x1cc] ss:$72 sps:$4 sm:$0xff]  }
 0xb05   :  { %4554 = vmatpush1.bf16.msra.mxu1 %v9677_v32  ;;  %4502 = vmatprep.subr.bf16.mxu0 %v9682_v39  ;;  %v9716_v32 = vld [vmem:[#allocation15 + $0x1c0] ss:$72 sps:$4 sm:$0xff]  }
 0xb06   :  { %4555 = vmatprep.subr.bf16.mxu1 %v9685_v53  ;;  %v9719_v39 = vld [vmem:[#allocation15 + $0x1c8] ss:$72 sps:$4 sm:$0xff]   ;;  %v9724_v53 = vld [vmem:[#allocation15 + $0x134] ss:$72 sps:$4 sm:$0xff]  }
 0xb08   :  { %4503 = vmatpush1.bf16.msra.mxu0 %v9680_v20  ;;  %v9727_v20 = vld [vmem:[#allocation15 + $0x13c] ss:$72 sps:$4 sm:$0xff]  }
 0xb09   :  { %4556 = vmatpush1.bf16.msra.mxu1 %v9683_v54  ;;  %4504 = vmatprep.subr.bf16.mxu0 %v9688_v33  ;;  %v9722_v54 = vld [vmem:[#allocation15 + $0x130] ss:$72 sps:$4 sm:$0xff]  }
 0xb0a   :  { %4557 = vmatprep.subr.bf16.mxu1 %v9691_v59  ;;  %v9725_v33 = vld [vmem:[#allocation15 + $0x138] ss:$72 sps:$4 sm:$0xff]   ;;  %v9730_v59 = vld [vmem:[#allocation15 + $0xa4] ss:$72 sps:$4 sm:$0xff]  }
 0xb0c   :  { %4505 = vmatpush1.bf16.msra.mxu0 %v9686_v13  ;;  %v9733_v13 = vld [vmem:[#allocation15 + $0xac] ss:$72 sps:$4 sm:$0xff]  }
 0xb0d   :  { %4558 = vmatpush1.bf16.msra.mxu1 %v9689_v60  ;;  %4596 = vmatprep.subr.bf16.mxu0 %v9694_v47  ;;  %v9728_v60 = vld [vmem:[#allocation15 + $0xa0] ss:$72 sps:$4 sm:$0xff]  }
 0xb0e   :  { %4649 = vmatprep.subr.bf16.mxu1 %v9697_v9  ;;  %v9731_v47 = vld [vmem:[#allocation15 + $0xa8] ss:$72 sps:$4 sm:$0xff]   ;;  %v9736_v9 = vld [vmem:[#allocation15 + $0x14] ss:$72 sps:$4 sm:$0xff]  }
 0xb0f   :  { %4523 = vmatmul.mubr.bf16.vlgmr.msra.gmra.mxu0 %v11000_v24 }
 0xb10   :  { %4576 = vmatmul.mubr.bf16.vlgmr.msra.gmra.mxu1 %v11000_v24  ;;  %4597 = vmatpush1.bf16.msra.mxu0 %v9692_v46  ;;  %v9739_v46 = vld [vmem:[#allocation15 + $0x1c] ss:$72 sps:$4 sm:$0xff]  }
 0xb11   :  { %4650 = vmatpush1.bf16.msra.mxu1 %v9695_v22  ;;  %4598 = vmatprep.subr.bf16.mxu0 %v9700_v44  ;;  %v9734_v22 = vld [vmem:[#allocation15 + $0x10] ss:$72 sps:$4 sm:$0xff]  }
 0xb12   :  { %4651 = vmatprep.subr.bf16.mxu1 %v9703_v63  ;;  %4532 = vmatprep.mubr.bf16.mxu0 %v11930_v55  ;;  %v9737_v44 = vld [vmem:[#allocation15 + $0x18] ss:$72 sps:$4 sm:$0xff]   ;;  %v9742_v63 = vld [vmem:[#allocation15 + $0x414] ss:$72 sps:$4 sm:$0xff]  }
 0xb13   :  { %4585 = vmatprep.mubr.bf16.mxu1 %v11930_v55 }
 0xb14   :  { %4599 = vmatpush1.bf16.msra.mxu0 %v9698_v26  ;;  %v9745_v26 = vld [vmem:[#allocation15 + $0x41c] ss:$72 sps:$4 sm:$0xff]  }
 0xb15   :  { %4652 = vmatpush1.bf16.msra.mxu1 %v9701_v27  ;;  %4600 = vmatprep.subr.bf16.mxu0 %v9706_v62  ;;  %v9740_v27 = vld [vmem:[#allocation15 + $0x410] ss:$72 sps:$4 sm:$0xff]  }
 0xb16   :  { %4653 = vmatprep.subr.bf16.mxu1 %v9709_v10  ;;  %v9743_v62 = vld [vmem:[#allocation15 + $0x418] ss:$72 sps:$4 sm:$0xff]   ;;  %v9748_v10 = vld [vmem:[#allocation15 + $0x384] ss:$72 sps:$4 sm:$0xff]  }
 0xb17   :  { %4533 = vmatmul.mubr.bf16.gmra.mxu0 %v10968_v57 }
 0xb18   :  { %4586 = vmatmul.mubr.bf16.gmra.mxu1 %v10968_v57  ;;  %4601 = vmatpush1.bf16.msra.mxu0 %v9704_v42  ;;  %v9751_v42 = vld [vmem:[#allocation15 + $0x38c] ss:$72 sps:$4 sm:$0xff]  }
 0xb19   :  { %4654 = vmatpush1.bf16.msra.mxu1 %v9707_v3  ;;  %4602 = vmatprep.subr.bf16.mxu0 %v9712_v19  ;;  %v9746_v3 = vld [vmem:[#allocation15 + $0x380] ss:$72 sps:$4 sm:$0xff]  }
 0xb1a   :  { %4655 = vmatprep.subr.bf16.mxu1 %v9715_v31  ;;  %4628 = vmatprep.mubr.bf16.mxu0 %v11930_v55  ;;  %v9749_v19 = vld [vmem:[#allocation15 + $0x388] ss:$72 sps:$4 sm:$0xff]   ;;  %v9754_v31 = vld [vmem:[#allocation15 + $0x2f4] ss:$72 sps:$4 sm:$0xff]  }
 0xb1b   :  { %4681 = vmatprep.mubr.bf16.mxu1 %v11930_v55 }
 0xb1c   :  { %4603 = vmatpush1.bf16.msra.mxu0 %v9710_v58  ;;  %v9757_v58 = vld [vmem:[#allocation15 + $0x2fc] ss:$72 sps:$4 sm:$0xff]  }
 0xb1d   :  { %4656 = vmatpush1.bf16.msra.mxu1 %v9713_v28  ;;  %4604 = vmatprep.subr.bf16.mxu0 %v9718_v37  ;;  %v9752_v28 = vld [vmem:[#allocation15 + $0x2f0] ss:$72 sps:$4 sm:$0xff]  }
 0xb1e   :  { %4657 = vmatprep.subr.bf16.mxu1 %v9721_v2  ;;  %v9755_v37 = vld [vmem:[#allocation15 + $0x2f8] ss:$72 sps:$4 sm:$0xff]   ;;  %v9760_v2 = vld [vmem:[#allocation15 + $0x264] ss:$72 sps:$4 sm:$0xff]  }
 0xb20   :  { %4605 = vmatpush1.bf16.msra.mxu0 %v9716_v32  ;;  %v9763_v32 = vld [vmem:[#allocation15 + $0x26c] ss:$72 sps:$4 sm:$0xff]  }
 0xb21   :  { %4658 = vmatpush1.bf16.msra.mxu1 %v9719_v39  ;;  %4606 = vmatprep.subr.bf16.mxu0 %v9724_v53  ;;  %v9758_v39 = vld [vmem:[#allocation15 + $0x260] ss:$72 sps:$4 sm:$0xff]  }
 0xb22   :  { %4659 = vmatprep.subr.bf16.mxu1 %v9727_v20  ;;  %v9761_v53 = vld [vmem:[#allocation15 + $0x268] ss:$72 sps:$4 sm:$0xff]   ;;  %v9766_v20 = vld [vmem:[#allocation15 + $0x1d4] ss:$72 sps:$4 sm:$0xff]  }
 0xb24   :  { %4607 = vmatpush1.bf16.msra.mxu0 %v9722_v54  ;;  %v9769_v54 = vld [vmem:[#allocation15 + $0x1dc] ss:$72 sps:$4 sm:$0xff]  }
 0xb25   :  { %4660 = vmatpush1.bf16.msra.mxu1 %v9725_v33  ;;  %4608 = vmatprep.subr.bf16.mxu0 %v9730_v59  ;;  %v9764_v33 = vld [vmem:[#allocation15 + $0x1d0] ss:$72 sps:$4 sm:$0xff]  }
 0xb26   :  { %4661 = vmatprep.subr.bf16.mxu1 %v9733_v13  ;;  %v9767_v59 = vld [vmem:[#allocation15 + $0x1d8] ss:$72 sps:$4 sm:$0xff]   ;;  %v9772_v13 = vld [vmem:[#allocation15 + $0x144] ss:$72 sps:$4 sm:$0xff]  }
 0xb28   :  { %4609 = vmatpush1.bf16.msra.mxu0 %v9728_v60  ;;  %v9775_v60 = vld [vmem:[#allocation15 + $0x14c] ss:$72 sps:$4 sm:$0xff]  }
 0xb29   :  { %4662 = vmatpush1.bf16.msra.mxu1 %v9731_v47  ;;  %4610 = vmatprep.subr.bf16.mxu0 %v9736_v9  ;;  %v9770_v47 = vld [vmem:[#allocation15 + $0x140] ss:$72 sps:$4 sm:$0xff]  }
 0xb2a   :  { %4663 = vmatprep.subr.bf16.mxu1 %v9739_v46  ;;  %v9773_v9 = vld [vmem:[#allocation15 + $0x148] ss:$72 sps:$4 sm:$0xff]   ;;  %v9778_v46 = vld [vmem:[#allocation15 + $0xb4] ss:$72 sps:$4 sm:$0xff]  }
 0xb2c   :  { %4611 = vmatpush1.bf16.msra.mxu0 %v9734_v22  ;;  %v9781_v22 = vld [vmem:[#allocation15 + $0xbc] ss:$72 sps:$4 sm:$0xff]  }
 0xb2d   :  { %4664 = vmatpush1.bf16.msra.mxu1 %v9737_v44  ;;  %4702 = vmatprep.subr.bf16.mxu0 %v9742_v63  ;;  %v9776_v44 = vld [vmem:[#allocation15 + $0xb0] ss:$72 sps:$4 sm:$0xff]  }
 0xb2e   :  { %4755 = vmatprep.subr.bf16.mxu1 %v9745_v26  ;;  %v9779_v63 = vld [vmem:[#allocation15 + $0xb8] ss:$72 sps:$4 sm:$0xff]   ;;  %v9784_v26 = vld [vmem:[#allocation15 + $0x24] ss:$72 sps:$4 sm:$0xff]  }
 0xb2f   :  { %4629 = vmatmul.mubr.bf16.vlgmr.msra.gmra.mxu0 %v11000_v24 }
 0xb30   :  { %4682 = vmatmul.mubr.bf16.vlgmr.msra.gmra.mxu1 %v11000_v24  ;;  %4703 = vmatpush1.bf16.msra.mxu0 %v9740_v27  ;;  %v9787_v27 = vld [vmem:[#allocation15 + $0x2c] ss:$72 sps:$4 sm:$0xff]  }
 0xb31   :  { %4756 = vmatpush1.bf16.msra.mxu1 %v9743_v62  ;;  %4704 = vmatprep.subr.bf16.mxu0 %v9748_v10  ;;  %v9782_v62 = vld [vmem:[#allocation15 + $0x20] ss:$72 sps:$4 sm:$0xff]  }
 0xb32   :  { %4757 = vmatprep.subr.bf16.mxu1 %v9751_v42  ;;  %4638 = vmatprep.mubr.bf16.mxu0 %v11930_v55  ;;  %v9785_v10 = vld [vmem:[#allocation15 + $0x28] ss:$72 sps:$4 sm:$0xff]   ;;  %v9790_v42 = vld [vmem:[#allocation15 + $0x424] ss:$72 sps:$4 sm:$0xff]  }
 0xb33   :  { %4691 = vmatprep.mubr.bf16.mxu1 %v11930_v55 }
 0xb34   :  { %4705 = vmatpush1.bf16.msra.mxu0 %v9746_v3  ;;  %v9793_v3 = vld [vmem:[#allocation15 + $0x42c] ss:$72 sps:$4 sm:$0xff]  }
 0xb35   :  { %4758 = vmatpush1.bf16.msra.mxu1 %v9749_v19  ;;  %4706 = vmatprep.subr.bf16.mxu0 %v9754_v31  ;;  %v9788_v19 = vld [vmem:[#allocation15 + $0x420] ss:$72 sps:$4 sm:$0xff]  }
 0xb36   :  { %4759 = vmatprep.subr.bf16.mxu1 %v9757_v58  ;;  %v9791_v31 = vld [vmem:[#allocation15 + $0x428] ss:$72 sps:$4 sm:$0xff]   ;;  %v9796_v58 = vld [vmem:[#allocation15 + $0x394] ss:$72 sps:$4 sm:$0xff]  }
 0xb37   :  { %4639 = vmatmul.mubr.bf16.gmra.mxu0 %v10968_v57 }
 0xb38   :  { %4692 = vmatmul.mubr.bf16.gmra.mxu1 %v10968_v57  ;;  %4707 = vmatpush1.bf16.msra.mxu0 %v9752_v28  ;;  %v9799_v28 = vld [vmem:[#allocation15 + $0x39c] ss:$72 sps:$4 sm:$0xff]  }
 0xb39   :  { %4760 = vmatpush1.bf16.msra.mxu1 %v9755_v37  ;;  %4708 = vmatprep.subr.bf16.mxu0 %v9760_v2  ;;  %v9794_v37 = vld [vmem:[#allocation15 + $0x390] ss:$72 sps:$4 sm:$0xff]  }
 0xb3a   :  { %4761 = vmatprep.subr.bf16.mxu1 %v9763_v32  ;;  %4734 = vmatprep.mubr.bf16.mxu0 %v11930_v55  ;;  %v9797_v2 = vld [vmem:[#allocation15 + $0x398] ss:$72 sps:$4 sm:$0xff]   ;;  %v9802_v32 = vld [vmem:[#allocation15 + $0x304] ss:$72 sps:$4 sm:$0xff]  }
 0xb3b   :  { %4787 = vmatprep.mubr.bf16.mxu1 %v11930_v55 }
 0xb3c   :  { %4709 = vmatpush1.bf16.msra.mxu0 %v9758_v39  ;;  %v9805_v39 = vld [vmem:[#allocation15 + $0x30c] ss:$72 sps:$4 sm:$0xff]  }
 0xb3d   :  { %4762 = vmatpush1.bf16.msra.mxu1 %v9761_v53  ;;  %4710 = vmatprep.subr.bf16.mxu0 %v9766_v20  ;;  %v9800_v53 = vld [vmem:[#allocation15 + $0x300] ss:$72 sps:$4 sm:$0xff]  }
 0xb3e   :  { %4763 = vmatprep.subr.bf16.mxu1 %v9769_v54  ;;  %v9803_v20 = vld [vmem:[#allocation15 + $0x308] ss:$72 sps:$4 sm:$0xff]   ;;  %v9808_v54 = vld [vmem:[#allocation15 + $0x274] ss:$72 sps:$4 sm:$0xff]  }
 0xb40   :  { %4711 = vmatpush1.bf16.msra.mxu0 %v9764_v33  ;;  %v9811_v33 = vld [vmem:[#allocation15 + $0x27c] ss:$72 sps:$4 sm:$0xff]  }
 0xb41   :  { %4764 = vmatpush1.bf16.msra.mxu1 %v9767_v59  ;;  %4712 = vmatprep.subr.bf16.mxu0 %v9772_v13  ;;  %v9806_v59 = vld [vmem:[#allocation15 + $0x270] ss:$72 sps:$4 sm:$0xff]  }
 0xb42   :  { %4765 = vmatprep.subr.bf16.mxu1 %v9775_v60  ;;  %v9809_v13 = vld [vmem:[#allocation15 + $0x278] ss:$72 sps:$4 sm:$0xff]   ;;  %v9814_v60 = vld [vmem:[#allocation15 + $0x1e4] ss:$72 sps:$4 sm:$0xff]  }
 0xb44   :  { %4713 = vmatpush1.bf16.msra.mxu0 %v9770_v47  ;;  %v9817_v47 = vld [vmem:[#allocation15 + $0x1ec] ss:$72 sps:$4 sm:$0xff]  }
 0xb45   :  { %4766 = vmatpush1.bf16.msra.mxu1 %v9773_v9  ;;  %4714 = vmatprep.subr.bf16.mxu0 %v9778_v46  ;;  %v9812_v9 = vld [vmem:[#allocation15 + $0x1e0] ss:$72 sps:$4 sm:$0xff]  }
 0xb46   :  { %4767 = vmatprep.subr.bf16.mxu1 %v9781_v22  ;;  %v9815_v46 = vld [vmem:[#allocation15 + $0x1e8] ss:$72 sps:$4 sm:$0xff]   ;;  %v9820_v22 = vld [vmem:[#allocation15 + $0x154] ss:$72 sps:$4 sm:$0xff]  }
 0xb48   :  { %4715 = vmatpush1.bf16.msra.mxu0 %v9776_v44  ;;  %v9823_v44 = vld [vmem:[#allocation15 + $0x15c] ss:$72 sps:$4 sm:$0xff]  }
 0xb49   :  { %4768 = vmatpush1.bf16.msra.mxu1 %v9779_v63  ;;  %4716 = vmatprep.subr.bf16.mxu0 %v9784_v26  ;;  %v9818_v63 = vld [vmem:[#allocation15 + $0x150] ss:$72 sps:$4 sm:$0xff]  }
 0xb4a   :  { %4769 = vmatprep.subr.bf16.mxu1 %v9787_v27  ;;  %v9821_v26 = vld [vmem:[#allocation15 + $0x158] ss:$72 sps:$4 sm:$0xff]   ;;  %v9826_v27 = vld [vmem:[#allocation15 + $0xc4] ss:$72 sps:$4 sm:$0xff]  }
 0xb4c   :  { %4717 = vmatpush1.bf16.msra.mxu0 %v9782_v62  ;;  %v9829_v62 = vld [vmem:[#allocation15 + $0xcc] ss:$72 sps:$4 sm:$0xff]  }
 0xb4d   :  { %4770 = vmatpush1.bf16.msra.mxu1 %v9785_v10  ;;  %4808 = vmatprep.subr.bf16.mxu0 %v9790_v42  ;;  %v9824_v10 = vld [vmem:[#allocation15 + $0xc0] ss:$72 sps:$4 sm:$0xff]  }
 0xb4e   :  { %4861 = vmatprep.subr.bf16.mxu1 %v9793_v3  ;;  %v9827_v42 = vld [vmem:[#allocation15 + $0xc8] ss:$72 sps:$4 sm:$0xff]   ;;  %v9832_v3 = vld [vmem:[#allocation15 + $0x34] ss:$72 sps:$4 sm:$0xff]  }
 0xb4f   :  { %4735 = vmatmul.mubr.bf16.vlgmr.msra.gmra.mxu0 %v11000_v24 }
 0xb50   :  { %4788 = vmatmul.mubr.bf16.vlgmr.msra.gmra.mxu1 %v11000_v24  ;;  %4809 = vmatpush1.bf16.msra.mxu0 %v9788_v19  ;;  %v9835_v19 = vld [vmem:[#allocation15 + $0x3c] ss:$72 sps:$4 sm:$0xff]  }
 0xb51   :  { %4862 = vmatpush1.bf16.msra.mxu1 %v9791_v31  ;;  %4810 = vmatprep.subr.bf16.mxu0 %v9796_v58  ;;  %v3075_v31 = vld [vmem:[#allocation16 + $0x1c0] sm:$0xff] }
 0xb52   :  { %4863 = vmatprep.subr.bf16.mxu1 %v9799_v28  ;;  %4744 = vmatprep.mubr.bf16.mxu0 %v11930_v55  ;;  %v3079_v58 = vld [vmem:[#allocation16 + $0x1e0] sm:$0xff]  ;;  %v9830_v28 = vld [vmem:[#allocation15 + $0x30] ss:$72 sps:$4 sm:$0xff]  }
 0xb53   :  { %4797 = vmatprep.mubr.bf16.mxu1 %v11930_v55 }
 0xb54   :  { %4811 = vmatpush1.bf16.msra.mxu0 %v9794_v37  ;;  %v9833_v37 = vld [vmem:[#allocation15 + $0x38] ss:$72 sps:$4 sm:$0xff]  }
 0xb55   :  { %4864 = vmatpush1.bf16.msra.mxu1 %v9797_v2  ;;  %4812 = vmatprep.subr.bf16.mxu0 %v9802_v32  ;;  %v9838_v2 = vld [vmem:[#allocation15 + $0x434] ss:$72 sps:$4 sm:$0xff]   ;;  %v8621_v32 = vcombine.high %v3075_v31, %v3079_v58 }
 0xb56   :  { %4865 = vmatprep.subr.bf16.mxu1 %v9805_v39  ;;  %v9836_v39 = vld [vmem:[#allocation15 + $0x430] ss:$72 sps:$4 sm:$0xff]  }
 0xb57   :  { %4745 = vmatmul.mubr.bf16.gmra.mxu0 %v10968_v57 }
 0xb58   :  { %4798 = vmatmul.mubr.bf16.gmra.mxu1 %v10968_v57  ;;  %4813 = vmatpush1.bf16.msra.mxu0 %v9800_v53  ;;  %v3067_v53 = vld [vmem:[#allocation16 + $0x180] sm:$0xff] }
 0xb59   :  { %4866 = vmatpush1.bf16.msra.mxu1 %v9803_v20  ;;  %4814 = vmatprep.subr.bf16.mxu0 %v9808_v54  ;;  %v3071_v20 = vld [vmem:[#allocation16 + $0x1a0] sm:$0xff] }
 0xb5a   :  { %4867 = vmatprep.subr.bf16.mxu1 %v9811_v33  ;;  %4840 = vmatprep.mubr.bf16.mxu0 %v11930_v55  ;;  %v9841_v54 = vld [vmem:[#allocation15 + $0x3a4] ss:$72 sps:$4 sm:$0xff]   ;;  %v8620_v33 = vcombine.low %v3075_v31, %v3079_v58  ;;  %v9850_v31 = vld [vmem:[#allocation15 + $0x1f4] ss:$72 sps:$4 sm:$0xff]  }
 0xb5b   :  { %4893 = vmatprep.mubr.bf16.mxu1 %v11930_v55 }
 0xb5c   :  { %4815 = vmatpush1.bf16.msra.mxu0 %v9806_v59  ;;  %v8613_v59 = vcombine.high %v3067_v53, %v3071_v20 }
 0xb5d   :  { %4868 = vmatpush1.bf16.msra.mxu1 %v9809_v13  ;;  %4816 = vmatprep.subr.bf16.mxu0 %v9814_v60  ;;  %v9839_v13 = vld [vmem:[#allocation15 + $0x3a0] ss:$72 sps:$4 sm:$0xff]  }
 0xb5e   :  { %4869 = vmatprep.subr.bf16.mxu1 %v9817_v47  ;;  %v3059_v60 = vld [vmem:[#allocation16 + $0x140] sm:$0xff] }
 0xb5f   :  { %v3063_v47 = vld [vmem:[#allocation16 + $0x160] sm:$0xff] }
 0xb60   :  { %4817 = vmatpush1.bf16.msra.mxu0 %v9812_v9  ;;  %v9844_v9 = vld [vmem:[#allocation15 + $0x314] ss:$72 sps:$4 sm:$0xff]  }
 0xb61   :  { %4870 = vmatpush1.bf16.msra.mxu1 %v9815_v46  ;;  %4818 = vmatprep.subr.bf16.mxu0 %v9820_v22  ;;  %v8612_v46 = vcombine.low %v3067_v53, %v3071_v20  ;;  %v8605_v22 = vcombine.high %v3059_v60, %v3063_v47 }
 0xb62   :  { %4871 = vmatprep.subr.bf16.mxu1 %v9823_v44  ;;  %v9842_v44 = vld [vmem:[#allocation15 + $0x310] ss:$72 sps:$4 sm:$0xff]  }
 0xb64   :  { %4819 = vmatpush1.bf16.msra.mxu0 %v9818_v63  ;;  %v3051_v63 = vld [vmem:[#allocation16 + $0x100] sm:$0xff] }
 0xb65   :  { %4872 = vmatpush1.bf16.msra.mxu1 %v9821_v26  ;;  %4820 = vmatprep.subr.bf16.mxu0 %v9826_v27  ;;  %v3055_v26 = vld [vmem:[#allocation16 + $0x120] sm:$0xff] }
 0xb66   :  { %4873 = vmatprep.subr.bf16.mxu1 %v9829_v62  ;;  %v9847_v27 = vld [vmem:[#allocation15 + $0x284] ss:$72 sps:$4 sm:$0xff]   ;;  %v8604_v62 = vcombine.low %v3059_v60, %v3063_v47  ;;  %v8596_v58 = vcombine.low %v3051_v63, %v3055_v26 }
 0xb68   :  { %4821 = vmatpush1.bf16.msra.mxu0 %v9824_v10  ;;  %v8597_v10 = vcombine.high %v3051_v63, %v3055_v26  ;;  %v3203_v26 = vld [vmem:[#allocation16 + $0x5c0] sm:$0xff] }
 0xb69   :  { %4874 = vmatpush1.bf16.msra.mxu1 %v9827_v42  ;;  %4822 = vmatprep.subr.bf16.mxu0 %v9832_v3  ;;  %v9845_v42 = vld [vmem:[#allocation15 + $0x280] ss:$72 sps:$4 sm:$0xff]  }
 0xb6a   :  { %4875 = vmatprep.subr.bf16.mxu1 %v9835_v19  ;;  %v3043_v3 = vld [vmem:[#allocation16 + $0xc0] sm:$0xff] }
 0xb6b   :  { %v3047_v19 = vld [vmem:[#allocation16 + $0xe0] sm:$0xff] }
 0xb6c   :  { %4823 = vmatpush1.bf16.msra.mxu0 %v9830_v28  ;;  %v8589_v28 = vcombine.high %v3043_v3, %v3047_v19  ;;  %v8588_v53 = vcombine.low %v3043_v3, %v3047_v19  ;;  %v3143_v3 = vld [vmem:[#allocation16 + $0x3e0] sm:$0xff] }
 0xb6d   :  { %4876 = vmatpush1.bf16.msra.mxu1 %v9833_v37  ;;  %4914 = vmatprep.subr.bf16.mxu0 %v9838_v2  ;;  %v9848_v37 = vld [vmem:[#allocation15 + $0x1f0] ss:$72 sps:$4 sm:$0xff]   ;;  %v3035_v2 = vld [vmem:[#allocation16 + $0x80] sm:$0xff] }
 0xb6e   :  { %6061 = vmatprep.subr.bf16.mxu1 %v8621_v32  ;;  %v3039_v32 = vld [vmem:[#allocation16 + $0xa0] sm:$0xff] }
 0xb6f   :  { %4841 = vmatmul.mubr.bf16.vlgmr.msra.gmra.mxu0 %v11000_v24  ;;  %v8581_v20 = vcombine.high %v3035_v2, %v3039_v32  ;;  %v8580_v60 = vcombine.low %v3035_v2, %v3039_v32  ;;  %v3131_v32 = vld [vmem:[#allocation16 + $0x380] sm:$0xff] }
 0xb70   :  { %4894 = vmatmul.mubr.bf16.vlgmr.msra.gmra.mxu1 %v11000_v24  ;;  %4915 = vmatpush1.bf16.msra.mxu0 %v9836_v39  ;;  %v9853_v39 = vld [vmem:[#allocation15 + $0x164] ss:$72 sps:$4 sm:$0xff]  }
 0xb71   :  { %4916 = vmatprep.subr.bf16.mxu0 %v9841_v54  ;;  %4850 = vmatprep.mubr.bf16.mxu0 %v11930_v55  ;;  %v9851_v54 = vld [vmem:[#allocation15 + $0x160] ss:$72 sps:$4 sm:$0xff]  }
 0xb72   :  { %4903 = vmatprep.mubr.bf16.mxu1 %v11930_v55  ;;  %6062 = vmatpush1.bf16.msra.mxu1 %v8620_v33  ;;  %v3027_v33 = vld [vmem:[#allocation16 + $0x40] sm:$0xff] }
 0xb73   :  { %6063 = vmatprep.subr.bf16.mxu1 %v8613_v59  ;;  %v3031_v59 = vld [vmem:[#allocation16 + $0x60] sm:$0xff] }
 0xb74   :  { %4917 = vmatpush1.bf16.msra.mxu0 %v9839_v13  ;;  %v9856_v13 = vld [vmem:[#allocation15 + $0xd4] ss:$72 sps:$4 sm:$0xff]   ;;  %v8573_v47 = vcombine.high %v3027_v33, %v3031_v59  ;;  %v8572_v63 = vcombine.low %v3027_v33, %v3031_v59  ;;  %v3191_v33 = vld [vmem:[#allocation16 + $0x560] sm:$0xff] }
 0xb75   :  { %4918 = vmatprep.subr.bf16.mxu0 %v9844_v9  ;;  %v9854_v9 = vld [vmem:[#allocation15 + $0xd0] ss:$72 sps:$4 sm:$0xff]  }
 0xb76   :  { %6064 = vmatpush1.bf16.msra.mxu1 %v8612_v46  ;;  %v3019_v46 = vld [vmem:[#allocation16] sm:$0xff] }
 0xb77   :  { %4851 = vmatmul.mubr.bf16.gmra.mxu0 %v10968_v57  ;;  %6065 = vmatprep.subr.bf16.mxu1 %v8605_v22  ;;  %v3023_v22 = vld [vmem:[#allocation16 + $0x20] sm:$0xff] }
 0xb78   :  { %4904 = vmatmul.mubr.bf16.gmra.mxu1 %v10968_v57  ;;  %4919 = vmatpush1.bf16.msra.mxu0 %v9842_v44  ;;  %v9859_v44 = vld [vmem:[#allocation15 + $0x44] ss:$72 sps:$4 sm:$0xff]  }
 0xb79   :  { %4920 = vmatprep.subr.bf16.mxu0 %v9847_v27  ;;  %4946 = vmatprep.mubr.bf16.mxu0 %v11930_v55  ;;  %v3207_v27 = vld [vmem:[#allocation16 + $0x5e0] sm:$0xff] }
 0xb7a   :  { %6066 = vmatpush1.bf16.msra.mxu1 %v8604_v62  ;;  %v8565_v62 = vcombine.high %v3019_v46, %v3023_v22  ;;  %v8749_v19 = vcombine.high %v3203_v26, %v3207_v27  ;;  %v8748_v2 = vcombine.low %v3203_v26, %v3207_v27  ;;  %v3115_v27 = vld [vmem:[#allocation16 + $0x300] sm:$0xff] }
 0xb7b   :  { %6067 = vmatprep.subr.bf16.mxu1 %v8597_v10  ;;  %v9857_v10 = vld [vmem:[#allocation15 + $0x40] ss:$72 sps:$4 sm:$0xff]  }
 0xb7c   :  { %4921 = vmatpush1.bf16.msra.mxu0 %v9845_v42  ;;  %v3139_v42 = vld [vmem:[#allocation16 + $0x3c0] sm:$0xff] }
 0xb7d   :  { %4922 = vmatprep.subr.bf16.mxu0 %v9850_v31  ;;  %v8564_v31 = vcombine.low %v3019_v46, %v3023_v22  ;;  %v3179_v22 = vld [vmem:[#allocation16 + $0x500] sm:$0xff] }
 0xb7e   :  { %6068 = vmatpush1.bf16.msra.mxu1 %v8596_v58  ;;  %v3195_v58 = vld [vmem:[#allocation16 + $0x580] sm:$0xff] }
 0xb7f   :  { %6069 = vmatprep.subr.bf16.mxu1 %v8589_v28  ;;  %v3199_v28 = vld [vmem:[#allocation16 + $0x5a0] sm:$0xff] }
 0xb80   :  { %4923 = vmatpush1.bf16.msra.mxu0 %v9848_v37  ;;  %v8685_v37 = vcombine.high %v3139_v42, %v3143_v3 }
 0xb81   :  { %4924 = vmatprep.subr.bf16.mxu0 %v9853_v39  ;;  %v3135_v39 = vld [vmem:[#allocation16 + $0x3a0] sm:$0xff] }
 0xb82   :  { %6070 = vmatpush1.bf16.msra.mxu1 %v8588_v53  ;;  %v8741_v53 = vcombine.high %v3195_v58, %v3199_v28  ;;  %v8677_v59 = vcombine.high %v3131_v32, %v3135_v39  ;;  %v8676_v46 = vcombine.low %v3131_v32, %v3135_v39  ;;  %v3163_v32 = vld [vmem:[#allocation16 + $0x480] sm:$0xff] }
 0xb83   :  { %6071 = vmatprep.subr.bf16.mxu1 %v8581_v20  ;;  %v8684_v20 = vcombine.low %v3139_v42, %v3143_v3  ;;  %v3171_v42 = vld [vmem:[#allocation16 + $0x4c0] sm:$0xff] }
 0xb84   :  { %4925 = vmatpush1.bf16.msra.mxu0 %v9851_v54  ;;  %v3187_v54 = vld [vmem:[#allocation16 + $0x540] sm:$0xff] }
 0xb85   :  { %4926 = vmatprep.subr.bf16.mxu0 %v9856_v13  ;;  %v8740_v13 = vcombine.low %v3195_v58, %v3199_v28  ;;  %v8732_v26 = vcombine.low %v3187_v54, %v3191_v33  ;;  %v3175_v3 = vld [vmem:[#allocation16 + $0x4e0] sm:$0xff] }
 0xb86   :  { %6072 = vmatpush1.bf16.msra.mxu1 %v8580_v60  ;;  %v3123_v60 = vld [vmem:[#allocation16 + $0x340] sm:$0xff] }
 0xb87   :  { %6073 = vmatprep.subr.bf16.mxu1 %v8573_v47  ;;  %v3127_v47 = vld [vmem:[#allocation16 + $0x360] sm:$0xff] }
 0xb88   :  { %4927 = vmatpush1.bf16.msra.mxu0 %v9854_v9  ;;  %v8733_v9 = vcombine.high %v3187_v54, %v3191_v33  ;;  %v3107_v58 = vld [vmem:[#allocation16 + $0x2c0] sm:$0xff] }
 0xb89   :  { %4928 = vmatprep.subr.bf16.mxu0 %v9859_v44  ;;  %v3183_v44 = vld [vmem:[#allocation16 + $0x520] sm:$0xff] }
 0xb8a   :  { %6074 = vmatpush1.bf16.msra.mxu1 %v8572_v63  ;;  %v8669_v63 = vcombine.high %v3123_v60, %v3127_v47  ;;  %v3111_v28 = vld [vmem:[#allocation16 + $0x2e0] sm:$0xff] }
 0xb8b   :  { %6075 = vmatprep.subr.bf16.mxu1 %v8565_v62  ;;  %v8725_v62 = vcombine.high %v3179_v22, %v3183_v44  ;;  %v3167_v39 = vld [vmem:[#allocation16 + $0x4a0] sm:$0xff] }
 0xb8c   :  { %4929 = vmatpush1.bf16.msra.mxu0 %v9857_v10  ;;  %v8668_v10 = vcombine.low %v3123_v60, %v3127_v47  ;;  %v3099_v54 = vld [vmem:[#allocation16 + $0x280] sm:$0xff]  ;;  %v8709_v33 = vcombine.high %v3163_v32, %v3167_v39 }
 0xb8d   :  { %6114 = vmatprep.subr.bf16.mxu0 %v8749_v19  ;;  %v3159_v60 = vld [vmem:[#allocation16 + $0x460] sm:$0xff] }
 0xb8e   :  { %6076 = vmatpush1.bf16.msra.mxu1 %v8564_v31  ;;  %v8724_v31 = vcombine.low %v3179_v22, %v3183_v44  ;;  %v3095_v22 = vld [vmem:[#allocation16 + $0x260] sm:$0xff] }
 0xb8f   :  { %4947 = vmatmul.mubr.bf16.vlgmr.msra.gmra.mxu0 %v11000_v24  ;;  %6077 = vmatprep.subr.bf16.mxu1 %v8685_v37  ;;  %v3119_v24 = vld [vmem:[#allocation16 + $0x320] sm:$0xff]  ;;  %v8717_v37 = vcombine.high %v3171_v42, %v3175_v3 }
 0xb90   :  { %4956 = vmatprep.mubr.bf16.mxu0 %v11930_v55  ;;  %6115 = vmatpush1.bf16.msra.mxu0 %v8748_v2  ;;  %v8661_v19 = vcombine.high %v3115_v27, %v3119_v24  ;;  %v8660_v2 = vcombine.low %v3115_v27, %v3119_v24  ;;  %v3151_v27 = vld [vmem:[#allocation16 + $0x420] sm:$0xff] }
 0xb91   :  { %6116 = vmatprep.subr.bf16.mxu0 %v8741_v53  ;;  %v8653_v53 = vcombine.high %v3107_v58, %v3111_v28 }
 0xb92   :  { %6078 = vmatpush2.bf16.msra.mxu1 %v8684_v20  ;;  %v8716_v20 = vcombine.low %v3171_v42, %v3175_v3  ;;  %v3087_v42 = vld [vmem:[#allocation16 + $0x220] sm:$0xff] }
 0xb93   :  { %6079 = vmatprep.subr.bf16.mxu1 %v8677_v59  ;;  %v8652_v59 = vcombine.low %v3107_v58, %v3111_v28  ;;  %v3080_v58 = vld [vmem:[#allocation16 + $0x1e8] sm:$0xff] }
 0xb94   :  { %6117 = vmatpush1.bf16.msra.mxu0 %v8740_v13  ;;  %v3155_v13 = vld [vmem:[#allocation16 + $0x440] sm:$0xff] }
 0xb95   :  { %6118 = vmatprep.subr.bf16.mxu0 %v8733_v9  ;;  %v8708_v9 = vcombine.low %v3163_v32, %v3167_v39  ;;  %v8701_v44 = vcombine.high %v3155_v13, %v3159_v60  ;;  %v3208_v32 = vld [vmem:[#allocation16 + $0x5e8] sm:$0xff] }
 0xb96   :  { %6080 = vmatpush2.bf16.msra.mxu1 %v8676_v46  ;;  %v3091_v46 = vld [vmem:[#allocation16 + $0x240] sm:$0xff] }
 0xb97   :  { %4957 = vmatmul.mubr.bf16.gmra.mxu0 %v10968_v57  ;;  %6081 = vmatprep.subr.bf16.mxu1 %v8669_v63  ;;  %v3103_v57 = vld [vmem:[#allocation16 + $0x2a0] sm:$0xff]  ;;  %v8637_v24 = vcombine.high %v3091_v46, %v3095_v22 }
 0xb98   :  { %6119 = vmatpush1.bf16.msra.mxu0 %v8732_v26  ;;  %6146 = vmatprep.mubr.bf16.mxu0 %v11930_v55  ;;  %v8645_v47 = vcombine.high %v3099_v54, %v3103_v57  ;;  %v8644_v63 = vcombine.low %v3099_v54, %v3103_v57  ;;  %v3147_v26 = vld [vmem:[#allocation16 + $0x400] sm:$0xff] }
 0xb99   :  { %6120 = vmatprep.subr.bf16.mxu0 %v8725_v62  ;;  %v8700_v62 = vcombine.low %v3155_v13, %v3159_v60  ;;  %v8693_v3 = vcombine.high %v3147_v26, %v3151_v27  ;;  %v8414_v13 = vld [vmem:[#allocation13 + $0x68] ss:$0 sm:$0xff] }
 0xb9a   :  { %6082 = vmatpush2.bf16.msra.mxu1 %v8668_v10  ;;  %v3083_v10 = vld [vmem:[#allocation16 + $0x200] sm:$0xff] }
 0xb9b   :  { %6083 = vmatprep.subr.bf16.mxu1 %v8661_v19  ;;  %v8636_v19 = vcombine.low %v3091_v46, %v3095_v22  ;;  %v8629_v28 = vcombine.high %v3083_v10, %v3087_v42  ;;  %v8415_v46 = vld [vmem:[#allocation13 + $0x70] ss:$0 sm:$0xff] }
 0xb9c   :  { %6121 = vmatpush1.bf16.msra.mxu0 %v8724_v31  ;;  %v3076_v31 = vld [vmem:[#allocation16 + $0x1c8] sm:$0xff] }
 0xb9d   :  { %6122 = vmatprep.subr.bf16.mxu0 %v8717_v37  ;;  %v8692_v37 = vcombine.low %v3147_v26, %v3151_v27  ;;  %v8623_v39 = vcombine.high %v3076_v31, %v3080_v58 }
 0xb9e   :  { %6084 = vmatpush2.bf16.msra.mxu1 %v8660_v2  ;;  %v3204_v2 = vld [vmem:[#allocation16 + $0x5c8] sm:$0xff] }
 0xb9f   :  { %6085 = vmatprep.subr.bf16.mxu1 %v8653_v53  ;;  %v8628_v53 = vcombine.low %v3083_v10, %v3087_v42  ;;  %v3196_v10 = vld [vmem:[#allocation16 + $0x588] sm:$0xff] }
 0xba0   :  { %6123 = vmatpush1.bf16.msra.mxu0 %v8716_v20  ;;  %v8751_v20 = vcombine.high %v3204_v2, %v3208_v32  ;;  %v3200_v42 = vld [vmem:[#allocation16 + $0x5a8] sm:$0xff] }
 0xba1   :  { %6124 = vmatprep.subr.bf16.mxu0 %v8709_v33 }
 0xba2   :  { %6086 = vmatpush2.bf16.msra.mxu1 %v8652_v59 }
 0xba3   :  { %6087 = vmatprep.subr.bf16.mxu1 %v8645_v47  ;;  %v8413_v47 = vld [vmem:[#allocation13 + $0x60] ss:$0 sm:$0xff] }
 0xba4   :  { %6125 = vmatpush1.bf16.msra.mxu0 %v8708_v9 }
 0xba5   :  { %6126 = vmatprep.subr.bf16.mxu0 %v8701_v44 }
 0xba6   :  { %6088 = vmatpush2.bf16.msra.mxu1 %v8644_v63  ;;  %v3068_v63 = vld [vmem:[#allocation16 + $0x188] sm:$0xff] }
 0xba7   :  { %6089 = vmatprep.subr.bf16.mxu1 %v8637_v24 }
 0xba8   :  { %6127 = vmatpush1.bf16.msra.mxu0 %v8700_v62  ;;  %v3072_v62 = vld [vmem:[#allocation16 + $0x1a8] sm:$0xff] }
 0xba9   :  { %6128 = vmatprep.subr.bf16.mxu0 %v8693_v3  ;;  %v8615_v50 = vcombine.high %v3068_v63, %v3072_v62 }
 0xbaa   :  { %6090 = vmatpush2.bf16.msra.mxu1 %v8636_v19 }
 0xbab   :  { %6091 = vmatprep.subr.bf16.mxu1 %v8629_v28 }
 0xbac   :  { %6129 = vmatpush1.bf16.msra.mxu0 %v8692_v37 }
 0xbad   :  { %6167 = vmatprep.subr.bf16.mxu0 %v8623_v39 }
 0xbae   :  { %6092 = vmatpush2.bf16.msra.mxu1 %v8628_v53  ;;  %v8622_v53 = vcombine.low %v3076_v31, %v3080_v58  ;;  %v8614_v31 = vcombine.low %v3068_v63, %v3072_v62  ;;  %v8742_v58 = vcombine.low %v3196_v10, %v3200_v42 }
 0xbaf   :  { %v3700_v54 = vpop.f32.mrf.mxu0  ;;  %6220 = vmatprep.subr.bf16.mxu1 %v8751_v20  ;;  %v8750_v20 = vcombine.low %v3204_v2, %v3208_v32 }
 0xbb0   :  { %v9323_v57 = vpop.f32.mrf.mxu1  ;;  %v3701_v3 = vadd.f32 %v8413_v47, %v3700_v54  ;;  %v3192_v54 = vld [vmem:[#allocation16 + $0x568] sm:$0xff] }
 0xbb1   :  { %v3702_v33 = vpop.f32.mrf.mxu0  ;;  %v3762_v14 = vadd.f32 %v9323_v57, %v8415_v46  ;;  %v8734_v63 = vcombine.low %v3188_v21, %v3192_v54 }
 0xbb2   :  { %v3753_v59 = vpop.f32.mrf.mxu1  ;;  %v3703_v26 = vadd.f32 %v8414_v13, %v3702_v33  ;;  %v8743_v33 = vcombine.high %v3196_v10, %v3200_v42  ;;  %v3044_v10 = vld [vmem:[#allocation16 + $0xc8] sm:$0xff] }
 0xbb3   :  { %v3704_v60 = vpop.f32.mrf.mxu0  ;;  %v3754_v19 = vadd.f32 %v8415_v46, %v3753_v59  ;;  %v3176_v42 = vld [vmem:[#allocation16 + $0x4e8] sm:$0xff] }
 0xbb4   :  { %v9324_v9 = vpop.f32.mrf.mxu1  ;;  %v3705_v22 = vadd.f32 %v8413_v47, %v3704_v60 }
 0xbb5   :  { %v3706_v44 = vpop.f32.mrf.mxu0  ;;  %v3765_v32 = vadd.f32 %v9324_v9, %v8415_v46 }
 0xbb6   :  { %v3707_v27 = vadd.f32 %v8414_v13, %v3706_v44  ;;  %v3756_v24 = vpop.f32.mrf.mxu1  ;;  %v11039_v23 = vpack.c.bf16 %v3705_v22, %v3701_v3  ;;  %v3060_v44 = vld [vmem:[#allocation16 + $0x148] sm:$0xff] }
 0xbb7   :  { %v3757_v28 = vadd.f32 %v8415_v46, %v3756_v24  ;;  %v3710_v37 = vpop.f32.mrf.mxu0  ;;  %v8607_v2 = vcombine.high %v3060_v44, %v3064_v4  ;;  %v8606_v9 = vcombine.low %v3060_v44, %v3064_v4  ;;  %v11049_v62 = vpack.c.bf16 %v3765_v32, %v3762_v14  ;;  %v3172_v46 = vld [vmem:[#allocation16 + $0x4c8] sm:$0xff] }
 0xbb8   :  { %v11037_v39 = vpack.c.bf16 %v3707_v27, %v3703_v26  ;;  %11942 = vst [vmem:[#allocation54_spill] sm:$0xff] %v11039_v23  ;;  %v8735_v27 = vcombine.high %v3188_v21, %v3192_v54  ;;  %v3711_v52 = vadd.f32 %v8413_v47, %v3710_v37  ;;  %v8719_v4 = vcombine.high %v3172_v46, %v3176_v42  ;;  %v3036_v37 = vld [vmem:[#allocation16 + $0x88] sm:$0xff] }
 0xbb9   :  { %v11041_v25 = vpack.c.bf16 %v3757_v28, %v3754_v19  ;;  %v3712_v60 = vpop.f32.mrf.mxu0  ;;  %v3052_v19 = vld [vmem:[#allocation16 + $0x108] sm:$0xff]  ;;  %11944 = vst [vmem:[#allocation56_spill] sm:$0xff] %v11049_v62 }
 0xbba   :  { %6093 = vmatprep.mubr.bf16.mxu1 %v11037_v39  ;;  %v3713_v24 = vadd.f32 %v8414_v13, %v3712_v60  ;;  %v3056_v28 = vld [vmem:[#allocation16 + $0x128] sm:$0xff] }
 0xbbb   :  { %v3714_v59 = vpop.f32.mrf.mxu0  ;;  %6094 = vmatmul.mubr.bf16.vlgmr.msra.gmra.mxu1 %v11039_v23  ;;  %6147 = vmatmul.mubr.bf16.vlgmr.msra.gmra.mxu0 %v11041_v25  ;;  %v8598_v14 = vcombine.low %v3052_v19, %v3056_v28  ;;  %v3040_v60 = vld [vmem:[#allocation16 + $0xa8] sm:$0xff] }
 0xbbc   :  { %6168 = vmatpush1.bf16.msra.mxu0 %v8622_v53  ;;  %6221 = vmatpush1.bf16.msra.mxu1 %v8750_v20  ;;  %v3715_v22 = vadd.f32 %v8413_v47, %v3714_v59  ;;  %v3184_v53 = vld [vmem:[#allocation16 + $0x528] sm:$0xff]  ;;  %v8718_v59 = vcombine.low %v3172_v46, %v3176_v42 }
 0xbbd   :  { %v3716_v26 = vpop.f32.mrf.mxu0  ;;  %6169 = vmatprep.subr.bf16.mxu0 %v8615_v50  ;;  %6222 = vmatprep.subr.bf16.mxu1 %v8743_v33  ;;  %v8727_v57 = vcombine.high %v3180_v40, %v3184_v53  ;;  %v3048_v47 = vld [vmem:[#allocation16 + $0xe8] sm:$0xff]  ;;  %v8726_v21 = vcombine.low %v3180_v40, %v3184_v53 }
 0xbbe   :  { %v3717_v3 = vadd.f32 %v8414_v13, %v3716_v26  ;;  %6156 = vmatprep.mubr.bf16.mxu0 %v11930_v55  ;;  %v11051_v50 = vpack.c.bf16 %v3715_v22, %v3711_v52  ;;  %v8599_v13 = vcombine.high %v3052_v19, %v3056_v28  ;;  %v8591_v52 = vcombine.high %v3044_v10, %v3048_v47  ;;  %v3164_v33 = vld [vmem:[#allocation16 + $0x488] sm:$0xff] }
 0xbbf   :  { %v3168_v44 = vld [vmem:[#allocation16 + $0x4a8] sm:$0xff]  ;;  %v8590_v54 = vcombine.low %v3044_v10, %v3048_v47  ;;  %v8582_v26 = vcombine.low %v3036_v37, %v3040_v60 }
 0xbc0   :  { %v11047_v20 = vpack.c.bf16 %v3717_v3, %v3713_v24  ;;  %6170 = vmatpush1.bf16.msra.mxu0 %v8614_v31  ;;  %6223 = vmatpush1.bf16.msra.mxu1 %v8742_v58  ;;  %11945 = vst [vmem:[#allocation57_spill] sm:$0xff] %v11051_v50  ;;  %v8583_v31 = vcombine.high %v3036_v37, %v3040_v60  ;;  %v3028_v58 = vld [vmem:[#allocation16 + $0x48] sm:$0xff]  ;;  %v3077_v37 = vld [vmem:[#allocation16 + $0x1d0] sm:$0xff] }
 0xbc1   :  { %6171 = vmatprep.subr.bf16.mxu0 %v8607_v2  ;;  %6224 = vmatprep.subr.bf16.mxu1 %v8735_v27  ;;  %v8711_v40 = vcombine.high %v3164_v33, %v3168_v44  ;;  %v3032_v2 = vld [vmem:[#allocation16 + $0x68] sm:$0xff]  ;;  %v8710_v27 = vcombine.low %v3164_v33, %v3168_v44  ;;  %v3081_v60 = vld [vmem:[#allocation16 + $0x1f0] sm:$0xff] }
 0xbc2   :  { %11943 = vst [vmem:[#allocation55_spill] sm:$0xff] %v11047_v20  ;;  %6103 = vmatprep.mubr.bf16.mxu1 %v11047_v20  ;;  %v3156_v32 = vld [vmem:[#allocation16 + $0x448] sm:$0xff]  ;;  %v8575_v24 = vcombine.high %v3028_v58, %v3032_v2  ;;  %v8574_v10 = vcombine.low %v3028_v58, %v3032_v2 }
 0xbc3   :  { %6104 = vmatmul.mubr.bf16.gmra.mxu1 %v11051_v50  ;;  %6157 = vmatmul.mubr.bf16.gmra.mxu0 %v11049_v62  ;;  %v3160_v22 = vld [vmem:[#allocation16 + $0x468] sm:$0xff] }
 0xbc4   :  { %6172 = vmatpush1.bf16.msra.mxu0 %v8606_v9  ;;  %6225 = vmatpush1.bf16.msra.mxu1 %v8734_v63  ;;  %v8703_v3 = vcombine.high %v3156_v32, %v3160_v22  ;;  %v3020_v19 = vld [vmem:[#allocation16 + $0x8] sm:$0xff] }
 0xbc5   :  { %6199 = vmatprep.mubr.bf16.mxu0 %v11037_v39  ;;  %6173 = vmatprep.subr.bf16.mxu0 %v8599_v13  ;;  %v3024_v28 = vld [vmem:[#allocation16 + $0x28] sm:$0xff] }
 0xbc6   :  { %6226 = vmatprep.subr.bf16.mxu1 %v8727_v57  ;;  %6252 = vmatprep.mubr.bf16.mxu1 %v11930_v55  ;;  %v3148_v53 = vld [vmem:[#allocation16 + $0x408] sm:$0xff]  ;;  %v8702_v57 = vcombine.low %v3156_v32, %v3160_v22  ;;  %v8567_v42 = vcombine.high %v3020_v19, %v3024_v28  ;;  %v8625_v32 = vcombine.high %v3077_v37, %v3081_v60 }
 0xbc7   :  { %v3152_v9 = vld [vmem:[#allocation16 + $0x428] sm:$0xff] }
 0xbc8   :  { %6174 = vmatpush1.bf16.msra.mxu0 %v8598_v14  ;;  %6227 = vmatpush1.bf16.msra.mxu1 %v8726_v21  ;;  %v8695_v14 = vcombine.high %v3148_v53, %v3152_v9  ;;  %v3140_v21 = vld [vmem:[#allocation16 + $0x3c8] sm:$0xff] }
 0xbc9   :  { %6175 = vmatprep.subr.bf16.mxu0 %v8591_v52  ;;  %6228 = vmatprep.subr.bf16.mxu1 %v8719_v4  ;;  %v3144_v4 = vld [vmem:[#allocation16 + $0x3e8] sm:$0xff] }
 0xbca   :  { %v8687_v2 = vcombine.high %v3140_v21, %v3144_v4  ;;  %v3132_v22 = vld [vmem:[#allocation16 + $0x388] sm:$0xff] }
 0xbcc   :  { %6176 = vmatpush1.bf16.msra.mxu0 %v8590_v54  ;;  %6229 = vmatpush1.bf16.msra.mxu1 %v8718_v59  ;;  %v8566_v59 = vcombine.low %v3020_v19, %v3024_v28  ;;  %v8686_v19 = vcombine.low %v3140_v21, %v3144_v4  ;;  %v8624_v28 = vcombine.low %v3077_v37, %v3081_v60 }
 0xbcd   :  { %6177 = vmatprep.subr.bf16.mxu0 %v8583_v31  ;;  %6230 = vmatprep.subr.bf16.mxu1 %v8711_v40  ;;  %v8694_v31 = vcombine.low %v3148_v53, %v3152_v9 }
 0xbcf   :  { %v4524_v63 = vpop.f32.mrf.mxu0 }
 0xbd0   :  { %v4577_v13 = vpop.f32.mrf.mxu1  ;;  %6178 = vmatpush1.bf16.msra.mxu0 %v8582_v26  ;;  %6231 = vmatpush1.bf16.msra.mxu1 %v8710_v27  ;;  %v3136_v27 = vld [vmem:[#allocation16 + $0x3a8] sm:$0xff] }
 0xbd1   :  { %v4967_v47 = vmul.f32 %v4577_v13, %v10734_v6  ;;  %v11059_v46 = vpop.f32.mrf.mxu0  ;;  %6179 = vmatprep.subr.bf16.mxu0 %v8575_v24  ;;  %6232 = vmatprep.subr.bf16.mxu1 %v8703_v3  ;;  %v3069_v24 = vld [vmem:[#allocation16 + $0x190] sm:$0xff]  ;;  %v8679_v9 = vcombine.high %v3132_v22, %v3136_v27  ;;  %v8678_v4 = vcombine.low %v3132_v22, %v3136_v27 }
 0xbd2   :  { %v11061_v52 = vpop.f32.mrf.mxu1  ;;  %v3073_v3 = vld [vmem:[#allocation16 + $0x1b0] sm:$0xff]  ;;  %v8608_v27 = vcombine.low %v3061_v56, %v3065_v5 }
 0xbd3   :  { %v11063_v33 = vadd.f32 %v4967_v47, %v4524_v63  ;;  %v4528_v44 = vpop.f32.mrf.mxu0  ;;  %v3124_v47 = vld [vmem:[#allocation16 + $0x348] sm:$0xff]  ;;  %v8616_v37 = vcombine.low %v3069_v24, %v3073_v3 }
 0xbd4   :  { %v4581_v54 = vpop.f32.mrf.mxu1  ;;  %6180 = vmatpush1.bf16.msra.mxu0 %v8574_v10  ;;  %6233 = vmatpush1.bf16.msra.mxu1 %v8702_v57  ;;  %v8617_v57 = vcombine.high %v3069_v24, %v3073_v3  ;;  %v3108_v3 = vld [vmem:[#allocation16 + $0x2c8] sm:$0xff] }
 0xbd5   :  { %v4969_v40 = vmul.f32 %v4581_v54, %v10763_v61  ;;  %v11066_v58 = vpop.f32.mrf.mxu0  ;;  %6181 = vmatprep.subr.bf16.mxu0 %v8567_v42  ;;  %6234 = vmatprep.subr.bf16.mxu1 %v8695_v14  ;;  %v3128_v42 = vld [vmem:[#allocation16 + $0x368] sm:$0xff] }
 0xbd6   :  { %v11068_v26 = vpop.f32.mrf.mxu1  ;;  %v8671_v60 = vcombine.high %v3124_v47, %v3128_v42  ;;  %v8670_v22 = vcombine.low %v3124_v47, %v3128_v42  ;;  %v3037_v42 = vld [vmem:[#allocation16 + $0x90] sm:$0xff] }
 0xbd7   :  { %v11070_v63 = vadd.f32 %v4969_v40, %v4528_v44  ;;  %v4534_v13 = vpop.f32.mrf.mxu0 }
 0xbd8   :  { %v4587_v10 = vpop.f32.mrf.mxu1  ;;  %6182 = vmatpush1.bf16.msra.mxu0 %v8566_v59  ;;  %6235 = vmatpush1.bf16.msra.mxu1 %v8694_v31 }
 0xbd9   :  { %v4971_v53 = vmul.f32 %v4587_v10, %v10744_v17  ;;  %6183 = vmatprep.subr.bf16.mxu0 %v8687_v2  ;;  %6273 = vmatprep.subr.bf16.mxu1 %v8625_v32  ;;  %v4536_v14 = vpop.f32.mrf.mxu0  ;;  %v8609_v2 = vcombine.high %v3061_v56, %v3065_v5  ;;  %v3100_v5 = vld [vmem:[#allocation16 + $0x288] sm:$0xff] }
 0xbda   :  { %v4589_v54 = vpop.f32.mrf.mxu1  ;;  %v3104_v56 = vld [vmem:[#allocation16 + $0x2a8] sm:$0xff] }
 0xbdb   :  { %v11073_v44 = vadd.f32 %v4971_v53, %v4534_v13  ;;  %v4972_v40 = vmul.f32 %v4589_v54, %v10744_v17  ;;  %6253 = vmatmul.mubr.bf16.vlgmr.msra.gmra.mxu1 %v11041_v25  ;;  %v4538_v32 = vpop.f32.mrf.mxu0  ;;  %v3116_v13 = vld [vmem:[#allocation16 + $0x308] sm:$0xff]  ;;  %v3053_v53 = vld [vmem:[#allocation16 + $0x110] sm:$0xff] }
 0xbdc   :  { %v4591_v21 = vpop.f32.mrf.mxu1  ;;  %6184 = vmatpush2.bf16.msra.mxu0 %v8686_v19  ;;  %6274 = vmatpush1.bf16.msra.mxu1 %v8624_v28  ;;  %v3120_v17 = vld [vmem:[#allocation16 + $0x328] sm:$0xff]  ;;  %v3057_v19 = vld [vmem:[#allocation16 + $0x130] sm:$0xff] }
 0xbdd   :  { %v11077_v59 = vadd.f32 %v4972_v40, %v4536_v14  ;;  %v4973_v31 = vmul.f32 %v4591_v21, %v10776_v12  ;;  %6185 = vmatprep.subr.bf16.mxu0 %v8679_v9  ;;  %6275 = vmatprep.subr.bf16.mxu1 %v8617_v57  ;;  %v8663_v24 = vcombine.high %v3116_v13, %v3120_v17  ;;  %v3112_v9 = vld [vmem:[#allocation16 + $0x2e8] sm:$0xff]  ;;  %v3045_v57 = vld [vmem:[#allocation16 + $0xd0] sm:$0xff] }
 0xbde   :  { %6262 = vmatprep.mubr.bf16.mxu1 %v11930_v55  ;;  %v8601_v28 = vcombine.high %v3053_v53, %v3057_v19  ;;  %v3049_v14 = vld [vmem:[#allocation16 + $0xf0] sm:$0xff]  ;;  %v8662_v54 = vcombine.low %v3116_v13, %v3120_v17  ;;  %v8600_v40 = vcombine.low %v3053_v53, %v3057_v19  ;;  %v8655_v21 = vcombine.high %v3108_v3, %v3112_v9  ;;  %v3096_v13 = vld [vmem:[#allocation16 + $0x268] sm:$0xff] }
 0xbdf   :  { %v11081_v10 = vadd.f32 %v4973_v31, %v4538_v32  ;;  %v8593_v47 = vcombine.high %v3045_v57, %v3049_v14  ;;  %v8647_v31 = vcombine.high %v3100_v5, %v3104_v56  ;;  %v3092_v32 = vld [vmem:[#allocation16 + $0x248] sm:$0xff]  ;;  %v3029_v17 = vld [vmem:[#allocation16 + $0x50] sm:$0xff]  ;;  %v8646_v19 = vcombine.low %v3100_v5, %v3104_v56 }
 0xbe0   :  { %6186 = vmatpush2.bf16.msra.mxu0 %v8678_v4  ;;  %6276 = vmatpush1.bf16.msra.mxu1 %v8616_v37  ;;  %v3041_v4 = vld [vmem:[#allocation16 + $0xb0] sm:$0xff]  ;;  %v8654_v37 = vcombine.low %v3108_v3, %v3112_v9  ;;  %v3084_v3 = vld [vmem:[#allocation16 + $0x208] sm:$0xff] }
 0xbe1   :  { %6187 = vmatprep.subr.bf16.mxu0 %v8671_v60  ;;  %6277 = vmatprep.subr.bf16.mxu1 %v8609_v2  ;;  %v8592_v60 = vcombine.low %v3045_v57, %v3049_v14  ;;  %v8585_v2 = vcombine.high %v3037_v42, %v3041_v4  ;;  %v3033_v53 = vld [vmem:[#allocation16 + $0x70] sm:$0xff]  ;;  %v3088_v9 = vld [vmem:[#allocation16 + $0x228] sm:$0xff] }
 0xbe2   :  { %v3021_v57 = vld [vmem:[#allocation16 + $0x10] sm:$0xff]  ;;  %v8631_v5 = vcombine.high %v3084_v3, %v3088_v9 }
 0xbe3   :  { %6263 = vmatmul.mubr.bf16.gmra.mxu1 %v11049_v62  ;;  %v3025_v14 = vld [vmem:[#allocation16 + $0x30] sm:$0xff] }
 0xbe4   :  { %6188 = vmatpush2.bf16.msra.mxu0 %v8670_v22  ;;  %6278 = vmatpush1.bf16.msra.mxu1 %v8608_v27  ;;  %v8584_v22 = vcombine.low %v3037_v42, %v3041_v4  ;;  %v11085_v27 = vpop.f32.mrf.mxu0  ;;  %v8569_v56 = vcombine.high %v3021_v57, %v3025_v14  ;;  %v3141_v42 = vld [vmem:[#allocation16 + $0x3d0] sm:$0xff] }
 0xbe5   :  { %6305 = vmatprep.mubr.bf16.mxu1 %v11037_v39  ;;  %6189 = vmatprep.subr.bf16.mxu0 %v8663_v24  ;;  %v8639_v24 = vcombine.high %v3092_v32, %v3096_v13 }
 0xbe6   :  { %6279 = vmatprep.subr.bf16.mxu1 %v8601_v28  ;;  %v8577_v28 = vcombine.high %v3029_v17, %v3033_v53 }
 0xbe8   :  { %6190 = vmatpush2.bf16.msra.mxu0 %v8662_v54  ;;  %6280 = vmatpush1.bf16.msra.mxu1 %v8600_v40 }
 0xbe9   :  { %6191 = vmatprep.subr.bf16.mxu0 %v8655_v21  ;;  %6281 = vmatprep.subr.bf16.mxu1 %v8593_v47  ;;  %v8638_v21 = vcombine.low %v3092_v32, %v3096_v13  ;;  %v8576_v47 = vcombine.low %v3029_v17, %v3033_v53  ;;  %v8630_v32 = vcombine.low %v3084_v3, %v3088_v9 }
 0xbea   :  { %v8568_v13 = vcombine.low %v3021_v57, %v3025_v14 }
 0xbec   :  { %6192 = vmatpush2.bf16.msra.mxu0 %v8654_v37  ;;  %6282 = vmatpush1.bf16.msra.mxu1 %v8592_v60  ;;  %v3145_v60 = vld [vmem:[#allocation16 + $0x3f0] sm:$0xff] }
 0xbed   :  { %6193 = vmatprep.subr.bf16.mxu0 %v8647_v31  ;;  %6283 = vmatprep.subr.bf16.mxu1 %v8585_v2  ;;  %v3205_v31 = vld [vmem:[#allocation16 + $0x5d0] sm:$0xff]  ;;  %v8689_v53 = vcombine.high %v3141_v42, %v3145_v60  ;;  %v8688_v3 = vcombine.low %v3141_v42, %v3145_v60 }
 0xbee   :  { %v3209_v2 = vld [vmem:[#allocation16 + $0x5f0] sm:$0xff] }
 0xbef   :  { %v4630_v54 = vpop.f32.mrf.mxu0  ;;  %v8752_v57 = vcombine.low %v3205_v31, %v3209_v2 }
 0xbf0   :  { %v4983_v40 = vmul.f32 %v4630_v54, %v10736_v11  ;;  %6194 = vmatpush2.bf16.msra.mxu0 %v8646_v19  ;;  %6284 = vmatpush1.bf16.msra.mxu1 %v8584_v22  ;;  %v8753_v19 = vcombine.high %v3205_v31, %v3209_v2 }
 0xbf1   :  { %v11088_v37 = vpop.f32.mrf.mxu0  ;;  %6195 = vmatprep.subr.bf16.mxu0 %v8639_v24  ;;  %6285 = vmatprep.subr.bf16.mxu1 %v8577_v28  ;;  %v3137_v24 = vld [vmem:[#allocation16 + $0x3b0] sm:$0xff] }
 0xbf2   :  { %v11091_v4 = vadd.f32 %v4983_v40, %v11063_v33  ;;  %v3133_v33 = vld [vmem:[#allocation16 + $0x390] sm:$0xff] }
 0xbf3   :  { %v4634_v16 = vpop.f32.mrf.mxu0  ;;  %v3197_v40 = vld [vmem:[#allocation16 + $0x590] sm:$0xff]  ;;  %v8681_v14 = vcombine.high %v3133_v33, %v3137_v24 }
 0xbf4   :  { %v4985_v54 = vmul.f32 %v4634_v16, %v10788_v41  ;;  %6196 = vmatpush2.bf16.msra.mxu0 %v8638_v21  ;;  %6286 = vmatpush1.bf16.msra.mxu1 %v8576_v47  ;;  %v8745_v47 = vcombine.high %v3197_v40, %v3201_v18 }
 0xbf5   :  { %v11094_v17 = vpop.f32.mrf.mxu0  ;;  %6197 = vmatprep.subr.bf16.mxu0 %v8631_v5  ;;  %6287 = vmatprep.subr.bf16.mxu1 %v8569_v56  ;;  %v3125_v5 = vld [vmem:[#allocation16 + $0x350] sm:$0xff] }
 0xbf6   :  { %v11097_v22 = vadd.f32 %v4985_v54, %v11070_v63  ;;  %v3129_v56 = vld [vmem:[#allocation16 + $0x370] sm:$0xff] }
 0xbf7   :  { %v4640_v28 = vpop.f32.mrf.mxu0  ;;  %v8673_v31 = vcombine.high %v3125_v5, %v3129_v56 }
 0xbf8   :  { %11946 = vst [vmem:[#allocation58_spill] sm:$0xff] %v11097_v22  ;;  %v4987_v16 = vmul.f32 %v4640_v28, %v10754_v45  ;;  %6198 = vmatpush2.bf16.msra.mxu0 %v8630_v32  ;;  %6288 = vmatpush1.bf16.msra.mxu1 %v8568_v13  ;;  %v3189_v28 = vld [vmem:[#allocation16 + $0x550] sm:$0xff]  ;;  %v11105_v13 = vpop.f32.mrf.mxu1  ;;  %v11255_v22 = vld [vmem:[#allocation16 + $0x680] sm:$0xff] }
 0xbf9   :  { %v4642_v9 = vpop.f32.mrf.mxu0  ;;  %6289 = vmatprep.subr.bf16.mxu1 %v8689_v53  ;;  %6326 = vmatprep.subr.bf16.mxu0 %v8753_v19  ;;  %v3193_v32 = vld [vmem:[#allocation16 + $0x570] sm:$0xff] }
 0xbfa   :  { %v11101_v21 = vadd.f32 %v4987_v16, %v11073_v44  ;;  %v4988_v63 = vmul.f32 %v4642_v9, %v10754_v45  ;;  %v8680_v44 = vcombine.low %v3133_v33, %v3137_v24  ;;  %v8744_v45 = vcombine.low %v3197_v40, %v3201_v18  ;;  %v11112_v2 = vpop.f32.mrf.mxu1  ;;  %v3117_v16 = vld [vmem:[#allocation16 + $0x310] sm:$0xff] }
 0xbfb   :  { %v4644_v54 = vpop.f32.mrf.mxu0  ;;  %6200 = vmatmul.mubr.bf16.vlgmr.msra.gmra.mxu0 %v11039_v23  ;;  %v8737_v19 = vcombine.high %v3189_v28, %v3193_v32  ;;  %v3181_v9 = vld [vmem:[#allocation16 + $0x510] sm:$0xff]  ;;  %v8736_v33 = vcombine.low %v3189_v28, %v3193_v32 }
 0xbfc   :  { %11947 = vst [vmem:[#allocation59_spill] sm:$0xff] %v11101_v21  ;;  %v11108_v42 = vadd.f32 %v4988_v63, %v11077_v59  ;;  %v4989_v60 = vmul.f32 %v4644_v54, %v10760_v29  ;;  %6209 = vmatprep.mubr.bf16.mxu0 %v11047_v20  ;;  %6290 = vmatpush2.bf16.msra.mxu1 %v8688_v3  ;;  %v3121_v59 = vld [vmem:[#allocation16 + $0x330] sm:$0xff]  ;;  %v11117_v3 = vpop.f32.mrf.mxu1  ;;  %v11281_v21 = vld [vmem:[#allocation16 + $0x640] sm:$0xff] }
 0xbfd   :  { %6327 = vmatpush1.bf16.msra.mxu0 %v8752_v57  ;;  %6291 = vmatprep.subr.bf16.mxu1 %v8681_v14  ;;  %v3185_v63 = vld [vmem:[#allocation16 + $0x530] sm:$0xff]  ;;  %v8672_v54 = vcombine.low %v3125_v5, %v3129_v56  ;;  %v8665_v24 = vcombine.high %v3117_v16, %v3121_v59 }
 0xbfe   :  { %11948 = vst [vmem:[#allocation60_spill] sm:$0xff] %v11108_v42  ;;  %v11115_v53 = vadd.f32 %v4989_v60, %v11081_v10  ;;  %6328 = vmatprep.subr.bf16.mxu0 %v8745_v47  ;;  %v8729_v18 = vcombine.high %v3181_v9, %v3185_v63  ;;  %v3109_v40 = vld [vmem:[#allocation16 + $0x2d0] sm:$0xff]  ;;  %v8664_v47 = vcombine.low %v3117_v16, %v3121_v59  ;;  %v11121_v28 = vpop.f32.mrf.mxu1 }
 0xbff   :  { %v3113_v57 = vld [vmem:[#allocation16 + $0x2f0] sm:$0xff]  ;;  %v8728_v5 = vcombine.low %v3181_v9, %v3185_v63 }
 0xc00   :  { %11949 = vst [vmem:[#allocation61_spill] sm:$0xff] %v11115_v53  ;;  %6292 = vmatpush2.bf16.msra.mxu1 %v8680_v44  ;;  %v3173_v10 = vld [vmem:[#allocation16 + $0x4d0] sm:$0xff]  ;;  %v8657_v56 = vcombine.high %v3109_v40, %v3113_v57  ;;  %v11123_v59 = vpop.f32.mrf.mxu1  ;;  %v3202_v53 = vld [vmem:[#allocation16 + $0x5b8] sm:$0xff] }
 0xc01   :  { %6329 = vmatpush1.bf16.msra.mxu0 %v8744_v45  ;;  %6293 = vmatprep.subr.bf16.mxu1 %v8673_v31  ;;  %v3177_v14 = vld [vmem:[#allocation16 + $0x4f0] sm:$0xff] }
 0xc02   :  { %6330 = vmatprep.subr.bf16.mxu0 %v8737_v19  ;;  %v8721_v32 = vcombine.high %v3173_v10, %v3177_v14  ;;  %v3101_v60 = vld [vmem:[#allocation16 + $0x290] sm:$0xff]  ;;  %v8656_v19 = vcombine.low %v3109_v40, %v3113_v57 }
 0xc03   :  { %6210 = vmatmul.mubr.bf16.gmra.mxu0 %v11051_v50  ;;  %v3105_v44 = vld [vmem:[#allocation16 + $0x2b0] sm:$0xff] }
 0xc04   :  { %6294 = vmatpush2.bf16.msra.mxu1 %v8672_v54  ;;  %6358 = vmatprep.mubr.bf16.mxu0 %v11930_v55  ;;  %v3165_v45 = vld [vmem:[#allocation16 + $0x490] sm:$0xff]  ;;  %v8720_v54 = vcombine.low %v3173_v10, %v3177_v14  ;;  %v8649_v16 = vcombine.high %v3101_v60, %v3105_v44 }
 0xc05   :  { %6331 = vmatpush1.bf16.msra.mxu0 %v8736_v33  ;;  %6295 = vmatprep.subr.bf16.mxu1 %v8665_v24  ;;  %v3169_v31 = vld [vmem:[#allocation16 + $0x4b0] sm:$0xff] }
 0xc06   :  { %6332 = vmatprep.subr.bf16.mxu0 %v8729_v18  ;;  %v8713_v33 = vcombine.high %v3165_v45, %v3169_v31  ;;  %v3093_v9 = vld [vmem:[#allocation16 + $0x250] sm:$0xff]  ;;  %v8648_v18 = vcombine.low %v3101_v60, %v3105_v44  ;;  %v8712_v1 = vcombine.low %v3165_v45, %v3169_v31  ;;  %v3206_v31 = vld [vmem:[#allocation16 + $0x5d8] sm:$0xff] }
 0xc07   :  { %v3097_v63 = vld [vmem:[#allocation16 + $0x270] sm:$0xff] }
 0xc08   :  { %6296 = vmatpush2.bf16.msra.mxu1 %v8664_v47  ;;  %v3157_v24 = vld [vmem:[#allocation16 + $0x450] sm:$0xff]  ;;  %v8641_v36 = vcombine.high %v3093_v9, %v3097_v63  ;;  %v11125_v47 = vpop.f32.mrf.mxu1 }
 0xc09   :  { %6333 = vmatpush1.bf16.msra.mxu0 %v8728_v5  ;;  %6297 = vmatprep.subr.bf16.mxu1 %v8657_v56  ;;  %v8705_v40 = vcombine.high %v3157_v24, %v3161_v15  ;;  %v3085_v57 = vld [vmem:[#allocation16 + $0x210] sm:$0xff]  ;;  %v8640_v56 = vcombine.low %v3093_v9, %v3097_v63 }
 0xc0a   :  { %6334 = vmatprep.subr.bf16.mxu0 %v8721_v32  ;;  %v3089_v10 = vld [vmem:[#allocation16 + $0x230] sm:$0xff]  ;;  %v11127_v32 = vpop.f32.mrf.mxu0  ;;  %v11129_v44 = vpop.f32.mrf.mxu1 }
 0xc0b   :  { %v3149_v14 = vld [vmem:[#allocation16 + $0x410] sm:$0xff]  ;;  %11950 = vst [vmem:[#allocation62_spill] sm:$0xff] %v11127_v32  ;;  %v8633_v60 = vcombine.high %v3085_v57, %v3089_v10  ;;  %v8632_v38 = vcombine.low %v3085_v57, %v3089_v10 }
 0xc0c   :  { %6298 = vmatpush2.bf16.msra.mxu1 %v8656_v19  ;;  %v3153_v5 = vld [vmem:[#allocation16 + $0x430] sm:$0xff]  ;;  %v8704_v19 = vcombine.low %v3157_v24, %v3161_v15  ;;  %v3070_v15 = vld [vmem:[#allocation16 + $0x198] sm:$0xff] }
 0xc0d   :  { %6335 = vmatpush1.bf16.msra.mxu0 %v8720_v54  ;;  %6299 = vmatprep.subr.bf16.mxu1 %v8649_v16  ;;  %v8697_v45 = vcombine.high %v3149_v14, %v3153_v5  ;;  %v3210_v54 = vld [vmem:[#allocation16 + $0x5f8] sm:$0xff]  ;;  %v8696_v9 = vcombine.low %v3149_v14, %v3153_v5 }
 0xc0e   :  { %6336 = vmatprep.subr.bf16.mxu0 %v8713_v33  ;;  %v3078_v33 = vld [vmem:[#allocation16 + $0x1d8] sm:$0xff]  ;;  %v8755_v63 = vcombine.high %v3206_v31, %v3210_v54  ;;  %v8754_v48 = vcombine.low %v3206_v31, %v3210_v54 }
 0xc0f   :  { %v11131_v16 = vpop.f32.mrf.mxu0  ;;  %v8626_v35 = vcombine.low %v3078_v33, %v3082_v49  ;;  %v3062_v5 = vld [vmem:[#allocation16 + $0x158] sm:$0xff] }
 0xc10   :  { %6300 = vmatpush2.bf16.msra.mxu1 %v8648_v18  ;;  %v3074_v18 = vld [vmem:[#allocation16 + $0x1b8] sm:$0xff] }
 0xc11   :  { %6337 = vmatpush1.bf16.msra.mxu0 %v8712_v1  ;;  %6301 = vmatprep.subr.bf16.mxu1 %v8641_v36  ;;  %v11133_v1 = vpop.f32.mrf.mxu1  ;;  %v8627_v36 = vcombine.high %v3078_v33, %v3082_v49  ;;  %v11135_v24 = vpop.f32.mrf.mxu0  ;;  %v8619_v10 = vcombine.high %v3070_v15, %v3074_v18 }
 0xc12   :  { %6338 = vmatprep.subr.bf16.mxu0 %v8705_v40  ;;  %11951 = vst [vmem:[#allocation63_spill] sm:$0xff] %v11133_v1  ;;  %v3198_v40 = vld [vmem:[#allocation16 + $0x598] sm:$0xff] }
 0xc13   :  { %v11137_v57 = vpop.f32.mrf.mxu1  ;;  %v8747_v14 = vcombine.high %v3198_v40, %v3202_v53  ;;  %v8746_v49 = vcombine.low %v3198_v40, %v3202_v53  ;;  %v3046_v40 = vld [vmem:[#allocation16 + $0xd8] sm:$0xff] }
 0xc14   :  { %6302 = vmatpush2.bf16.msra.mxu1 %v8640_v56  ;;  %11952 = vst [vmem:[#allocation64_spill] sm:$0xff] %v11137_v57  ;;  %v11139_v56 = vpop.f32.mrf.mxu0  ;;  %v3186_v57 = vld [vmem:[#allocation16 + $0x538] sm:$0xff] }
 0xc15   :  { %6339 = vmatpush1.bf16.msra.mxu0 %v8704_v19  ;;  %6303 = vmatprep.subr.bf16.mxu1 %v8633_v60  ;;  %11953 = vst [vmem:[#allocation65_spill] sm:$0xff] %v11139_v56  ;;  %v3066_v19 = vld [vmem:[#allocation16 + $0x178] sm:$0xff]  ;;  %v11142_v42 = vpop.f32.mrf.mxu1 }
 0xc16   :  { %6340 = vmatprep.subr.bf16.mxu0 %v8697_v45  ;;  %v3190_v60 = vld [vmem:[#allocation16 + $0x558] sm:$0xff]  ;;  %11954 = vst [vmem:[#allocation66_spill] sm:$0xff] %v11142_v42  ;;  %v8611_v31 = vcombine.high %v3062_v5, %v3066_v19  ;;  %v11146_v33 = vpop.f32.mrf.mxu0  ;;  %v11209_v42 = vld [vmem:[#allocation16 + $0x760] sm:$0xff] }
 0xc17   :  { %v3194_v45 = vld [vmem:[#allocation16 + $0x578] sm:$0xff]  ;;  %11955 = vst [vmem:[#allocation67_spill] sm:$0xff] %v11146_v33 }
 0xc18   :  { %6304 = vmatpush2.bf16.msra.mxu1 %v8632_v38  ;;  %v8618_v38 = vcombine.low %v3070_v15, %v3074_v18  ;;  %v8739_v54 = vcombine.high %v3190_v60, %v3194_v45  ;;  %v11151_v15 = vpop.f32.mrf.mxu0  ;;  %v11251_v1 = vld [vmem:[#allocation16 + $0x298] sm:$0xff] }
 0xc19   :  { %6341 = vmatpush1.bf16.msra.mxu0 %v8696_v9  ;;  %6432 = vmatprep.subr.bf16.mxu1 %v8755_v63  ;;  %v3054_v9 = vld [vmem:[#allocation16 + $0x118] sm:$0xff]  ;;  %11957 = vst [vmem:[#allocation69_spill] sm:$0xff] %v11151_v15 }
 0xc1a   :  { %6379 = vmatprep.subr.bf16.mxu0 %v8627_v36  ;;  %v3058_v63 = vld [vmem:[#allocation16 + $0x138] sm:$0xff]  ;;  %v11149_v36 = vpop.f32.mrf.mxu1 }
 0xc1b   :  { %6306 = vmatmul.mubr.bf16.vlgmr.msra.gmra.mxu1 %v11039_v23  ;;  %11956 = vst [vmem:[#allocation68_spill] sm:$0xff] %v11149_v36  ;;  %v3182_v23 = vld [vmem:[#allocation16 + $0x518] sm:$0xff]  ;;  %v8603_v53 = vcombine.high %v3054_v9, %v3058_v63 }
 0xc1c   :  { %6359 = vmatmul.mubr.bf16.vlgmr.msra.gmra.mxu0 %v11041_v25  ;;  %6315 = vmatprep.mubr.bf16.mxu1 %v11047_v20  ;;  %v8731_v18 = vcombine.high %v3182_v23, %v3186_v57  ;;  %v3174_v20 = vld [vmem:[#allocation16 + $0x4d8] sm:$0xff] }
 0xc1d   :  { %6380 = vmatpush1.bf16.msra.mxu0 %v8626_v35  ;;  %6433 = vmatpush1.bf16.msra.mxu1 %v8754_v48  ;;  %v8610_v35 = vcombine.low %v3062_v5, %v3066_v19  ;;  %v8738_v48 = vcombine.low %v3190_v60, %v3194_v45  ;;  %v3178_v36 = vld [vmem:[#allocation16 + $0x4f8] sm:$0xff]  ;;  %v8602_v5 = vcombine.low %v3054_v9, %v3058_v63  ;;  %v11159_v45 = vpop.f32.mrf.mxu0 }
 0xc1e   :  { %6381 = vmatprep.subr.bf16.mxu0 %v8619_v10  ;;  %6434 = vmatprep.subr.bf16.mxu1 %v8747_v14  ;;  %v3050_v10 = vld [vmem:[#allocation16 + $0xf8] sm:$0xff]  ;;  %v11154_v14 = vpop.f32.mrf.mxu1  ;;  %v8730_v19 = vcombine.low %v3182_v23, %v3186_v57  ;;  %11959 = vst [vmem:[#allocation71_spill] sm:$0xff] %v11159_v45 }
 0xc1f   :  { %6368 = vmatprep.mubr.bf16.mxu0 %v11930_v55  ;;  %11958 = vst [vmem:[#allocation70_spill] sm:$0xff] %v11154_v14  ;;  %v8595_v60 = vcombine.high %v3046_v40, %v3050_v10  ;;  %v3170_v14 = vld [vmem:[#allocation16 + $0x4b8] sm:$0xff]  ;;  %v8594_v15 = vcombine.low %v3046_v40, %v3050_v10  ;;  %v11163_v63 = vpop.f32.mrf.mxu0 }
 0xc20   :  { %11961 = vst [vmem:[#allocation73_spill] sm:$0xff] %v11163_v63  ;;  %v3030_v57 = vld [vmem:[#allocation16 + $0x58] sm:$0xff] }
 0xc21   :  { %6382 = vmatpush1.bf16.msra.mxu0 %v8618_v38  ;;  %6435 = vmatpush1.bf16.msra.mxu1 %v8746_v49  ;;  %v8723_v38 = vcombine.high %v3174_v20, %v3178_v36  ;;  %v3038_v49 = vld [vmem:[#allocation16 + $0x98] sm:$0xff]  ;;  %v11167_v10 = vpop.f32.mrf.mxu0 }
 0xc22   :  { %6383 = vmatprep.subr.bf16.mxu0 %v8611_v31  ;;  %6436 = vmatprep.subr.bf16.mxu1 %v8739_v54  ;;  %v3042_v31 = vld [vmem:[#allocation16 + $0xb8] sm:$0xff]  ;;  %v11161_v54 = vpop.f32.mrf.mxu1  ;;  %11963 = vst [vmem:[#allocation75_spill] sm:$0xff] %v11167_v10 }
 0xc23   :  { %6316 = vmatmul.mubr.bf16.gmra.mxu1 %v11051_v50  ;;  %11960 = vst [vmem:[#allocation72_spill] sm:$0xff] %v11161_v54  ;;  %v3166_v50 = vld [vmem:[#allocation16 + $0x498] sm:$0xff]  ;;  %v8587_v9 = vcombine.high %v3038_v49, %v3042_v31  ;;  %v8586_v45 = vcombine.low %v3038_v49, %v3042_v31 }
 0xc24   :  { %6369 = vmatmul.mubr.bf16.gmra.mxu0 %v11049_v62  ;;  %6464 = vmatprep.mubr.bf16.mxu1 %v11930_v55  ;;  %v8715_v23 = vcombine.high %v3166_v50, %v3170_v14  ;;  %v11173_v63 = vld [vmem:[#allocation16 + $0x438] sm:$0xff] }
 0xc25   :  { %6384 = vmatpush1.bf16.msra.mxu0 %v8610_v35  ;;  %6411 = vmatprep.mubr.bf16.mxu0 %v11037_v39  ;;  %v8722_v39 = vcombine.low %v3174_v20, %v3178_v36  ;;  %v3034_v35 = vld [vmem:[#allocation16 + $0x78] sm:$0xff] }
 0xc26   :  { %6437 = vmatpush1.bf16.msra.mxu1 %v8738_v48  ;;  %6385 = vmatprep.subr.bf16.mxu0 %v8603_v53  ;;  %v11165_v48 = vpop.f32.mrf.mxu1  ;;  %v3158_v53 = vld [vmem:[#allocation16 + $0x458] sm:$0xff]  ;;  %v8579_v40 = vcombine.high %v3030_v57, %v3034_v35 }
 0xc27   :  { %6438 = vmatprep.subr.bf16.mxu1 %v8731_v18  ;;  %11962 = vst [vmem:[#allocation74_spill] sm:$0xff] %v11165_v48  ;;  %v3162_v18 = vld [vmem:[#allocation16 + $0x478] sm:$0xff] }
 0xc28   :  { %v8707_v20 = vcombine.high %v3158_v53, %v3162_v18  ;;  %v3022_v36 = vld [vmem:[#allocation16 + $0x18] sm:$0xff] }
 0xc29   :  { %6386 = vmatpush1.bf16.msra.mxu0 %v8602_v5  ;;  %v8714_v5 = vcombine.low %v3166_v50, %v3170_v14  ;;  %v11177_v49 = vld [vmem:[#allocation16 + $0x3d8] sm:$0xff]  ;;  %v8706_v14 = vcombine.low %v3158_v53, %v3162_v18 }
 0xc2a   :  { %6439 = vmatpush1.bf16.msra.mxu1 %v8730_v19  ;;  %6387 = vmatprep.subr.bf16.mxu0 %v8595_v60  ;;  %v3026_v19 = vld [vmem:[#allocation16 + $0x38] sm:$0xff]  ;;  %v11169_v60 = vpop.f32.mrf.mxu1 }
 0xc2b   :  { %6440 = vmatprep.subr.bf16.mxu1 %v8723_v38  ;;  %11964 = vst [vmem:[#allocation76_spill] sm:$0xff] %v11169_v60  ;;  %v11171_v38 = vld [vmem:[#allocation16 + $0x418] sm:$0xff]  ;;  %v8571_v31 = vcombine.high %v3022_v36, %v3026_v19 }
 0xc2c   :  { %v11179_v50 = vld [vmem:[#allocation16 + $0x3f8] sm:$0xff]  ;;  %v8699_v10 = vcombine.high %v11171_v38, %v11173_v63 }
 0xc2d   :  { %6388 = vmatpush1.bf16.msra.mxu0 %v8594_v15  ;;  %v8578_v15 = vcombine.low %v3030_v57, %v3034_v35  ;;  %v11191_v57 = vld [vmem:[#allocation16 + $0x780] sm:$0xff]  ;;  %v11197_v53 = vld [vmem:[#allocation16 + $0x358] sm:$0xff]  ;;  %v8691_v54 = vcombine.high %v11177_v49, %v11179_v50  ;;  %v8690_v32 = vcombine.low %v11177_v49, %v11179_v50 }
 0xc2e   :  { %6441 = vmatpush1.bf16.msra.mxu1 %v8722_v39  ;;  %6389 = vmatprep.subr.bf16.mxu0 %v8587_v9  ;;  %v11181_v39 = vld [vmem:[#allocation16 + $0x7c0] sm:$0xff]  ;;  %v11199_v18 = vld [vmem:[#allocation16 + $0x378] sm:$0xff] }
 0xc2f   :  { %6442 = vmatprep.subr.bf16.mxu1 %v8715_v23  ;;  %v11175_v48 = vpop.f32.mrf.mxu0  ;;  %v11183_v9 = vld [vmem:[#allocation16 + $0x7e0] sm:$0xff]  ;;  %v11185_v23 = vld [vmem:[#allocation16 + $0x398] sm:$0xff] }
 0xc30   :  { %11965 = vst [vmem:[#allocation77_spill] sm:$0xff] %v11175_v48  ;;  %v11193_v35 = vld [vmem:[#allocation16 + $0x7a0] sm:$0xff]  ;;  %v8698_v48 = vcombine.low %v11171_v38, %v11173_v63  ;;  %v8813_v63 = vcombine.high %v11181_v39, %v11183_v9  ;;  %v11269_v33 = vld [vmem:[#allocation16 + $0x258] sm:$0xff] }
 0xc31   :  { %6390 = vmatpush1.bf16.msra.mxu0 %v8586_v45  ;;  %v11189_v45 = vld [vmem:[#allocation16 + $0x3b8] sm:$0xff]  ;;  %v11203_v60 = vpop.f32.mrf.mxu0  ;;  %v11223_v38 = vld [vmem:[#allocation16 + $0x720] sm:$0xff]  ;;  %v8805_v50 = vcombine.high %v11191_v57, %v11193_v35 }
 0xc32   :  { %6443 = vmatpush1.bf16.msra.mxu1 %v8714_v5  ;;  %6391 = vmatprep.subr.bf16.mxu0 %v8579_v40  ;;  %v11195_v5 = vpop.f32.mrf.mxu1  ;;  %v11201_v40 = vld [vmem:[#allocation16 + $0x740] sm:$0xff]  ;;  %11967 = vst [vmem:[#allocation79_spill] sm:$0xff] %v11203_v60  ;;  %11968 = vst [vmem:[#allocation80_spill] sm:$0xff] %v11223_v38  ;;  %v11271_v56 = vld [vmem:[#allocation16 + $0x278] sm:$0xff] }
 0xc33   :  { %6444 = vmatprep.subr.bf16.mxu1 %v8707_v20  ;;  %11966 = vst [vmem:[#allocation78_spill] sm:$0xff] %v11195_v5  ;;  %v8570_v20 = vcombine.low %v3022_v36, %v3026_v19  ;;  %v11213_v5 = vld [vmem:[#allocation16 + $0x338] sm:$0xff]  ;;  %v8812_v36 = vcombine.low %v11181_v39, %v11183_v9  ;;  %v11221_v19 = vld [vmem:[#allocation16 + $0x700] sm:$0xff]  ;;  %v11257_v62 = vpop.f32.mrf.mxu0 }
 0xc34   :  { %v11235_v39 = vld [vmem:[#allocation16 + $0x2f8] sm:$0xff]  ;;  %v11237_v9 = vld [vmem:[#allocation16 + $0x6c0] sm:$0xff]  ;;  %v11241_v29 = vpop.f32.mrf.mxu1  ;;  %11971 = vst [vmem:[#allocation83_spill] sm:$0xff] %v11257_v62 }
 0xc35   :  { %6392 = vmatpush1.bf16.msra.mxu0 %v8578_v15  ;;  %v11225_v15 = vld [vmem:[#allocation16 + $0x2d8] sm:$0xff]  ;;  %v11239_v60 = vld [vmem:[#allocation16 + $0x6e0] sm:$0xff]  ;;  %11969 = vst [vmem:[#allocation81_spill] sm:$0xff] %v11241_v29  ;;  %v11311_v43 = vpop.f32.mrf.mxu0 }
 0xc36   :  { %6445 = vmatpush1.bf16.msra.mxu1 %v8706_v14  ;;  %6393 = vmatprep.subr.bf16.mxu0 %v8571_v31  ;;  %v8683_v31 = vcombine.high %v11185_v23, %v11189_v45  ;;  %v11267_v29 = vld [vmem:[#allocation16 + $0x6a0] sm:$0xff]  ;;  %v11275_v62 = vpop.f32.mrf.mxu1  ;;  %v11303_v49 = vld [vmem:[#allocation16 + $0x238] sm:$0xff] }
 0xc37   :  { %6446 = vmatprep.subr.bf16.mxu1 %v8699_v10  ;;  %11972 = vst [vmem:[#allocation84_spill] sm:$0xff] %v11275_v62  ;;  %v11283_v14 = vld [vmem:[#allocation16 + $0x660] sm:$0xff]  ;;  %v4970_v10 = vmul.f32 %v11068_v26, %v10763_v61  ;;  %v8642_v61 = vcombine.low %v11269_v33, %v11271_v56 }
 0xc38   :  { %v11307_v62 = vld [vmem:[#allocation16 + $0x620] sm:$0xff]  ;;  %v8764_v26 = vcombine.low %v11281_v21, %v11283_v14  ;;  %v11321_v38 = vpop.f32.mrf.mxu1 }
 0xc39   :  { %6394 = vmatpush1.bf16.msra.mxu0 %v8570_v20  ;;  %v4968_v20 = vmul.f32 %v11061_v52, %v10734_v6  ;;  %v11305_v52 = vld [vmem:[#allocation16 + $0x600] sm:$0xff] }
 0xc3a   :  { %6447 = vmatpush1.bf16.msra.mxu1 %v8698_v48  ;;  %6395 = vmatprep.subr.bf16.mxu0 %v8691_v54  ;;  %v11293_v48 = vld [vmem:[#allocation16 + $0x218] sm:$0xff]  ;;  %v4984_v54 = vmul.f32 %v11088_v37, %v10736_v11  ;;  %v8765_v11 = vcombine.high %v11281_v21, %v11283_v14  ;;  %v11327_v37 = vld [vmem:[#allocation16 + $0x9e0] sm:$0xff]  ;;  %v3260_v21 = vld [vmem:[#allocation16 + $0x788] sm:$0xff] }
 0xc3b   :  { %7129 = vmatprep.subr.bf16.mxu1 %v8813_v63  ;;  %v4976_v6 = vadd.f32 %v4968_v20, %v11059_v46  ;;  %v4986_v63 = vmul.f32 %v11094_v17, %v10788_v41  ;;  %v11345_v20 = vld [vmem:[#allocation16 + $0x7e8] sm:$0xff]  ;;  %v5000_v41 = vmul.f32 %v11117_v3, %v10738_v30  ;;  %v11349_v17 = vpop.f32.mrf.mxu0  ;;  %v11974_v3 = vcombine.low %v11191_v57, %v11193_v35 }
 0xc3c   :  { %v3264_v14 = vld [vmem:[#allocation16 + $0x7a8] sm:$0xff] }
 0xc3d   :  { %6465 = vmatmul.mubr.bf16.vlgmr.msra.gmra.mxu1 %v11041_v25  ;;  %6396 = vmatpush2.bf16.msra.mxu0 %v8690_v32  ;;  %v11325_v25 = vld [vmem:[#allocation16 + $0x9c0] sm:$0xff]  ;;  %v4978_v32 = vadd.f32 %v4970_v10, %v11066_v58  ;;  %v4992_v46 = vadd.f32 %v4984_v54, %v4976_v6  ;;  %v11973_v58 = vcombine.low %v11185_v23, %v11189_v45 }
 0xc3e   :  { %7130 = vmatpush1.bf16.msra.mxu1 %v8812_v36  ;;  %6397 = vmatprep.subr.bf16.mxu0 %v8683_v31  ;;  %v4974_v36 = vmul.f32 %v11105_v13, %v10776_v12  ;;  %v4999_v31 = vmul.f32 %v11112_v2, %v10738_v30  ;;  %v5001_v2 = vmul.f32 %v11121_v28, %v10740_v51  ;;  %v11362_v30 = vpop.f32.mrf.mxu1  ;;  %v11979_v12 = vld [vmem:[#allocation56_spill] sm:$0xff]  ;;  %v11996_v13 = vld [vmem:[#allocation69_spill] sm:$0xff] }
 0xc3f   :  { %7131 = vmatprep.subr.bf16.mxu1 %v8805_v50  ;;  %6474 = vmatprep.mubr.bf16.mxu1 %v11930_v55  ;;  %v11343_v50 = vld [vmem:[#allocation16 + $0x7c8] sm:$0xff]  ;;  %v4994_v10 = vadd.f32 %v4986_v63, %v4978_v32  ;;  %v5002_v6 = vmul.f32 %v11123_v59, %v10740_v51  ;;  %v11975_v23 = vcombine.high %v11197_v53, %v11199_v18  ;;  %v11977_v32 = vld [vmem:[#allocation65_spill] sm:$0xff]  ;;  %v11997_v59 = vld [vmem:[#allocation35_spill] sm:$0xff] }
 0xc40   :  { %v5003_v45 = vmul.f32 %v11125_v47, %v10778_v8  ;;  %v5015_v28 = vmul.f32 %v11131_v16, %v10767_v0  ;;  %v11976_v54 = vcombine.high %v11201_v40, %v11209_v42  ;;  %v4982_v57 = vadd.f32 %v4974_v36, %v11085_v27  ;;  %v11982_v36 = vld [vmem:[#allocation41_spill] sm:$0xff] }
 0xc41   :  { %6398 = vmatpush2.bf16.msra.mxu0 %v11973_v58  ;;  %v5007_v35 = vadd.f32 %v4999_v31, %v11091_v4  ;;  %v5004_v47 = vmul.f32 %v11129_v44, %v10778_v8  ;;  %v5016_v16 = vmul.f32 %v11135_v24, %v10767_v0  ;;  %v5008_v63 = vadd.f32 %v5000_v41, %v4992_v46  ;;  %v11981_v4 = vld [vmem:[#allocation58_spill] sm:$0xff]  ;;  %v11983_v0 = vld [vmem:[#allocation63_spill] sm:$0xff]  ;;  %v4901_v46 = vpop.f32.mrf.mxu1 }
 0xc42   :  { %7132 = vmatpush1.bf16.msra.mxu1 %v11974_v3  ;;  %6399 = vmatprep.subr.bf16.mxu0 %v11975_v23  ;;  %v5017_v58 = vmul.f32 %v11977_v32, %v10742_v34  ;;  %v11978_v3 = vld [vmem:[#allocation67_spill] sm:$0xff]  ;;  %v11980_v27 = vcombine.low %v11197_v53, %v11199_v18  ;;  %v5009_v8 = vadd.f32 %v5001_v2, %v11981_v4  ;;  %v11987_v32 = vld [vmem:[#allocation28_spill] sm:$0xff]  ;;  %v11988_v53 = vld [vmem:[#allocation62_spill] sm:$0xff] }
 0xc43   :  { %7133 = vmatprep.subr.bf16.mxu1 %v11976_v54  ;;  %v5018_v23 = vmul.f32 %v11978_v3, %v10742_v34  ;;  %v11391_v54 = vpop.f32.mrf.mxu0  ;;  %v5010_v44 = vadd.f32 %v5002_v6, %v4994_v10  ;;  %v5005_v24 = vmul.f32 %v11983_v0, %v11982_v36  ;;  %v11984_v41 = vcombine.low %v11201_v40, %v11209_v42  ;;  %v11986_v31 = vld [vmem:[#allocation59_spill] sm:$0xff]  ;;  %v11990_v10 = vld [vmem:[#allocation66_spill] sm:$0xff]  ;;  %v11993_v0 = vld [vmem:[#allocation60_spill] sm:$0xff] }
 0xc44   :  { %v11985_v34 = vcombine.high %v11211_v7, %v11213_v5  ;;  %v4990_v18 = vmul.f32 %v11988_v53, %v11987_v32  ;;  %v5023_v3 = vadd.f32 %v5015_v28, %v5007_v35  ;;  %v11989_v2 = vld [vmem:[#allocation27_spill] sm:$0xff]  ;;  %v5012_v42 = vadd.f32 %v5004_v47, %v11993_v0  ;;  %v11998_v32 = vld [vmem:[#allocation70_spill] sm:$0xff]  ;;  %v11999_v53 = vld [vmem:[#allocation72_spill] sm:$0xff] }
 0xc45   :  { %6475 = vmatmul.mubr.bf16.gmra.mxu1 %v11979_v12  ;;  %6400 = vmatpush2.bf16.msra.mxu0 %v11980_v27  ;;  %v5011_v12 = vadd.f32 %v5003_v45, %v11986_v31  ;;  %v5031_v6 = vmul.f32 %v11990_v10, %v11989_v2  ;;  %v11991_v27 = vld [vmem:[#allocation80_spill] sm:$0xff]  ;;  %v5024_v40 = vadd.f32 %v5016_v16, %v5008_v63  ;;  %v4856_v55 = vpop.f32.mrf.mxu0  ;;  %v12001_v47 = vld [vmem:[#allocation61_spill] sm:$0xff] }
 0xc46   :  { %7134 = vmatpush1.bf16.msra.mxu1 %v11984_v41  ;;  %6401 = vmatprep.subr.bf16.mxu0 %v11985_v34  ;;  %v11992_v4 = vcombine.high %v11221_v19, %v11991_v27  ;;  %v11994_v41 = vld [vmem:[#allocation68_spill] sm:$0xff]  ;;  %v11995_v34 = vld [vmem:[#allocation33_spill] sm:$0xff]  ;;  %v5025_v31 = vadd.f32 %v5017_v58, %v5009_v8  ;;  %v5033_v28 = vmul.f32 %v11998_v32, %v11997_v59  ;;  %v11431_v8 = vpop.f32.mrf.mxu1 }
 0xc47   :  { %v5032_v51 = vmul.f32 %v11994_v41, %v11989_v2  ;;  %v5019_v45 = vmul.f32 %v11996_v13, %v11995_v34  ;;  %v5026_v35 = vadd.f32 %v5018_v23, %v5010_v44  ;;  %v5034_v10 = vmul.f32 %v11999_v53, %v11997_v59  ;;  %v12002_v63 = vld [vmem:[#allocation64_spill] sm:$0xff]  ;;  %v12003_v13 = vld [vmem:[#allocation71_spill] sm:$0xff]  ;;  %v12006_v44 = vld [vmem:[#allocation34_spill] sm:$0xff] }
 0xc48   :  { %7135 = vmatprep.subr.bf16.mxu1 %v11992_v4  ;;  %v12000_v4 = vcombine.low %v11211_v7, %v11213_v5  ;;  %v5013_v16 = vadd.f32 %v5005_v24, %v12001_v47  ;;  %v5006_v2 = vmul.f32 %v12002_v63, %v11982_v36  ;;  %v5020_v58 = vmul.f32 %v12003_v13, %v11995_v34  ;;  %v12007_v24 = vld [vmem:[#allocation73_spill] sm:$0xff]  ;;  %v12008_v41 = vld [vmem:[#allocation39_spill] sm:$0xff] }
 0xc49   :  { %v12004_v23 = vcombine.low %v11221_v19, %v11991_v27  ;;  %v12005_v59 = vcombine.high %v11225_v15, %v11235_v39  ;;  %v4998_v7 = vadd.f32 %v4990_v18, %v4982_v57  ;;  %v5039_v5 = vadd.f32 %v5031_v6, %v5023_v3  ;;  %v12009_v36 = vld [vmem:[#allocation77_spill] sm:$0xff]  ;;  %v12012_v27 = vld [vmem:[#allocation74_spill] sm:$0xff]  ;;  %v12014_v13 = vld [vmem:[#allocation83_spill] sm:$0xff] }
 0xc4a   :  { %6402 = vmatpush2.bf16.msra.mxu0 %v12000_v4  ;;  %v5021_v0 = vmul.f32 %v12007_v24, %v12006_v44  ;;  %v5047_v32 = vmul.f32 %v12009_v36, %v12008_v41  ;;  %v12010_v34 = vcombine.high %v11237_v9, %v11239_v60  ;;  %v5040_v53 = vadd.f32 %v5032_v51, %v5024_v40  ;;  %v12011_v19 = vld [vmem:[#allocation37_spill] sm:$0xff]  ;;  %v12015_v3 = vld [vmem:[#allocation79_spill] sm:$0xff]  ;;  %v4858_v24 = vpop.f32.mrf.mxu0 }
 0xc4b   :  { %7136 = vmatpush1.bf16.msra.mxu1 %v12004_v23  ;;  %6403 = vmatprep.subr.bf16.mxu0 %v12005_v59  ;;  %v5027_v4 = vadd.f32 %v5019_v45, %v5011_v12  ;;  %v5035_v47 = vmul.f32 %v12012_v27, %v12011_v19  ;;  %v12013_v63 = vld [vmem:[#allocation29_spill] sm:$0xff]  ;;  %v5041_v57 = vadd.f32 %v5033_v28, %v5025_v31  ;;  %v12017_v12 = vld [vmem:[#allocation76_spill] sm:$0xff]  ;;  %v12018_v45 = vld [vmem:[#allocation38_spill] sm:$0xff]  ;;  %v4907_v31 = vpop.f32.mrf.mxu1 }
 0xc4c   :  { %7137 = vmatprep.subr.bf16.mxu1 %v12010_v34  ;;  %v5049_v23 = vmul.f32 %v12014_v13, %v12013_v63  ;;  %v5042_v18 = vadd.f32 %v5034_v10, %v5026_v35  ;;  %v5048_v6 = vmul.f32 %v12015_v3, %v12008_v41  ;;  %v5050_v59 = vmul.f32 %v11311_v43, %v12013_v63  ;;  %v12019_v34 = vld [vmem:[#allocation78_spill] sm:$0xff]  ;;  %v12025_v41 = vld [vmem:[#allocation84_spill] sm:$0xff] }
 0xc4d   :  { %v12016_v36 = vcombine.low %v11225_v15, %v11235_v39  ;;  %v5028_v51 = vadd.f32 %v5020_v58, %v5012_v42  ;;  %v5036_v40 = vmul.f32 %v12017_v12, %v12011_v19  ;;  %v5037_v27 = vmul.f32 %v12019_v34, %v12018_v45  ;;  %v12021_v35 = vld [vmem:[#allocation82_spill] sm:$0xff]  ;;  %v12023_v15 = vld [vmem:[#allocation75_spill] sm:$0xff] }
 0xc4e   :  { %v12020_v28 = vcombine.low %v11237_v9, %v11239_v60  ;;  %v12022_v43 = vcombine.high %v11251_v1, %v12021_v35  ;;  %v5029_v10 = vadd.f32 %v5021_v0, %v5013_v16  ;;  %v5022_v39 = vmul.f32 %v12023_v15, %v12006_v44  ;;  %v12024_v58 = vld [vmem:[#allocation31_spill] sm:$0xff] }
 0xc4f   :  { %6404 = vmatpush2.bf16.msra.mxu0 %v12016_v36  ;;  %v5055_v42 = vadd.f32 %v5047_v32, %v5039_v5  ;;  %v5063_v19 = vmul.f32 %v12025_v41, %v12024_v58  ;;  %v4948_v63 = vpop.f32.mrf.mxu0  ;;  %v12026_v13 = vcombine.high %v11255_v22, %v11267_v29  ;;  %v5014_v3 = vadd.f32 %v5006_v2, %v4998_v7  ;;  %v12027_v36 = vld [vmem:[#allocation30_spill] sm:$0xff]  ;;  %v12029_v2 = vld [vmem:[#allocation81_spill] sm:$0xff] }
 0xc50   :  { %7138 = vmatpush1.bf16.msra.mxu1 %v12020_v28  ;;  %6405 = vmatprep.subr.bf16.mxu0 %v12022_v43  ;;  %v5043_v60 = vadd.f32 %v5035_v47, %v5027_v4  ;;  %v5057_v9 = vadd.f32 %v5049_v23, %v5041_v57  ;;  %v5065_v12 = vmul.f32 %v11362_v30, %v12027_v36  ;;  %v4909_v4 = vpop.f32.mrf.mxu1  ;;  %v12030_v47 = vld [vmem:[#allocation32_spill] sm:$0xff] }
 0xc51   :  { %7139 = vmatprep.subr.bf16.mxu1 %v12026_v13  ;;  %v5056_v34 = vadd.f32 %v5048_v6, %v5040_v53  ;;  %v5064_v16 = vmul.f32 %v11321_v38, %v12024_v58  ;;  %v5058_v44 = vadd.f32 %v5050_v59, %v5042_v18  ;;  %v5066_v5 = vmul.f32 %v4901_v46, %v12027_v36  ;;  %v4950_v32 = vpop.f32.mrf.mxu0  ;;  %v12033_v57 = vld [vmem:[#allocation40_spill] sm:$0xff]  ;;  %v12037_v58 = vld [vmem:[#allocation42_spill] sm:$0xff]  ;;  %v3327_v36 = vld [vmem:[#allocation16 + $0x9a0] sm:$0xff] }
 0xc52   :  { %v12028_v0 = vcombine.low %v11251_v1, %v12021_v35  ;;  %v5044_v28 = vadd.f32 %v5036_v40, %v5028_v51  ;;  %v5038_v7 = vmul.f32 %v12029_v2, %v12018_v45  ;;  %v5079_v23 = vmul.f32 %v4948_v63, %v12030_v47  ;;  %v12034_v51 = vld [vmem:[#allocation43_spill] sm:$0xff] }
 0xc53   :  { %v12031_v30 = vcombine.low %v11255_v22, %v11267_v29  ;;  %v12032_v38 = vcombine.high %v11269_v33, %v11271_v56  ;;  %v5045_v46 = vadd.f32 %v5037_v27, %v5029_v10  ;;  %v5030_v53 = vadd.f32 %v5022_v39, %v5014_v3  ;;  %v4952_v6 = vpop.f32.mrf.mxu0  ;;  %v12035_v22 = vld [vmem:[#allocation36_spill] sm:$0xff] }
 0xc54   :  { %6406 = vmatpush2.bf16.msra.mxu0 %v12028_v0  ;;  %v5071_v1 = vadd.f32 %v5063_v19, %v5055_v42  ;;  %v5051_v18 = vmul.f32 %v11349_v17, %v12033_v57  ;;  %v5073_v59 = vadd.f32 %v5065_v12, %v5057_v9  ;;  %v5053_v40 = vmul.f32 %v4856_v55, %v12034_v51  ;;  %v12038_v33 = vld [vmem:[#allocation44_spill] sm:$0xff]  ;;  %v3323_v9 = vld [vmem:[#allocation16 + $0x980] sm:$0xff] }
 0xc55   :  { %7140 = vmatpush1.bf16.msra.mxu1 %v12031_v30  ;;  %6407 = vmatprep.subr.bf16.mxu0 %v12032_v38  ;;  %v5080_v29 = vmul.f32 %v4950_v32, %v12030_v47  ;;  %v5081_v45 = vmul.f32 %v4952_v6, %v12035_v22  ;;  %v5072_v35 = vadd.f32 %v5064_v16, %v5056_v34  ;;  %v4954_v17 = vpop.f32.mrf.mxu0  ;;  %v12041_v0 = vld [vmem:[#allocation45_spill] sm:$0xff] }
 0xc56   :  { %7141 = vmatprep.subr.bf16.mxu1 %v8765_v11  ;;  %v5074_v43 = vadd.f32 %v5066_v5, %v5058_v44  ;;  %v5052_v27 = vmul.f32 %v11391_v54, %v12033_v57  ;;  %v5054_v10 = vmul.f32 %v4858_v24, %v12034_v51  ;;  %v4911_v11 = vpop.f32.mrf.mxu1  ;;  %v5087_v15 = vadd.f32 %v5079_v23, %v5071_v1  ;;  %v12046_v1 = vld [vmem:[#allocation54_spill] sm:$0xff]  ;;  %v3315_v57 = vld [vmem:[#allocation16 + $0x940] sm:$0xff]  ;;  %v12047_v51 = vld [vmem:[#allocation55_spill] sm:$0xff] }
 0xc57   :  { %v5089_v39 = vadd.f32 %v5081_v45, %v5073_v59  ;;  %v5082_v55 = vmul.f32 %v4954_v17, %v12035_v22  ;;  %v12036_v42 = vcombine.high %v11293_v48, %v11303_v49  ;;  %v5046_v54 = vadd.f32 %v5038_v7, %v5030_v53  ;;  %v4958_v41 = vpop.f32.mrf.mxu0  ;;  %v3252_v7 = vld [vmem:[#allocation16 + $0x748] sm:$0xff] }
 0xc58   :  { %6408 = vmatpush2.bf16.msra.mxu0 %v8642_v61  ;;  %v5059_v24 = vadd.f32 %v5051_v18, %v5043_v60  ;;  %v5067_v56 = vmul.f32 %v11431_v8, %v12037_v58  ;;  %v5069_v61 = vmul.f32 %v4909_v4, %v12038_v33  ;;  %v12039_v19 = vcombine.high %v11305_v52, %v11307_v62  ;;  %v3256_v4 = vld [vmem:[#allocation16 + $0x768] sm:$0xff]  ;;  %v3319_v18 = vld [vmem:[#allocation16 + $0x960] sm:$0xff] }
 0xc59   :  { %7142 = vmatpush1.bf16.msra.mxu1 %v8764_v26  ;;  %6409 = vmatprep.subr.bf16.mxu0 %v12036_v42  ;;  %v5061_v26 = vadd.f32 %v5053_v40, %v5045_v46  ;;  %v5088_v63 = vadd.f32 %v5080_v29, %v5072_v35  ;;  %v11518_v13 = vpack.c.bf16 %v5089_v39, %v5087_v15  ;;  %v4960_v44 = vpop.f32.mrf.mxu0  ;;  %v3244_v17 = vld [vmem:[#allocation16 + $0x708] sm:$0xff] }
 0xc5a   :  { %7143 = vmatprep.subr.bf16.mxu1 %v12039_v19  ;;  %v5090_v3 = vadd.f32 %v5082_v55, %v5074_v43  ;;  %v5060_v60 = vadd.f32 %v5052_v27, %v5044_v28  ;;  %v5068_v12 = vmul.f32 %v4907_v31, %v12037_v58  ;;  %v5062_v8 = vadd.f32 %v5054_v10, %v5046_v54  ;;  %v3311_v55 = vld [vmem:[#allocation16 + $0x920] sm:$0xff]  ;;  %v3236_v58 = vld [vmem:[#allocation16 + $0x6c8] sm:$0xff] }
 0xc5b   :  { %v5070_v34 = vmul.f32 %v4911_v11, %v12038_v33  ;;  %v12040_v16 = vcombine.low %v11293_v48, %v11303_v49  ;;  %v5083_v32 = vmul.f32 %v4958_v41, %v12041_v0  ;;  %v12042_v2 = vcombine.low %v11305_v52, %v11307_v62  ;;  %v4962_v23 = vpop.f32.mrf.mxu0  ;;  %v12045_v52 = vld [vmem:[#allocation46_spill] sm:$0xff]  ;;  %v12050_v33 = vld [vmem:[#allocation57_spill] sm:$0xff] }
 0xc5c   :  { %v11525_v5 = vpack.c.bf16 %v5090_v3, %v5088_v63  ;;  %v12043_v28 = vcombine.high %v11343_v50, %v11345_v20  ;;  %v8807_v31 = vcombine.high %v3260_v21, %v3264_v14  ;;  %v5075_v47 = vadd.f32 %v5067_v56, %v5059_v24  ;;  %v3248_v11 = vld [vmem:[#allocation16 + $0x728] sm:$0xff]  ;;  %v3303_v41 = vld [vmem:[#allocation16 + $0x8e0] sm:$0xff] }
 0xc5d   :  { %6410 = vmatpush2.bf16.msra.mxu0 %v12040_v16  ;;  %7144 = vmatpush1.bf16.msra.mxu1 %v12042_v2  ;;  %v12044_v49 = vcombine.high %v11325_v25, %v11327_v37  ;;  %v8868_v48 = vcombine.low %v3323_v9, %v3327_v36  ;;  %v8869_v30 = vcombine.high %v3323_v9, %v3327_v36  ;;  %v4964_v29 = vpop.f32.mrf.mxu0  ;;  %v3240_v56 = vld [vmem:[#allocation16 + $0x6e8] sm:$0xff]  ;;  %v3291_v9 = vld [vmem:[#allocation16 + $0x880] sm:$0xff] }
 0xc5e   :  { %7182 = vmatprep.subr.bf16.mxu0 %v12043_v28  ;;  %v8806_v38 = vcombine.low %v3260_v21, %v3264_v14  ;;  %v5077_v46 = vadd.f32 %v5069_v61, %v5061_v26  ;;  %v5084_v62 = vmul.f32 %v4960_v44, %v12041_v0  ;;  %v5085_v53 = vmul.f32 %v4962_v23, %v12045_v52  ;;  %v3299_v61 = vld [vmem:[#allocation16 + $0x8c0] sm:$0xff]  ;;  %v3228_v63 = vld [vmem:[#allocation16 + $0x688] sm:$0xff] }
 0xc5f   :  { %7145 = vmatprep.subr.bf16.mxu1 %v12044_v49  ;;  %7161 = vmatprep.mubr.bf16.mxu1 %v11525_v5  ;;  %v5076_v6 = vadd.f32 %v5068_v12, %v5060_v60  ;;  %v5078_v59 = vadd.f32 %v5070_v34, %v5062_v8  ;;  %v12048_v40 = vcombine.low %v11343_v50, %v11345_v20  ;;  %v3307_v20 = vld [vmem:[#allocation16 + $0x900] sm:$0xff]  ;;  %v3232_v3 = vld [vmem:[#allocation16 + $0x6a8] sm:$0xff] }
 0xc60   :  { %6412 = vmatmul.mubr.bf16.vlgmr.msra.gmra.mxu0 %v12046_v1  ;;  %v8799_v22 = vcombine.high %v3252_v7, %v3256_v4  ;;  %v5091_v45 = vadd.f32 %v5083_v32, %v5075_v47  ;;  %v5093_v35 = vadd.f32 %v5085_v53, %v5077_v46  ;;  %v12049_v43 = vcombine.low %v11325_v25, %v11327_v37  ;;  %v3295_v36 = vld [vmem:[#allocation16 + $0x8a0] sm:$0xff]  ;;  %v3220_v16 = vld [vmem:[#allocation16 + $0x648] sm:$0xff]  ;;  %v3269_v53 = vld [vmem:[#allocation16 + $0x7d0] sm:$0xff] }
 0xc61   :  { %6421 = vmatprep.mubr.bf16.mxu0 %v12047_v51  ;;  %7183 = vmatpush1.bf16.msra.mxu0 %v12048_v40  ;;  %v5086_v27 = vmul.f32 %v4964_v29, %v12045_v52  ;;  %v8861_v10 = vcombine.high %v3315_v57, %v3319_v18  ;;  %v5092_v15 = vadd.f32 %v5084_v62, %v5076_v6  ;;  %v3224_v44 = vld [vmem:[#allocation16 + $0x668] sm:$0xff]  ;;  %v3283_v0 = vld [vmem:[#allocation16 + $0x840] sm:$0xff]  ;;  %v3273_v1 = vld [vmem:[#allocation16 + $0x7f0] sm:$0xff] }
 0xc62   :  { %7146 = vmatpush2.bf16.msra.mxu1 %v12049_v43  ;;  %7184 = vmatprep.subr.bf16.mxu0 %v8807_v31  ;;  %v11549_v39 = vpack.c.bf16 %v5093_v35, %v5091_v45  ;;  %v8798_v42 = vcombine.low %v3252_v7, %v3256_v4  ;;  %v8860_v25 = vcombine.low %v3315_v57, %v3319_v18  ;;  %v3287_v32 = vld [vmem:[#allocation16 + $0x860] sm:$0xff]  ;;  %v3212_v4 = vld [vmem:[#allocation16 + $0x608] sm:$0xff]  ;;  %v3261_v29 = vld [vmem:[#allocation16 + $0x790] sm:$0xff] }
 0xc63   :  { %7147 = vmatprep.subr.bf16.mxu1 %v8869_v30  ;;  %v5094_v50 = vadd.f32 %v5086_v27, %v5078_v59  ;;  %v8791_v37 = vcombine.high %v3244_v17, %v3248_v11  ;;  %v8853_v24 = vcombine.high %v3307_v20, %v3311_v55  ;;  %v8790_v19 = vcombine.low %v3244_v17, %v3248_v11  ;;  %v3216_v47 = vld [vmem:[#allocation16 + $0x628] sm:$0xff]  ;;  %v3275_v23 = vld [vmem:[#allocation16 + $0x800] sm:$0xff]  ;;  %v3253_v11 = vld [vmem:[#allocation16 + $0x750] sm:$0xff] }
 0xc64   :  { %v8852_v21 = vcombine.low %v3307_v20, %v3311_v55  ;;  %v8783_v14 = vcombine.high %v3236_v58, %v3240_v56  ;;  %v8845_v26 = vcombine.high %v3299_v61, %v3303_v41  ;;  %v8782_v60 = vcombine.low %v3236_v58, %v3240_v56  ;;  %v3279_v49 = vld [vmem:[#allocation16 + $0x820] sm:$0xff]  ;;  %v3332_v62 = vld [vmem:[#allocation16 + $0x9c8] sm:$0xff]  ;;  %v3249_v58 = vld [vmem:[#allocation16 + $0x730] sm:$0xff] }
 0xc65   :  { %7185 = vmatpush1.bf16.msra.mxu0 %v8806_v38  ;;  %v11551_v54 = vpack.c.bf16 %v5094_v50, %v5092_v15  ;;  %v8844_v12 = vcombine.low %v3299_v61, %v3303_v41  ;;  %v8775_v8 = vcombine.high %v3228_v63, %v3232_v3  ;;  %v8837_v34 = vcombine.high %v3291_v9, %v3295_v36  ;;  %v3336_v52 = vld [vmem:[#allocation16 + $0x9e8] sm:$0xff]  ;;  %v3257_v15 = vld [vmem:[#allocation16 + $0x770] sm:$0xff] }
 0xc66   :  { %7148 = vmatpush2.bf16.msra.mxu1 %v8868_v48  ;;  %7186 = vmatprep.subr.bf16.mxu0 %v8799_v22  ;;  %v8774_v2 = vcombine.low %v3228_v63, %v3232_v3  ;;  %v8836_v28 = vcombine.low %v3291_v9, %v3295_v36  ;;  %v8767_v31 = vcombine.high %v3220_v16, %v3224_v44  ;;  %v3324_v51 = vld [vmem:[#allocation16 + $0x988] sm:$0xff]  ;;  %v3265_v22 = vld [vmem:[#allocation16 + $0x7b0] sm:$0xff] }
 0xc67   :  { %7149 = vmatprep.subr.bf16.mxu1 %v8861_v10  ;;  %v8829_v7 = vcombine.high %v3283_v0, %v3287_v32  ;;  %v8766_v48 = vcombine.low %v3220_v16, %v3224_v44  ;;  %v8828_v30 = vcombine.low %v3283_v0, %v3287_v32  ;;  %v8759_v38 = vcombine.high %v3212_v4, %v3216_v47  ;;  %v3328_v40 = vld [vmem:[#allocation16 + $0x9a8] sm:$0xff] }
 0xc68   :  { %6422 = vmatmul.mubr.bf16.gmra.mxu0 %v12050_v33  ;;  %v8821_v46 = vcombine.high %v3275_v23, %v3279_v49  ;;  %v8758_v57 = vcombine.low %v3212_v4, %v3216_v47  ;;  %v8820_v18 = vcombine.low %v3275_v23, %v3279_v49  ;;  %v8879_v6 = vcombine.high %v3332_v62, %v3336_v52  ;;  %v3316_v10 = vld [vmem:[#allocation16 + $0x948] sm:$0xff] }
 0xc69   :  { %7187 = vmatpush1.bf16.msra.mxu0 %v8798_v42  ;;  %7214 = vmatprep.mubr.bf16.mxu0 %v11525_v5  ;;  %v8817_v59 = vcombine.high %v3269_v53, %v3273_v1  ;;  %v8878_v45 = vcombine.low %v3332_v62, %v3336_v52  ;;  %v8816_v35 = vcombine.low %v3269_v53, %v3273_v1  ;;  %v3320_v17 = vld [vmem:[#allocation16 + $0x968] sm:$0xff] }
 0xc6a   :  { %7150 = vmatpush2.bf16.msra.mxu1 %v8860_v25  ;;  %7188 = vmatprep.subr.bf16.mxu0 %v8791_v37  ;;  %v8871_v43 = vcombine.high %v3324_v51, %v3328_v40  ;;  %v8809_v27 = vcombine.high %v3261_v29, %v3265_v22  ;;  %v8870_v50 = vcombine.low %v3324_v51, %v3328_v40  ;;  %v3308_v25 = vld [vmem:[#allocation16 + $0x908] sm:$0xff] }
 0xc6b   :  { %7151 = vmatprep.subr.bf16.mxu1 %v8853_v24  ;;  %v8808_v20 = vcombine.low %v3261_v29, %v3265_v22  ;;  %v8863_v55 = vcombine.high %v3316_v10, %v3320_v17  ;;  %v8801_v42 = vcombine.high %v3253_v11, %v3257_v15  ;;  %v3312_v37 = vld [vmem:[#allocation16 + $0x928] sm:$0xff]  ;;  %v3245_v24 = vld [vmem:[#allocation16 + $0x710] sm:$0xff]  ;;  %v8862_v56 = vcombine.low %v3316_v10, %v3320_v17 }
 0xc6c   :  { %v8800_v33 = vcombine.low %v3253_v11, %v3257_v15  ;;  %v8855_v61 = vcombine.high %v3308_v25, %v3312_v37  ;;  %v8793_v41 = vcombine.high %v3245_v24, %v3249_v58  ;;  %v8854_v63 = vcombine.low %v3308_v25, %v3312_v37 }
 0xc6d   :  { %7189 = vmatpush1.bf16.msra.mxu0 %v8790_v19  ;;  %v3300_v19 = vld [vmem:[#allocation16 + $0x8c8] sm:$0xff]  ;;  %v8792_v3 = vcombine.low %v3245_v24, %v3249_v58 }
 0xc6e   :  { %7152 = vmatpush2.bf16.msra.mxu1 %v8852_v21  ;;  %7190 = vmatprep.subr.bf16.mxu0 %v8783_v14  ;;  %v3304_v21 = vld [vmem:[#allocation16 + $0x8e8] sm:$0xff]  ;;  %v3237_v14 = vld [vmem:[#allocation16 + $0x6d0] sm:$0xff] }
 0xc6f   :  { %7153 = vmatprep.subr.bf16.mxu1 %v8845_v26  ;;  %v3241_v26 = vld [vmem:[#allocation16 + $0x6f0] sm:$0xff]  ;;  %v8847_v9 = vcombine.high %v3300_v19, %v3304_v21  ;;  %v8846_v16 = vcombine.low %v3300_v19, %v3304_v21 }
 0xc70   :  { %v8785_v36 = vcombine.high %v3237_v14, %v3241_v26  ;;  %v8784_v44 = vcombine.low %v3237_v14, %v3241_v26  ;;  %v3309_v19 = vld [vmem:[#allocation16 + $0x910] sm:$0xff] }
 0xc71   :  { %7191 = vmatpush1.bf16.msra.mxu0 %v8782_v60  ;;  %v3292_v60 = vld [vmem:[#allocation16 + $0x888] sm:$0xff]  ;;  %v3313_v21 = vld [vmem:[#allocation16 + $0x930] sm:$0xff] }
 0xc72   :  { %7154 = vmatpush2.bf16.msra.mxu1 %v8844_v12  ;;  %7192 = vmatprep.subr.bf16.mxu0 %v8775_v8  ;;  %v3296_v12 = vld [vmem:[#allocation16 + $0x8a8] sm:$0xff]  ;;  %v3229_v8 = vld [vmem:[#allocation16 + $0x690] sm:$0xff] }
 0xc73   :  { %7155 = vmatprep.subr.bf16.mxu1 %v8837_v34  ;;  %v3233_v34 = vld [vmem:[#allocation16 + $0x6b0] sm:$0xff]  ;;  %v8839_v0 = vcombine.high %v3292_v60, %v3296_v12  ;;  %v8838_v4 = vcombine.low %v3292_v60, %v3296_v12  ;;  %v3242_v60 = vld [vmem:[#allocation16 + $0x6f8] sm:$0xff] }
 0xc74   :  { %v8777_v32 = vcombine.high %v3229_v8, %v3233_v34  ;;  %v8776_v47 = vcombine.low %v3229_v8, %v3233_v34  ;;  %v3301_v8 = vld [vmem:[#allocation16 + $0x8d0] sm:$0xff] }
 0xc75   :  { %7193 = vmatpush1.bf16.msra.mxu0 %v8774_v2  ;;  %v3284_v2 = vld [vmem:[#allocation16 + $0x848] sm:$0xff]  ;;  %v3305_v34 = vld [vmem:[#allocation16 + $0x8f0] sm:$0xff] }
 0xc76   :  { %7156 = vmatpush2.bf16.msra.mxu1 %v8836_v28  ;;  %7194 = vmatprep.subr.bf16.mxu0 %v8767_v31  ;;  %v3288_v28 = vld [vmem:[#allocation16 + $0x868] sm:$0xff]  ;;  %v3221_v31 = vld [vmem:[#allocation16 + $0x650] sm:$0xff] }
 0xc77   :  { %7157 = vmatprep.subr.bf16.mxu1 %v8829_v7  ;;  %v3225_v7 = vld [vmem:[#allocation16 + $0x670] sm:$0xff]  ;;  %v8831_v23 = vcombine.high %v3284_v2, %v3288_v28  ;;  %v8830_v62 = vcombine.low %v3284_v2, %v3288_v28  ;;  %v8849_v2 = vcombine.high %v3301_v8, %v3305_v34  ;;  %v3230_v28 = vld [vmem:[#allocation16 + $0x698] sm:$0xff] }
 0xc78   :  { %v8769_v49 = vcombine.high %v3221_v31, %v3225_v7  ;;  %v8768_v52 = vcombine.low %v3221_v31, %v3225_v7  ;;  %v3234_v31 = vld [vmem:[#allocation16 + $0x6b8] sm:$0xff] }
 0xc79   :  { %7195 = vmatpush1.bf16.msra.mxu0 %v8766_v48  ;;  %v3276_v48 = vld [vmem:[#allocation16 + $0x808] sm:$0xff] }
 0xc7a   :  { %7158 = vmatpush2.bf16.msra.mxu1 %v8828_v30  ;;  %7196 = vmatprep.subr.bf16.mxu0 %v8759_v38  ;;  %v3280_v30 = vld [vmem:[#allocation16 + $0x828] sm:$0xff]  ;;  %v3213_v38 = vld [vmem:[#allocation16 + $0x610] sm:$0xff] }
 0xc7b   :  { %7159 = vmatprep.subr.bf16.mxu1 %v8821_v46  ;;  %v3217_v46 = vld [vmem:[#allocation16 + $0x630] sm:$0xff]  ;;  %v8823_v53 = vcombine.high %v3276_v48, %v3280_v30  ;;  %v8822_v51 = vcombine.low %v3276_v48, %v3280_v30  ;;  %v11561_v58 = vpop.f32.mrf.mxu1 }
 0xc7c   :  { %v8761_v1 = vcombine.high %v3213_v38, %v3217_v46  ;;  %v8760_v40 = vcombine.low %v3213_v38, %v3217_v46  ;;  %v3222_v38 = vld [vmem:[#allocation16 + $0x658] sm:$0xff] }
 0xc7d   :  { %7197 = vmatpush1.bf16.msra.mxu0 %v8758_v57  ;;  %v3270_v57 = vld [vmem:[#allocation16 + $0x7d8] sm:$0xff] }
 0xc7e   :  { %7160 = vmatpush2.bf16.msra.mxu1 %v8820_v18  ;;  %7198 = vmatprep.subr.bf16.mxu0 %v8879_v6  ;;  %v3274_v18 = vld [vmem:[#allocation16 + $0x7f8] sm:$0xff]  ;;  %v3333_v6 = vld [vmem:[#allocation16 + $0x9d0] sm:$0xff] }
 0xc7f   :  { %7235 = vmatprep.subr.bf16.mxu1 %v8817_v59  ;;  %v3337_v59 = vld [vmem:[#allocation16 + $0x9f0] sm:$0xff]  ;;  %v8819_v29 = vcombine.high %v3270_v57, %v3274_v18  ;;  %v8818_v10 = vcombine.low %v3270_v57, %v3274_v18  ;;  %v3226_v46 = vld [vmem:[#allocation16 + $0x678] sm:$0xff] }
 0xc80   :  { %v8881_v22 = vcombine.high %v3333_v6, %v3337_v59  ;;  %v8880_v17 = vcombine.low %v3333_v6, %v3337_v59  ;;  %v8771_v18 = vcombine.high %v3222_v38, %v3226_v46 }
 0xc81   :  { %7162 = vmatmul.mubr.bf16.vlgmr.msra.gmra.mxu1 %v11518_v13  ;;  %7199 = vmatpush2.bf16.msra.mxu0 %v8878_v45  ;;  %v3262_v45 = vld [vmem:[#allocation16 + $0x798] sm:$0xff] }
 0xc82   :  { %7171 = vmatprep.mubr.bf16.mxu1 %v11551_v54  ;;  %7236 = vmatpush1.bf16.msra.mxu1 %v8816_v35  ;;  %v3266_v35 = vld [vmem:[#allocation16 + $0x7b8] sm:$0xff] }
 0xc83   :  { %7200 = vmatprep.subr.bf16.mxu0 %v8871_v43  ;;  %7237 = vmatprep.subr.bf16.mxu1 %v8809_v27  ;;  %v3325_v43 = vld [vmem:[#allocation16 + $0x990] sm:$0xff]  ;;  %v8811_v11 = vcombine.high %v3262_v45, %v3266_v35  ;;  %v8810_v25 = vcombine.low %v3262_v45, %v3266_v35  ;;  %v8770_v35 = vcombine.low %v3222_v38, %v3226_v46  ;;  %v9866_v38 = vld [vmem:[#allocation18 + $0x60] sm:$0xff]  }
 0xc84   :  { %v3329_v27 = vld [vmem:[#allocation16 + $0x9b0] sm:$0xff] }
 0xc85   :  { %7201 = vmatpush2.bf16.msra.mxu0 %v8870_v50  ;;  %v8873_v15 = vcombine.high %v3325_v43, %v3329_v27  ;;  %v3254_v50 = vld [vmem:[#allocation16 + $0x758] sm:$0xff]  ;;  %v8872_v37 = vcombine.low %v3325_v43, %v3329_v27  ;;  %v3281_v45 = vld [vmem:[#allocation16 + $0x830] sm:$0xff] }
 0xc86   :  { %7238 = vmatpush1.bf16.msra.mxu1 %v8808_v20  ;;  %7202 = vmatprep.subr.bf16.mxu0 %v8863_v55  ;;  %v3258_v20 = vld [vmem:[#allocation16 + $0x778] sm:$0xff]  ;;  %v3317_v55 = vld [vmem:[#allocation16 + $0x950] sm:$0xff] }
 0xc87   :  { %7239 = vmatprep.subr.bf16.mxu1 %v8801_v42  ;;  %v3321_v42 = vld [vmem:[#allocation16 + $0x970] sm:$0xff]  ;;  %v8803_v24 = vcombine.high %v3254_v50, %v3258_v20  ;;  %v8802_v14 = vcombine.low %v3254_v50, %v3258_v20 }
 0xc88   :  { %v8864_v26 = vcombine.low %v3317_v55, %v3321_v42 }
 0xc89   :  { %7172 = vmatmul.mubr.bf16.gmra.mxu1 %v11549_v39  ;;  %7203 = vmatpush2.bf16.msra.mxu0 %v8862_v56  ;;  %v8865_v56 = vcombine.high %v3317_v55, %v3321_v42 }
 0xc8a   :  { %7240 = vmatpush1.bf16.msra.mxu1 %v8800_v33  ;;  %7267 = vmatprep.mubr.bf16.mxu1 %v11525_v5  ;;  %v3246_v33 = vld [vmem:[#allocation16 + $0x718] sm:$0xff] }
 0xc8b   :  { %7204 = vmatprep.subr.bf16.mxu0 %v8855_v61  ;;  %7241 = vmatprep.subr.bf16.mxu1 %v8793_v41  ;;  %v3250_v61 = vld [vmem:[#allocation16 + $0x738] sm:$0xff]  ;;  %v11563_v41 = vpop.f32.mrf.mxu0 }
 0xc8d   :  { %7205 = vmatpush2.bf16.msra.mxu0 %v8854_v63  ;;  %v8795_v63 = vcombine.high %v3246_v33, %v3250_v61  ;;  %v11567_v12 = vpop.f32.mrf.mxu0 }
 0xc8e   :  { %7242 = vmatpush1.bf16.msra.mxu1 %v8792_v3  ;;  %7206 = vmatprep.subr.bf16.mxu0 %v8847_v9  ;;  %v11565_v3 = vpop.f32.mrf.mxu1  ;;  %v8857_v9 = vcombine.high %v3309_v19, %v3313_v21 }
 0xc8f   :  { %7243 = vmatprep.subr.bf16.mxu1 %v8785_v36  ;;  %v3238_v36 = vld [vmem:[#allocation16 + $0x6d8] sm:$0xff]  ;;  %v11573_v7 = vpop.f32.mrf.mxu0 }
 0xc91   :  { %7207 = vmatpush2.bf16.msra.mxu0 %v8846_v16  ;;  %v8794_v16 = vcombine.low %v3246_v33, %v3250_v61 }
 0xc92   :  { %7244 = vmatpush1.bf16.msra.mxu1 %v8784_v44  ;;  %7208 = vmatprep.subr.bf16.mxu0 %v8839_v0  ;;  %v8856_v44 = vcombine.low %v3309_v19, %v3313_v21  ;;  %v8787_v0 = vcombine.high %v3238_v36, %v3242_v60 }
 0xc93   :  { %7245 = vmatprep.subr.bf16.mxu1 %v8777_v32  ;;  %v11571_v32 = vpop.f32.mrf.mxu1 }
 0xc95   :  { %7209 = vmatpush2.bf16.msra.mxu0 %v8838_v4  ;;  %v3293_v4 = vld [vmem:[#allocation16 + $0x890] sm:$0xff]  ;;  %v11575_v48 = vpop.f32.mrf.mxu1 }
 0xc96   :  { %7246 = vmatpush1.bf16.msra.mxu1 %v8776_v47  ;;  %7210 = vmatprep.subr.bf16.mxu0 %v8831_v23  ;;  %v3297_v47 = vld [vmem:[#allocation16 + $0x8b0] sm:$0xff]  ;;  %v8786_v23 = vcombine.low %v3238_v36, %v3242_v60 }
 0xc97   :  { %7247 = vmatprep.subr.bf16.mxu1 %v8769_v49  ;;  %v8848_v49 = vcombine.low %v3301_v8, %v3305_v34  ;;  %v8841_v30 = vcombine.high %v3293_v4, %v3297_v47  ;;  %v8840_v57 = vcombine.low %v3293_v4, %v3297_v47  ;;  %v11579_v6 = vpop.f32.mrf.mxu1  ;;  %v9862_v36 = vld [vmem:[#allocation18 + $0x70] sm:$0xff]  }
 0xc99   :  { %7211 = vmatpush2.bf16.msra.mxu0 %v8830_v62  ;;  %v11577_v62 = vpop.f32.mrf.mxu0 }
 0xc9a   :  { %7248 = vmatpush1.bf16.msra.mxu1 %v8768_v52  ;;  %7212 = vmatprep.subr.bf16.mxu0 %v8823_v53  ;;  %v3285_v52 = vld [vmem:[#allocation16 + $0x850] sm:$0xff] }
 0xc9b   :  { %7249 = vmatprep.subr.bf16.mxu1 %v8761_v1  ;;  %v3289_v53 = vld [vmem:[#allocation16 + $0x870] sm:$0xff]  ;;  %v8778_v1 = vcombine.low %v3230_v28, %v3234_v31 }
 0xc9c   :  { %v8833_v59 = vcombine.high %v3285_v52, %v3289_v53  ;;  %v8832_v43 = vcombine.low %v3285_v52, %v3289_v53 }
 0xc9d   :  { %7213 = vmatpush2.bf16.msra.mxu0 %v8822_v51  ;;  %v3214_v51 = vld [vmem:[#allocation16 + $0x618] sm:$0xff] }
 0xc9e   :  { %7250 = vmatpush1.bf16.msra.mxu1 %v8760_v40  ;;  %7288 = vmatprep.subr.bf16.mxu0 %v8819_v29  ;;  %v3218_v40 = vld [vmem:[#allocation16 + $0x638] sm:$0xff]  ;;  %v11581_v29 = vpop.f32.mrf.mxu0 }
 0xc9f   :  { %7251 = vmatprep.subr.bf16.mxu1 %v8881_v22  ;;  %v3277_v22 = vld [vmem:[#allocation16 + $0x810] sm:$0xff]  ;;  %v8763_v27 = vcombine.high %v3214_v51, %v3218_v40  ;;  %v8762_v20 = vcombine.low %v3214_v51, %v3218_v40  ;;  %v9868_v51 = vld [vmem:[#allocation18 + $0x58] sm:$0xff]  }
 0xca0   :  { %7215 = vmatmul.mubr.bf16.vlgmr.msra.gmra.mxu0 %v11518_v13  ;;  %v11585_v50 = vpop.f32.mrf.mxu0  ;;  %v8824_v55 = vcombine.low %v3277_v22, %v3281_v45 }
 0xca1   :  { %7224 = vmatprep.mubr.bf16.mxu0 %v11551_v54  ;;  %7289 = vmatpush1.bf16.msra.mxu0 %v8818_v10  ;;  %v11583_v10 = vpop.f32.mrf.mxu1 }
 0xca2   :  { %7252 = vmatpush2.bf16.msra.mxu1 %v8880_v17  ;;  %7290 = vmatprep.subr.bf16.mxu0 %v8811_v11  ;;  %v8825_v17 = vcombine.high %v3277_v22, %v3281_v45  ;;  %v3334_v11 = vld [vmem:[#allocation16 + $0x9d8] sm:$0xff]  ;;  %v11589_v33 = vpop.f32.mrf.mxu0 }
 0xca3   :  { %7253 = vmatprep.subr.bf16.mxu1 %v8873_v15  ;;  %v3338_v15 = vld [vmem:[#allocation16 + $0x9f8] sm:$0xff] }
 0xca4   :  { %v8883_v42 = vcombine.high %v3334_v11, %v3338_v15  ;;  %v8882_v61 = vcombine.low %v3334_v11, %v3338_v15  ;;  %v9870_v11 = vld [vmem:[#allocation18 + $0x50] sm:$0xff]  }
 0xca5   :  { %7291 = vmatpush1.bf16.msra.mxu0 %v8810_v25  ;;  %v11587_v25 = vpop.f32.mrf.mxu1 }
 0xca6   :  { %7254 = vmatpush2.bf16.msra.mxu1 %v8872_v37  ;;  %7292 = vmatprep.subr.bf16.mxu0 %v8803_v24  ;;  %v3326_v37 = vld [vmem:[#allocation16 + $0x998] sm:$0xff] }
 0xca7   :  { %7255 = vmatprep.subr.bf16.mxu1 %v8865_v56  ;;  %v3330_v24 = vld [vmem:[#allocation16 + $0x9b8] sm:$0xff]  ;;  %v11591_v21 = vpop.f32.mrf.mxu1 }
 0xca8   :  { %7225 = vmatmul.mubr.bf16.gmra.mxu0 %v11549_v39  ;;  %v9860_v56 = vld [vmem:[#allocation18 + $0x78] sm:$0xff]   ;;  %v8875_v19 = vcombine.high %v3326_v37, %v3330_v24  ;;  %v8874_v8 = vcombine.low %v3326_v37, %v3330_v24 }
 0xca9   :  { %7293 = vmatpush1.bf16.msra.mxu0 %v8802_v14  ;;  %7320 = vmatprep.mubr.bf16.mxu0 %v11525_v5  ;;  %v8779_v5 = vcombine.high %v3230_v28, %v3234_v31  ;;  %v3318_v14 = vld [vmem:[#allocation16 + $0x958] sm:$0xff]  ;;  %v11595_v60 = vpop.f32.mrf.mxu1  ;;  %v9864_v28 = vld [vmem:[#allocation18 + $0x68] sm:$0xff]  }
 0xcaa   :  { %7256 = vmatpush2.bf16.msra.mxu1 %v8864_v26  ;;  %7294 = vmatprep.subr.bf16.mxu0 %v8795_v63  ;;  %v3322_v26 = vld [vmem:[#allocation16 + $0x978] sm:$0xff] }
 0xcab   :  { %7257 = vmatprep.subr.bf16.mxu1 %v8857_v9  ;;  %v9861_v63 = vld [vmem:[#allocation18 + $0x38] sm:$0xff]   ;;  %v11593_v9 = vpop.f32.mrf.mxu0  ;;  %v11601_v31 = vpop.f32.mrf.mxu1  ;;  %v8866_v4 = vcombine.low %v3318_v14, %v3322_v26 }
 0xcac   :  { %v3278_v37 = vld [vmem:[#allocation16 + $0x818] sm:$0xff] }
 0xcad   :  { %7295 = vmatpush1.bf16.msra.mxu0 %v8794_v16  ;;  %v8867_v16 = vcombine.high %v3318_v14, %v3322_v26  ;;  %v11605_v46 = vpop.f32.mrf.mxu1  ;;  %v3282_v24 = vld [vmem:[#allocation16 + $0x838] sm:$0xff] }
 0xcae   :  { %7258 = vmatpush2.bf16.msra.mxu1 %v8856_v44  ;;  %7296 = vmatprep.subr.bf16.mxu0 %v8787_v0  ;;  %v3310_v44 = vld [vmem:[#allocation16 + $0x918] sm:$0xff] }
 0xcaf   :  { %7259 = vmatprep.subr.bf16.mxu1 %v8849_v2  ;;  %v3314_v0 = vld [vmem:[#allocation16 + $0x938] sm:$0xff]  ;;  %v9863_v2 = vld [vmem:[#allocation18 + $0x30] sm:$0xff]   ;;  %v11610_v40 = vpop.f32.mrf.mxu1 }
 0xcb0   :  { %v8858_v52 = vcombine.low %v3310_v44, %v3314_v0 }
 0xcb1   :  { %7297 = vmatpush1.bf16.msra.mxu0 %v8786_v23  ;;  %v8859_v23 = vcombine.high %v3310_v44, %v3314_v0  ;;  %v11614_v15 = vpop.f32.mrf.mxu1  ;;  %v8826_v44 = vcombine.low %v3278_v37, %v3282_v24 }
 0xcb2   :  { %7260 = vmatpush2.bf16.msra.mxu1 %v8848_v49  ;;  %7298 = vmatprep.subr.bf16.mxu0 %v8779_v5  ;;  %v3302_v49 = vld [vmem:[#allocation16 + $0x8d8] sm:$0xff] }
 0xcb3   :  { %7261 = vmatprep.subr.bf16.mxu1 %v8841_v30  ;;  %v3306_v5 = vld [vmem:[#allocation16 + $0x8f8] sm:$0xff]  ;;  %v9865_v30 = vld [vmem:[#allocation18 + $0x28] sm:$0xff]  }
 0xcb4   :  { %v8850_v22 = vcombine.low %v3302_v49, %v3306_v5 }
 0xcb5   :  { %7299 = vmatpush1.bf16.msra.mxu0 %v8778_v1  ;;  %v8851_v1 = vcombine.high %v3302_v49, %v3306_v5  ;;  %v9878_v5 = vld [vmem:[#allocation18 + $0xf0] sm:$0xff]  }
 0xcb6   :  { %7262 = vmatpush2.bf16.msra.mxu1 %v8840_v57  ;;  %7300 = vmatprep.subr.bf16.mxu0 %v8771_v18  ;;  %v3294_v57 = vld [vmem:[#allocation16 + $0x898] sm:$0xff] }
 0xcb7   :  { %7263 = vmatprep.subr.bf16.mxu1 %v8833_v59  ;;  %v3298_v18 = vld [vmem:[#allocation16 + $0x8b8] sm:$0xff]  ;;  %v9867_v59 = vld [vmem:[#allocation18 + $0x20] sm:$0xff]  }
 0xcb9   :  { %7301 = vmatpush1.bf16.msra.mxu0 %v8770_v35  ;;  %v8843_v35 = vcombine.high %v3294_v57, %v3298_v18 }
 0xcba   :  { %7264 = vmatpush2.bf16.msra.mxu1 %v8832_v43  ;;  %7302 = vmatprep.subr.bf16.mxu0 %v8763_v27  ;;  %v3286_v43 = vld [vmem:[#allocation16 + $0x858] sm:$0xff] }
 0xcbb   :  { %7265 = vmatprep.subr.bf16.mxu1 %v8825_v17  ;;  %v11598_v34 = vpop.f32.mrf.mxu0  ;;  %v3290_v27 = vld [vmem:[#allocation16 + $0x878] sm:$0xff] }
 0xcbc   :  { %v9869_v17 = vld [vmem:[#allocation18 + $0x18] sm:$0xff]   ;;  %v8834_v14 = vcombine.low %v3286_v43, %v3290_v27 }
 0xcbd   :  { %7303 = vmatpush1.bf16.msra.mxu0 %v8762_v20  ;;  %v11603_v47 = vpop.f32.mrf.mxu0  ;;  %v8842_v20 = vcombine.low %v3294_v57, %v3298_v18  ;;  %v9879_v57 = vld [vmem:[#allocation18 + $0xb0] sm:$0xff]  }
 0xcbe   :  { %7266 = vmatpush2.bf16.msra.mxu1 %v8824_v55  ;;  %7304 = vmatprep.subr.bf16.mxu0 %v8883_v42  ;;  %v8835_v42 = vcombine.high %v3286_v43, %v3290_v27 }
 0xcbf   :  { %9054 = vmatprep.subr.bf16.mxu1 %v9860_v56  ;;  %v11608_v53 = vpop.f32.mrf.mxu0  ;;  %v9871_v56 = vld [vmem:[#allocation18 + $0x10] sm:$0xff]  }
 0xcc1   :  { %7268 = vmatmul.mubr.bf16.vlgmr.msra.gmra.mxu1 %v11518_v13  ;;  %7305 = vmatpush2.bf16.msra.mxu0 %v8882_v61  ;;  %v11612_v45 = vpop.f32.mrf.mxu0  ;;  %v9872_v61 = vld [vmem:[#allocation18 + $0x48] sm:$0xff]  }
 0xcc2   :  { %7277 = vmatprep.mubr.bf16.mxu1 %v11551_v54  ;;  %7306 = vmatprep.subr.bf16.mxu0 %v8875_v19  ;;  %v11618_v19 = vpop.f32.mrf.mxu1 }
 0xcc3   :  { %9055 = vmatpush3.bf16.msra.mxu1 %v9861_v63  ;;  %v11616_v55 = vpop.f32.mrf.mxu0  ;;  %v8827_v63 = vcombine.high %v3278_v37, %v3282_v24  ;;  %v9883_v24 = vld [vmem:[#allocation18 + $0xa0] sm:$0xff]  }
 0xcc4   :  { %9056 = vmatprep.subr.bf16.mxu1 %v9862_v36  ;;  %v9873_v36 = vld [vmem:[#allocation18 + $0x8] sm:$0xff]  }
 0xcc5   :  { %7307 = vmatpush2.bf16.msra.mxu0 %v8874_v8  ;;  %v11620_v26 = vpop.f32.mrf.mxu0  ;;  %v9874_v8 = vld [vmem:[#allocation18 + $0x40] sm:$0xff]  }
 0xcc6   :  { %7308 = vmatprep.subr.bf16.mxu0 %v8867_v16  ;;  %v11622_v16 = vpop.f32.mrf.mxu1 }
 0xcc7   :  { %9057 = vmatpush3.bf16.msra.mxu1 %v9863_v2  ;;  %v11624_v0 = vpop.f32.mrf.mxu0  ;;  %v9876_v2 = vld [vmem:[#allocation18 + $0xf8] sm:$0xff]  }
 0xcc8   :  { %9058 = vmatprep.subr.bf16.mxu1 %v9864_v28  ;;  %v9875_v28 = vld [vmem:[#allocation18] sm:$0xff]  }
 0xcc9   :  { %7278 = vmatmul.mubr.bf16.gmra.mxu1 %v11549_v39  ;;  %7309 = vmatpush2.bf16.msra.mxu0 %v8866_v4  ;;  %v11626_v4 = vpop.f32.mrf.mxu1  ;;  %v11628_v49 = vpop.f32.mrf.mxu0 }
 0xcca   :  { %7310 = vmatprep.subr.bf16.mxu0 %v8859_v23  ;;  %v9877_v23 = vld [vmem:[#allocation18 + $0xb8] sm:$0xff]  }
 0xccb   :  { %9059 = vmatpush3.bf16.msra.mxu1 %v9865_v30 }
 0xccc   :  { %9060 = vmatprep.subr.bf16.mxu1 %v9866_v38 }
 0xccd   :  { %7311 = vmatpush2.bf16.msra.mxu0 %v8858_v52 }
 0xcce   :  { %7312 = vmatprep.subr.bf16.mxu0 %v8851_v1 }
 0xccf   :  { %9061 = vmatpush3.bf16.msra.mxu1 %v9867_v59  ;;  %v9880_v59 = vld [vmem:[#allocation18 + $0xe8] sm:$0xff]  }
 0xcd0   :  { %9062 = vmatprep.subr.bf16.mxu1 %v9868_v51 }
 0xcd1   :  { %7313 = vmatpush2.bf16.msra.mxu0 %v8850_v22 }
 0xcd2   :  { %7314 = vmatprep.subr.bf16.mxu0 %v8843_v35 }
 0xcd3   :  { %9063 = vmatpush3.bf16.msra.mxu1 %v9869_v17 }
 0xcd4   :  { %9064 = vmatprep.subr.bf16.mxu1 %v9870_v11 }
 0xcd5   :  { %7315 = vmatpush2.bf16.msra.mxu0 %v8842_v20 }
 0xcd6   :  { %7316 = vmatprep.subr.bf16.mxu0 %v8835_v42 }
 0xcd7   :  { %9065 = vmatpush3.bf16.msra.mxu1 %v9871_v56 }
 0xcd8   :  { %9066 = vmatprep.subr.bf16.mxu1 %v9872_v61  ;;  %v9884_v61 = vld [vmem:[#allocation18 + $0xd8] sm:$0xff]  }
 0xcd9   :  { %7317 = vmatpush2.bf16.msra.mxu0 %v8834_v14 }
 0xcda   :  { %7318 = vmatprep.subr.bf16.mxu0 %v8827_v63 }
 0xcdb   :  { %9067 = vmatpush3.bf16.msra.mxu1 %v9873_v36  ;;  %v6307_v30 = vpop.f32.mrf.mxu1  ;;  %v9892_v36 = vld [vmem:[#allocation18 + $0x178] sm:$0xff]  }
 0xcdc   :  { %9068 = vmatprep.subr.bf16.mxu1 %v9874_v8  ;;  %v6360_v38 = vpop.f32.mrf.mxu0 }
 0xcdd   :  { %7319 = vmatpush2.bf16.msra.mxu0 %v8826_v44  ;;  %v11631_v52 = vadd.f32 %v6360_v38, %v6307_v30  ;;  %v6309_v1 = vpop.f32.mrf.mxu1  ;;  %v9890_v30 = vld [vmem:[#allocation18 + $0xc0] sm:$0xff]  }
 0xcde   :  { %9082 = vmatprep.subr.bf16.mxu0 %v9876_v2  ;;  %v6362_v18 = vpop.f32.mrf.mxu0  ;;  %v9885_v2 = vld [vmem:[#allocation18 + $0x98] sm:$0xff]   ;;  %v9891_v38 = vld [vmem:[#allocation18 + $0x80] sm:$0xff]  }
 0xcdf   :  { %9069 = vmatpush3.bf16.msra.mxu1 %v9875_v28  ;;  %v11634_v51 = vadd.f32 %v6362_v18, %v6309_v1  ;;  %v6311_v22 = vpop.f32.mrf.mxu1  ;;  %v9887_v28 = vld [vmem:[#allocation18 + $0x90] sm:$0xff]   ;;  %v9908_v1 = vld [vmem:[#allocation18 + $0x1f8] sm:$0xff]  }
 0xce0   :  { %7321 = vmatmul.mubr.bf16.vlgmr.msra.gmra.mxu0 %v11518_v13  ;;  %v6364_v35 = vpop.f32.mrf.mxu0  ;;  %v9881_v13 = vld [vmem:[#allocation18 + $0xa8] sm:$0xff]   ;;  %9110 = vmatprep.subr.bf16.mxu1 %v9892_v36 }
 0xce1   :  { %7330 = vmatprep.mubr.bf16.mxu0 %v11551_v54  ;;  %9083 = vmatpush3.bf16.msra.mxu0 %v9877_v23  ;;  %v11636_v43 = vadd.f32 %v6364_v35, %v6311_v22  ;;  %v11638_v27 = vpop.f32.mrf.mxu1  ;;  %v9882_v54 = vld [vmem:[#allocation18 + $0xe0] sm:$0xff]   ;;  %v9888_v23 = vld [vmem:[#allocation18 + $0xc8] sm:$0xff]  }
 0xce2   :  { %9084 = vmatprep.subr.bf16.mxu0 %v9878_v5  ;;  %v11640_v17 = vpop.f32.mrf.mxu0  ;;  %v9889_v5 = vld [vmem:[#allocation18 + $0x88] sm:$0xff]  }
 0xce3   :  { %v6317_v11 = vpop.f32.mrf.mxu1 }
 0xce4   :  { %v6370_v20 = vpop.f32.mrf.mxu0 }
 0xce5   :  { %9085 = vmatpush3.bf16.msra.mxu0 %v9879_v57  ;;  %v11643_v42 = vadd.f32 %v6370_v20, %v6317_v11  ;;  %v6319_v37 = vpop.f32.mrf.mxu1 }
 0xce6   :  { %9086 = vmatprep.subr.bf16.mxu0 %v9880_v59  ;;  %v6372_v56 = vpop.f32.mrf.mxu0 }
 0xce7   :  { %v11645_v14 = vadd.f32 %v6372_v56, %v6319_v37  ;;  %v6321_v63 = vpop.f32.mrf.mxu1 }
 0xce8   :  { %7331 = vmatmul.mubr.bf16.gmra.mxu0 %v11549_v39  ;;  %v6374_v8 = vpop.f32.mrf.mxu0  ;;  %v9886_v39 = vld [vmem:[#allocation18 + $0xd0] sm:$0xff]  }
 0xce9   :  { %9087 = vmatpush3.bf16.msra.mxu0 %v9881_v13  ;;  %v11647_v44 = vadd.f32 %v6374_v8, %v6321_v63  ;;  %v11649_v57 = vpop.f32.mrf.mxu1 }
 0xcea   :  { %9088 = vmatprep.subr.bf16.mxu0 %v9882_v54  ;;  %v11651_v35 = vpop.f32.mrf.mxu0 }
 0xced   :  { %9089 = vmatpush3.bf16.msra.mxu0 %v9883_v24 }
 0xcee   :  { %9090 = vmatprep.subr.bf16.mxu0 %v9884_v61 }
 0xcf1   :  { %9091 = vmatpush3.bf16.msra.mxu0 %v9885_v2 }
 0xcf2   :  { %9092 = vmatprep.subr.bf16.mxu0 %v9886_v39 }
 0xcf5   :  { %9093 = vmatpush3.bf16.msra.mxu0 %v9887_v28 }
 0xcf6   :  { %9094 = vmatprep.subr.bf16.mxu0 %v9888_v23 }
 0xcf9   :  { %9095 = vmatpush3.bf16.msra.mxu0 %v9889_v5 }
 0xcfa   :  { %9096 = vmatprep.subr.bf16.mxu0 %v9890_v30 }
 0xcfd   :  { %9097 = vmatpush3.bf16.msra.mxu0 %v9891_v38  ;;  %v6466_v18 = vpop.f32.mrf.mxu1 }
 0xcfe   :  { %9138 = vmatprep.subr.bf16.mxu0 %v9908_v1 }
 0xcff   :  { %v6468_v59 = vpop.f32.mrf.mxu1 }
 0xd01   :  { %v6470_v22 = vpop.f32.mrf.mxu1 }
 0xd03   :  { %v6472_v13 = vpop.f32.mrf.mxu1 }
 0xd05   :  { %v6476_v20 = vpop.f32.mrf.mxu1 }
 0xd07   :  { %v6478_v63 = vpop.f32.mrf.mxu1 }
 0xd09   :  { %v6480_v28 = vpop.f32.mrf.mxu1 }
 0xd0b   :  { %v6482_v1 = vpop.f32.mrf.mxu1 }
 0xd20   :  { %v6413_v54 = vpop.f32.mrf.mxu0 }
 0xd21   :  { %v11653_v11 = vadd.f32 %v6466_v18, %v6413_v54 }
 0xd22   :  { %v6415_v37 = vpop.f32.mrf.mxu0 }
 0xd23   :  { %v11655_v24 = vadd.f32 %v6468_v59, %v6415_v37 }
 0xd24   :  { %v6417_v56 = vpop.f32.mrf.mxu0 }
 0xd25   :  { %v11657_v61 = vadd.f32 %v6470_v22, %v6417_v56  ;;  %v6151_v56 = vadd.f32 %v11567_v12, %v11565_v3  ;;  %v6163_v3 = vadd.f32 %v11589_v33, %v11587_v25  ;;  %v9897_v33 = vld [vmem:[#allocation18 + $0x128] sm:$0xff]  }
 0xd26   :  { %v6419_v36 = vpop.f32.mrf.mxu0 }
 0xd27   :  { %v11659_v8 = vadd.f32 %v6472_v13, %v6419_v36  ;;  %v6149_v13 = vadd.f32 %v11563_v41, %v11561_v58  ;;  %v9894_v41 = vld [vmem:[#allocation18 + $0x170] sm:$0xff]  }
 0xd28   :  { %v6423_v2 = vpop.f32.mrf.mxu0 }
 0xd29   :  { %v11661_v39 = vadd.f32 %v6476_v20, %v6423_v2  ;;  %v6153_v20 = vadd.f32 %v11573_v7, %v11571_v32  ;;  %v6159_v32 = vadd.f32 %v11581_v29, %v11579_v6  ;;  %v6161_v7 = vadd.f32 %v11585_v50, %v11583_v10  ;;  %v9899_v10 = vld [vmem:[#allocation18 + $0x120] sm:$0xff]   ;;  %v9900_v50 = vld [vmem:[#allocation18 + $0x158] sm:$0xff]  }
 0xd2a   :  { %v6425_v23 = vpop.f32.mrf.mxu0 }
 0xd2b   :  { %v11663_v5 = vadd.f32 %v6478_v63, %v6425_v23  ;;  %v6155_v63 = vadd.f32 %v11577_v62, %v11575_v48  ;;  %v6165_v48 = vadd.f32 %v11593_v9, %v11591_v21  ;;  %v9901_v21 = vld [vmem:[#allocation18 + $0x118] sm:$0xff]   ;;  %v9902_v9 = vld [vmem:[#allocation18 + $0x150] sm:$0xff]  }
 0xd2c   :  { %v6427_v30 = vpop.f32.mrf.mxu0 }
 0xd2d   :  { %12051 = vst [vmem:[#allocation65_spill] sm:$0xff] %v11663_v5  ;;  %v11665_v38 = vadd.f32 %v6480_v28, %v6427_v30  ;;  %v9893_v5 = vld [vmem:[#allocation18 + $0x138] sm:$0xff]  }
 0xd2e   :  { %v6429_v18 = vpop.f32.mrf.mxu0 }
 0xd2f   :  { %v11667_v59 = vadd.f32 %v6482_v1, %v6429_v18 }
 0xd31   :  { %12052 = vst [vmem:[#allocation67_spill] sm:$0xff] %v11667_v59 }
 0xd41   :  { %v7163_v22 = vpop.f32.mrf.mxu1 }
 0xd42   :  { %v7341_v36 = vmul.f32 %v7163_v22, %v6149_v13 }
 0xd43   :  { %v7165_v54 = vpop.f32.mrf.mxu1 }
 0xd44   :  { %v7342_v23 = vmul.f32 %v7165_v54, %v6151_v56  ;;  %v9895_v54 = vld [vmem:[#allocation18 + $0x130] sm:$0xff]   ;;  %v9904_v56 = vld [vmem:[#allocation18 + $0x148] sm:$0xff]  }
 0xd45   :  { %v7167_v37 = vpop.f32.mrf.mxu1 }
 0xd46   :  { %v7349_v2 = vmul.f32 %v7167_v37, %v6153_v20  ;;  %v9896_v20 = vld [vmem:[#allocation18 + $0x168] sm:$0xff]  }
 0xd47   :  { %v7169_v28 = vpop.f32.mrf.mxu1 }
 0xd48   :  { %v7373_v30 = vpack.c.bf16 %v7349_v2, %v7341_v36  ;;  %v7350_v1 = vmul.f32 %v7169_v28, %v6155_v63  ;;  %v9905_v2 = vld [vmem:[#allocation18 + $0x108] sm:$0xff]   ;;  %v6255_v28 = vadd.f32 %v11595_v60, %v11598_v34 }
 0xd49   :  { %v7173_v18 = vpop.f32.mrf.mxu1 }
 0xd4a   :  { %v7374_v59 = vpack.c.bf16 %v7350_v1, %v7342_v23  ;;  %v7357_v62 = vmul.f32 %v7173_v18, %v6159_v32  ;;  %v6259_v23 = vadd.f32 %v11605_v46, %v11608_v53  ;;  %v6257_v18 = vadd.f32 %v11601_v31, %v11603_v47  ;;  %v9909_v53 = vld [vmem:[#allocation18 + $0x1b8] sm:$0xff]  }
 0xd4b   :  { %v7175_v58 = vpop.f32.mrf.mxu1  ;;  %v6265_v31 = vadd.f32 %v11614_v15, %v11616_v55  ;;  %v6269_v47 = vadd.f32 %v11622_v16, %v11624_v0  ;;  %v9912_v15 = vld [vmem:[#allocation18 + $0x1e8] sm:$0xff]  }
 0xd4c   :  { %7805 = vmatprep.mubr.bf16.mxu1 %v7374_v59  ;;  %v7358_v6 = vmul.f32 %v7175_v58, %v6161_v7  ;;  %v9898_v59 = vld [vmem:[#allocation18 + $0x160] sm:$0xff]   ;;  %v6261_v58 = vadd.f32 %v11610_v40, %v11612_v45  ;;  %v12053_v40 = vmov 0.0  }
 0xd4d   :  { %v7177_v12 = vpop.f32.mrf.mxu1  ;;  %7806 = vmatmul.mubr.bf16.vlgmr.msra.gmra.mxu1 %v7373_v30  ;;  %v9906_v30 = vld [vmem:[#allocation18 + $0x140] sm:$0xff]  }
 0xd4e   :  { %v7365_v22 = vmul.f32 %v7177_v12, %v6163_v3  ;;  %9111 = vmatpush3.bf16.msra.mxu1 %v9893_v5  ;;  %v9903_v5 = vld [vmem:[#allocation18 + $0x110] sm:$0xff]   ;;  %v9907_v12 = vld [vmem:[#allocation18 + $0x100] sm:$0xff]  }
 0xd4f   :  { %v7179_v13 = vpop.f32.mrf.mxu1  ;;  %9112 = vmatprep.subr.bf16.mxu1 %v9894_v41 }
 0xd50   :  { %v7381_v29 = vpack.c.bf16 %v7365_v22, %v7357_v62  ;;  %v7366_v37 = vmul.f32 %v7179_v13, %v6165_v48  ;;  %v9910_v22 = vld [vmem:[#allocation18 + $0x1f0] sm:$0xff]   ;;  %v6271_v13 = vadd.f32 %v11626_v4, %v11628_v49  ;;  %v9917_v4 = vld [vmem:[#allocation18 + $0x198] sm:$0xff]  }
 0xd51   :  { %v9918_v49 = vld [vmem:[#allocation18 + $0x1d0] sm:$0xff]  }
 0xd52   :  { %v7382_v25 = vpack.c.bf16 %v7366_v37, %v7358_v6  ;;  %9113 = vmatpush3.bf16.msra.mxu1 %v9895_v54  ;;  %v6267_v54 = vadd.f32 %v11618_v19, %v11620_v26  ;;  %v9915_v19 = vld [vmem:[#allocation18 + $0x1a0] sm:$0xff]   ;;  %v9916_v26 = vld [vmem:[#allocation18 + $0x1d8] sm:$0xff]  }
 0xd53   :  { %9114 = vmatprep.subr.bf16.mxu1 %v9896_v20 }
 0xd54   :  { %7813 = vmatprep.mubr.bf16.mxu1 %v7382_v25 }
 0xd55   :  { %7814 = vmatmul.mubr.bf16.gmra.mxu1 %v7381_v29  ;;  %v9911_v29 = vld [vmem:[#allocation18 + $0x1b0] sm:$0xff]  }
 0xd56   :  { %9115 = vmatpush3.bf16.msra.mxu1 %v9897_v33  ;;  %v9913_v33 = vld [vmem:[#allocation18 + $0x1a8] sm:$0xff]  }
 0xd57   :  { %9116 = vmatprep.subr.bf16.mxu1 %v9898_v59  ;;  %v9914_v59 = vld [vmem:[#allocation18 + $0x1e0] sm:$0xff]  }
 0xd5a   :  { %9117 = vmatpush3.bf16.msra.mxu1 %v9899_v10  ;;  %v9919_v10 = vld [vmem:[#allocation18 + $0x190] sm:$0xff]  }
 0xd5b   :  { %9118 = vmatprep.subr.bf16.mxu1 %v9900_v50  ;;  %v9920_v50 = vld [vmem:[#allocation18 + $0x1c8] sm:$0xff]  }
 0xd5e   :  { %9119 = vmatpush3.bf16.msra.mxu1 %v9901_v21 }
 0xd5f   :  { %9120 = vmatprep.subr.bf16.mxu1 %v9902_v9  ;;  %v9921_v9 = vld [vmem:[#allocation18 + $0x188] sm:$0xff]  }
 0xd60   :  { %v7216_v63 = vpop.f32.mrf.mxu0 }
 0xd61   :  { %v7343_v41 = vmul.f32 %v7216_v63, %v6255_v28 }
 0xd62   :  { %v7218_v36 = vpop.f32.mrf.mxu0  ;;  %9121 = vmatpush3.bf16.msra.mxu1 %v9903_v5  ;;  %v9922_v5 = vld [vmem:[#allocation18 + $0x1c0] sm:$0xff]  }
 0xd63   :  { %9122 = vmatprep.subr.bf16.mxu1 %v9904_v56  ;;  %v7344_v7 = vmul.f32 %v7218_v36, %v6257_v18  ;;  %v9923_v36 = vld [vmem:[#allocation18 + $0x180] sm:$0xff]  }
 0xd64   :  { %v7220_v1 = vpop.f32.mrf.mxu0 }
 0xd65   :  { %v7351_v32 = vmul.f32 %v7220_v1, %v6259_v23 }
 0xd66   :  { %v7222_v3 = vpop.f32.mrf.mxu0  ;;  %9123 = vmatpush3.bf16.msra.mxu1 %v9905_v2  ;;  %v6367_v2 = vadd.f32 %v11640_v17, %v11638_v27  ;;  %v6377_v27 = vadd.f32 %v11651_v35, %v11649_v57 }
 0xd67   :  { %v7375_v48 = vpack.c.bf16 %v7351_v32, %v7343_v41  ;;  %v7352_v60 = vmul.f32 %v7222_v3, %v6261_v58  ;;  %9124 = vmatprep.subr.bf16.mxu1 %v9906_v30 }
 0xd68   :  { %v7226_v34 = vpop.f32.mrf.mxu0 }
 0xd69   :  { %v7376_v46 = vpack.c.bf16 %v7352_v60, %v7344_v7  ;;  %v7359_v20 = vmul.f32 %v7226_v34, %v6265_v31 }
 0xd6a   :  { %v7228_v62 = vpop.f32.mrf.mxu0  ;;  %9125 = vmatpush3.bf16.msra.mxu1 %v9907_v12 }
 0xd6b   :  { %7854 = vmatprep.mubr.bf16.mxu0 %v7376_v46  ;;  %9325 = vmatprep.subr.bf16.mxu1 %v12053_v40  ;;  %v7360_v55 = vmul.f32 %v7228_v62, %v6267_v54 }
 0xd6c   :  { %v7230_v45 = vpop.f32.mrf.mxu0  ;;  %7855 = vmatmul.mubr.bf16.vlgmr.msra.gmra.mxu0 %v7375_v48 }
 0xd6d   :  { %v7367_v6 = vmul.f32 %v7230_v45, %v6269_v47  ;;  %9139 = vmatpush3.bf16.msra.mxu0 %v9909_v53 }
 0xd6e   :  { %v7232_v37 = vpop.f32.mrf.mxu0  ;;  %9140 = vmatprep.subr.bf16.mxu0 %v9910_v22 }
 0xd6f   :  { %v7383_v16 = vpack.c.bf16 %v7367_v6, %v7359_v20  ;;  %v7368_v0 = vmul.f32 %v7232_v37, %v6271_v13 }
 0xd71   :  { %v7384_v25 = vpack.c.bf16 %v7368_v0, %v7360_v55  ;;  %9141 = vmatpush3.bf16.msra.mxu0 %v9911_v29  ;;  %v12055_v29 = vld [vmem:[#allocation67_spill] sm:$0xff] }
 0xd72   :  { %9142 = vmatprep.subr.bf16.mxu0 %v9912_v15 }
 0xd73   :  { %7862 = vmatprep.mubr.bf16.mxu0 %v7384_v25 }
 0xd74   :  { %7863 = vmatmul.mubr.bf16.gmra.mxu0 %v7383_v16 }
 0xd75   :  { %9143 = vmatpush3.bf16.msra.mxu0 %v9913_v33 }
 0xd76   :  { %9144 = vmatprep.subr.bf16.mxu0 %v9914_v59 }
 0xd79   :  { %9145 = vmatpush3.bf16.msra.mxu0 %v9915_v19 }
 0xd7a   :  { %9146 = vmatprep.subr.bf16.mxu0 %v9916_v26 }
 0xd7d   :  { %9147 = vmatpush3.bf16.msra.mxu0 %v9917_v4 }
 0xd7e   :  { %9148 = vmatprep.subr.bf16.mxu0 %v9918_v49 }
 0xd81   :  { %v7269_v21 = vpop.f32.mrf.mxu1  ;;  %9149 = vmatpush3.bf16.msra.mxu0 %v9919_v10 }
 0xd82   :  { %9150 = vmatprep.subr.bf16.mxu0 %v9920_v50  ;;  %v7345_v28 = vmul.f32 %v7269_v21, %v11631_v52 }
 0xd83   :  { %v7271_v56 = vpop.f32.mrf.mxu1 }
 0xd84   :  { %v7346_v1 = vmul.f32 %v7271_v56, %v11634_v51 }
 0xd85   :  { %v7273_v63 = vpop.f32.mrf.mxu1  ;;  %9151 = vmatpush3.bf16.msra.mxu0 %v9921_v9 }
 0xd86   :  { %v7353_v23 = vmul.f32 %v7273_v63, %v11636_v43  ;;  %9152 = vmatprep.subr.bf16.mxu0 %v9922_v5 }
 0xd87   :  { %v7275_v30 = vpop.f32.mrf.mxu1 }
 0xd88   :  { %v7377_v18 = vpack.c.bf16 %v7353_v23, %v7345_v28  ;;  %v7354_v58 = vmul.f32 %v7275_v30, %v6367_v2 }
 0xd89   :  { %v7279_v41 = vpop.f32.mrf.mxu1  ;;  %9153 = vmatpush3.bf16.msra.mxu0 %v9923_v36 }
 0xd8a   :  { %v7378_v32 = vpack.c.bf16 %v7354_v58, %v7346_v1  ;;  %v7361_v52 = vmul.f32 %v7279_v41, %v11643_v42 }
 0xd8b   :  { %v7281_v3 = vpop.f32.mrf.mxu1 }
 0xd8c   :  { %7903 = vmatprep.mubr.bf16.mxu1 %v7378_v32  ;;  %v7362_v7 = vmul.f32 %v7281_v3, %v11645_v14 }
 0xd8d   :  { %v7283_v12 = vpop.f32.mrf.mxu1  ;;  %7904 = vmatmul.mubr.bf16.vlgmr.msra.gmra.mxu1 %v7377_v18 }
 0xd8e   :  { %v7369_v43 = vmul.f32 %v7283_v12, %v11647_v44 }
 0xd8f   :  { %v7285_v17 = vpop.f32.mrf.mxu1 }
 0xd90   :  { %v7385_v51 = vpack.c.bf16 %v7369_v43, %v7361_v52  ;;  %v7370_v48 = vmul.f32 %v7285_v17, %v6377_v27 }
 0xd92   :  { %v7386_v60 = vpack.c.bf16 %v7370_v48, %v7362_v7 }
 0xd94   :  { %7911 = vmatprep.mubr.bf16.mxu1 %v7386_v60 }
 0xd95   :  { %7912 = vmatmul.mubr.bf16.gmra.mxu1 %v7385_v51 }
 0xd96   :  { %9329 = vmatprep.mubr.msk.bf16.mxu1 %vm10262_vm13, %v12053_v40 }
 0xda0   :  { %v7322_v34 = vpop.f32.mrf.mxu0 }
 0xda1   :  { %v7347_v57 = vmul.f32 %v7322_v34, %v11653_v11  ;;  %v12054_v11 = vld [vmem:[#allocation65_spill] sm:$0xff] }
 0xda2   :  { %v7324_v46 = vpop.f32.mrf.mxu0 }
 0xda3   :  { %v7348_v44 = vmul.f32 %v7324_v46, %v11655_v24 }
 0xda4   :  { %v7326_v53 = vpop.f32.mrf.mxu0 }
 0xda5   :  { %v7355_v42 = vmul.f32 %v7326_v53, %v11657_v61 }
 0xda6   :  { %v7328_v35 = vpop.f32.mrf.mxu0 }
 0xda7   :  { %v7379_v62 = vpack.c.bf16 %v7355_v42, %v7347_v57  ;;  %v7356_v14 = vmul.f32 %v7328_v35, %v11659_v8 }
 0xda8   :  { %v7332_v22 = vpop.f32.mrf.mxu0 }
 0xda9   :  { %v7380_v31 = vpack.c.bf16 %v7356_v14, %v7348_v44  ;;  %v7363_v54 = vmul.f32 %v7332_v22, %v11661_v39 }
 0xdaa   :  { %v7334_v47 = vpop.f32.mrf.mxu0 }
 0xdab   :  { %7952 = vmatprep.mubr.bf16.mxu0 %v7380_v31  ;;  %v7364_v6 = vmul.f32 %v7334_v47, %v12054_v11 }
 0xdac   :  { %v7336_v45 = vpop.f32.mrf.mxu0  ;;  %7953 = vmatmul.mubr.bf16.vlgmr.msra.gmra.mxu0 %v7379_v62 }
 0xdad   :  { %v7371_v13 = vmul.f32 %v7336_v45, %v11665_v38 }
 0xdae   :  { %v7338_v20 = vpop.f32.mrf.mxu0 }
 0xdaf   :  { %v7387_v61 = vpack.c.bf16 %v7371_v13, %v7363_v54  ;;  %v7372_v37 = vmul.f32 %v7338_v20, %v12055_v29 }
 0xdb1   :  { %v7388_v24 = vpack.c.bf16 %v7372_v37, %v7364_v6 }
 0xdb3   :  { %7960 = vmatprep.mubr.bf16.mxu0 %v7388_v24  ;;  %v12056_v24 = vld [vmem:[#allocation47_spill] sm:$0xff] }
 0xdb4   :  { %7961 = vmatmul.mubr.bf16.gmra.mxu0 %v7387_v61 }
 0xe0d   :  { %v9070_v8 = vpop.f32.mrf.mxu1 }
 0xe0f   :  { %v9071_v15 = vpop.f32.mrf.mxu1 }
 0xe10   :  { %v9072_v57 = vadd.f32 %v9071_v15, %v9070_v8  ;;  %v12057_v15 = vld [vmem:[#allocation48_spill] sm:$0xff] }
 0xe11   :  { %v9073_v55 = vpop.f32.mrf.mxu1 }
 0xe13   :  { %v9074_v16 = vpop.f32.mrf.mxu1 }
 0xe14   :  { %v9075_v7 = vadd.f32 %v9074_v16, %v9073_v55 }
 0xe15   :  { %v9076_v0 = vpop.f32.mrf.mxu1 }
 0xe17   :  { %v9077_v25 = vpop.f32.mrf.mxu1 }
 0xe18   :  { %v9078_v27 = vadd.f32 %v9077_v25, %v9076_v0  ;;  %v12058_v0 = vld [vmem:[#allocation25_spill] sm:$0xff] }
 0xe19   :  { %v9079_v59 = vpop.f32.mrf.mxu1  ;;  %vm8072_vm5 = vcmp.ge.s32.totalorder %v12058_v0, 40  ;;  %vm8073_vm6 = vcmp.lt.s32.totalorder %v12058_v0, 52  ;;  %vm8091_vm10 = vcmp.ge.s32.totalorder %v12058_v0, 52  ;;  %vm8092_vm11 = vcmp.lt.s32.totalorder %v12058_v0, 72 }
 0xe1a   :  { %vm11754_vm7 = vmand %vm8072_vm5, %vm8073_vm6 }
 0xe1b   :  { %v9080_v19 = vpop.f32.mrf.mxu1 }
 0xe1c   :  { %v9081_v52 = vadd.f32 %v9080_v19, %v9079_v59  ;;  %v12059_v59 = vld [vmem:[#allocation49_spill] sm:$0xff] }
 0xe2c   :  { %v9098_v33 = vpop.f32.mrf.mxu0 }
 0xe2e   :  { %v9099_v39 = vpop.f32.mrf.mxu0 }
 0xe2f   :  { %v9100_v51 = vadd.f32 %v9099_v39, %v9098_v33 }
 0xe30   :  { %v9101_v38 = vpop.f32.mrf.mxu0 }
 0xe31   :  { %v7857_v47 = vadd.f32 %v9100_v51, %v9072_v57 }
 0xe32   :  { %v9102_v4 = vpop.f32.mrf.mxu0 }
 0xe33   :  { %v9103_v3 = vadd.f32 %v9102_v4, %v9101_v38 }
 0xe34   :  { %v9104_v10 = vpop.f32.mrf.mxu0 }
 0xe35   :  { %v7860_v42 = vadd.f32 %v9103_v3, %v9075_v7 }
 0xe36   :  { %v9105_v21 = vpop.f32.mrf.mxu0 }
 0xe37   :  { %v9106_v41 = vadd.f32 %v9105_v21, %v9104_v10 }
 0xe38   :  { %v9107_v5 = vpop.f32.mrf.mxu0 }
 0xe39   :  { %v7865_v60 = vadd.f32 %v9106_v41, %v9078_v27 }
 0xe3a   :  { %v9108_v63 = vpop.f32.mrf.mxu0 }
 0xe3b   :  { %v9109_v32 = vadd.f32 %v9108_v63, %v9107_v5 }
 0xe3d   :  { %v7868_v34 = vadd.f32 %v9109_v32, %v9081_v52 }
 0xe4d   :  { %v9126_v26 = vpop.f32.mrf.mxu1 }
 0xe4f   :  { %v9127_v49 = vpop.f32.mrf.mxu1 }
 0xe50   :  { %v9128_v35 = vadd.f32 %v9127_v49, %v9126_v26 }
 0xe51   :  { %v9129_v50 = vpop.f32.mrf.mxu1 }
 0xe52   :  { %v7906_v11 = vadd.f32 %v9128_v35, %v7857_v47 }
 0xe53   :  { %v9130_v9 = vpop.f32.mrf.mxu1 }
 0xe54   :  { %v9131_v46 = vadd.f32 %v9130_v9, %v9129_v50 }
 0xe55   :  { %v9132_v56 = vpop.f32.mrf.mxu1 }
 0xe56   :  { %v7909_v45 = vadd.f32 %v9131_v46, %v7860_v42 }
 0xe57   :  { %v9133_v36 = vpop.f32.mrf.mxu1 }
 0xe58   :  { %v9134_v43 = vadd.f32 %v9133_v36, %v9132_v56 }
 0xe59   :  { %v9135_v23 = vpop.f32.mrf.mxu1 }
 0xe5a   :  { %v7914_v62 = vadd.f32 %v9134_v43, %v7865_v60  ;;  %v217_v43 = vld [vmem:[#allocation2 + $0x20] sm:$0xff] }
 0xe5b   :  { %v9136_v18 = vpop.f32.mrf.mxu1 }
 0xe5c   :  { %v9137_v17 = vadd.f32 %v9136_v18, %v9135_v23 }
 0xe5e   :  { %v7917_v14 = vadd.f32 %v9137_v17, %v7868_v34  ;;  %v8119_v17 = vpack.c.bf16 %v217_v43, %v217_v43 }
 0xe60   :  { %v8129_v7 = vsel %vm535_vm8, %v8119_v17, 0 }
 0xe6c   :  { %v9154_v2 = vpop.f32.mrf.mxu0 }
 0xe6e   :  { %v9155_v28 = vpop.f32.mrf.mxu0 }
 0xe6f   :  { %v9156_v54 = vadd.f32 %v9155_v28, %v9154_v2 }
 0xe70   :  { %v9157_v30 = vpop.f32.mrf.mxu0 }
 0xe71   :  { %v7955_v29 = vadd.f32 %v9156_v54, %v7906_v11 }
 0xe72   :  { %v9158_v1 = vpop.f32.mrf.mxu0 }
 0xe73   :  { %v9159_v22 = vadd.f32 %v9158_v1, %v9157_v30 }
 0xe74   :  { %v9160_v58 = vpop.f32.mrf.mxu0 }
 0xe75   :  { %v7958_v6 = vadd.f32 %v9159_v22, %v7909_v45 }
 0xe76   :  { %v9161_v12 = vpop.f32.mrf.mxu0 }
 0xe77   :  { %v9162_v53 = vadd.f32 %v9161_v12, %v9160_v58  ;;  %v7969_v37 = vpack.c.bf16 %v7958_v6, %v7955_v29 }
 0xe78   :  { %v9163_v48 = vpop.f32.mrf.mxu0 }
 0xe79   :  { %v7963_v13 = vadd.f32 %v9162_v53, %v7914_v62 }
 0xe7a   :  { %v9164_v44 = vpop.f32.mrf.mxu0 }
 0xe7b   :  { %v9165_v31 = vadd.f32 %v9164_v44, %v9163_v48 }
 0xe7d   :  { %v7966_v20 = vadd.f32 %v9165_v31, %v7917_v14 }
 0xe7f   :  { %v7970_v61 = vpack.c.bf16 %v7966_v20, %v7963_v13 }
 0xe81   :  { %9326 = vmatpush3.bf16.msra.mxu1 %v7970_v61 }
 0xe82   :  { %9327 = vmatprep.subr.bf16.mxu1 %v12053_v40 }
 0xe85   :  { %9328 = vmatpush3.bf16.msra.mxu1 %v7969_v37 }
 0xe86   :  { %9333 = vmatprep.subr.bf16.mxu1 %v12053_v40 }
 0xe88   :  { %9330 = vmatmul.mubr.msk.bf16.vlgmr.msra.gmra.mxu1 %vm223_vm12, %v12056_v24  ;;  %vm11764_vm12 = vmand %vm8091_vm10, %vm8092_vm11 }
 0xe89   :  { %9335 = vmatprep.mubr.msk.bf16.mxu1 %vm10262_vm13, %v12053_v40  ;;  %9334 = vmatpush3.bf16.msra.mxu1 %v8129_v7 }
 0xe8a   :  { %9339 = vmatprep.subr.bf16.mxu1 %v12053_v40 }
 0xf48   :  { %v8005_v8 = vpop.f32.mrf.mxu1 }
 0xf49   :  { %v11729_v55 = vmul.f32 %v12057_v15, %v8005_v8 }
 0xf4a   :  { %v9331_v16 = vpop.f32.mrf.mxu1 }
 0xf4b   :  { %v8014_v25 = vsel %vm676_vm14, %v11729_v55, 0.0  ;;  %v8038_v4 = vmul.f32 %v11729_v55, %v11729_v55 }
 0xf4c   :  { %8016 = vadd.xlane.f32.xlu1 %v8014_v25  ;;  %v8008_v33 = vpop.f32.mrf.mxu1 }
 0xf4d   :  { %v11735_v39 = vmul.f32 %v12059_v59, %v8008_v33  ;;  %v8040_v50 = vsel %vm10894_vm1, %v8038_v4, 0.0  ;;  %v8056_v5 = vsel %vm10910_vm4, %v8038_v4, 0.0  ;;  %v8075_v36 = vsel %vm11754_vm7, %v8038_v4, 0.0 }
 0xf4e   :  { %v9332_v19 = vpop.f32.mrf.mxu1  ;;  %v8094_v23 = vsel %vm11764_vm12, %v8038_v4, 0.0 }
 0xf4f   :  { %v8039_v38 = vmul.f32 %v11735_v39, %v11735_v39  ;;  %v8015_v26 = vsel %vm676_vm14, %v11735_v39, 0.0 }
 0xf50   :  { %8018 = vadd.xlane.f32.xlu0 %v8015_v26 }
 0xf51   :  { %v8041_v10 = vsel %vm10894_vm1, %v8039_v38, 0.0  ;;  %v8057_v9 = vsel %vm10910_vm4, %v8039_v38, 0.0  ;;  %v8076_v63 = vsel %vm11754_vm7, %v8039_v38, 0.0  ;;  %v8095_v28 = vsel %vm11764_vm12, %v8039_v38, 0.0 }
 0xf52   :  { %8044 = vadd.xlane.f32.xlu1 %v8041_v10 }
 0xf54   :  { %8042 = vadd.xlane.f32.xlu0 %v8040_v50 }
 0xf56   :  { %8060 = vadd.xlane.f32.xlu1 %v8057_v9 }
 0xf58   :  { %8058 = vadd.xlane.f32.xlu0 %v8056_v5 }
 0xf5a   :  { %8079 = vadd.xlane.f32.xlu1 %v8076_v63 }
 0xf5c   :  { %8077 = vadd.xlane.f32.xlu0 %v8075_v36 }
 0xf5e   :  { %8098 = vadd.xlane.f32.xlu1 %v8095_v28 }
 0xf60   :  { %8096 = vadd.xlane.f32.xlu0 %v8094_v23 }
 0xfd5   :  { %v8017_v30 = vpop.xlane.xlu1 %8016 }
 0xfd6   :  { %v8020_v1 = vmul.f32 0.125, %v8017_v30 }
 0xfd8   :  { %v11773_v18 = vsub.f32 %v11729_v55, %v8020_v1 }
 0xfd9   :  { %v8019_v58 = vpop.xlane.xlu0 %8018 }
 0xfda   :  { %v8021_v41 = vmul.f32 0.125, %v8019_v58  ;;  %v8024_v32 = vmul.f32 %v11773_v18, %v11773_v18 }
 0xfdb   :  { %v8045_v48 = vpop.xlane.xlu1 %8044 }
 0xfdc   :  { %v11778_v3 = vsub.f32 %v11735_v39, %v8021_v41  ;;  %v8026_v12 = vsel %vm676_vm14, %v8024_v32, 0.0  ;;  %v8047_v57 = vmul.f32 0.25, %v8045_v48 }
 0xfdd   :  { %8028 = vadd.xlane.f32.xlu0 %v8026_v12  ;;  %v8043_v51 = vpop.xlane.xlu0 %8042 }
 0xfde   :  { %v8025_v27 = vmul.f32 %v11778_v3, %v11778_v3  ;;  %v8046_v42 = vmul.f32 0.25, %v8043_v51  ;;  %v8049_v14 = vadd.f32 1e-05, %v8047_v57 }
 0xfdf   :  { %v8061_v34 = vpop.xlane.xlu1 %8060 }
 0xfe0   :  { %v8027_v52 = vsel %vm676_vm14, %v8025_v27, 0.0  ;;  %v8063_v44 = vmul.f32 0.25, %v8061_v34  ;;  %v8048_v31 = vadd.f32 1e-05, %v8046_v42  ;;  %9965 = vrsqrt.f32 %v8049_v14  ;;  %v218_v42 = vld [vmem:[#allocation2 + $0x28] sm:$0xff] }
 0xfe1   :  { %8030 = vadd.xlane.f32.xlu1 %v8027_v52  ;;  %v8059_v60 = vpop.xlane.xlu0 %8058 }
 0xfe2   :  { %v8062_v35 = vmul.f32 0.25, %v8059_v60  ;;  %v8065_v20 = vadd.f32 1e-05, %v8063_v44  ;;  %9967 = vrsqrt.f32 %v8048_v31  ;;  %v12066_v60 = vld [vmem:[#allocation52_spill] sm:$0xff] }
 0xfe3   :  { %v8080_v53 = vpop.xlane.xlu1 %8079 }
 0xfe4   :  { %v8082_v47 = vmul.f32 0.25, %v8080_v53  ;;  %v8064_v54 = vadd.f32 1e-05, %v8062_v35 }
 0xfe5   :  { %v8078_v46 = vpop.xlane.xlu0 %8077 }
 0xfe6   :  { %v8081_v22 = vmul.f32 0.25, %v8078_v46  ;;  %v8084_v61 = vadd.f32 1e-05, %v8082_v47  ;;  %9969 = vrsqrt.f32 %v8064_v54  ;;  %v12067_v46 = vld [vmem:[#allocation53_spill] sm:$0xff] }
 0xfe7   :  { %v8099_v45 = vpop.xlane.xlu1 %8098  ;;  %9971 = vrsqrt.f32 %v8065_v20 }
 0xfe8   :  { %v8083_v11 = vadd.f32 1e-05, %v8081_v22  ;;  %v8101_v6 = vmul.f32 0.25, %v8099_v45 }
 0xfe9   :  { %v8097_v62 = vpop.xlane.xlu0 %8096 }
 0xfea   :  { %v8100_v13 = vmul.f32 0.25, %v8097_v62  ;;  %9973 = vrsqrt.f32 %v8083_v11  ;;  %v8103_v37 = vadd.f32 1e-05, %v8101_v6 }
 0xfeb   :  { %9975 = vrsqrt.f32 %v8084_v61 }
 0xfec   :  { %v8102_v29 = vadd.f32 1e-05, %v8100_v13 }
 0xfed   :  { %v9966_v25 = vpop.eup %9965 }
 0xfee   :  { %9977 = vrsqrt.f32 %v8102_v29  ;;  %v8053_v30 = vsel %vm10894_vm1, %v9966_v25, 0.0 }
 0xfef   :  { %9979 = vrsqrt.f32 %v8103_v37  ;;  %v9968_v59 = vpop.eup %9967 }
 0xff0   :  { %v8052_v5 = vsel %vm10894_vm1, %v9968_v59, 0.0 }
 0xff3   :  { %v9970_v19 = vpop.eup %9969 }
 0xff4   :  { %v9972_v26 = vpop.eup %9971  ;;  %v8068_v50 = vsel %vm10910_vm4, %v9970_v19, 0.0 }
 0xff5   :  { %v8069_v63 = vsel %vm10910_vm4, %v9972_v26, 0.0  ;;  %v8070_v23 = vadd.f32 %v8068_v50, %v8052_v5 }
 0xff6   :  { %v8071_v41 = vadd.f32 %v8069_v63, %v8053_v30 }
 0xff7   :  { %v9974_v4 = vpop.eup %9973 }
 0xff8   :  { %v9976_v10 = vpop.eup %9975  ;;  %v8087_v36 = vsel %vm11754_vm7, %v9974_v4, 0.0 }
 0xff9   :  { %v8088_v1 = vsel %vm11754_vm7, %v9976_v10, 0.0  ;;  %v8089_v32 = vadd.f32 %v8087_v36, %v8070_v23 }
 0xffa   :  { %v8090_v12 = vadd.f32 %v8088_v1, %v8071_v41 }
 0xffb   :  { %v9978_v9 = vpop.eup %9977 }
 0xffc   :  { %v9980_v28 = vpop.eup %9979  ;;  %v8106_v58 = vsel %vm11764_vm12, %v9978_v9, 0.0 }
 0xffd   :  { %v8107_v21 = vsel %vm11764_vm12, %v9980_v28, 0.0  ;;  %v8108_v27 = vadd.f32 %v8106_v58, %v8089_v32 }
 0xffe   :  { %v8109_v43 = vadd.f32 %v8107_v21, %v8090_v12 }
 0xfff   :  { %v8112_v49 = vmul.f32 %v8108_v27, %v11729_v55  ;;  %v219_v55 = vld [vmem:[#allocation2 + $0x30] sm:$0xff] }
0x1000   :  { %v8113_v56 = vmul.f32 %v8109_v43, %v11735_v39  ;;  %v8120_v39 = vpack.c.bf16 %v219_v55, %v219_v55 }
0x1066   :  { %v8029_v24 = vpop.xlane.xlu0 %8028 }
0x1067   :  { %v8032_v8 = vmul.f32 0.125, %v8029_v24 }
0x1069   :  { %v8034_v15 = vadd.f32 1e-05, %v8032_v8 }
0x106a   :  { %v8031_v16 = vpop.xlane.xlu1 %8030 }
0x106b   :  { %9981 = vrsqrt.f32 %v8034_v15  ;;  %v8033_v33 = vmul.f32 0.125, %v8031_v16 }
0x106d   :  { %v8035_v38 = vadd.f32 1e-05, %v8033_v33 }
0x106f   :  { %9983 = vrsqrt.f32 %v8035_v38 }
0x1078   :  { %v9982_v52 = vpop.eup %9981 }
0x1079   :  { %v8110_v17 = vmul.f32 %v9982_v52, %v11773_v18  ;;  %v8183_v18 = vsel %vm535_vm8, %v8120_v39, 0 }
0x107b   :  { %v8114_v51 = vsel %vm676_vm14, %v8110_v17, %v8112_v49 }
0x107c   :  { %v9984_v7 = vpop.eup %9983  ;;  %v8116_v34 = vadd.f32 %v8114_v51, %v12066_v60 }
0x107d   :  { %v8111_v48 = vmul.f32 %v9984_v7, %v11778_v3  ;;  %v12068_v3 = vld [vmem:[#allocation26_spill] sm:$0xff] }
0x107e   :  { %v8124_v35 = vrot.slane %v218_v42, %v12068_v3 }
0x107f   :  { %v8115_v2 = vsel %vm676_vm14, %v8111_v48, %v8113_v56 }
0x1080   :  { %v8117_v53 = vadd.f32 %v8115_v2, %v12067_v46 }
0x1082   :  { %v8118_v57 = vpack.c.bf16 %v8117_v53, %v8116_v34 }
0x1084   :  { %9336 = vmatmul.mubr.msk.bf16.vlgmr.msra.gmra.mxu1 %vm528_vm9, %v8118_v57 }
0x1085   :  { %9341 = vmatprep.mubr.msk.bf16.mxu1 %vm10262_vm13, %v12053_v40  ;;  %9340 = vmatpush3.bf16.msra.mxu1 %v8183_v18  ;;  %v220_v40 = vld [vmem:[#allocation2 + $0x38] sm:$0xff] }
0x1086   :  { %v8178_v13 = vrot.slane %v220_v40, %v12068_v3 }
0x1144   :  { %v8165_v0 = vpop.f32.mrf.mxu1 }
0x1145   :  { %v8166_v62 = vadd.f32 %v8165_v0, %v8124_v35 }
0x1146   :  { %v9337_v44 = vpop.f32.mrf.mxu1 }
0x1147   :  { %v8172_v47 = vmax.f32 %v8166_v62, 0.0 }
0x1148   :  { %v8168_v14 = vpop.f32.mrf.mxu1 }
0x1149   :  { %v8169_v22 = vadd.f32 %v8168_v14, %v8124_v35 }
0x114a   :  { %v9338_v31 = vpop.f32.mrf.mxu1 }
0x114b   :  { %v8173_v45 = vmax.f32 %v8169_v22, 0.0 }
0x114d   :  { %v8174_v54 = vpack.c.bf16 %v8173_v45, %v8172_v47 }
0x114f   :  { %9342 = vmatmul.mubr.msk.bf16.vlgmr.msra.gmra.mxu1 %vm528_vm9, %v8174_v54 }
0x120f   :  { %v8219_v20 = vpop.f32.mrf.mxu1 }
0x1210   :  { %v8220_v11 = vadd.f32 %v8219_v20, %v8178_v13 }
0x1211   :  { %v9343_v6 = vpop.f32.mrf.mxu1 }
0x1212   :  { %8226 = vst.msk [vmem:[%s11843_s14] sm:$0xff] %vm528_vm9, %v8220_v11 }
0x1213   :  { %v8222_v61 = vpop.f32.mrf.mxu1 }
0x1214   :  { %v8223_v29 = vadd.f32 %v8222_v61, %v8178_v13 }
0x1215   :  { %v9344_v37 = vpop.f32.mrf.mxu1 }
0x1216   :  { %8227 = vst.msk [vmem:[%s11843_s14 + $0x8] sm:$0xff] %vm528_vm9, %v8223_v29 }
0x1217   :  { %8232 = vsyncpa [#allocation3], 1 }
0x1218   :  { %8233 = vsyncpa [#allocation5], 1 }
0x1219   :  { %8234 = vsyncpa [#allocation8], 1 }
0x121a   :  { %8235 = vsyncpa [#allocation11], 1 }
0x121b   :  { %8236 = vsyncpa [#allocation14], 1 }
0x121c   :  { %8237 = vsyncpa [#allocation17], 1 }

</bundles_post_ra>
